<compile_context>
chip_gen: v5e
topology: v5e:2x2
jax: 0.10.0
libtpu: 0.0.40
codegen_flags: <defaults>
</compile_context>

<pallas_src>
import functools
import itertools

import jax
import jax.numpy as jnp
import numpy as np
from jax import lax
from jax.experimental import pallas as pl
from jax.experimental.pallas import tpu as pltpu

BIG = 1.0e6          # torch.nan_to_num(nan=1e6, posinf=1e6, neginf=1e6)
NEGF = -1.0e30       # finite "-inf" sentinel for masked float maxima
NEG_KEY = np.int32(np.iinfo(np.int32).min)   # loses to every valid (>= 0) bid key
LANES = 128          # batch lanes per grid step (lane packing)

EPS0 = 0.25          # initial auction epsilon (normalised cost units)
EPS_DECAY = 0.2      # per-phase shrink factor
NUM_PHASES = 6       # eps_final ~8e-5, aligned with the fkey quantisation floor
EPS_FINAL = EPS0 * (EPS_DECAY ** (NUM_PHASES - 1))
SWEEPS_PER_CHECK = 4 # sweeps per while-body before the cross-lane done check


def _matcher_kernel(costs_ref, out_ref, *, batch):
    # costs_ref block: (N, N, BT) f32   [row/person i, col/object j, batch lane]
    # out_ref   block: (N, BT)    i32   out[j, lane] = row assigned to column j
    N = costs_ref.shape[0]
    bt = costs_ref.shape[2]
    IB = max(1, (N - 1).bit_length())            # index bits packed into the key
    imask = jnp.int32((1 << IB) - 1)
    nimask = jnp.int32(~((1 << IB) - 1))
    sign_fill = jnp.int32(0x7FFFFFFF)

    # ---- packed sortable key helpers (fused max + lowest-index argmax) -----------------
    def fkey(x, inv_idx):
        b = pltpu.bitcast(x, jnp.int32)
        m = b ^ (jnp.right_shift(b, 31) & sign_fill)       # monotonic int32 of the float
        return (m & nimask) | inv_idx                      # low bits: inverted index

    def key_val(k):                                        # approx value (low bits cleared)
        m = k & nimask
        b = m ^ (jnp.right_shift(m, 31) & sign_fill)
        return pltpu.bitcast(b, jnp.float32)

    def key_idx(k):
        return imask - (k & imask)

    # ---- sanitise (nan_to_num semantics) ------------------------------------------------
    c = costs_ref[...]
    c = jnp.where(jnp.isnan(c) | jnp.isinf(c), jnp.float32(BIG), c)

    # ---- compress the 1e6 sentinel & normalise per lane ---------------------------------
    # Entries >= 1e6 are treated as the "invalid" sentinel class; compressing them to just
    # above the finite range preserves the optimal assignment whenever 1e6 dominates the
    # finite costs (the intended use of the sentinel).
    big = c >= jnp.float32(BIG)
    fmax = jnp.max(jnp.where(big, jnp.float32(-3e38), c), axis=1, keepdims=True)
    fmax = jnp.max(fmax, axis=0, keepdims=True)                         # (1,1,BT)
    fmin = jnp.min(jnp.where(big, jnp.float32(3e38), c), axis=1, keepdims=True)
    fmin = jnp.min(fmin, axis=0, keepdims=True)
    has_fin = fmax >= fmin
    fmax = jnp.where(has_fin, fmax, 0.0)
    fmin = jnp.where(has_fin, fmin, 0.0)
    clamp = fmax + jnp.float32(N) * (fmax - fmin) + 1.0
    c = jnp.where(big, jnp.minimum(c, clamp), c)
    scale = jnp.max(jnp.abs(c), axis=1, keepdims=True)
    scale = jnp.maximum(jnp.max(scale, axis=0, keepdims=True), 1e-6)    # (1,1,BT)
    # Reuse the (now dead) input block as the benefit buffer: frees one (N,N,BT) slab.
    costs_ref[...] = -c / scale                                         # benefit ~[-1, 1]

    # ---- loop-invariant index helpers ----------------------------------------------------
    obj_iota = lax.broadcasted_iota(jnp.int32, (1, N, bt), 1)           # object (column) id
    per_iota = lax.broadcasted_iota(jnp.int32, (N, 1, bt), 0)           # person (row) id
    inv_obj = imask - obj_iota
    inv_per = imask - per_iota
    lane = lax.broadcasted_iota(jnp.int32, (1, 1, bt), 2)
    lane_valid = (pl.program_id(0) * bt + lane) < batch                 # (1,1,BT) bool

    # caps are in units of while-loop bodies (SWEEPS_PER_CHECK sweeps each)
    phase_cap = jnp.int32((16 * N + 64 + SWEEPS_PER_CHECK - 1) // SWEEPS_PER_CHECK)
    final_cap = jnp.int32((64 * N + 512 + SWEEPS_PER_CHECK - 1) // SWEEPS_PER_CHECK)

    def sweep(eps, price, owner):
        # price, owner: (1, N, BT);  owner[0, j, b] = person owning object j (-1 = free)
        benefit = costs_ref[...]                                        # (N,N,BT)
        assigned = jnp.max((owner == per_iota).astype(jnp.int32),
                           axis=1, keepdims=True) > 0                   # (N,1,BT)
        unassigned = jnp.logical_not(assigned)                          # (N,1,BT)
        values = benefit - price                                        # (N,N,BT)
        # fused (best value, best object) over objects: one sublane reduce
        vkey = fkey(values, inv_obj)
        best = jnp.max(vkey, axis=1, keepdims=True)                     # (N,1,BT)
        best_obj = key_idx(best)
        v1 = key_val(best)                                              # approx best value
        is_best = obj_iota == best_obj                                  # hoisted, reused
        # second-best value over objects (exclude best object)
        v2 = jnp.max(jnp.where(is_best, jnp.float32(NEGF), values),
                     axis=1, keepdims=True)                             # (N,1,BT)
        incr = jnp.maximum(v1 - v2, 0.0) + eps                          # (N,1,BT), >= eps > 0
        # person key computed on the small (N,1,BT) increment; one full-tensor select only
        pkey = fkey(incr, inv_per)                                      # (N,1,BT)
        bkey = jnp.where(is_best & unassigned, pkey, NEG_KEY)           # (N,N,BT)
        # fused (best bid, winning person) over persons: leading-dim reduce (pure VPU)
        wkey = jnp.max(bkey, axis=0, keepdims=True)                     # (1,N,BT)
        has_bid = wkey >= 0                                             # valid bid keys >= 0
        winner = key_idx(wkey)
        best_bid = key_val(wkey)
        owner = jnp.where(has_bid, winner, owner)
        price = jnp.where(has_bid, price + best_bid, price)
        return price, owner

    def cond(state):
        return state[0] < NUM_PHASES

    def body(state):
        phase, eps, it, price, owner = state
        for _ in range(SWEEPS_PER_CHECK):            # unrolled at trace time
            price, owner = sweep(eps, price, owner)
        owned = jnp.where((owner >= 0) | jnp.logical_not(lane_valid), 1, 0)
        done = jnp.min(owned) == 1                   # all valid lanes fully assigned
        last = phase == NUM_PHASES - 1
        cap = jnp.where(last, final_cap, phase_cap)
        advance = done | (it + 1 >= cap)
        phase = jnp.where(advance, phase + 1, phase)
        eps = jnp.where(advance, eps * jnp.float32(EPS_DECAY), eps)
        it = jnp.where(advance, jnp.int32(0), it + 1)
        # next (non-final) phase starts with everybody unassigned, prices warm-started
        reset = advance & jnp.logical_not(last)
        owner = jnp.where(reset, jnp.full_like(owner, -1), owner)
        return phase, eps, it, price, owner

    price0 = jnp.zeros((1, N, bt), jnp.float32)
    owner0 = jnp.full((1, N, bt), -1, jnp.int32)
    state0 = (jnp.int32(0), jnp.float32(EPS0), jnp.int32(0), price0, owner0)
    _, _, _, _, owner = lax.while_loop(cond, body, state0)

    # ---- guard against final-phase cap escape --------------------------------------------
    # Greedy fill of any unowned columns with unused persons so the output is always a
    # valid permutation (no-op when the auction converged, which is the normal case).
    assigned_p = jnp.max((owner == per_iota).astype(jnp.int32), axis=1, keepdims=True)

    def fill_body(_, carry):
        own, asg = carry
        unassigned_p = asg == 0                                          # (N,1,BT)
        unowned_c = own < 0                                              # (1,N,BT)
        p_low = jnp.min(jnp.where(unassigned_p, per_iota, jnp.int32(N)),
                        axis=0, keepdims=True)                           # (1,1,BT)
        c_low = jnp.min(jnp.where(unowned_c, obj_iota, jnp.int32(N)),
                        axis=1, keepdims=True)                           # (1,1,BT)
        do = (p_low < N) & (c_low < N)
        own = jnp.where(do & (obj_iota == c_low), p_low, own)
        asg = jnp.where(do & (per_iota == p_low), 1, asg)
        return own, asg

    owner, _ = lax.fori_loop(0, N, fill_body, (owner, assigned_p))
    out_ref[...] = owner[0]


def matcher_forward(costs):
    """costs: (B, N, N) float -> (B, N) int32; out[b, j] = row assigned to column j."""
    costs = jnp.asarray(costs, jnp.float32)
    B, N, M = costs.shape
    assert N == M, "pad_mask=None path assumes square cost matrices"
    assert N <= 128, "lane-packed path supports N <= 128"
    # TODO(synk): for N > 128 fall back to a per-batch (1, N, N) tiling with a smaller
    #             lane tile so the working set fits VMEM.

    # TODO(synk): ideally the producer emits costs already in (N, N, B) layout; this
    #             transpose is one extra HBM round-trip outside the kernel.
    ct = jnp.transpose(costs, (1, 2, 0))                 # (N_rows, N_cols, B): batch -> lanes

    if B <= LANES:
        bt, bp = B, B                                    # single full-extent tile, no pad
    else:
        bt = LANES
        bp = pl.cdiv(B, LANES) * LANES
        if bp != B:
            ct = jnp.pad(ct, ((0, 0), (0, 0), (0, bp - B)))
    grid = bp // bt

    # Generation-aware VMEM budget: v7x has 64 MiB/TC vs 128 MiB on v5e/v6e.
    try:
        vmem_cap = int(getattr(pltpu.get_tpu_info(), "vmem_capacity_bytes", 128 << 20))
    except Exception:
        vmem_cap = 128 << 20
    tile_bytes = N * N * bt * 4
    want = 8 * tile_bytes + (4 << 20)
    vmem_limit = int(min(max(want, 16 << 20), int(0.72 * vmem_cap)))

    def build(single_buffer):
        if single_buffer:
            # The kernel runs hundreds-thousands of sweeps per tile (>>100 us) while the
            # tile DMA is a few us, so input prefetch overlap is worthless; single
            # buffering frees one (N,N,BT) VMEM slab (matters on v7x's 64 MiB/TC).
            in_spec = pl.BlockSpec((N, N, bt), lambda b: (0, 0, b),
                                   pipeline_mode=pl.Buffered(1))
        else:
            in_spec = pl.BlockSpec((N, N, bt), lambda b: (0, 0, b))
        return pl.pallas_call(
            functools.partial(_matcher_kernel, batch=B),
            out_shape=jax.ShapeDtypeStruct((N, bp), jnp.int32),
            grid=(grid,),
            in_specs=[in_spec],
            out_specs=pl.BlockSpec((N, bt), lambda b: (0, b)),
            compiler_params=pltpu.CompilerParams(
                # "parallel" lets v7x shard grid steps across its two TensorCores;
                # it only engages when B > 128 (grid >= 2).
                dimension_semantics=("parallel",),
                vmem_limit_bytes=vmem_limit,
            ),
        )

    try:
        out = build(single_buffer=True)(ct)
    except Exception:
        out = build(single_buffer=False)(ct)             # fallback if Buffered(1) rejected

    # TODO(synk): the torch module returns .long() (int64); we return int32 and leave the
    #             widening cast to the consumer to avoid enabling global x64.
    return jnp.transpose(out[:, :B], (1, 0))


if __name__ == "__main__":
    key = jax.random.PRNGKey(0)
    B, N = 2, 8
    costs = jax.random.uniform(key, (B, N, N), dtype=jnp.float32)
    # exercise the nan_to_num path
    costs = costs.at[0, 0, 0].set(jnp.nan)
    costs = costs.at[1, 3, 5].set(jnp.inf)

    pred_idxs = jax.block_until_ready(matcher_forward(costs))

    # reference check: brute-force optimal assignment on the sanitized costs
    c_np = np.nan_to_num(np.asarray(costs, np.float32), nan=BIG, posinf=BIG, neginf=BIG)
    perms = np.array(list(itertools.permutations(range(N))))   # (N!, N)
    cols = np.arange(N)
    ok = True
    for b in range(B):
        sel = np.asarray(pred_idxs[b])
        ok &= sorted(sel.tolist()) == list(range(N))            # valid permutation
        got = float(c_np[b][sel, cols].sum())
        best = float(c_np[b][perms, cols].sum(axis=1).min())
        # tolerance mirrors the kernel's eps-optimality bound (N * eps_final * scale)
        big_m = c_np[b] >= BIG
        fin = c_np[b][~big_m]
        fmax = float(fin.max()) if fin.size else 0.0
        fmin = float(fin.min()) if fin.size else 0.0
        clamp = fmax + N * (fmax - fmin) + 1.0
        cw = np.where(big_m, np.minimum(c_np[b], clamp), c_np[b])
        scale = max(float(np.abs(cw).max()), 1e-6)
        tol = N * EPS_FINAL * scale + 5e-3
        ok &= got <= best + tol

    if ok:
        print("KERNEL_OK")
    else:
        print("KERNEL_MISMATCH", np.asarray(pred_idxs))
</pallas_src>

<mosaic_0001>
module attributes {stable_mosaic.version = 11 : i64} {
  func.func @_matcher_kernel(%arg0: i32, %arg1: memref<8x8x2xf32, #tpu.memory_space<vmem>>, %arg2: memref<8x2xi32, #tpu.memory_space<vmem>>) attributes {dimension_semantics = [#tpu.dimension_semantics<parallel>], iteration_bounds = array<i64: 1>, scalar_prefetch = 0 : i64, scratch_operands = 0 : i64, tpu.core_type = #tpu.core_type<tc>, window_params = [{pipeline_mode = #tpu.pipeline_mode<synchronous>, transform_indices = @transform_0, window_bounds = array<i64: 8, 8, 2>}, {transform_indices = @transform_1, window_bounds = array<i64: 8, 2>}]} {
    %c0 = arith.constant 0 : index
    %c0_0 = arith.constant 0 : index
    %c0_1 = arith.constant 0 : index
    %0 = vector.load %arg1[%c0, %c0_0, %c0_1] : memref<8x8x2xf32, #tpu.memory_space<vmem>>, vector<8x8x2xf32>
    %1 = arith.cmpf one, %0, %0 : vector<8x8x2xf32>
    %2 = math.absf %0 : vector<8x8x2xf32>
    %cst = arith.constant 0x7F800000 : f32
    %3 = vector.broadcast %cst : f32 to vector<8x8x2xf32>
    %4 = arith.cmpf oeq, %2, %3 : vector<8x8x2xf32>
    %5 = arith.ori %1, %4 : vector<8x8x2xi1>
    %cst_2 = arith.constant 1.000000e+06 : f32
    %6 = vector.broadcast %cst_2 : f32 to vector<8x8x2xf32>
    %7 = arith.select %5, %6, %0 : vector<8x8x2xi1>, vector<8x8x2xf32>
    %cst_3 = arith.constant 1.000000e+06 : f32
    %8 = vector.broadcast %cst_3 : f32 to vector<8x8x2xf32>
    %9 = arith.cmpf oge, %7, %8 : vector<8x8x2xf32>
    %cst_4 = arith.constant -3.000000e+38 : f32
    %10 = vector.broadcast %cst_4 : f32 to vector<8x8x2xf32>
    %11 = arith.select %9, %10, %7 : vector<8x8x2xi1>, vector<8x8x2xf32>
    %cst_5 = arith.constant dense<0xFF800000> : vector<8x2xf32>
    %12 = vector.multi_reduction <maximumf>, %11, %cst_5 [1] : vector<8x8x2xf32> to vector<8x2xf32>
    %13 = vector.shape_cast %12 : vector<8x2xf32> to vector<8x1x2xf32>
    %cst_6 = arith.constant dense<0xFF800000> : vector<1x2xf32>
    %14 = vector.multi_reduction <maximumf>, %13, %cst_6 [0] : vector<8x1x2xf32> to vector<1x2xf32>
    %15 = vector.shape_cast %14 : vector<1x2xf32> to vector<1x1x2xf32>
    %cst_7 = arith.constant 3.000000e+38 : f32
    %16 = vector.broadcast %cst_7 : f32 to vector<8x8x2xf32>
    %17 = arith.select %9, %16, %7 : vector<8x8x2xi1>, vector<8x8x2xf32>
    %cst_8 = arith.constant dense<0x7F800000> : vector<8x2xf32>
    %18 = vector.multi_reduction <minimumf>, %17, %cst_8 [1] : vector<8x8x2xf32> to vector<8x2xf32>
    %19 = vector.shape_cast %18 : vector<8x2xf32> to vector<8x1x2xf32>
    %cst_9 = arith.constant dense<0x7F800000> : vector<1x2xf32>
    %20 = vector.multi_reduction <minimumf>, %19, %cst_9 [0] : vector<8x1x2xf32> to vector<1x2xf32>
    %21 = vector.shape_cast %20 : vector<1x2xf32> to vector<1x1x2xf32>
    %22 = arith.cmpf oge, %15, %21 : vector<1x1x2xf32>
    %cst_10 = arith.constant 0.000000e+00 : f32
    %23 = vector.broadcast %cst_10 : f32 to vector<1x1x2xf32>
    %24 = arith.select %22, %15, %23 : vector<1x1x2xi1>, vector<1x1x2xf32>
    %cst_11 = arith.constant 0.000000e+00 : f32
    %25 = vector.broadcast %cst_11 : f32 to vector<1x1x2xf32>
    %26 = arith.select %22, %21, %25 : vector<1x1x2xi1>, vector<1x1x2xf32>
    %27 = arith.subf %24, %26 : vector<1x1x2xf32>
    %cst_12 = arith.constant 8.000000e+00 : f32
    %28 = vector.broadcast %cst_12 : f32 to vector<1x1x2xf32>
    %29 = arith.mulf %28, %27 : vector<1x1x2xf32>
    %30 = arith.addf %24, %29 : vector<1x1x2xf32>
    %cst_13 = arith.constant 1.000000e+00 : f32
    %31 = vector.broadcast %cst_13 : f32 to vector<1x1x2xf32>
    %32 = arith.addf %30, %31 : vector<1x1x2xf32>
    %33 = vector.broadcast %32 : vector<1x1x2xf32> to vector<8x8x2xf32>
    %34 = arith.minimumf %7, %33 : vector<8x8x2xf32>
    %35 = arith.select %9, %34, %7 : vector<8x8x2xi1>, vector<8x8x2xf32>
    %36 = math.absf %35 : vector<8x8x2xf32>
    %cst_14 = arith.constant dense<0xFF800000> : vector<8x2xf32>
    %37 = vector.multi_reduction <maximumf>, %36, %cst_14 [1] : vector<8x8x2xf32> to vector<8x2xf32>
    %38 = vector.shape_cast %37 : vector<8x2xf32> to vector<8x1x2xf32>
    %cst_15 = arith.constant dense<0xFF800000> : vector<1x2xf32>
    %39 = vector.multi_reduction <maximumf>, %38, %cst_15 [0] : vector<8x1x2xf32> to vector<1x2xf32>
    %40 = vector.shape_cast %39 : vector<1x2xf32> to vector<1x1x2xf32>
    %cst_16 = arith.constant 9.99999997E-7 : f32
    %41 = vector.broadcast %cst_16 : f32 to vector<1x1x2xf32>
    %42 = arith.maximumf %40, %41 : vector<1x1x2xf32>
    %cst_17 = arith.constant 0.000000e+00 : f32
    %43 = vector.broadcast %cst_17 : f32 to vector<8x8x2xf32>
    %44 = arith.subf %43, %35 : vector<8x8x2xf32>
    %45 = vector.broadcast %42 : vector<1x1x2xf32> to vector<8x8x2xf32>
    %46 = arith.divf %44, %45 : vector<8x8x2xf32>
    %c0_18 = arith.constant 0 : index
    %c0_19 = arith.constant 0 : index
    %c0_20 = arith.constant 0 : index
    %47 = vector.load %arg1[%c0_18, %c0_19, %c0_20] : memref<8x8x2xf32, #tpu.memory_space<vmem>>, vector<8x8x2xf32>
    tpu.vector_store %arg1[%c0_18, %c0_19, %c0_20], %46 {strides = array<i32>} : memref<8x8x2xf32, #tpu.memory_space<vmem>>, vector<8x8x2xf32>,
    %48 = tpu.iota {dimensions = array<i32: 1>} : vector<1x8x2xi32>
    %49 = tpu.iota {dimensions = array<i32: 0>} : vector<8x1x2xi32>
    %c7_i32 = arith.constant 7 : i32
    %50 = vector.broadcast %c7_i32 : i32 to vector<1x8x2xi32>
    %51 = arith.subi %50, %48 : vector<1x8x2xi32>
    %c7_i32_21 = arith.constant 7 : i32
    %52 = vector.broadcast %c7_i32_21 : i32 to vector<8x1x2xi32>
    %53 = arith.subi %52, %49 : vector<8x1x2xi32>
    %54 = tpu.iota {dimensions = array<i32: 2>} : vector<1x1x2xi32>
    %c2_i32 = arith.constant 2 : i32
    %55 = arith.muli %arg0, %c2_i32 : i32
    %56 = vector.broadcast %55 : i32 to vector<1x1x2xi32>
    %57 = arith.addi %56, %54 : vector<1x1x2xi32>
    %c2_i32_22 = arith.constant 2 : i32
    %58 = vector.broadcast %c2_i32_22 : i32 to vector<1x1x2xi32>
    %59 = arith.cmpi slt, %57, %58 : vector<1x1x2xi32>
    %cst_23 = arith.constant 0.000000e+00 : f32
    %60 = vector.broadcast %cst_23 : f32 to vector<1x8x2xf32>
    %c-1_i32 = arith.constant -1 : i32
    %61 = vector.broadcast %c-1_i32 : i32 to vector<1x8x2xi32>
    %c2147483647_i32 = arith.constant 2147483647 : i32
    %c-8_i32 = arith.constant -8 : i32
    %c7_i32_24 = arith.constant 7 : i32
    %c256_i32 = arith.constant 256 : i32
    %c48_i32 = arith.constant 48 : i32
    %c0_i32 = arith.constant 0 : i32
    %cst_25 = arith.constant 2.500000e-01 : f32
    %c0_i32_26 = arith.constant 0 : i32
    %62:5 = scf.while (%arg3 = %c0_i32, %arg4 = %cst_25, %arg5 = %c0_i32_26, %arg6 = %60, %arg7 = %61) : (i32, f32, i32, vector<1x8x2xf32>, vector<1x8x2xi32>) -> (i32, f32, i32, vector<1x8x2xf32>, vector<1x8x2xi32>) {
      %c6_i32 = arith.constant 6 : i32
      %73 = arith.cmpi slt, %arg3, %c6_i32 : i32
      scf.condition(%73) %arg3, %arg4, %arg5, %arg6, %arg7 : i32, f32, i32, vector<1x8x2xf32>, vector<1x8x2xi32>
    } do {
    ^bb0(%arg3: i32, %arg4: f32, %arg5: i32, %arg6: vector<1x8x2xf32>, %arg7: vector<1x8x2xi32>):
      %c0_31 = arith.constant 0 : index
      %c0_32 = arith.constant 0 : index
      %c0_33 = arith.constant 0 : index
      %73 = vector.load %arg1[%c0_31, %c0_32, %c0_33] : memref<8x8x2xf32, #tpu.memory_space<vmem>>, vector<8x8x2xf32>
      %74 = vector.broadcast %arg7 : vector<1x8x2xi32> to vector<8x8x2xi32>
      %75 = vector.broadcast %49 : vector<8x1x2xi32> to vector<8x8x2xi32>
      %76 = arith.cmpi eq, %74, %75 : vector<8x8x2xi32>
      %77 = arith.extui %76 : vector<8x8x2xi1> to vector<8x8x2xi32>
      %cst_34 = arith.constant dense<-2147483648> : vector<8x2xi32>
      %78 = vector.multi_reduction <maxsi>, %77, %cst_34 [1] : vector<8x8x2xi32> to vector<8x2xi32>
      %79 = vector.shape_cast %78 : vector<8x2xi32> to vector<8x1x2xi32>
      %c0_i32_35 = arith.constant 0 : i32
      %80 = vector.broadcast %c0_i32_35 : i32 to vector<8x1x2xi32>
      %81 = arith.cmpi sgt, %79, %80 : vector<8x1x2xi32>
      %cst_36 = arith.constant dense<true> : vector<8x1x2xi1>
      %82 = arith.xori %81, %cst_36 : vector<8x1x2xi1>
      %83 = vector.broadcast %arg6 : vector<1x8x2xf32> to vector<8x8x2xf32>
      %84 = arith.subf %73, %83 : vector<8x8x2xf32>
      %85 = tpu.bitcast %84 : vector<8x8x2xf32> -> vector<8x8x2xi32>
      %c31_i32 = arith.constant 31 : i32
      %86 = vector.broadcast %c31_i32 : i32 to vector<8x8x2xi32>
      %87 = arith.shrsi %85, %86 : vector<8x8x2xi32>
      %88 = vector.broadcast %c2147483647_i32 : i32 to vector<8x8x2xi32>
      %89 = arith.andi %87, %88 : vector<8x8x2xi32>
      %90 = arith.xori %85, %89 : vector<8x8x2xi32>
      %91 = vector.broadcast %c-8_i32 : i32 to vector<8x8x2xi32>
      %92 = arith.andi %90, %91 : vector<8x8x2xi32>
      %93 = vector.broadcast %51 : vector<1x8x2xi32> to vector<8x8x2xi32>
      %94 = arith.ori %92, %93 : vector<8x8x2xi32>
      %cst_37 = arith.constant dense<-2147483648> : vector<8x2xi32>
      %95 = vector.multi_reduction <maxsi>, %94, %cst_37 [1] : vector<8x8x2xi32> to vector<8x2xi32>
      %96 = vector.shape_cast %95 : vector<8x2xi32> to vector<8x1x2xi32>
      %97 = vector.broadcast %c7_i32_24 : i32 to vector<8x1x2xi32>
      %98 = arith.andi %96, %97 : vector<8x1x2xi32>
      %99 = vector.broadcast %c7_i32_24 : i32 to vector<8x1x2xi32>
      %100 = arith.subi %99, %98 : vector<8x1x2xi32>
      %101 = vector.broadcast %c-8_i32 : i32 to vector<8x1x2xi32>
      %102 = arith.andi %96, %101 : vector<8x1x2xi32>
      %c31_i32_38 = arith.constant 31 : i32
      %103 = vector.broadcast %c31_i32_38 : i32 to vector<8x1x2xi32>
      %104 = arith.shrsi %102, %103 : vector<8x1x2xi32>
      %105 = vector.broadcast %c2147483647_i32 : i32 to vector<8x1x2xi32>
      %106 = arith.andi %104, %105 : vector<8x1x2xi32>
      %107 = arith.xori %102, %106 : vector<8x1x2xi32>
      %108 = tpu.bitcast %107 : vector<8x1x2xi32> -> vector<8x1x2xf32>
      %109 = vector.broadcast %48 : vector<1x8x2xi32> to vector<8x8x2xi32>
      %110 = vector.broadcast %100 : vector<8x1x2xi32> to vector<8x8x2xi32>
      %111 = arith.cmpi eq, %109, %110 : vector<8x8x2xi32>
      %cst_39 = arith.constant -1.000000e+30 : f32
      %112 = vector.broadcast %cst_39 : f32 to vector<8x8x2xf32>
      %113 = arith.select %111, %112, %84 : vector<8x8x2xi1>, vector<8x8x2xf32>
      %cst_40 = arith.constant dense<0xFF800000> : vector<8x2xf32>
      %114 = vector.multi_reduction <maximumf>, %113, %cst_40 [1] : vector<8x8x2xf32> to vector<8x2xf32>
      %115 = vector.shape_cast %114 : vector<8x2xf32> to vector<8x1x2xf32>
      %116 = arith.subf %108, %115 : vector<8x1x2xf32>
      %cst_41 = arith.constant 0.000000e+00 : f32
      %117 = vector.broadcast %cst_41 : f32 to vector<8x1x2xf32>
      %118 = arith.maximumf %116, %117 : vector<8x1x2xf32>
      %119 = vector.broadcast %arg4 : f32 to vector<8x1x2xf32>
      %120 = arith.addf %118, %119 : vector<8x1x2xf32>
      %121 = tpu.bitcast %120 : vector<8x1x2xf32> -> vector<8x1x2xi32>
      %c31_i32_42 = arith.constant 31 : i32
      %122 = vector.broadcast %c31_i32_42 : i32 to vector<8x1x2xi32>
      %123 = arith.shrsi %121, %122 : vector<8x1x2xi32>
      %124 = vector.broadcast %c2147483647_i32 : i32 to vector<8x1x2xi32>
      %125 = arith.andi %123, %124 : vector<8x1x2xi32>
      %126 = arith.xori %121, %125 : vector<8x1x2xi32>
      %127 = vector.broadcast %c-8_i32 : i32 to vector<8x1x2xi32>
      %128 = arith.andi %126, %127 : vector<8x1x2xi32>
      %129 = arith.ori %128, %53 : vector<8x1x2xi32>
      %130 = vector.broadcast %82 : vector<8x1x2xi1> to vector<8x8x2xi1>
      %131 = arith.andi %111, %130 : vector<8x8x2xi1>
      %c-2147483648_i32 = arith.constant -2147483648 : i32
      %132 = vector.shape_cast %129 : vector<8x1x2xi32> to vector<8x1x2xi32>
      %133 = vector.broadcast %132 : vector<8x1x2xi32> to vector<8x8x2xi32>
      %134 = vector.broadcast %c-2147483648_i32 : i32 to vector<8x8x2xi32>
      %135 = arith.select %131, %133, %134 : vector<8x8x2xi1>, vector<8x8x2xi32>
      %cst_43 = arith.constant dense<-2147483648> : vector<8x2xi32>
      %136 = vector.multi_reduction <maxsi>, %135, %cst_43 [0] : vector<8x8x2xi32> to vector<8x2xi32>
      %137 = vector.shape_cast %136 : vector<8x2xi32> to vector<1x8x2xi32>
      %c0_i32_44 = arith.constant 0 : i32
      %138 = vector.broadcast %c0_i32_44 : i32 to vector<1x8x2xi32>
      %139 = arith.cmpi sge, %137, %138 : vector<1x8x2xi32>
      %140 = vector.broadcast %c7_i32_24 : i32 to vector<1x8x2xi32>
      %141 = arith.andi %137, %140 : vector<1x8x2xi32>
      %142 = vector.broadcast %c7_i32_24 : i32 to vector<1x8x2xi32>
      %143 = arith.subi %142, %141 : vector<1x8x2xi32>
      %144 = vector.broadcast %c-8_i32 : i32 to vector<1x8x2xi32>
      %145 = arith.andi %137, %144 : vector<1x8x2xi32>
      %c31_i32_45 = arith.constant 31 : i32
      %146 = vector.broadcast %c31_i32_45 : i32 to vector<1x8x2xi32>
      %147 = arith.shrsi %145, %146 : vector<1x8x2xi32>
      %148 = vector.broadcast %c2147483647_i32 : i32 to vector<1x8x2xi32>
      %149 = arith.andi %147, %148 : vector<1x8x2xi32>
      %150 = arith.xori %145, %149 : vector<1x8x2xi32>
      %151 = tpu.bitcast %150 : vector<1x8x2xi32> -> vector<1x8x2xf32>
      %152 = arith.select %139, %143, %arg7 : vector<1x8x2xi1>, vector<1x8x2xi32>
      %153 = arith.addf %arg6, %151 : vector<1x8x2xf32>
      %154 = arith.select %139, %153, %arg6 : vector<1x8x2xi1>, vector<1x8x2xf32>
      %c0_46 = arith.constant 0 : index
      %c0_47 = arith.constant 0 : index
      %c0_48 = arith.constant 0 : index
      %155 = vector.load %arg1[%c0_46, %c0_47, %c0_48] : memref<8x8x2xf32, #tpu.memory_space<vmem>>, vector<8x8x2xf32>
      %156 = vector.broadcast %152 : vector<1x8x2xi32> to vector<8x8x2xi32>
      %157 = vector.broadcast %49 : vector<8x1x2xi32> to vector<8x8x2xi32>
      %158 = arith.cmpi eq, %156, %157 : vector<8x8x2xi32>
      %159 = arith.extui %158 : vector<8x8x2xi1> to vector<8x8x2xi32>
      %cst_49 = arith.constant dense<-2147483648> : vector<8x2xi32>
      %160 = vector.multi_reduction <maxsi>, %159, %cst_49 [1] : vector<8x8x2xi32> to vector<8x2xi32>
      %161 = vector.shape_cast %160 : vector<8x2xi32> to vector<8x1x2xi32>
      %c0_i32_50 = arith.constant 0 : i32
      %162 = vector.broadcast %c0_i32_50 : i32 to vector<8x1x2xi32>
      %163 = arith.cmpi sgt, %161, %162 : vector<8x1x2xi32>
      %cst_51 = arith.constant dense<true> : vector<8x1x2xi1>
      %164 = arith.xori %163, %cst_51 : vector<8x1x2xi1>
      %165 = vector.broadcast %154 : vector<1x8x2xf32> to vector<8x8x2xf32>
      %166 = arith.subf %155, %165 : vector<8x8x2xf32>
      %167 = tpu.bitcast %166 : vector<8x8x2xf32> -> vector<8x8x2xi32>
      %c31_i32_52 = arith.constant 31 : i32
      %168 = vector.broadcast %c31_i32_52 : i32 to vector<8x8x2xi32>
      %169 = arith.shrsi %167, %168 : vector<8x8x2xi32>
      %170 = vector.broadcast %c2147483647_i32 : i32 to vector<8x8x2xi32>
      %171 = arith.andi %169, %170 : vector<8x8x2xi32>
      %172 = arith.xori %167, %171 : vector<8x8x2xi32>
      %173 = vector.broadcast %c-8_i32 : i32 to vector<8x8x2xi32>
      %174 = arith.andi %172, %173 : vector<8x8x2xi32>
      %175 = vector.broadcast %51 : vector<1x8x2xi32> to vector<8x8x2xi32>
      %176 = arith.ori %174, %175 : vector<8x8x2xi32>
      %cst_53 = arith.constant dense<-2147483648> : vector<8x2xi32>
      %177 = vector.multi_reduction <maxsi>, %176, %cst_53 [1] : vector<8x8x2xi32> to vector<8x2xi32>
      %178 = vector.shape_cast %177 : vector<8x2xi32> to vector<8x1x2xi32>
      %179 = vector.broadcast %c7_i32_24 : i32 to vector<8x1x2xi32>
      %180 = arith.andi %178, %179 : vector<8x1x2xi32>
      %181 = vector.broadcast %c7_i32_24 : i32 to vector<8x1x2xi32>
      %182 = arith.subi %181, %180 : vector<8x1x2xi32>
      %183 = vector.broadcast %c-8_i32 : i32 to vector<8x1x2xi32>
      %184 = arith.andi %178, %183 : vector<8x1x2xi32>
      %c31_i32_54 = arith.constant 31 : i32
      %185 = vector.broadcast %c31_i32_54 : i32 to vector<8x1x2xi32>
      %186 = arith.shrsi %184, %185 : vector<8x1x2xi32>
      %187 = vector.broadcast %c2147483647_i32 : i32 to vector<8x1x2xi32>
      %188 = arith.andi %186, %187 : vector<8x1x2xi32>
      %189 = arith.xori %184, %188 : vector<8x1x2xi32>
      %190 = tpu.bitcast %189 : vector<8x1x2xi32> -> vector<8x1x2xf32>
      %191 = vector.broadcast %48 : vector<1x8x2xi32> to vector<8x8x2xi32>
      %192 = vector.broadcast %182 : vector<8x1x2xi32> to vector<8x8x2xi32>
      %193 = arith.cmpi eq, %191, %192 : vector<8x8x2xi32>
      %cst_55 = arith.constant -1.000000e+30 : f32
      %194 = vector.broadcast %cst_55 : f32 to vector<8x8x2xf32>
      %195 = arith.select %193, %194, %166 : vector<8x8x2xi1>, vector<8x8x2xf32>
      %cst_56 = arith.constant dense<0xFF800000> : vector<8x2xf32>
      %196 = vector.multi_reduction <maximumf>, %195, %cst_56 [1] : vector<8x8x2xf32> to vector<8x2xf32>
      %197 = vector.shape_cast %196 : vector<8x2xf32> to vector<8x1x2xf32>
      %198 = arith.subf %190, %197 : vector<8x1x2xf32>
      %cst_57 = arith.constant 0.000000e+00 : f32
      %199 = vector.broadcast %cst_57 : f32 to vector<8x1x2xf32>
      %200 = arith.maximumf %198, %199 : vector<8x1x2xf32>
      %201 = vector.broadcast %arg4 : f32 to vector<8x1x2xf32>
      %202 = arith.addf %200, %201 : vector<8x1x2xf32>
      %203 = tpu.bitcast %202 : vector<8x1x2xf32> -> vector<8x1x2xi32>
      %c31_i32_58 = arith.constant 31 : i32
      %204 = vector.broadcast %c31_i32_58 : i32 to vector<8x1x2xi32>
      %205 = arith.shrsi %203, %204 : vector<8x1x2xi32>
      %206 = vector.broadcast %c2147483647_i32 : i32 to vector<8x1x2xi32>
      %207 = arith.andi %205, %206 : vector<8x1x2xi32>
      %208 = arith.xori %203, %207 : vector<8x1x2xi32>
      %209 = vector.broadcast %c-8_i32 : i32 to vector<8x1x2xi32>
      %210 = arith.andi %208, %209 : vector<8x1x2xi32>
      %211 = arith.ori %210, %53 : vector<8x1x2xi32>
      %212 = vector.broadcast %164 : vector<8x1x2xi1> to vector<8x8x2xi1>
      %213 = arith.andi %193, %212 : vector<8x8x2xi1>
      %c-2147483648_i32_59 = arith.constant -2147483648 : i32
      %214 = vector.shape_cast %211 : vector<8x1x2xi32> to vector<8x1x2xi32>
      %215 = vector.broadcast %214 : vector<8x1x2xi32> to vector<8x8x2xi32>
      %216 = vector.broadcast %c-2147483648_i32_59 : i32 to vector<8x8x2xi32>
      %217 = arith.select %213, %215, %216 : vector<8x8x2xi1>, vector<8x8x2xi32>
      %cst_60 = arith.constant dense<-2147483648> : vector<8x2xi32>
      %218 = vector.multi_reduction <maxsi>, %217, %cst_60 [0] : vector<8x8x2xi32> to vector<8x2xi32>
      %219 = vector.shape_cast %218 : vector<8x2xi32> to vector<1x8x2xi32>
      %c0_i32_61 = arith.constant 0 : i32
      %220 = vector.broadcast %c0_i32_61 : i32 to vector<1x8x2xi32>
      %221 = arith.cmpi sge, %219, %220 : vector<1x8x2xi32>
      %222 = vector.broadcast %c7_i32_24 : i32 to vector<1x8x2xi32>
      %223 = arith.andi %219, %222 : vector<1x8x2xi32>
      %224 = vector.broadcast %c7_i32_24 : i32 to vector<1x8x2xi32>
      %225 = arith.subi %224, %223 : vector<1x8x2xi32>
      %226 = vector.broadcast %c-8_i32 : i32 to vector<1x8x2xi32>
      %227 = arith.andi %219, %226 : vector<1x8x2xi32>
      %c31_i32_62 = arith.constant 31 : i32
      %228 = vector.broadcast %c31_i32_62 : i32 to vector<1x8x2xi32>
      %229 = arith.shrsi %227, %228 : vector<1x8x2xi32>
      %230 = vector.broadcast %c2147483647_i32 : i32 to vector<1x8x2xi32>
      %231 = arith.andi %229, %230 : vector<1x8x2xi32>
      %232 = arith.xori %227, %231 : vector<1x8x2xi32>
      %233 = tpu.bitcast %232 : vector<1x8x2xi32> -> vector<1x8x2xf32>
      %234 = arith.select %221, %225, %152 : vector<1x8x2xi1>, vector<1x8x2xi32>
      %235 = arith.addf %154, %233 : vector<1x8x2xf32>
      %236 = arith.select %221, %235, %154 : vector<1x8x2xi1>, vector<1x8x2xf32>
      %c0_63 = arith.constant 0 : index
      %c0_64 = arith.constant 0 : index
      %c0_65 = arith.constant 0 : index
      %237 = vector.load %arg1[%c0_63, %c0_64, %c0_65] : memref<8x8x2xf32, #tpu.memory_space<vmem>>, vector<8x8x2xf32>
      %238 = vector.broadcast %234 : vector<1x8x2xi32> to vector<8x8x2xi32>
      %239 = vector.broadcast %49 : vector<8x1x2xi32> to vector<8x8x2xi32>
      %240 = arith.cmpi eq, %238, %239 : vector<8x8x2xi32>
      %241 = arith.extui %240 : vector<8x8x2xi1> to vector<8x8x2xi32>
      %cst_66 = arith.constant dense<-2147483648> : vector<8x2xi32>
      %242 = vector.multi_reduction <maxsi>, %241, %cst_66 [1] : vector<8x8x2xi32> to vector<8x2xi32>
      %243 = vector.shape_cast %242 : vector<8x2xi32> to vector<8x1x2xi32>
      %c0_i32_67 = arith.constant 0 : i32
      %244 = vector.broadcast %c0_i32_67 : i32 to vector<8x1x2xi32>
      %245 = arith.cmpi sgt, %243, %244 : vector<8x1x2xi32>
      %cst_68 = arith.constant dense<true> : vector<8x1x2xi1>
      %246 = arith.xori %245, %cst_68 : vector<8x1x2xi1>
      %247 = vector.broadcast %236 : vector<1x8x2xf32> to vector<8x8x2xf32>
      %248 = arith.subf %237, %247 : vector<8x8x2xf32>
      %249 = tpu.bitcast %248 : vector<8x8x2xf32> -> vector<8x8x2xi32>
      %c31_i32_69 = arith.constant 31 : i32
      %250 = vector.broadcast %c31_i32_69 : i32 to vector<8x8x2xi32>
      %251 = arith.shrsi %249, %250 : vector<8x8x2xi32>
      %252 = vector.broadcast %c2147483647_i32 : i32 to vector<8x8x2xi32>
      %253 = arith.andi %251, %252 : vector<8x8x2xi32>
      %254 = arith.xori %249, %253 : vector<8x8x2xi32>
      %255 = vector.broadcast %c-8_i32 : i32 to vector<8x8x2xi32>
      %256 = arith.andi %254, %255 : vector<8x8x2xi32>
      %257 = vector.broadcast %51 : vector<1x8x2xi32> to vector<8x8x2xi32>
      %258 = arith.ori %256, %257 : vector<8x8x2xi32>
      %cst_70 = arith.constant dense<-2147483648> : vector<8x2xi32>
      %259 = vector.multi_reduction <maxsi>, %258, %cst_70 [1] : vector<8x8x2xi32> to vector<8x2xi32>
      %260 = vector.shape_cast %259 : vector<8x2xi32> to vector<8x1x2xi32>
      %261 = vector.broadcast %c7_i32_24 : i32 to vector<8x1x2xi32>
      %262 = arith.andi %260, %261 : vector<8x1x2xi32>
      %263 = vector.broadcast %c7_i32_24 : i32 to vector<8x1x2xi32>
      %264 = arith.subi %263, %262 : vector<8x1x2xi32>
      %265 = vector.broadcast %c-8_i32 : i32 to vector<8x1x2xi32>
      %266 = arith.andi %260, %265 : vector<8x1x2xi32>
      %c31_i32_71 = arith.constant 31 : i32
      %267 = vector.broadcast %c31_i32_71 : i32 to vector<8x1x2xi32>
      %268 = arith.shrsi %266, %267 : vector<8x1x2xi32>
      %269 = vector.broadcast %c2147483647_i32 : i32 to vector<8x1x2xi32>
      %270 = arith.andi %268, %269 : vector<8x1x2xi32>
      %271 = arith.xori %266, %270 : vector<8x1x2xi32>
      %272 = tpu.bitcast %271 : vector<8x1x2xi32> -> vector<8x1x2xf32>
      %273 = vector.broadcast %48 : vector<1x8x2xi32> to vector<8x8x2xi32>
      %274 = vector.broadcast %264 : vector<8x1x2xi32> to vector<8x8x2xi32>
      %275 = arith.cmpi eq, %273, %274 : vector<8x8x2xi32>
      %cst_72 = arith.constant -1.000000e+30 : f32
      %276 = vector.broadcast %cst_72 : f32 to vector<8x8x2xf32>
      %277 = arith.select %275, %276, %248 : vector<8x8x2xi1>, vector<8x8x2xf32>
      %cst_73 = arith.constant dense<0xFF800000> : vector<8x2xf32>
      %278 = vector.multi_reduction <maximumf>, %277, %cst_73 [1] : vector<8x8x2xf32> to vector<8x2xf32>
      %279 = vector.shape_cast %278 : vector<8x2xf32> to vector<8x1x2xf32>
      %280 = arith.subf %272, %279 : vector<8x1x2xf32>
      %cst_74 = arith.constant 0.000000e+00 : f32
      %281 = vector.broadcast %cst_74 : f32 to vector<8x1x2xf32>
      %282 = arith.maximumf %280, %281 : vector<8x1x2xf32>
      %283 = vector.broadcast %arg4 : f32 to vector<8x1x2xf32>
      %284 = arith.addf %282, %283 : vector<8x1x2xf32>
      %285 = tpu.bitcast %284 : vector<8x1x2xf32> -> vector<8x1x2xi32>
      %c31_i32_75 = arith.constant 31 : i32
      %286 = vector.broadcast %c31_i32_75 : i32 to vector<8x1x2xi32>
      %287 = arith.shrsi %285, %286 : vector<8x1x2xi32>
      %288 = vector.broadcast %c2147483647_i32 : i32 to vector<8x1x2xi32>
      %289 = arith.andi %287, %288 : vector<8x1x2xi32>
      %290 = arith.xori %285, %289 : vector<8x1x2xi32>
      %291 = vector.broadcast %c-8_i32 : i32 to vector<8x1x2xi32>
      %292 = arith.andi %290, %291 : vector<8x1x2xi32>
      %293 = arith.ori %292, %53 : vector<8x1x2xi32>
      %294 = vector.broadcast %246 : vector<8x1x2xi1> to vector<8x8x2xi1>
      %295 = arith.andi %275, %294 : vector<8x8x2xi1>
      %c-2147483648_i32_76 = arith.constant -2147483648 : i32
      %296 = vector.shape_cast %293 : vector<8x1x2xi32> to vector<8x1x2xi32>
      %297 = vector.broadcast %296 : vector<8x1x2xi32> to vector<8x8x2xi32>
      %298 = vector.broadcast %c-2147483648_i32_76 : i32 to vector<8x8x2xi32>
      %299 = arith.select %295, %297, %298 : vector<8x8x2xi1>, vector<8x8x2xi32>
      %cst_77 = arith.constant dense<-2147483648> : vector<8x2xi32>
      %300 = vector.multi_reduction <maxsi>, %299, %cst_77 [0] : vector<8x8x2xi32> to vector<8x2xi32>
      %301 = vector.shape_cast %300 : vector<8x2xi32> to vector<1x8x2xi32>
      %c0_i32_78 = arith.constant 0 : i32
      %302 = vector.broadcast %c0_i32_78 : i32 to vector<1x8x2xi32>
      %303 = arith.cmpi sge, %301, %302 : vector<1x8x2xi32>
      %304 = vector.broadcast %c7_i32_24 : i32 to vector<1x8x2xi32>
      %305 = arith.andi %301, %304 : vector<1x8x2xi32>
      %306 = vector.broadcast %c7_i32_24 : i32 to vector<1x8x2xi32>
      %307 = arith.subi %306, %305 : vector<1x8x2xi32>
      %308 = vector.broadcast %c-8_i32 : i32 to vector<1x8x2xi32>
      %309 = arith.andi %301, %308 : vector<1x8x2xi32>
      %c31_i32_79 = arith.constant 31 : i32
      %310 = vector.broadcast %c31_i32_79 : i32 to vector<1x8x2xi32>
      %311 = arith.shrsi %309, %310 : vector<1x8x2xi32>
      %312 = vector.broadcast %c2147483647_i32 : i32 to vector<1x8x2xi32>
      %313 = arith.andi %311, %312 : vector<1x8x2xi32>
      %314 = arith.xori %309, %313 : vector<1x8x2xi32>
      %315 = tpu.bitcast %314 : vector<1x8x2xi32> -> vector<1x8x2xf32>
      %316 = arith.select %303, %307, %234 : vector<1x8x2xi1>, vector<1x8x2xi32>
      %317 = arith.addf %236, %315 : vector<1x8x2xf32>
      %318 = arith.select %303, %317, %236 : vector<1x8x2xi1>, vector<1x8x2xf32>
      %c0_80 = arith.constant 0 : index
      %c0_81 = arith.constant 0 : index
      %c0_82 = arith.constant 0 : index
      %319 = vector.load %arg1[%c0_80, %c0_81, %c0_82] : memref<8x8x2xf32, #tpu.memory_space<vmem>>, vector<8x8x2xf32>
      %320 = vector.broadcast %316 : vector<1x8x2xi32> to vector<8x8x2xi32>
      %321 = vector.broadcast %49 : vector<8x1x2xi32> to vector<8x8x2xi32>
      %322 = arith.cmpi eq, %320, %321 : vector<8x8x2xi32>
      %323 = arith.extui %322 : vector<8x8x2xi1> to vector<8x8x2xi32>
      %cst_83 = arith.constant dense<-2147483648> : vector<8x2xi32>
      %324 = vector.multi_reduction <maxsi>, %323, %cst_83 [1] : vector<8x8x2xi32> to vector<8x2xi32>
      %325 = vector.shape_cast %324 : vector<8x2xi32> to vector<8x1x2xi32>
      %c0_i32_84 = arith.constant 0 : i32
      %326 = vector.broadcast %c0_i32_84 : i32 to vector<8x1x2xi32>
      %327 = arith.cmpi sgt, %325, %326 : vector<8x1x2xi32>
      %cst_85 = arith.constant dense<true> : vector<8x1x2xi1>
      %328 = arith.xori %327, %cst_85 : vector<8x1x2xi1>
      %329 = vector.broadcast %318 : vector<1x8x2xf32> to vector<8x8x2xf32>
      %330 = arith.subf %319, %329 : vector<8x8x2xf32>
      %331 = tpu.bitcast %330 : vector<8x8x2xf32> -> vector<8x8x2xi32>
      %c31_i32_86 = arith.constant 31 : i32
      %332 = vector.broadcast %c31_i32_86 : i32 to vector<8x8x2xi32>
      %333 = arith.shrsi %331, %332 : vector<8x8x2xi32>
      %334 = vector.broadcast %c2147483647_i32 : i32 to vector<8x8x2xi32>
      %335 = arith.andi %333, %334 : vector<8x8x2xi32>
      %336 = arith.xori %331, %335 : vector<8x8x2xi32>
      %337 = vector.broadcast %c-8_i32 : i32 to vector<8x8x2xi32>
      %338 = arith.andi %336, %337 : vector<8x8x2xi32>
      %339 = vector.broadcast %51 : vector<1x8x2xi32> to vector<8x8x2xi32>
      %340 = arith.ori %338, %339 : vector<8x8x2xi32>
      %cst_87 = arith.constant dense<-2147483648> : vector<8x2xi32>
      %341 = vector.multi_reduction <maxsi>, %340, %cst_87 [1] : vector<8x8x2xi32> to vector<8x2xi32>
      %342 = vector.shape_cast %341 : vector<8x2xi32> to vector<8x1x2xi32>
      %343 = vector.broadcast %c7_i32_24 : i32 to vector<8x1x2xi32>
      %344 = arith.andi %342, %343 : vector<8x1x2xi32>
      %345 = vector.broadcast %c7_i32_24 : i32 to vector<8x1x2xi32>
      %346 = arith.subi %345, %344 : vector<8x1x2xi32>
      %347 = vector.broadcast %c-8_i32 : i32 to vector<8x1x2xi32>
      %348 = arith.andi %342, %347 : vector<8x1x2xi32>
      %c31_i32_88 = arith.constant 31 : i32
      %349 = vector.broadcast %c31_i32_88 : i32 to vector<8x1x2xi32>
      %350 = arith.shrsi %348, %349 : vector<8x1x2xi32>
      %351 = vector.broadcast %c2147483647_i32 : i32 to vector<8x1x2xi32>
      %352 = arith.andi %350, %351 : vector<8x1x2xi32>
      %353 = arith.xori %348, %352 : vector<8x1x2xi32>
      %354 = tpu.bitcast %353 : vector<8x1x2xi32> -> vector<8x1x2xf32>
      %355 = vector.broadcast %48 : vector<1x8x2xi32> to vector<8x8x2xi32>
      %356 = vector.broadcast %346 : vector<8x1x2xi32> to vector<8x8x2xi32>
      %357 = arith.cmpi eq, %355, %356 : vector<8x8x2xi32>
      %cst_89 = arith.constant -1.000000e+30 : f32
      %358 = vector.broadcast %cst_89 : f32 to vector<8x8x2xf32>
      %359 = arith.select %357, %358, %330 : vector<8x8x2xi1>, vector<8x8x2xf32>
      %cst_90 = arith.constant dense<0xFF800000> : vector<8x2xf32>
      %360 = vector.multi_reduction <maximumf>, %359, %cst_90 [1] : vector<8x8x2xf32> to vector<8x2xf32>
      %361 = vector.shape_cast %360 : vector<8x2xf32> to vector<8x1x2xf32>
      %362 = arith.subf %354, %361 : vector<8x1x2xf32>
      %cst_91 = arith.constant 0.000000e+00 : f32
      %363 = vector.broadcast %cst_91 : f32 to vector<8x1x2xf32>
      %364 = arith.maximumf %362, %363 : vector<8x1x2xf32>
      %365 = vector.broadcast %arg4 : f32 to vector<8x1x2xf32>
      %366 = arith.addf %364, %365 : vector<8x1x2xf32>
      %367 = tpu.bitcast %366 : vector<8x1x2xf32> -> vector<8x1x2xi32>
      %c31_i32_92 = arith.constant 31 : i32
      %368 = vector.broadcast %c31_i32_92 : i32 to vector<8x1x2xi32>
      %369 = arith.shrsi %367, %368 : vector<8x1x2xi32>
      %370 = vector.broadcast %c2147483647_i32 : i32 to vector<8x1x2xi32>
      %371 = arith.andi %369, %370 : vector<8x1x2xi32>
      %372 = arith.xori %367, %371 : vector<8x1x2xi32>
      %373 = vector.broadcast %c-8_i32 : i32 to vector<8x1x2xi32>
      %374 = arith.andi %372, %373 : vector<8x1x2xi32>
      %375 = arith.ori %374, %53 : vector<8x1x2xi32>
      %376 = vector.broadcast %328 : vector<8x1x2xi1> to vector<8x8x2xi1>
      %377 = arith.andi %357, %376 : vector<8x8x2xi1>
      %c-2147483648_i32_93 = arith.constant -2147483648 : i32
      %378 = vector.shape_cast %375 : vector<8x1x2xi32> to vector<8x1x2xi32>
      %379 = vector.broadcast %378 : vector<8x1x2xi32> to vector<8x8x2xi32>
      %380 = vector.broadcast %c-2147483648_i32_93 : i32 to vector<8x8x2xi32>
      %381 = arith.select %377, %379, %380 : vector<8x8x2xi1>, vector<8x8x2xi32>
      %cst_94 = arith.constant dense<-2147483648> : vector<8x2xi32>
      %382 = vector.multi_reduction <maxsi>, %381, %cst_94 [0] : vector<8x8x2xi32> to vector<8x2xi32>
      %383 = vector.shape_cast %382 : vector<8x2xi32> to vector<1x8x2xi32>
      %c0_i32_95 = arith.constant 0 : i32
      %384 = vector.broadcast %c0_i32_95 : i32 to vector<1x8x2xi32>
      %385 = arith.cmpi sge, %383, %384 : vector<1x8x2xi32>
      %386 = vector.broadcast %c7_i32_24 : i32 to vector<1x8x2xi32>
      %387 = arith.andi %383, %386 : vector<1x8x2xi32>
      %388 = vector.broadcast %c7_i32_24 : i32 to vector<1x8x2xi32>
      %389 = arith.subi %388, %387 : vector<1x8x2xi32>
      %390 = vector.broadcast %c-8_i32 : i32 to vector<1x8x2xi32>
      %391 = arith.andi %383, %390 : vector<1x8x2xi32>
      %c31_i32_96 = arith.constant 31 : i32
      %392 = vector.broadcast %c31_i32_96 : i32 to vector<1x8x2xi32>
      %393 = arith.shrsi %391, %392 : vector<1x8x2xi32>
      %394 = vector.broadcast %c2147483647_i32 : i32 to vector<1x8x2xi32>
      %395 = arith.andi %393, %394 : vector<1x8x2xi32>
      %396 = arith.xori %391, %395 : vector<1x8x2xi32>
      %397 = tpu.bitcast %396 : vector<1x8x2xi32> -> vector<1x8x2xf32>
      %398 = arith.select %385, %389, %316 : vector<1x8x2xi1>, vector<1x8x2xi32>
      %399 = arith.addf %318, %397 : vector<1x8x2xf32>
      %400 = arith.select %385, %399, %318 : vector<1x8x2xi1>, vector<1x8x2xf32>
      %c0_i32_97 = arith.constant 0 : i32
      %401 = vector.broadcast %c0_i32_97 : i32 to vector<1x8x2xi32>
      %402 = arith.cmpi sge, %398, %401 : vector<1x8x2xi32>
      %cst_98 = arith.constant dense<true> : vector<1x1x2xi1>
      %403 = arith.xori %59, %cst_98 : vector<1x1x2xi1>
      %404 = vector.broadcast %403 : vector<1x1x2xi1> to vector<1x8x2xi1>
      %405 = arith.ori %402, %404 : vector<1x8x2xi1>
      %c1_i32_99 = arith.constant 1 : i32
      %c0_i32_100 = arith.constant 0 : i32
      %406 = vector.broadcast %c1_i32_99 : i32 to vector<1x8x2xi32>
      %407 = vector.broadcast %c0_i32_100 : i32 to vector<1x8x2xi32>
      %408 = arith.select %405, %406, %407 : vector<1x8x2xi1>, vector<1x8x2xi32>
      %409 = vector.shape_cast %408 : vector<1x8x2xi32> to vector<1x1x8x2xi32>
      %cst_101 = arith.constant dense<2147483647> : vector<1xi32>
      %410 = vector.multi_reduction <minsi>, %409, %cst_101 [1, 2, 3] : vector<1x1x8x2xi32> to vector<1xi32>
      %411 = vector.shape_cast %410 : vector<1xi32> to vector<1x1x1x1xi32>
      %412 = vector.extract %411[0, 0, 0, 0] : i32 from vector<1x1x1x1xi32>
      %c1_i32_102 = arith.constant 1 : i32
      %413 = arith.cmpi eq, %412, %c1_i32_102 : i32
      %c5_i32 = arith.constant 5 : i32
      %414 = arith.cmpi eq, %arg3, %c5_i32 : i32
      %415 = arith.select %414, %c256_i32, %c48_i32 : i32
      %c1_i32_103 = arith.constant 1 : i32
      %416 = arith.addi %arg5, %c1_i32_103 : i32
      %417 = arith.cmpi sge, %416, %415 : i32
      %418 = arith.ori %413, %417 : i1
      %c1_i32_104 = arith.constant 1 : i32
      %419 = arith.addi %arg3, %c1_i32_104 : i32
      %420 = arith.select %418, %419, %arg3 : i32
      %cst_105 = arith.constant 2.000000e-01 : f32
      %421 = arith.mulf %arg4, %cst_105 : f32
      %422 = arith.select %418, %421, %arg4 : f32
      %c1_i32_106 = arith.constant 1 : i32
      %423 = arith.addi %arg5, %c1_i32_106 : i32
      %c0_i32_107 = arith.constant 0 : i32
      %424 = arith.select %418, %c0_i32_107, %423 : i32
      %true = arith.constant true
      %425 = arith.xori %414, %true : i1
      %426 = arith.andi %418, %425 : i1
      %c-1_i32_108 = arith.constant -1 : i32
      %427 = vector.broadcast %c-1_i32_108 : i32 to vector<1x8x2xi32>
      %428 = arith.select %426, %427, %398 : vector<1x8x2xi32>
      scf.yield %420, %422, %424, %400, %428 : i32, f32, i32, vector<1x8x2xf32>, vector<1x8x2xi32>
    }
    %63 = vector.broadcast %62#4 : vector<1x8x2xi32> to vector<8x8x2xi32>
    %64 = vector.broadcast %49 : vector<8x1x2xi32> to vector<8x8x2xi32>
    %65 = arith.cmpi eq, %63, %64 : vector<8x8x2xi32>
    %66 = arith.extui %65 : vector<8x8x2xi1> to vector<8x8x2xi32>
    %cst_27 = arith.constant dense<-2147483648> : vector<8x2xi32>
    %67 = vector.multi_reduction <maxsi>, %66, %cst_27 [1] : vector<8x8x2xi32> to vector<8x2xi32>
    %68 = vector.shape_cast %67 : vector<8x2xi32> to vector<8x1x2xi32>
    %c0_i32_28 = arith.constant 0 : i32
    %c8_i32 = arith.constant 8 : i32
    %69 = arith.addi %c0_i32_28, %c8_i32 : i32
    %c1_i32 = arith.constant 1 : i32
    %70:2 = scf.for %arg3 = %c0_i32_28 to %69 step %c1_i32 iter_args(%arg4 = %62#4, %arg5 = %68) -> (vector<1x8x2xi32>, vector<8x1x2xi32>)  : i32 {
      %c0_i32_31 = arith.constant 0 : i32
      %73 = vector.broadcast %c0_i32_31 : i32 to vector<8x1x2xi32>
      %74 = arith.cmpi eq, %arg5, %73 : vector<8x1x2xi32>
      %c0_i32_32 = arith.constant 0 : i32
      %75 = vector.broadcast %c0_i32_32 : i32 to vector<1x8x2xi32>
      %76 = arith.cmpi slt, %arg4, %75 : vector<1x8x2xi32>
      %c8_i32_33 = arith.constant 8 : i32
      %77 = vector.broadcast %c8_i32_33 : i32 to vector<8x1x2xi32>
      %78 = arith.select %74, %49, %77 : vector<8x1x2xi1>, vector<8x1x2xi32>
      %cst_34 = arith.constant dense<2147483647> : vector<1x2xi32>
      %79 = vector.multi_reduction <minsi>, %78, %cst_34 [0] : vector<8x1x2xi32> to vector<1x2xi32>
      %80 = vector.shape_cast %79 : vector<1x2xi32> to vector<1x1x2xi32>
      %c8_i32_35 = arith.constant 8 : i32
      %81 = vector.broadcast %c8_i32_35 : i32 to vector<1x8x2xi32>
      %82 = arith.select %76, %48, %81 : vector<1x8x2xi1>, vector<1x8x2xi32>
      %cst_36 = arith.constant dense<2147483647> : vector<1x2xi32>
      %83 = vector.multi_reduction <minsi>, %82, %cst_36 [1] : vector<1x8x2xi32> to vector<1x2xi32>
      %84 = vector.shape_cast %83 : vector<1x2xi32> to vector<1x1x2xi32>
      %c8_i32_37 = arith.constant 8 : i32
      %85 = vector.broadcast %c8_i32_37 : i32 to vector<1x1x2xi32>
      %86 = arith.cmpi slt, %80, %85 : vector<1x1x2xi32>
      %c8_i32_38 = arith.constant 8 : i32
      %87 = vector.broadcast %c8_i32_38 : i32 to vector<1x1x2xi32>
      %88 = arith.cmpi slt, %84, %87 : vector<1x1x2xi32>
      %89 = arith.andi %86, %88 : vector<1x1x2xi1>
      %90 = vector.broadcast %84 : vector<1x1x2xi32> to vector<1x8x2xi32>
      %91 = arith.cmpi eq, %48, %90 : vector<1x8x2xi32>
      %92 = vector.broadcast %89 : vector<1x1x2xi1> to vector<1x8x2xi1>
      %93 = arith.andi %92, %91 : vector<1x8x2xi1>
      %94 = vector.shape_cast %80 : vector<1x1x2xi32> to vector<1x1x2xi32>
      %95 = vector.broadcast %94 : vector<1x1x2xi32> to vector<1x8x2xi32>
      %96 = arith.select %93, %95, %arg4 : vector<1x8x2xi1>, vector<1x8x2xi32>
      %97 = vector.broadcast %80 : vector<1x1x2xi32> to vector<8x1x2xi32>
      %98 = arith.cmpi eq, %49, %97 : vector<8x1x2xi32>
      %99 = vector.broadcast %89 : vector<1x1x2xi1> to vector<8x1x2xi1>
      %100 = arith.andi %99, %98 : vector<8x1x2xi1>
      %c1_i32_39 = arith.constant 1 : i32
      %101 = vector.broadcast %c1_i32_39 : i32 to vector<8x1x2xi32>
      %102 = arith.select %100, %101, %arg5 : vector<8x1x2xi1>, vector<8x1x2xi32>
      scf.yield %96, %102 : vector<1x8x2xi32>, vector<8x1x2xi32>
    }
    %71 = vector.shape_cast %70#0 : vector<1x8x2xi32> to vector<8x2xi32>
    %c0_29 = arith.constant 0 : index
    %c0_30 = arith.constant 0 : index
    %72 = vector.load %arg2[%c0_29, %c0_30] : memref<8x2xi32, #tpu.memory_space<vmem>>, vector<8x2xi32>
    tpu.vector_store %arg2[%c0_29, %c0_30], %71 {strides = array<i32>} : memref<8x2xi32, #tpu.memory_space<vmem>>, vector<8x2xi32>,
    return
  }
  func.func @transform_0(%arg0: i32) -> (i32, i32, i32) {
    %c0_i32 = arith.constant 0 : i32
    %c0_i32_0 = arith.constant 0 : i32
    %c0_i32_1 = arith.constant 0 : i32
    return %c0_i32, %c0_i32_0, %arg0 : i32, i32, i32
  }
  func.func @transform_1(%arg0: i32) -> (i32, i32) {
    %c0_i32 = arith.constant 0 : i32
    %c0_i32_0 = arith.constant 0 : i32
    return %c0_i32, %arg0 : i32, i32
  }
}

module attributes {stable_mosaic.version = 11 : i64} {
  func.func @_matcher_kernel(%arg0: i32, %arg1: memref<8x8x2xf32, #tpu.memory_space<vmem>>, %arg2: memref<8x2xi32, #tpu.memory_space<vmem>>) attributes {dimension_semantics = [#tpu.dimension_semantics<parallel>], iteration_bounds = array<i64: 1>, scalar_prefetch = 0 : i64, scratch_operands = 0 : i64, tpu.core_type = #tpu.core_type<tc>, window_params = [{transform_indices = @transform_0, window_bounds = array<i64: 8, 8, 2>}, {transform_indices = @transform_1, window_bounds = array<i64: 8, 2>}]} {
    %c0 = arith.constant 0 : index
    %c0_0 = arith.constant 0 : index
    %c0_1 = arith.constant 0 : index
    %0 = vector.load %arg1[%c0, %c0_0, %c0_1] : memref<8x8x2xf32, #tpu.memory_space<vmem>>, vector<8x8x2xf32>
    %1 = arith.cmpf one, %0, %0 : vector<8x8x2xf32>
    %2 = math.absf %0 : vector<8x8x2xf32>
    %cst = arith.constant 0x7F800000 : f32
    %3 = vector.broadcast %cst : f32 to vector<8x8x2xf32>
    %4 = arith.cmpf oeq, %2, %3 : vector<8x8x2xf32>
    %5 = arith.ori %1, %4 : vector<8x8x2xi1>
    %cst_2 = arith.constant 1.000000e+06 : f32
    %6 = vector.broadcast %cst_2 : f32 to vector<8x8x2xf32>
    %7 = arith.select %5, %6, %0 : vector<8x8x2xi1>, vector<8x8x2xf32>
    %cst_3 = arith.constant 1.000000e+06 : f32
    %8 = vector.broadcast %cst_3 : f32 to vector<8x8x2xf32>
    %9 = arith.cmpf oge, %7, %8 : vector<8x8x2xf32>
    %cst_4 = arith.constant -3.000000e+38 : f32
    %10 = vector.broadcast %cst_4 : f32 to vector<8x8x2xf32>
    %11 = arith.select %9, %10, %7 : vector<8x8x2xi1>, vector<8x8x2xf32>
    %cst_5 = arith.constant dense<0xFF800000> : vector<8x2xf32>
    %12 = vector.multi_reduction <maximumf>, %11, %cst_5 [1] : vector<8x8x2xf32> to vector<8x2xf32>
    %13 = vector.shape_cast %12 : vector<8x2xf32> to vector<8x1x2xf32>
    %cst_6 = arith.constant dense<0xFF800000> : vector<1x2xf32>
    %14 = vector.multi_reduction <maximumf>, %13, %cst_6 [0] : vector<8x1x2xf32> to vector<1x2xf32>
    %15 = vector.shape_cast %14 : vector<1x2xf32> to vector<1x1x2xf32>
    %cst_7 = arith.constant 3.000000e+38 : f32
    %16 = vector.broadcast %cst_7 : f32 to vector<8x8x2xf32>
    %17 = arith.select %9, %16, %7 : vector<8x8x2xi1>, vector<8x8x2xf32>
    %cst_8 = arith.constant dense<0x7F800000> : vector<8x2xf32>
    %18 = vector.multi_reduction <minimumf>, %17, %cst_8 [1] : vector<8x8x2xf32> to vector<8x2xf32>
    %19 = vector.shape_cast %18 : vector<8x2xf32> to vector<8x1x2xf32>
    %cst_9 = arith.constant dense<0x7F800000> : vector<1x2xf32>
    %20 = vector.multi_reduction <minimumf>, %19, %cst_9 [0] : vector<8x1x2xf32> to vector<1x2xf32>
    %21 = vector.shape_cast %20 : vector<1x2xf32> to vector<1x1x2xf32>
    %22 = arith.cmpf oge, %15, %21 : vector<1x1x2xf32>
    %cst_10 = arith.constant 0.000000e+00 : f32
    %23 = vector.broadcast %cst_10 : f32 to vector<1x1x2xf32>
    %24 = arith.select %22, %15, %23 : vector<1x1x2xi1>, vector<1x1x2xf32>
    %cst_11 = arith.constant 0.000000e+00 : f32
    %25 = vector.broadcast %cst_11 : f32 to vector<1x1x2xf32>
    %26 = arith.select %22, %21, %25 : vector<1x1x2xi1>, vector<1x1x2xf32>
    %27 = arith.subf %24, %26 : vector<1x1x2xf32>
    %cst_12 = arith.constant 8.000000e+00 : f32
    %28 = vector.broadcast %cst_12 : f32 to vector<1x1x2xf32>
    %29 = arith.mulf %28, %27 : vector<1x1x2xf32>
    %30 = arith.addf %24, %29 : vector<1x1x2xf32>
    %cst_13 = arith.constant 1.000000e+00 : f32
    %31 = vector.broadcast %cst_13 : f32 to vector<1x1x2xf32>
    %32 = arith.addf %30, %31 : vector<1x1x2xf32>
    %33 = vector.broadcast %32 : vector<1x1x2xf32> to vector<8x8x2xf32>
    %34 = arith.minimumf %7, %33 : vector<8x8x2xf32>
    %35 = arith.select %9, %34, %7 : vector<8x8x2xi1>, vector<8x8x2xf32>
    %36 = math.absf %35 : vector<8x8x2xf32>
    %cst_14 = arith.constant dense<0xFF800000> : vector<8x2xf32>
    %37 = vector.multi_reduction <maximumf>, %36, %cst_14 [1] : vector<8x8x2xf32> to vector<8x2xf32>
    %38 = vector.shape_cast %37 : vector<8x2xf32> to vector<8x1x2xf32>
    %cst_15 = arith.constant dense<0xFF800000> : vector<1x2xf32>
    %39 = vector.multi_reduction <maximumf>, %38, %cst_15 [0] : vector<8x1x2xf32> to vector<1x2xf32>
    %40 = vector.shape_cast %39 : vector<1x2xf32> to vector<1x1x2xf32>
    %cst_16 = arith.constant 9.99999997E-7 : f32
    %41 = vector.broadcast %cst_16 : f32 to vector<1x1x2xf32>
    %42 = arith.maximumf %40, %41 : vector<1x1x2xf32>
    %cst_17 = arith.constant 0.000000e+00 : f32
    %43 = vector.broadcast %cst_17 : f32 to vector<8x8x2xf32>
    %44 = arith.subf %43, %35 : vector<8x8x2xf32>
    %45 = vector.broadcast %42 : vector<1x1x2xf32> to vector<8x8x2xf32>
    %46 = arith.divf %44, %45 : vector<8x8x2xf32>
    %c0_18 = arith.constant 0 : index
    %c0_19 = arith.constant 0 : index
    %c0_20 = arith.constant 0 : index
    %47 = vector.load %arg1[%c0_18, %c0_19, %c0_20] : memref<8x8x2xf32, #tpu.memory_space<vmem>>, vector<8x8x2xf32>
    tpu.vector_store %arg1[%c0_18, %c0_19, %c0_20], %46 {strides = array<i32>} : memref<8x8x2xf32, #tpu.memory_space<vmem>>, vector<8x8x2xf32>,
    %48 = tpu.iota {dimensions = array<i32: 1>} : vector<1x8x2xi32>
    %49 = tpu.iota {dimensions = array<i32: 0>} : vector<8x1x2xi32>
    %c7_i32 = arith.constant 7 : i32
    %50 = vector.broadcast %c7_i32 : i32 to vector<1x8x2xi32>
    %51 = arith.subi %50, %48 : vector<1x8x2xi32>
    %c7_i32_21 = arith.constant 7 : i32
    %52 = vector.broadcast %c7_i32_21 : i32 to vector<8x1x2xi32>
    %53 = arith.subi %52, %49 : vector<8x1x2xi32>
    %54 = tpu.iota {dimensions = array<i32: 2>} : vector<1x1x2xi32>
    %c2_i32 = arith.constant 2 : i32
    %55 = arith.muli %arg0, %c2_i32 : i32
    %56 = vector.broadcast %55 : i32 to vector<1x1x2xi32>
    %57 = arith.addi %56, %54 : vector<1x1x2xi32>
    %c2_i32_22 = arith.constant 2 : i32
    %58 = vector.broadcast %c2_i32_22 : i32 to vector<1x1x2xi32>
    %59 = arith.cmpi slt, %57, %58 : vector<1x1x2xi32>
    %cst_23 = arith.constant 0.000000e+00 : f32
    %60 = vector.broadcast %cst_23 : f32 to vector<1x8x2xf32>
    %c-1_i32 = arith.constant -1 : i32
    %61 = vector.broadcast %c-1_i32 : i32 to vector<1x8x2xi32>
    %c2147483647_i32 = arith.constant 2147483647 : i32
    %c-8_i32 = arith.constant -8 : i32
    %c7_i32_24 = arith.constant 7 : i32
    %c256_i32 = arith.constant 256 : i32
    %c48_i32 = arith.constant 48 : i32
    %c0_i32 = arith.constant 0 : i32
    %cst_25 = arith.constant 2.500000e-01 : f32
    %c0_i32_26 = arith.constant 0 : i32
    %62:5 = scf.while (%arg3 = %c0_i32, %arg4 = %cst_25, %arg5 = %c0_i32_26, %arg6 = %60, %arg7 = %61) : (i32, f32, i32, vector<1x8x2xf32>, vector<1x8x2xi32>) -> (i32, f32, i32, vector<1x8x2xf32>, vector<1x8x2xi32>) {
      %c6_i32 = arith.constant 6 : i32
      %73 = arith.cmpi slt, %arg3, %c6_i32 : i32
      scf.condition(%73) %arg3, %arg4, %arg5, %arg6, %arg7 : i32, f32, i32, vector<1x8x2xf32>, vector<1x8x2xi32>
    } do {
    ^bb0(%arg3: i32, %arg4: f32, %arg5: i32, %arg6: vector<1x8x2xf32>, %arg7: vector<1x8x2xi32>):
      %c0_31 = arith.constant 0 : index
      %c0_32 = arith.constant 0 : index
      %c0_33 = arith.constant 0 : index
      %73 = vector.load %arg1[%c0_31, %c0_32, %c0_33] : memref<8x8x2xf32, #tpu.memory_space<vmem>>, vector<8x8x2xf32>
      %74 = vector.broadcast %arg7 : vector<1x8x2xi32> to vector<8x8x2xi32>
      %75 = vector.broadcast %49 : vector<8x1x2xi32> to vector<8x8x2xi32>
      %76 = arith.cmpi eq, %74, %75 : vector<8x8x2xi32>
      %77 = arith.extui %76 : vector<8x8x2xi1> to vector<8x8x2xi32>
      %cst_34 = arith.constant dense<-2147483648> : vector<8x2xi32>
      %78 = vector.multi_reduction <maxsi>, %77, %cst_34 [1] : vector<8x8x2xi32> to vector<8x2xi32>
      %79 = vector.shape_cast %78 : vector<8x2xi32> to vector<8x1x2xi32>
      %c0_i32_35 = arith.constant 0 : i32
      %80 = vector.broadcast %c0_i32_35 : i32 to vector<8x1x2xi32>
      %81 = arith.cmpi sgt, %79, %80 : vector<8x1x2xi32>
      %cst_36 = arith.constant dense<true> : vector<8x1x2xi1>
      %82 = arith.xori %81, %cst_36 : vector<8x1x2xi1>
      %83 = vector.broadcast %arg6 : vector<1x8x2xf32> to vector<8x8x2xf32>
      %84 = arith.subf %73, %83 : vector<8x8x2xf32>
      %85 = tpu.bitcast %84 : vector<8x8x2xf32> -> vector<8x8x2xi32>
      %c31_i32 = arith.constant 31 : i32
      %86 = vector.broadcast %c31_i32 : i32 to vector<8x8x2xi32>
      %87 = arith.shrsi %85, %86 : vector<8x8x2xi32>
      %88 = vector.broadcast %c2147483647_i32 : i32 to vector<8x8x2xi32>
      %89 = arith.andi %87, %88 : vector<8x8x2xi32>
      %90 = arith.xori %85, %89 : vector<8x8x2xi32>
      %91 = vector.broadcast %c-8_i32 : i32 to vector<8x8x2xi32>
      %92 = arith.andi %90, %91 : vector<8x8x2xi32>
      %93 = vector.broadcast %51 : vector<1x8x2xi32> to vector<8x8x2xi32>
      %94 = arith.ori %92, %93 : vector<8x8x2xi32>
      %cst_37 = arith.constant dense<-2147483648> : vector<8x2xi32>
      %95 = vector.multi_reduction <maxsi>, %94, %cst_37 [1] : vector<8x8x2xi32> to vector<8x2xi32>
      %96 = vector.shape_cast %95 : vector<8x2xi32> to vector<8x1x2xi32>
      %97 = vector.broadcast %c7_i32_24 : i32 to vector<8x1x2xi32>
      %98 = arith.andi %96, %97 : vector<8x1x2xi32>
      %99 = vector.broadcast %c7_i32_24 : i32 to vector<8x1x2xi32>
      %100 = arith.subi %99, %98 : vector<8x1x2xi32>
      %101 = vector.broadcast %c-8_i32 : i32 to vector<8x1x2xi32>
      %102 = arith.andi %96, %101 : vector<8x1x2xi32>
      %c31_i32_38 = arith.constant 31 : i32
      %103 = vector.broadcast %c31_i32_38 : i32 to vector<8x1x2xi32>
      %104 = arith.shrsi %102, %103 : vector<8x1x2xi32>
      %105 = vector.broadcast %c2147483647_i32 : i32 to vector<8x1x2xi32>
      %106 = arith.andi %104, %105 : vector<8x1x2xi32>
      %107 = arith.xori %102, %106 : vector<8x1x2xi32>
      %108 = tpu.bitcast %107 : vector<8x1x2xi32> -> vector<8x1x2xf32>
      %109 = vector.broadcast %48 : vector<1x8x2xi32> to vector<8x8x2xi32>
      %110 = vector.broadcast %100 : vector<8x1x2xi32> to vector<8x8x2xi32>
      %111 = arith.cmpi eq, %109, %110 : vector<8x8x2xi32>
      %cst_39 = arith.constant -1.000000e+30 : f32
      %112 = vector.broadcast %cst_39 : f32 to vector<8x8x2xf32>
      %113 = arith.select %111, %112, %84 : vector<8x8x2xi1>, vector<8x8x2xf32>
      %cst_40 = arith.constant dense<0xFF800000> : vector<8x2xf32>
      %114 = vector.multi_reduction <maximumf>, %113, %cst_40 [1] : vector<8x8x2xf32> to vector<8x2xf32>
      %115 = vector.shape_cast %114 : vector<8x2xf32> to vector<8x1x2xf32>
      %116 = arith.subf %108, %115 : vector<8x1x2xf32>
      %cst_41 = arith.constant 0.000000e+00 : f32
      %117 = vector.broadcast %cst_41 : f32 to vector<8x1x2xf32>
      %118 = arith.maximumf %116, %117 : vector<8x1x2xf32>
      %119 = vector.broadcast %arg4 : f32 to vector<8x1x2xf32>
      %120 = arith.addf %118, %119 : vector<8x1x2xf32>
      %121 = tpu.bitcast %120 : vector<8x1x2xf32> -> vector<8x1x2xi32>
      %c31_i32_42 = arith.constant 31 : i32
      %122 = vector.broadcast %c31_i32_42 : i32 to vector<8x1x2xi32>
      %123 = arith.shrsi %121, %122 : vector<8x1x2xi32>
      %124 = vector.broadcast %c2147483647_i32 : i32 to vector<8x1x2xi32>
      %125 = arith.andi %123, %124 : vector<8x1x2xi32>
      %126 = arith.xori %121, %125 : vector<8x1x2xi32>
      %127 = vector.broadcast %c-8_i32 : i32 to vector<8x1x2xi32>
      %128 = arith.andi %126, %127 : vector<8x1x2xi32>
      %129 = arith.ori %128, %53 : vector<8x1x2xi32>
      %130 = vector.broadcast %82 : vector<8x1x2xi1> to vector<8x8x2xi1>
      %131 = arith.andi %111, %130 : vector<8x8x2xi1>
      %c-2147483648_i32 = arith.constant -2147483648 : i32
      %132 = vector.shape_cast %129 : vector<8x1x2xi32> to vector<8x1x2xi32>
      %133 = vector.broadcast %132 : vector<8x1x2xi32> to vector<8x8x2xi32>
      %134 = vector.broadcast %c-2147483648_i32 : i32 to vector<8x8x2xi32>
      %135 = arith.select %131, %133, %134 : vector<8x8x2xi1>, vector<8x8x2xi32>
      %cst_43 = arith.constant dense<-2147483648> : vector<8x2xi32>
      %136 = vector.multi_reduction <maxsi>, %135, %cst_43 [0] : vector<8x8x2xi32> to vector<8x2xi32>
      %137 = vector.shape_cast %136 : vector<8x2xi32> to vector<1x8x2xi32>
      %c0_i32_44 = arith.constant 0 : i32
      %138 = vector.broadcast %c0_i32_44 : i32 to vector<1x8x2xi32>
      %139 = arith.cmpi sge, %137, %138 : vector<1x8x2xi32>
      %140 = vector.broadcast %c7_i32_24 : i32 to vector<1x8x2xi32>
      %141 = arith.andi %137, %140 : vector<1x8x2xi32>
      %142 = vector.broadcast %c7_i32_24 : i32 to vector<1x8x2xi32>
      %143 = arith.subi %142, %141 : vector<1x8x2xi32>
      %144 = vector.broadcast %c-8_i32 : i32 to vector<1x8x2xi32>
      %145 = arith.andi %137, %144 : vector<1x8x2xi32>
      %c31_i32_45 = arith.constant 31 : i32
      %146 = vector.broadcast %c31_i32_45 : i32 to vector<1x8x2xi32>
      %147 = arith.shrsi %145, %146 : vector<1x8x2xi32>
      %148 = vector.broadcast %c2147483647_i32 : i32 to vector<1x8x2xi32>
      %149 = arith.andi %147, %148 : vector<1x8x2xi32>
      %150 = arith.xori %145, %149 : vector<1x8x2xi32>
      %151 = tpu.bitcast %150 : vector<1x8x2xi32> -> vector<1x8x2xf32>
      %152 = arith.select %139, %143, %arg7 : vector<1x8x2xi1>, vector<1x8x2xi32>
      %153 = arith.addf %arg6, %151 : vector<1x8x2xf32>
      %154 = arith.select %139, %153, %arg6 : vector<1x8x2xi1>, vector<1x8x2xf32>
      %c0_46 = arith.constant 0 : index
      %c0_47 = arith.constant 0 : index
      %c0_48 = arith.constant 0 : index
      %155 = vector.load %arg1[%c0_46, %c0_47, %c0_48] : memref<8x8x2xf32, #tpu.memory_space<vmem>>, vector<8x8x2xf32>
      %156 = vector.broadcast %152 : vector<1x8x2xi32> to vector<8x8x2xi32>
      %157 = vector.broadcast %49 : vector<8x1x2xi32> to vector<8x8x2xi32>
      %158 = arith.cmpi eq, %156, %157 : vector<8x8x2xi32>
      %159 = arith.extui %158 : vector<8x8x2xi1> to vector<8x8x2xi32>
      %cst_49 = arith.constant dense<-2147483648> : vector<8x2xi32>
      %160 = vector.multi_reduction <maxsi>, %159, %cst_49 [1] : vector<8x8x2xi32> to vector<8x2xi32>
      %161 = vector.shape_cast %160 : vector<8x2xi32> to vector<8x1x2xi32>
      %c0_i32_50 = arith.constant 0 : i32
      %162 = vector.broadcast %c0_i32_50 : i32 to vector<8x1x2xi32>
      %163 = arith.cmpi sgt, %161, %162 : vector<8x1x2xi32>
      %cst_51 = arith.constant dense<true> : vector<8x1x2xi1>
      %164 = arith.xori %163, %cst_51 : vector<8x1x2xi1>
      %165 = vector.broadcast %154 : vector<1x8x2xf32> to vector<8x8x2xf32>
      %166 = arith.subf %155, %165 : vector<8x8x2xf32>
      %167 = tpu.bitcast %166 : vector<8x8x2xf32> -> vector<8x8x2xi32>
      %c31_i32_52 = arith.constant 31 : i32
      %168 = vector.broadcast %c31_i32_52 : i32 to vector<8x8x2xi32>
      %169 = arith.shrsi %167, %168 : vector<8x8x2xi32>
      %170 = vector.broadcast %c2147483647_i32 : i32 to vector<8x8x2xi32>
      %171 = arith.andi %169, %170 : vector<8x8x2xi32>
      %172 = arith.xori %167, %171 : vector<8x8x2xi32>
      %173 = vector.broadcast %c-8_i32 : i32 to vector<8x8x2xi32>
      %174 = arith.andi %172, %173 : vector<8x8x2xi32>
      %175 = vector.broadcast %51 : vector<1x8x2xi32> to vector<8x8x2xi32>
      %176 = arith.ori %174, %175 : vector<8x8x2xi32>
      %cst_53 = arith.constant dense<-2147483648> : vector<8x2xi32>
      %177 = vector.multi_reduction <maxsi>, %176, %cst_53 [1] : vector<8x8x2xi32> to vector<8x2xi32>
      %178 = vector.shape_cast %177 : vector<8x2xi32> to vector<8x1x2xi32>
      %179 = vector.broadcast %c7_i32_24 : i32 to vector<8x1x2xi32>
      %180 = arith.andi %178, %179 : vector<8x1x2xi32>
      %181 = vector.broadcast %c7_i32_24 : i32 to vector<8x1x2xi32>
      %182 = arith.subi %181, %180 : vector<8x1x2xi32>
      %183 = vector.broadcast %c-8_i32 : i32 to vector<8x1x2xi32>
      %184 = arith.andi %178, %183 : vector<8x1x2xi32>
      %c31_i32_54 = arith.constant 31 : i32
      %185 = vector.broadcast %c31_i32_54 : i32 to vector<8x1x2xi32>
      %186 = arith.shrsi %184, %185 : vector<8x1x2xi32>
      %187 = vector.broadcast %c2147483647_i32 : i32 to vector<8x1x2xi32>
      %188 = arith.andi %186, %187 : vector<8x1x2xi32>
      %189 = arith.xori %184, %188 : vector<8x1x2xi32>
      %190 = tpu.bitcast %189 : vector<8x1x2xi32> -> vector<8x1x2xf32>
      %191 = vector.broadcast %48 : vector<1x8x2xi32> to vector<8x8x2xi32>
      %192 = vector.broadcast %182 : vector<8x1x2xi32> to vector<8x8x2xi32>
      %193 = arith.cmpi eq, %191, %192 : vector<8x8x2xi32>
      %cst_55 = arith.constant -1.000000e+30 : f32
      %194 = vector.broadcast %cst_55 : f32 to vector<8x8x2xf32>
      %195 = arith.select %193, %194, %166 : vector<8x8x2xi1>, vector<8x8x2xf32>
      %cst_56 = arith.constant dense<0xFF800000> : vector<8x2xf32>
      %196 = vector.multi_reduction <maximumf>, %195, %cst_56 [1] : vector<8x8x2xf32> to vector<8x2xf32>
      %197 = vector.shape_cast %196 : vector<8x2xf32> to vector<8x1x2xf32>
      %198 = arith.subf %190, %197 : vector<8x1x2xf32>
      %cst_57 = arith.constant 0.000000e+00 : f32
      %199 = vector.broadcast %cst_57 : f32 to vector<8x1x2xf32>
      %200 = arith.maximumf %198, %199 : vector<8x1x2xf32>
      %201 = vector.broadcast %arg4 : f32 to vector<8x1x2xf32>
      %202 = arith.addf %200, %201 : vector<8x1x2xf32>
      %203 = tpu.bitcast %202 : vector<8x1x2xf32> -> vector<8x1x2xi32>
      %c31_i32_58 = arith.constant 31 : i32
      %204 = vector.broadcast %c31_i32_58 : i32 to vector<8x1x2xi32>
      %205 = arith.shrsi %203, %204 : vector<8x1x2xi32>
      %206 = vector.broadcast %c2147483647_i32 : i32 to vector<8x1x2xi32>
      %207 = arith.andi %205, %206 : vector<8x1x2xi32>
      %208 = arith.xori %203, %207 : vector<8x1x2xi32>
      %209 = vector.broadcast %c-8_i32 : i32 to vector<8x1x2xi32>
      %210 = arith.andi %208, %209 : vector<8x1x2xi32>
      %211 = arith.ori %210, %53 : vector<8x1x2xi32>
      %212 = vector.broadcast %164 : vector<8x1x2xi1> to vector<8x8x2xi1>
      %213 = arith.andi %193, %212 : vector<8x8x2xi1>
      %c-2147483648_i32_59 = arith.constant -2147483648 : i32
      %214 = vector.shape_cast %211 : vector<8x1x2xi32> to vector<8x1x2xi32>
      %215 = vector.broadcast %214 : vector<8x1x2xi32> to vector<8x8x2xi32>
      %216 = vector.broadcast %c-2147483648_i32_59 : i32 to vector<8x8x2xi32>
      %217 = arith.select %213, %215, %216 : vector<8x8x2xi1>, vector<8x8x2xi32>
      %cst_60 = arith.constant dense<-2147483648> : vector<8x2xi32>
      %218 = vector.multi_reduction <maxsi>, %217, %cst_60 [0] : vector<8x8x2xi32> to vector<8x2xi32>
      %219 = vector.shape_cast %218 : vector<8x2xi32> to vector<1x8x2xi32>
      %c0_i32_61 = arith.constant 0 : i32
      %220 = vector.broadcast %c0_i32_61 : i32 to vector<1x8x2xi32>
      %221 = arith.cmpi sge, %219, %220 : vector<1x8x2xi32>
      %222 = vector.broadcast %c7_i32_24 : i32 to vector<1x8x2xi32>
      %223 = arith.andi %219, %222 : vector<1x8x2xi32>
      %224 = vector.broadcast %c7_i32_24 : i32 to vector<1x8x2xi32>
      %225 = arith.subi %224, %223 : vector<1x8x2xi32>
      %226 = vector.broadcast %c-8_i32 : i32 to vector<1x8x2xi32>
      %227 = arith.andi %219, %226 : vector<1x8x2xi32>
      %c31_i32_62 = arith.constant 31 : i32
      %228 = vector.broadcast %c31_i32_62 : i32 to vector<1x8x2xi32>
      %229 = arith.shrsi %227, %228 : vector<1x8x2xi32>
      %230 = vector.broadcast %c2147483647_i32 : i32 to vector<1x8x2xi32>
      %231 = arith.andi %229, %230 : vector<1x8x2xi32>
      %232 = arith.xori %227, %231 : vector<1x8x2xi32>
      %233 = tpu.bitcast %232 : vector<1x8x2xi32> -> vector<1x8x2xf32>
      %234 = arith.select %221, %225, %152 : vector<1x8x2xi1>, vector<1x8x2xi32>
      %235 = arith.addf %154, %233 : vector<1x8x2xf32>
      %236 = arith.select %221, %235, %154 : vector<1x8x2xi1>, vector<1x8x2xf32>
      %c0_63 = arith.constant 0 : index
      %c0_64 = arith.constant 0 : index
      %c0_65 = arith.constant 0 : index
      %237 = vector.load %arg1[%c0_63, %c0_64, %c0_65] : memref<8x8x2xf32, #tpu.memory_space<vmem>>, vector<8x8x2xf32>
      %238 = vector.broadcast %234 : vector<1x8x2xi32> to vector<8x8x2xi32>
      %239 = vector.broadcast %49 : vector<8x1x2xi32> to vector<8x8x2xi32>
      %240 = arith.cmpi eq, %238, %239 : vector<8x8x2xi32>
      %241 = arith.extui %240 : vector<8x8x2xi1> to vector<8x8x2xi32>
      %cst_66 = arith.constant dense<-2147483648> : vector<8x2xi32>
      %242 = vector.multi_reduction <maxsi>, %241, %cst_66 [1] : vector<8x8x2xi32> to vector<8x2xi32>
      %243 = vector.shape_cast %242 : vector<8x2xi32> to vector<8x1x2xi32>
      %c0_i32_67 = arith.constant 0 : i32
      %244 = vector.broadcast %c0_i32_67 : i32 to vector<8x1x2xi32>
      %245 = arith.cmpi sgt, %243, %244 : vector<8x1x2xi32>
      %cst_68 = arith.constant dense<true> : vector<8x1x2xi1>
      %246 = arith.xori %245, %cst_68 : vector<8x1x2xi1>
      %247 = vector.broadcast %236 : vector<1x8x2xf32> to vector<8x8x2xf32>
      %248 = arith.subf %237, %247 : vector<8x8x2xf32>
      %249 = tpu.bitcast %248 : vector<8x8x2xf32> -> vector<8x8x2xi32>
      %c31_i32_69 = arith.constant 31 : i32
      %250 = vector.broadcast %c31_i32_69 : i32 to vector<8x8x2xi32>
      %251 = arith.shrsi %249, %250 : vector<8x8x2xi32>
      %252 = vector.broadcast %c2147483647_i32 : i32 to vector<8x8x2xi32>
      %253 = arith.andi %251, %252 : vector<8x8x2xi32>
      %254 = arith.xori %249, %253 : vector<8x8x2xi32>
      %255 = vector.broadcast %c-8_i32 : i32 to vector<8x8x2xi32>
      %256 = arith.andi %254, %255 : vector<8x8x2xi32>
      %257 = vector.broadcast %51 : vector<1x8x2xi32> to vector<8x8x2xi32>
      %258 = arith.ori %256, %257 : vector<8x8x2xi32>
      %cst_70 = arith.constant dense<-2147483648> : vector<8x2xi32>
      %259 = vector.multi_reduction <maxsi>, %258, %cst_70 [1] : vector<8x8x2xi32> to vector<8x2xi32>
      %260 = vector.shape_cast %259 : vector<8x2xi32> to vector<8x1x2xi32>
      %261 = vector.broadcast %c7_i32_24 : i32 to vector<8x1x2xi32>
      %262 = arith.andi %260, %261 : vector<8x1x2xi32>
      %263 = vector.broadcast %c7_i32_24 : i32 to vector<8x1x2xi32>
      %264 = arith.subi %263, %262 : vector<8x1x2xi32>
      %265 = vector.broadcast %c-8_i32 : i32 to vector<8x1x2xi32>
      %266 = arith.andi %260, %265 : vector<8x1x2xi32>
      %c31_i32_71 = arith.constant 31 : i32
      %267 = vector.broadcast %c31_i32_71 : i32 to vector<8x1x2xi32>
      %268 = arith.shrsi %266, %267 : vector<8x1x2xi32>
      %269 = vector.broadcast %c2147483647_i32 : i32 to vector<8x1x2xi32>
      %270 = arith.andi %268, %269 : vector<8x1x2xi32>
      %271 = arith.xori %266, %270 : vector<8x1x2xi32>
      %272 = tpu.bitcast %271 : vector<8x1x2xi32> -> vector<8x1x2xf32>
      %273 = vector.broadcast %48 : vector<1x8x2xi32> to vector<8x8x2xi32>
      %274 = vector.broadcast %264 : vector<8x1x2xi32> to vector<8x8x2xi32>
      %275 = arith.cmpi eq, %273, %274 : vector<8x8x2xi32>
      %cst_72 = arith.constant -1.000000e+30 : f32
      %276 = vector.broadcast %cst_72 : f32 to vector<8x8x2xf32>
      %277 = arith.select %275, %276, %248 : vector<8x8x2xi1>, vector<8x8x2xf32>
      %cst_73 = arith.constant dense<0xFF800000> : vector<8x2xf32>
      %278 = vector.multi_reduction <maximumf>, %277, %cst_73 [1] : vector<8x8x2xf32> to vector<8x2xf32>
      %279 = vector.shape_cast %278 : vector<8x2xf32> to vector<8x1x2xf32>
      %280 = arith.subf %272, %279 : vector<8x1x2xf32>
      %cst_74 = arith.constant 0.000000e+00 : f32
      %281 = vector.broadcast %cst_74 : f32 to vector<8x1x2xf32>
      %282 = arith.maximumf %280, %281 : vector<8x1x2xf32>
      %283 = vector.broadcast %arg4 : f32 to vector<8x1x2xf32>
      %284 = arith.addf %282, %283 : vector<8x1x2xf32>
      %285 = tpu.bitcast %284 : vector<8x1x2xf32> -> vector<8x1x2xi32>
      %c31_i32_75 = arith.constant 31 : i32
      %286 = vector.broadcast %c31_i32_75 : i32 to vector<8x1x2xi32>
      %287 = arith.shrsi %285, %286 : vector<8x1x2xi32>
      %288 = vector.broadcast %c2147483647_i32 : i32 to vector<8x1x2xi32>
      %289 = arith.andi %287, %288 : vector<8x1x2xi32>
      %290 = arith.xori %285, %289 : vector<8x1x2xi32>
      %291 = vector.broadcast %c-8_i32 : i32 to vector<8x1x2xi32>
      %292 = arith.andi %290, %291 : vector<8x1x2xi32>
      %293 = arith.ori %292, %53 : vector<8x1x2xi32>
      %294 = vector.broadcast %246 : vector<8x1x2xi1> to vector<8x8x2xi1>
      %295 = arith.andi %275, %294 : vector<8x8x2xi1>
      %c-2147483648_i32_76 = arith.constant -2147483648 : i32
      %296 = vector.shape_cast %293 : vector<8x1x2xi32> to vector<8x1x2xi32>
      %297 = vector.broadcast %296 : vector<8x1x2xi32> to vector<8x8x2xi32>
      %298 = vector.broadcast %c-2147483648_i32_76 : i32 to vector<8x8x2xi32>
      %299 = arith.select %295, %297, %298 : vector<8x8x2xi1>, vector<8x8x2xi32>
      %cst_77 = arith.constant dense<-2147483648> : vector<8x2xi32>
      %300 = vector.multi_reduction <maxsi>, %299, %cst_77 [0] : vector<8x8x2xi32> to vector<8x2xi32>
      %301 = vector.shape_cast %300 : vector<8x2xi32> to vector<1x8x2xi32>
      %c0_i32_78 = arith.constant 0 : i32
      %302 = vector.broadcast %c0_i32_78 : i32 to vector<1x8x2xi32>
      %303 = arith.cmpi sge, %301, %302 : vector<1x8x2xi32>
      %304 = vector.broadcast %c7_i32_24 : i32 to vector<1x8x2xi32>
      %305 = arith.andi %301, %304 : vector<1x8x2xi32>
      %306 = vector.broadcast %c7_i32_24 : i32 to vector<1x8x2xi32>
      %307 = arith.subi %306, %305 : vector<1x8x2xi32>
      %308 = vector.broadcast %c-8_i32 : i32 to vector<1x8x2xi32>
      %309 = arith.andi %301, %308 : vector<1x8x2xi32>
      %c31_i32_79 = arith.constant 31 : i32
      %310 = vector.broadcast %c31_i32_79 : i32 to vector<1x8x2xi32>
      %311 = arith.shrsi %309, %310 : vector<1x8x2xi32>
      %312 = vector.broadcast %c2147483647_i32 : i32 to vector<1x8x2xi32>
      %313 = arith.andi %311, %312 : vector<1x8x2xi32>
      %314 = arith.xori %309, %313 : vector<1x8x2xi32>
      %315 = tpu.bitcast %314 : vector<1x8x2xi32> -> vector<1x8x2xf32>
      %316 = arith.select %303, %307, %234 : vector<1x8x2xi1>, vector<1x8x2xi32>
      %317 = arith.addf %236, %315 : vector<1x8x2xf32>
      %318 = arith.select %303, %317, %236 : vector<1x8x2xi1>, vector<1x8x2xf32>
      %c0_80 = arith.constant 0 : index
      %c0_81 = arith.constant 0 : index
      %c0_82 = arith.constant 0 : index
      %319 = vector.load %arg1[%c0_80, %c0_81, %c0_82] : memref<8x8x2xf32, #tpu.memory_space<vmem>>, vector<8x8x2xf32>
      %320 = vector.broadcast %316 : vector<1x8x2xi32> to vector<8x8x2xi32>
      %321 = vector.broadcast %49 : vector<8x1x2xi32> to vector<8x8x2xi32>
      %322 = arith.cmpi eq, %320, %321 : vector<8x8x2xi32>
      %323 = arith.extui %322 : vector<8x8x2xi1> to vector<8x8x2xi32>
      %cst_83 = arith.constant dense<-2147483648> : vector<8x2xi32>
      %324 = vector.multi_reduction <maxsi>, %323, %cst_83 [1] : vector<8x8x2xi32> to vector<8x2xi32>
      %325 = vector.shape_cast %324 : vector<8x2xi32> to vector<8x1x2xi32>
      %c0_i32_84 = arith.constant 0 : i32
      %326 = vector.broadcast %c0_i32_84 : i32 to vector<8x1x2xi32>
      %327 = arith.cmpi sgt, %325, %326 : vector<8x1x2xi32>
      %cst_85 = arith.constant dense<true> : vector<8x1x2xi1>
      %328 = arith.xori %327, %cst_85 : vector<8x1x2xi1>
      %329 = vector.broadcast %318 : vector<1x8x2xf32> to vector<8x8x2xf32>
      %330 = arith.subf %319, %329 : vector<8x8x2xf32>
      %331 = tpu.bitcast %330 : vector<8x8x2xf32> -> vector<8x8x2xi32>
      %c31_i32_86 = arith.constant 31 : i32
      %332 = vector.broadcast %c31_i32_86 : i32 to vector<8x8x2xi32>
      %333 = arith.shrsi %331, %332 : vector<8x8x2xi32>
      %334 = vector.broadcast %c2147483647_i32 : i32 to vector<8x8x2xi32>
      %335 = arith.andi %333, %334 : vector<8x8x2xi32>
      %336 = arith.xori %331, %335 : vector<8x8x2xi32>
      %337 = vector.broadcast %c-8_i32 : i32 to vector<8x8x2xi32>
      %338 = arith.andi %336, %337 : vector<8x8x2xi32>
      %339 = vector.broadcast %51 : vector<1x8x2xi32> to vector<8x8x2xi32>
      %340 = arith.ori %338, %339 : vector<8x8x2xi32>
      %cst_87 = arith.constant dense<-2147483648> : vector<8x2xi32>
      %341 = vector.multi_reduction <maxsi>, %340, %cst_87 [1] : vector<8x8x2xi32> to vector<8x2xi32>
      %342 = vector.shape_cast %341 : vector<8x2xi32> to vector<8x1x2xi32>
      %343 = vector.broadcast %c7_i32_24 : i32 to vector<8x1x2xi32>
      %344 = arith.andi %342, %343 : vector<8x1x2xi32>
      %345 = vector.broadcast %c7_i32_24 : i32 to vector<8x1x2xi32>
      %346 = arith.subi %345, %344 : vector<8x1x2xi32>
      %347 = vector.broadcast %c-8_i32 : i32 to vector<8x1x2xi32>
      %348 = arith.andi %342, %347 : vector<8x1x2xi32>
      %c31_i32_88 = arith.constant 31 : i32
      %349 = vector.broadcast %c31_i32_88 : i32 to vector<8x1x2xi32>
      %350 = arith.shrsi %348, %349 : vector<8x1x2xi32>
      %351 = vector.broadcast %c2147483647_i32 : i32 to vector<8x1x2xi32>
      %352 = arith.andi %350, %351 : vector<8x1x2xi32>
      %353 = arith.xori %348, %352 : vector<8x1x2xi32>
      %354 = tpu.bitcast %353 : vector<8x1x2xi32> -> vector<8x1x2xf32>
      %355 = vector.broadcast %48 : vector<1x8x2xi32> to vector<8x8x2xi32>
      %356 = vector.broadcast %346 : vector<8x1x2xi32> to vector<8x8x2xi32>
      %357 = arith.cmpi eq, %355, %356 : vector<8x8x2xi32>
      %cst_89 = arith.constant -1.000000e+30 : f32
      %358 = vector.broadcast %cst_89 : f32 to vector<8x8x2xf32>
      %359 = arith.select %357, %358, %330 : vector<8x8x2xi1>, vector<8x8x2xf32>
      %cst_90 = arith.constant dense<0xFF800000> : vector<8x2xf32>
      %360 = vector.multi_reduction <maximumf>, %359, %cst_90 [1] : vector<8x8x2xf32> to vector<8x2xf32>
      %361 = vector.shape_cast %360 : vector<8x2xf32> to vector<8x1x2xf32>
      %362 = arith.subf %354, %361 : vector<8x1x2xf32>
      %cst_91 = arith.constant 0.000000e+00 : f32
      %363 = vector.broadcast %cst_91 : f32 to vector<8x1x2xf32>
      %364 = arith.maximumf %362, %363 : vector<8x1x2xf32>
      %365 = vector.broadcast %arg4 : f32 to vector<8x1x2xf32>
      %366 = arith.addf %364, %365 : vector<8x1x2xf32>
      %367 = tpu.bitcast %366 : vector<8x1x2xf32> -> vector<8x1x2xi32>
      %c31_i32_92 = arith.constant 31 : i32
      %368 = vector.broadcast %c31_i32_92 : i32 to vector<8x1x2xi32>
      %369 = arith.shrsi %367, %368 : vector<8x1x2xi32>
      %370 = vector.broadcast %c2147483647_i32 : i32 to vector<8x1x2xi32>
      %371 = arith.andi %369, %370 : vector<8x1x2xi32>
      %372 = arith.xori %367, %371 : vector<8x1x2xi32>
      %373 = vector.broadcast %c-8_i32 : i32 to vector<8x1x2xi32>
      %374 = arith.andi %372, %373 : vector<8x1x2xi32>
      %375 = arith.ori %374, %53 : vector<8x1x2xi32>
      %376 = vector.broadcast %328 : vector<8x1x2xi1> to vector<8x8x2xi1>
      %377 = arith.andi %357, %376 : vector<8x8x2xi1>
      %c-2147483648_i32_93 = arith.constant -2147483648 : i32
      %378 = vector.shape_cast %375 : vector<8x1x2xi32> to vector<8x1x2xi32>
      %379 = vector.broadcast %378 : vector<8x1x2xi32> to vector<8x8x2xi32>
      %380 = vector.broadcast %c-2147483648_i32_93 : i32 to vector<8x8x2xi32>
      %381 = arith.select %377, %379, %380 : vector<8x8x2xi1>, vector<8x8x2xi32>
      %cst_94 = arith.constant dense<-2147483648> : vector<8x2xi32>
      %382 = vector.multi_reduction <maxsi>, %381, %cst_94 [0] : vector<8x8x2xi32> to vector<8x2xi32>
      %383 = vector.shape_cast %382 : vector<8x2xi32> to vector<1x8x2xi32>
      %c0_i32_95 = arith.constant 0 : i32
      %384 = vector.broadcast %c0_i32_95 : i32 to vector<1x8x2xi32>
      %385 = arith.cmpi sge, %383, %384 : vector<1x8x2xi32>
      %386 = vector.broadcast %c7_i32_24 : i32 to vector<1x8x2xi32>
      %387 = arith.andi %383, %386 : vector<1x8x2xi32>
      %388 = vector.broadcast %c7_i32_24 : i32 to vector<1x8x2xi32>
      %389 = arith.subi %388, %387 : vector<1x8x2xi32>
      %390 = vector.broadcast %c-8_i32 : i32 to vector<1x8x2xi32>
      %391 = arith.andi %383, %390 : vector<1x8x2xi32>
      %c31_i32_96 = arith.constant 31 : i32
      %392 = vector.broadcast %c31_i32_96 : i32 to vector<1x8x2xi32>
      %393 = arith.shrsi %391, %392 : vector<1x8x2xi32>
      %394 = vector.broadcast %c2147483647_i32 : i32 to vector<1x8x2xi32>
      %395 = arith.andi %393, %394 : vector<1x8x2xi32>
      %396 = arith.xori %391, %395 : vector<1x8x2xi32>
      %397 = tpu.bitcast %396 : vector<1x8x2xi32> -> vector<1x8x2xf32>
      %398 = arith.select %385, %389, %316 : vector<1x8x2xi1>, vector<1x8x2xi32>
      %399 = arith.addf %318, %397 : vector<1x8x2xf32>
      %400 = arith.select %385, %399, %318 : vector<1x8x2xi1>, vector<1x8x2xf32>
      %c0_i32_97 = arith.constant 0 : i32
      %401 = vector.broadcast %c0_i32_97 : i32 to vector<1x8x2xi32>
      %402 = arith.cmpi sge, %398, %401 : vector<1x8x2xi32>
      %cst_98 = arith.constant dense<true> : vector<1x1x2xi1>
      %403 = arith.xori %59, %cst_98 : vector<1x1x2xi1>
      %404 = vector.broadcast %403 : vector<1x1x2xi1> to vector<1x8x2xi1>
      %405 = arith.ori %402, %404 : vector<1x8x2xi1>
      %c1_i32_99 = arith.constant 1 : i32
      %c0_i32_100 = arith.constant 0 : i32
      %406 = vector.broadcast %c1_i32_99 : i32 to vector<1x8x2xi32>
      %407 = vector.broadcast %c0_i32_100 : i32 to vector<1x8x2xi32>
      %408 = arith.select %405, %406, %407 : vector<1x8x2xi1>, vector<1x8x2xi32>
      %409 = vector.shape_cast %408 : vector<1x8x2xi32> to vector<1x1x8x2xi32>
      %cst_101 = arith.constant dense<2147483647> : vector<1xi32>
      %410 = vector.multi_reduction <minsi>, %409, %cst_101 [1, 2, 3] : vector<1x1x8x2xi32> to vector<1xi32>
      %411 = vector.shape_cast %410 : vector<1xi32> to vector<1x1x1x1xi32>
      %412 = vector.extract %411[0, 0, 0, 0] : i32 from vector<1x1x1x1xi32>
      %c1_i32_102 = arith.constant 1 : i32
      %413 = arith.cmpi eq, %412, %c1_i32_102 : i32
      %c5_i32 = arith.constant 5 : i32
      %414 = arith.cmpi eq, %arg3, %c5_i32 : i32
      %415 = arith.select %414, %c256_i32, %c48_i32 : i32
      %c1_i32_103 = arith.constant 1 : i32
      %416 = arith.addi %arg5, %c1_i32_103 : i32
      %417 = arith.cmpi sge, %416, %415 : i32
      %418 = arith.ori %413, %417 : i1
      %c1_i32_104 = arith.constant 1 : i32
      %419 = arith.addi %arg3, %c1_i32_104 : i32
      %420 = arith.select %418, %419, %arg3 : i32
      %cst_105 = arith.constant 2.000000e-01 : f32
      %421 = arith.mulf %arg4, %cst_105 : f32
      %422 = arith.select %418, %421, %arg4 : f32
      %c1_i32_106 = arith.constant 1 : i32
      %423 = arith.addi %arg5, %c1_i32_106 : i32
      %c0_i32_107 = arith.constant 0 : i32
      %424 = arith.select %418, %c0_i32_107, %423 : i32
      %true = arith.constant true
      %425 = arith.xori %414, %true : i1
      %426 = arith.andi %418, %425 : i1
      %c-1_i32_108 = arith.constant -1 : i32
      %427 = vector.broadcast %c-1_i32_108 : i32 to vector<1x8x2xi32>
      %428 = arith.select %426, %427, %398 : vector<1x8x2xi32>
      scf.yield %420, %422, %424, %400, %428 : i32, f32, i32, vector<1x8x2xf32>, vector<1x8x2xi32>
    }
    %63 = vector.broadcast %62#4 : vector<1x8x2xi32> to vector<8x8x2xi32>
    %64 = vector.broadcast %49 : vector<8x1x2xi32> to vector<8x8x2xi32>
    %65 = arith.cmpi eq, %63, %64 : vector<8x8x2xi32>
    %66 = arith.extui %65 : vector<8x8x2xi1> to vector<8x8x2xi32>
    %cst_27 = arith.constant dense<-2147483648> : vector<8x2xi32>
    %67 = vector.multi_reduction <maxsi>, %66, %cst_27 [1] : vector<8x8x2xi32> to vector<8x2xi32>
    %68 = vector.shape_cast %67 : vector<8x2xi32> to vector<8x1x2xi32>
    %c0_i32_28 = arith.constant 0 : i32
    %c8_i32 = arith.constant 8 : i32
    %69 = arith.addi %c0_i32_28, %c8_i32 : i32
    %c1_i32 = arith.constant 1 : i32
    %70:2 = scf.for %arg3 = %c0_i32_28 to %69 step %c1_i32 iter_args(%arg4 = %62#4, %arg5 = %68) -> (vector<1x8x2xi32>, vector<8x1x2xi32>)  : i32 {
      %c0_i32_31 = arith.constant 0 : i32
      %73 = vector.broadcast %c0_i32_31 : i32 to vector<8x1x2xi32>
      %74 = arith.cmpi eq, %arg5, %73 : vector<8x1x2xi32>
      %c0_i32_32 = arith.constant 0 : i32
      %75 = vector.broadcast %c0_i32_32 : i32 to vector<1x8x2xi32>
      %76 = arith.cmpi slt, %arg4, %75 : vector<1x8x2xi32>
      %c8_i32_33 = arith.constant 8 : i32
      %77 = vector.broadcast %c8_i32_33 : i32 to vector<8x1x2xi32>
      %78 = arith.select %74, %49, %77 : vector<8x1x2xi1>, vector<8x1x2xi32>
      %cst_34 = arith.constant dense<2147483647> : vector<1x2xi32>
      %79 = vector.multi_reduction <minsi>, %78, %cst_34 [0] : vector<8x1x2xi32> to vector<1x2xi32>
      %80 = vector.shape_cast %79 : vector<1x2xi32> to vector<1x1x2xi32>
      %c8_i32_35 = arith.constant 8 : i32
      %81 = vector.broadcast %c8_i32_35 : i32 to vector<1x8x2xi32>
      %82 = arith.select %76, %48, %81 : vector<1x8x2xi1>, vector<1x8x2xi32>
      %cst_36 = arith.constant dense<2147483647> : vector<1x2xi32>
      %83 = vector.multi_reduction <minsi>, %82, %cst_36 [1] : vector<1x8x2xi32> to vector<1x2xi32>
      %84 = vector.shape_cast %83 : vector<1x2xi32> to vector<1x1x2xi32>
      %c8_i32_37 = arith.constant 8 : i32
      %85 = vector.broadcast %c8_i32_37 : i32 to vector<1x1x2xi32>
      %86 = arith.cmpi slt, %80, %85 : vector<1x1x2xi32>
      %c8_i32_38 = arith.constant 8 : i32
      %87 = vector.broadcast %c8_i32_38 : i32 to vector<1x1x2xi32>
      %88 = arith.cmpi slt, %84, %87 : vector<1x1x2xi32>
      %89 = arith.andi %86, %88 : vector<1x1x2xi1>
      %90 = vector.broadcast %84 : vector<1x1x2xi32> to vector<1x8x2xi32>
      %91 = arith.cmpi eq, %48, %90 : vector<1x8x2xi32>
      %92 = vector.broadcast %89 : vector<1x1x2xi1> to vector<1x8x2xi1>
      %93 = arith.andi %92, %91 : vector<1x8x2xi1>
      %94 = vector.shape_cast %80 : vector<1x1x2xi32> to vector<1x1x2xi32>
      %95 = vector.broadcast %94 : vector<1x1x2xi32> to vector<1x8x2xi32>
      %96 = arith.select %93, %95, %arg4 : vector<1x8x2xi1>, vector<1x8x2xi32>
      %97 = vector.broadcast %80 : vector<1x1x2xi32> to vector<8x1x2xi32>
      %98 = arith.cmpi eq, %49, %97 : vector<8x1x2xi32>
      %99 = vector.broadcast %89 : vector<1x1x2xi1> to vector<8x1x2xi1>
      %100 = arith.andi %99, %98 : vector<8x1x2xi1>
      %c1_i32_39 = arith.constant 1 : i32
      %101 = vector.broadcast %c1_i32_39 : i32 to vector<8x1x2xi32>
      %102 = arith.select %100, %101, %arg5 : vector<8x1x2xi1>, vector<8x1x2xi32>
      scf.yield %96, %102 : vector<1x8x2xi32>, vector<8x1x2xi32>
    }
    %71 = vector.shape_cast %70#0 : vector<1x8x2xi32> to vector<8x2xi32>
    %c0_29 = arith.constant 0 : index
    %c0_30 = arith.constant 0 : index
    %72 = vector.load %arg2[%c0_29, %c0_30] : memref<8x2xi32, #tpu.memory_space<vmem>>, vector<8x2xi32>
    tpu.vector_store %arg2[%c0_29, %c0_30], %71 {strides = array<i32>} : memref<8x2xi32, #tpu.memory_space<vmem>>, vector<8x2xi32>,
    return
  }
  func.func @transform_0(%arg0: i32) -> (i32, i32, i32) {
    %c0_i32 = arith.constant 0 : i32
    %c0_i32_0 = arith.constant 0 : i32
    %c0_i32_1 = arith.constant 0 : i32
    return %c0_i32, %c0_i32_0, %arg0 : i32, i32, i32
  }
  func.func @transform_1(%arg0: i32) -> (i32, i32) {
    %c0_i32 = arith.constant 0 : i32
    %c0_i32_0 = arith.constant 0 : i32
    return %c0_i32, %arg0 : i32, i32
  }
}

</mosaic_0001>

<bundles_post_ra>
// kernel: tpu_custom_call.1
= control target key start
LH: loop header
LB: loop body
LE: loop exit
PB: predicated region body
PF: predicated region fallthrough
CT: control target
= control target key end

     0   :  { %s3318_s9 = smov 0   ;;  %s3320_s10 = smov 0.25   ;;  %s5443_s0 = inlined_call_operand.vmem [shape: f32[8,8,2], index: 0, kind: input, shape index: {}]   ;;  %s5444_s1 = inlined_call_operand.vmem [shape: s32[8,2], index: 1, kind: output, shape index: {}]  }
   0x1   :  { %v8_v0 = vld [vmem:[%s5443_s0] sm:$0xff]  ;;  %v9_v1 = vld [vmem:[%s5443_s0 + $0x8] sm:$0xff]  ;;  %v10_v2 = vld [vmem:[%s5443_s0 + $0x10] sm:$0xff]  ;;  %s3322_s11 = smov 0  }
   0x2   :  { %v11_v3 = vld [vmem:[%s5443_s0 + $0x18] sm:$0xff]  ;;  %v12_v4 = vld [vmem:[%s5443_s0 + $0x20] sm:$0xff]  ;;  %v13_v5 = vld [vmem:[%s5443_s0 + $0x28] sm:$0xff]  ;;  %v24_v6 = vand.u32 2147483647, %v8_v0  ;;  %vm16_vm0 = vcmp.ne.f32.partialorder %v8_v0, %v8_v0  ;;  %vm17_vm1 = vcmp.ne.f32.partialorder %v9_v1, %v9_v1  ;;  %vm18_vm2 = vcmp.ne.f32.partialorder %v10_v2, %v10_v2 }
   0x3   :  { %v14_v7 = vld [vmem:[%s5443_s0 + $0x30] sm:$0xff]  ;;  %v15_v8 = vld [vmem:[%s5443_s0 + $0x38] sm:$0xff]  ;;  %v25_v9 = vand.u32 2147483647, %v9_v1  ;;  %v26_v10 = vand.u32 2147483647, %v10_v2  ;;  %vm19_vm6 = vcmp.ne.f32.partialorder %v11_v3, %v11_v3 }
   0x4   :  { %v27_v11 = vand.u32 2147483647, %v11_v3  ;;  %v28_v12 = vand.u32 2147483647, %v12_v4  ;;  %v29_v13 = vand.u32 2147483647, %v13_v5  ;;  %vm22_vm10 = vcmp.ne.f32.partialorder %v14_v7, %v14_v7 }
   0x5   :  { %v30_v14 = vand.u32 2147483647, %v14_v7  ;;  %v31_v15 = vand.u32 2147483647, %v15_v8  ;;  %vm32_vm3 = vcmp.eq.f32.partialorder %v24_v6, inf  ;;  %vm33_vm4 = vcmp.eq.f32.partialorder %v25_v9, inf }
   0x6   :  { %vm34_vm5 = vcmp.eq.f32.partialorder %v26_v10, inf  ;;  %vm35_vm8 = vcmp.eq.f32.partialorder %v27_v11, inf  ;;  %vm40_vm9 = vmor %vm16_vm0, %vm32_vm3  ;;  %vm3034_vm12 = vcmp.eq.f32.partialorder %v28_v12, inf  ;;  %vm3038_vm13 = vcmp.eq.f32.partialorder %v29_v13, inf }
   0x7   :  { %vm41_vm14 = vmor %vm17_vm1, %vm33_vm4  ;;  %v3043_v18 = vsel %vm40_vm9, 1000000.0, %v8_v0  ;;  %vm3045_vm15 = vcmp.eq.f32.partialorder %v30_v14, inf  ;;  %vm3049_vm7 = vcmp.eq.f32.partialorder %v31_v15, inf  ;;  %vm23_vm4 = vcmp.ne.f32.partialorder %v15_v8, %v15_v8 }
   0x8   :  { %vm42_vm0 = vmor %vm18_vm2, %vm34_vm5  ;;  %v3054_v21 = vsel %vm41_vm14, 1000000.0, %v9_v1  ;;  %vm56_vm3 = vcmp.ge.f32.partialorder %v3043_v18, 1000000.0  ;;  %vm5480_vm9 = vcmp.ne.f32.partialorder %v12_v4, %v12_v4 }
   0x9   :  { %vm43_vm11 = vmor %vm19_vm6, %vm35_vm8  ;;  %v3058_v22 = vsel %vm42_vm0, 1000000.0, %v10_v2  ;;  %vm57_vm1 = vcmp.ge.f32.partialorder %v3054_v21, 1000000.0  ;;  %v64_v23 = vsel %vm56_vm3, -3e+38, %v3043_v18  ;;  %vm5481_vm6 = vcmp.ne.f32.partialorder %v13_v5, %v13_v5 }
   0xa   :  { %vm44_vm2 = vmor %vm5480_vm9, %vm3034_vm12  ;;  %v3067_v24 = vsel %vm43_vm11, 1000000.0, %v11_v3  ;;  %vm58_vm5 = vcmp.ge.f32.partialorder %v3058_v22, 1000000.0  ;;  %v65_v25 = vsel %vm57_vm1, -3e+38, %v3054_v21 }
   0xb   :  { %vm45_vm8 = vmor %vm5481_vm6, %vm3038_vm13  ;;  %v3076_v26 = vsel %vm44_vm2, 1000000.0, %v12_v4  ;;  %vm59_vm14 = vcmp.ge.f32.partialorder %v3067_v24, 1000000.0  ;;  %v66_v27 = vsel %vm58_vm5, -3e+38, %v3058_v22 }
   0xc   :  { %vm46_vm11 = vmor %vm22_vm10, %vm3045_vm15  ;;  %v3084_v28 = vsel %vm45_vm8, 1000000.0, %v13_v5  ;;  %vm60_vm12 = vcmp.ge.f32.partialorder %v3076_v26, 1000000.0  ;;  %v67_v29 = vsel %vm59_vm14, -3e+38, %v3067_v24 }
   0xd   :  { %vm47_vm13 = vmor %vm23_vm4, %vm3049_vm7  ;;  %v3092_v30 = vsel %vm46_vm11, 1000000.0, %v14_v7  ;;  %vm61_vm0 = vcmp.ge.f32.partialorder %v3084_v28, 1000000.0  ;;  %v68_v31 = vsel %vm60_vm12, -3e+38, %v3076_v26 }
   0xe   :  { %v3098_v32 = vsel %vm47_vm13, 1000000.0, %v15_v8  ;;  %vm62_vm10 = vcmp.ge.f32.partialorder %v3092_v30, 1000000.0  ;;  %v69_v33 = vsel %vm61_vm0, -3e+38, %v3084_v28 }
   0xf   :  { %vm63_vm15 = vcmp.ge.f32.partialorder %v3098_v32, 1000000.0  ;;  %v70_v34 = vsel %vm62_vm10, -3e+38, %v3092_v30  ;;  %vm5482_vm7 = vcmask 15360  }
  0x10   :  { %v73_v35 = vsel %vm5482_vm7, %v64_v23, -inf  ;;  %vm5483_vm4 = vmmov %vm5482_vm7  ;;  %v71_v37 = vsel %vm63_vm15, -3e+38, %v3098_v32 }
  0x11   :  { %v80_v36 = vsel %vm5483_vm4, %v65_v25, -inf  ;;  %v74_v38 = vrot.slane %v73_v35, 4  ;;  %vm5484_vm9 = vmmov %vm5483_vm4 }
  0x12   :  { %v81_v39 = vrot.slane %v80_v36, 4  ;;  %v87_v40 = vsel %vm5484_vm9, %v66_v27, -inf  ;;  %vm5485_vm2 = vmmov %vm5483_vm4 }
  0x13   :  { %v88_v41 = vrot.slane %v87_v40, 4  ;;  %v94_v42 = vsel %vm5485_vm2, %v67_v29, -inf  ;;  %vm5486_vm6 = vmmov %vm5485_vm2  ;;  %v75_v45 = vmax.f32 %v73_v35, %v74_v38 }
  0x14   :  { %v101_v43 = vsel %vm5486_vm6, %v68_v31, -inf  ;;  %vm5487_vm8 = vmmov %vm5485_vm2  ;;  %v82_v46 = vmax.f32 %v80_v36, %v81_v39  ;;  %v95_v47 = vrot.slane %v94_v42, 4 }
  0x15   :  { %v108_v44 = vsel %vm5487_vm8, %v69_v33, -inf  ;;  %v102_v48 = vrot.slane %v101_v43, 4  ;;  %v89_v49 = vmax.f32 %v87_v40, %v88_v41  ;;  %vm5488_vm11 = vmmov %vm5485_vm2  ;;  %v76_v53 = vrot.slane %v75_v45, 2 }
  0x16   :  { %v109_v50 = vrot.slane %v108_v44, 4  ;;  %v115_v51 = vsel %vm5488_vm11, %v70_v34, -inf  ;;  %vm5489_vm13 = vmmov %vm5485_vm2  ;;  %v83_v54 = vrot.slane %v82_v46, 2  ;;  %v96_v55 = vmax.f32 %v94_v42, %v95_v47 }
  0x17   :  { %v122_v52 = vsel %vm5489_vm13, %v71_v37, -inf  ;;  %v103_v56 = vmax.f32 %v101_v43, %v102_v48  ;;  %v90_v57 = vrot.slane %v89_v49, 2  ;;  %v116_v59 = vrot.slane %v115_v51, 4  ;;  %vm5490_vm7 = vmmov %vm5485_vm2 }
  0x18   :  { %v110_v58 = vmax.f32 %v108_v44, %v109_v50  ;;  %v123_v60 = vrot.slane %v122_v52, 4  ;;  %v77_v61 = vmax.f32 %v75_v45, %v76_v53  ;;  %v84_v62 = vmax.f32 %v82_v46, %v83_v54  ;;  %vm5491_vm4 = vmmov %vm5485_vm2 }
  0x19   :  { %v97_v63 = vrot.slane %v96_v55, 2  ;;  %v104_v0 = vrot.slane %v103_v56, 2  ;;  %v91_v1 = vmax.f32 %v89_v49, %v90_v57  ;;  %v117_v3 = vmax.f32 %v115_v51, %v116_v59  ;;  %vm5492_vm9 = vmmov %vm5485_vm2 }
  0x1a   :  { %v111_v2 = vrot.slane %v110_v58, 2  ;;  %v124_v4 = vmax.f32 %v122_v52, %v123_v60  ;;  %v78_v5 = vrot.slane %v77_v61, 1  ;;  %v85_v6 = vrot.slane %v84_v62, 1  ;;  %vm5493_vm6 = vmmov %vm5485_vm2 }
  0x1b   :  { %v98_v7 = vmax.f32 %v96_v55, %v97_v63  ;;  %v105_v8 = vmax.f32 %v103_v56, %v104_v0  ;;  %v92_v9 = vrot.slane %v91_v1, 1  ;;  %v118_v11 = vrot.slane %v117_v3, 2  ;;  %vm5494_vm8 = vmmov %vm5485_vm2 }
  0x1c   :  { %v112_v10 = vmax.f32 %v110_v58, %v111_v2  ;;  %v125_v12 = vrot.slane %v124_v4, 2  ;;  %v79_v13 = vmax.f32 %v77_v61, %v78_v5  ;;  %v86_v14 = vmax.f32 %v84_v62, %v85_v6  ;;  %vm5495_vm11 = vmmov %vm5485_vm2 }
  0x1d   :  { %v99_v15 = vrot.slane %v98_v7, 1  ;;  %v106_v16 = vrot.slane %v105_v8, 1  ;;  %v93_v17 = vmax.f32 %v91_v1, %v92_v9  ;;  %v119_v20 = vmax.f32 %v117_v3, %v118_v11  ;;  %vm5496_vm13 = vmmov %vm5485_vm2 }
  0x1e   :  { %v113_v19 = vrot.slane %v112_v10, 1  ;;  %v126_v23 = vmax.f32 %v124_v4, %v125_v12  ;;  %v3120_v34 = vsel %vm5490_vm7, %v79_v13, -inf  ;;  %v3123_v35 = vsel %vm5491_vm4, %v86_v14, -inf  ;;  %vm5497_vm7 = vmmov %vm5485_vm2 }
  0x1f   :  { %v107_v25 = vmax.f32 %v105_v8, %v106_v16  ;;  %v100_v27 = vmax.f32 %v98_v7, %v99_v15  ;;  %v120_v31 = vrot.slane %v119_v20, 1  ;;  %v3129_v38 = vsel %vm5485_vm2, %v93_v17, -inf  ;;  %vm5498_vm4 = vmmov %vm5485_vm2 }
  0x20   :  { %v114_v29 = vmax.f32 %v112_v10, %v113_v19  ;;  %v127_v33 = vrot.slane %v126_v23, 1  ;;  %v144_v40 = vsel %vm56_vm3, 3e+38, %v3043_v18  ;;  %v145_v41 = vsel %vm57_vm1, 3e+38, %v3054_v21 }
  0x21   :  { %v3126_v36 = vsel %vm5492_vm9, %v107_v25, -inf  ;;  %v121_v37 = vmax.f32 %v119_v20, %v120_v31  ;;  %v146_v42 = vsel %vm58_vm5, 3e+38, %v3058_v22  ;;  %v147_v43 = vsel %vm59_vm14, 3e+38, %v3067_v24  ;;  %vm5499_vm9 = vmmov %vm5485_vm2 }
  0x22   :  { %v3132_v39 = vsel %vm5493_vm6, %v114_v29, -inf  ;;  %v128_v44 = vmax.f32 %v126_v23, %v127_v33  ;;  %v3147_v45 = vsel %vm5494_vm8, %v100_v27, -inf  ;;  %v134_v46 = vmax.f32 %v3120_v34, %v3126_v36  ;;  %vm5500_vm6 = vmmov %vm5485_vm2 }
  0x23   :  { %v148_v47 = vsel %vm60_vm12, 3e+38, %v3076_v26  ;;  %v136_v48 = vmax.f32 %v3123_v35, %v3132_v39  ;;  %v3157_v49 = vsel %vm5495_vm11, %v121_v37, -inf  ;;  %v149_v50 = vsel %vm61_vm0, 3e+38, %v3084_v28  ;;  %vm5501_vm8 = vmmov %vm5485_vm2 }
  0x24   :  { %v150_v51 = vsel %vm62_vm10, 3e+38, %v3092_v30  ;;  %v152_v52 = vsel %vm5496_vm13, %v144_v40, inf  ;;  %v159_v53 = vsel %vm5497_vm7, %v145_v41, inf  ;;  %v166_v54 = vsel %vm5498_vm4, %v146_v42, inf  ;;  %vm5502_vm11 = vmmov %vm5485_vm2 }
  0x25   :  { %v173_v55 = vsel %vm5499_vm9, %v147_v43, inf  ;;  %v151_v56 = vsel %vm63_vm15, 3e+38, %v3098_v32  ;;  %v153_v57 = vrot.slane %v152_v52, 4  ;;  %v160_v58 = vrot.slane %v159_v53, 4  ;;  %vm5503_vm13 = vmmov %vm5485_vm2 }
  0x26   :  { %v167_v59 = vrot.slane %v166_v54, 4  ;;  %v174_v60 = vrot.slane %v173_v55, 4  ;;  %v180_v61 = vsel %vm5485_vm2, %v148_v47, inf  ;;  %v187_v62 = vsel %vm5500_vm6, %v149_v50, inf  ;;  %vm5504_vm7 = vmmov %vm5485_vm2 }
  0x27   :  { %v194_v63 = vsel %vm5501_vm8, %v150_v51, inf  ;;  %v139_v0 = vsel %vm5502_vm11, %v128_v44, -inf  ;;  %v154_v1 = vmin.f32 %v152_v52, %v153_v57  ;;  %v161_v2 = vmin.f32 %v159_v53, %v160_v58  ;;  %vm5505_vm4 = vmmov %vm5485_vm2 }
  0x28   :  { %v168_v3 = vmin.f32 %v166_v54, %v167_v59  ;;  %v175_v4 = vmin.f32 %v173_v55, %v174_v60  ;;  %v181_v5 = vrot.slane %v180_v61, 4  ;;  %v188_v6 = vrot.slane %v187_v62, 4  ;;  %vm5506_vm9 = vmmov %vm5485_vm2 }
  0x29   :  { %v195_v7 = vrot.slane %v194_v63, 4  ;;  %v155_v8 = vrot.slane %v154_v1, 2  ;;  %v162_v9 = vrot.slane %v161_v2, 2  ;;  %v201_v11 = vsel %vm5503_vm13, %v151_v56, inf  ;;  %vm5507_vm6 = vmmov %vm5485_vm2 }
  0x2a   :  { %v169_v10 = vrot.slane %v168_v3, 2  ;;  %v176_v12 = vrot.slane %v175_v4, 2  ;;  %v182_v13 = vmin.f32 %v180_v61, %v181_v5  ;;  %v189_v14 = vmin.f32 %v187_v62, %v188_v6  ;;  %vm5508_vm8 = vmmov %vm5485_vm2 }
  0x2b   :  { %v196_v15 = vmin.f32 %v194_v63, %v195_v7  ;;  %v156_v16 = vmin.f32 %v154_v1, %v155_v8  ;;  %v163_v17 = vmin.f32 %v161_v2, %v162_v9  ;;  %v202_v20 = vrot.slane %v201_v11, 4  ;;  %vm5509_vm11 = vmmov %vm5485_vm2 }
  0x2c   :  { %v170_v19 = vmin.f32 %v168_v3, %v169_v10  ;;  %v177_v23 = vmin.f32 %v175_v4, %v176_v12  ;;  %v183_v25 = vrot.slane %v182_v13, 2  ;;  %v190_v27 = vrot.slane %v189_v14, 2  ;;  %vm5510_vm13 = vmmov %vm5485_vm2 }
  0x2d   :  { %v197_v29 = vrot.slane %v196_v15, 2  ;;  %v157_v31 = vrot.slane %v156_v16, 1  ;;  %v164_v33 = vrot.slane %v163_v17, 1  ;;  %v203_v40 = vmin.f32 %v201_v11, %v202_v20 }
  0x2e   :  { %v171_v37 = vrot.slane %v170_v19, 1  ;;  %v178_v41 = vrot.slane %v177_v23, 1  ;;  %v184_v42 = vmin.f32 %v182_v13, %v183_v25  ;;  %v191_v43 = vmin.f32 %v189_v14, %v190_v27 }
  0x2f   :  { %v198_v44 = vmin.f32 %v196_v15, %v197_v29  ;;  %v158_v47 = vmin.f32 %v156_v16, %v157_v31  ;;  %v165_v50 = vmin.f32 %v163_v17, %v164_v33  ;;  %v204_v52 = vrot.slane %v203_v40, 2 }
  0x30   :  { %v172_v51 = vmin.f32 %v170_v19, %v171_v37  ;;  %v138_v53 = vmax.f32 %v3129_v38, %v3157_v49  ;;  %v185_v54 = vrot.slane %v184_v42, 1  ;;  %v192_v55 = vrot.slane %v191_v43, 1 }
  0x31   :  { %v199_v56 = vrot.slane %v198_v44, 1  ;;  %v140_v57 = vmax.f32 %v3147_v45, %v139_v0  ;;  %v179_v58 = vmin.f32 %v177_v23, %v178_v41  ;;  %v205_v59 = vmin.f32 %v203_v40, %v204_v52 }
  0x32   :  { %v208_v60 = vsel %vm5504_vm7, %v158_v47, inf  ;;  %v186_v61 = vmin.f32 %v184_v42, %v185_v54  ;;  %v193_v62 = vmin.f32 %v191_v43, %v192_v55  ;;  %v209_v1 = vsel %vm5505_vm4, %v165_v50, inf }
  0x33   :  { %v200_v63 = vmin.f32 %v198_v44, %v199_v56  ;;  %v206_v2 = vrot.slane %v205_v59, 1  ;;  %v210_v3 = vsel %vm5506_vm9, %v172_v51, inf  ;;  %v211_v45 = vsel %vm5509_vm11, %v179_v58, inf }
  0x34   :  { %v212_v4 = vsel %vm5485_vm2, %v186_v61, inf  ;;  %v214_v38 = vsel %vm5507_vm6, %v193_v62, inf  ;;  %v141_v7 = vmax.f32 %v134_v46, %v136_v48  ;;  %v142_v8 = vmax.f32 %v138_v53, %v140_v57 }
  0x35   :  { %v216_v49 = vsel %vm5508_vm8, %v200_v63, inf  ;;  %v207_v5 = vmin.f32 %v205_v59, %v206_v2  ;;  %v213_v0 = vmin.f32 %v208_v60, %v212_v4  ;;  %v215_v6 = vmin.f32 %v209_v1, %v214_v38 }
  0x36   :  { %v217_v9 = vmin.f32 %v210_v3, %v216_v49  ;;  %v143_v13 = vmax.f32 %v141_v7, %v142_v8 }
  0x37   :  { %v218_v10 = vsel %vm5510_vm13, %v207_v5, inf  ;;  %v220_v12 = vmin.f32 %v213_v0, %v215_v6 }
  0x38   :  { %v219_v11 = vmin.f32 %v211_v45, %v218_v10 }
  0x3a   :  { %v221_v14 = vmin.f32 %v217_v9, %v219_v11 }
  0x3c   :  { %v222_v15 = vmin.f32 %v220_v12, %v221_v14 }
  0x3e   :  { %vm223_vm7 = vcmp.ge.f32.partialorder %v143_v13, %v222_v15 }
  0x3f   :  { %v224_v16 = vsel %vm223_vm7, %v143_v13, 0.0  ;;  %v225_v17 = vsel %vm223_vm7, %v222_v15, 0.0 }
  0x40   :  { %v226_v19 = vsub.f32 %v224_v16, %v225_v17 }
  0x42   :  { %v227_v20 = vmul.f32 8.0, %v226_v19 }
  0x44   :  { %v228_v23 = vadd.f32 %v227_v20, %v224_v16 }
  0x46   :  { %v229_v35 = vadd.f32 1.0, %v228_v23 }
  0x48   :  { %v230_v39 = vmin.f32 %v3043_v18, %v229_v35  ;;  %v231_v34 = vmin.f32 %v3054_v21, %v229_v35  ;;  %v232_v36 = vmin.f32 %v3058_v22, %v229_v35  ;;  %v233_v46 = vmin.f32 %v3067_v24, %v229_v35 }
  0x49   :  { %v234_v48 = vmin.f32 %v3076_v26, %v229_v35  ;;  %v235_v25 = vmin.f32 %v3084_v28, %v229_v35  ;;  %v236_v27 = vmin.f32 %v3092_v30, %v229_v35  ;;  %v237_v29 = vmin.f32 %v3098_v32, %v229_v35 }
  0x4a   :  { %v3205_v31 = vsel %vm56_vm3, %v230_v39, %v3043_v18  ;;  %v3210_v33 = vsel %vm57_vm1, %v231_v34, %v3054_v21  ;;  %v3215_v37 = vsel %vm58_vm5, %v232_v36, %v3058_v22  ;;  %v3220_v40 = vsel %vm59_vm14, %v233_v46, %v3067_v24  ;;  %vm5511_vm3 = vmmov %vm5485_vm2 }
  0x4b   :  { %v3225_v18 = vsel %vm60_vm12, %v234_v48, %v3076_v26  ;;  %v3230_v21 = vsel %vm61_vm0, %v235_v25, %v3084_v28  ;;  %v3235_v22 = vsel %vm62_vm10, %v236_v27, %v3092_v30  ;;  %v3240_v24 = vsel %vm63_vm15, %v237_v29, %v3098_v32  ;;  %vm5512_vm1 = vmmov %vm5485_vm2 }
  0x4c   :  { %v246_v41 = vand.u32 2147483647, %v3205_v31  ;;  %v247_v26 = vand.u32 2147483647, %v3210_v33  ;;  %v248_v42 = vand.u32 2147483647, %v3215_v37  ;;  %vm5513_vm5 = vmmov %vm5512_vm1 }
  0x4d   :  { %v249_v43 = vand.u32 2147483647, %v3220_v40  ;;  %v250_v28 = vand.u32 2147483647, %v3225_v18  ;;  %v251_v44 = vand.u32 2147483647, %v3230_v21  ;;  %vm5514_vm14 = vmmov %vm5512_vm1 }
  0x4e   :  { %v252_v30 = vand.u32 2147483647, %v3235_v22  ;;  %v253_v47 = vand.u32 2147483647, %v3240_v24  ;;  %v254_v50 = vsel %vm5511_vm3, %v246_v41, -inf  ;;  %v261_v32 = vsel %vm5512_vm1, %v247_v26, -inf  ;;  %vm5515_vm12 = vmmov %vm5512_vm1 }
  0x4f   :  { %v255_v51 = vrot.slane %v254_v50, 4  ;;  %v262_v52 = vrot.slane %v261_v32, 4  ;;  %v268_v53 = vsel %vm5513_vm5, %v248_v42, -inf  ;;  %v275_v54 = vsel %vm5514_vm14, %v249_v43, -inf  ;;  %vm5516_vm0 = vmmov %vm5512_vm1 }
  0x50   :  { %v269_v55 = vrot.slane %v268_v53, 4  ;;  %v276_v56 = vrot.slane %v275_v54, 4  ;;  %v282_v57 = vsel %vm5515_vm12, %v250_v28, -inf  ;;  %v289_v58 = vsel %vm5516_vm0, %v251_v44, -inf  ;;  %vm5517_vm10 = vmmov %vm5516_vm0 }
  0x51   :  { %v256_v59 = vmax.f32 %v254_v50, %v255_v51  ;;  %v263_v60 = vmax.f32 %v261_v32, %v262_v52  ;;  %v283_v61 = vrot.slane %v282_v57, 4  ;;  %v290_v62 = vrot.slane %v289_v58, 4  ;;  %vm5518_vm15 = vmmov %vm5516_vm0 }
  0x52   :  { %v270_v63 = vmax.f32 %v268_v53, %v269_v55  ;;  %v277_v1 = vmax.f32 %v275_v54, %v276_v56  ;;  %v296_v2 = vsel %vm5517_vm10, %v252_v30, -inf  ;;  %v303_v3 = vsel %vm5518_vm15, %v253_v47, -inf  ;;  %vm5519_vm4 = vmmov %vm5516_vm0 }
  0x53   :  { %v257_v4 = vrot.slane %v256_v59, 2  ;;  %v264_v38 = vrot.slane %v263_v60, 2  ;;  %v284_v49 = vmax.f32 %v282_v57, %v283_v61  ;;  %v291_v5 = vmax.f32 %v289_v58, %v290_v62  ;;  %vm5520_vm9 = vmmov %vm5516_vm0 }
  0x54   :  { %v271_v45 = vrot.slane %v270_v63, 2  ;;  %v278_v0 = vrot.slane %v277_v1, 2  ;;  %v297_v6 = vrot.slane %v296_v2, 4  ;;  %v304_v7 = vrot.slane %v303_v3, 4  ;;  %vm5521_vm2 = vmmov %vm5516_vm0 }
  0x55   :  { %v258_v8 = vmax.f32 %v256_v59, %v257_v4  ;;  %v265_v9 = vmax.f32 %v263_v60, %v264_v38  ;;  %v285_v10 = vrot.slane %v284_v49, 2  ;;  %v292_v11 = vrot.slane %v291_v5, 2  ;;  %vm5522_vm6 = vmmov %vm5516_vm0 }
  0x56   :  { %v272_v12 = vmax.f32 %v270_v63, %v271_v45  ;;  %v279_v13 = vmax.f32 %v277_v1, %v278_v0  ;;  %v298_v14 = vmax.f32 %v296_v2, %v297_v6  ;;  %v305_v15 = vmax.f32 %v303_v3, %v304_v7  ;;  %vm5523_vm8 = vmmov %vm5516_vm0 }
  0x57   :  { %v259_v16 = vrot.slane %v258_v8, 1  ;;  %v266_v17 = vrot.slane %v265_v9, 1  ;;  %v286_v19 = vmax.f32 %v284_v49, %v285_v10  ;;  %v293_v20 = vmax.f32 %v291_v5, %v292_v11  ;;  %vm5524_vm11 = vmmov %vm5516_vm0 }
  0x58   :  { %v273_v23 = vrot.slane %v272_v12, 1  ;;  %v280_v35 = vrot.slane %v279_v13, 1  ;;  %v299_v39 = vrot.slane %v298_v14, 2  ;;  %v306_v34 = vrot.slane %v305_v15, 2  ;;  %vm5525_vm13 = vmmov %vm5516_vm0 }
  0x59   :  { %v260_v36 = vmax.f32 %v258_v8, %v259_v16  ;;  %v267_v46 = vmax.f32 %v265_v9, %v266_v17  ;;  %v287_v48 = vrot.slane %v286_v19, 1  ;;  %v294_v25 = vrot.slane %v293_v20, 1  ;;  %vm5526_vm7 = vmmov %vm5516_vm0 }
  0x5a   :  { %v274_v27 = vmax.f32 %v272_v12, %v273_v23  ;;  %v281_v29 = vmax.f32 %v279_v13, %v280_v35  ;;  %v300_v41 = vmax.f32 %v298_v14, %v299_v39  ;;  %v307_v26 = vmax.f32 %v305_v15, %v306_v34  ;;  %vm5529_vm10 = vmmov %vm5516_vm0 }
  0x5b   :  { %v288_v42 = vmax.f32 %v286_v19, %v287_v48  ;;  %v295_v43 = vmax.f32 %v293_v20, %v294_v25  ;;  %v310_v28 = vsel %vm5519_vm4, %v260_v36, -inf  ;;  %v311_v44 = vsel %vm5520_vm9, %v267_v46, -inf  ;;  %vm5530_vm15 = vmmov %vm5516_vm0 }
  0x5c   :  { %v301_v30 = vrot.slane %v300_v41, 1  ;;  %v308_v47 = vrot.slane %v307_v26, 1  ;;  %v312_v50 = vsel %vm5521_vm2, %v274_v27, -inf  ;;  %v313_v32 = vsel %vm5522_vm6, %v281_v29, -inf  ;;  %vm5531_vm4 = vmmov %vm5516_vm0 }
  0x5d   :  { %v314_v51 = vsel %vm5523_vm8, %v288_v42, -inf  ;;  %v316_v52 = vsel %vm5524_vm11, %v295_v43, -inf  ;;  %v364_v62 = vlaneseq  ;;  %v326_v8 = vsub.f32 0.0, %v3205_v31  ;;  %vm5532_vm9 = vmmov %vm5516_vm0 }
  0x5e   :  { %v302_v53 = vmax.f32 %v300_v41, %v301_v30  ;;  %v309_v54 = vmax.f32 %v307_v26, %v308_v47  ;;  %v315_v55 = vmax.f32 %v310_v28, %v314_v51  ;;  %v317_v56 = vmax.f32 %v311_v44, %v316_v52  ;;  %vm5533_vm2 = vmmov %vm5516_vm0 }
  0x5f   :  { %v3266_v1 = vshrl.u32 %v364_v62, 7  ;;  %v3268_v2 = vand.u32 127, %v364_v62  ;;  %v327_v11 = vsub.f32 0.0, %v3210_v33  ;;  %v328_v12 = vsub.f32 0.0, %v3215_v37  ;;  %vm5534_vm6 = vmmov %vm5516_vm0 }
  0x60   :  { %v318_v57 = vsel %vm5525_vm13, %v302_v53, -inf  ;;  %v320_v58 = vsel %vm5526_vm7, %v309_v54, -inf  ;;  %v322_v61 = vmax.f32 %v315_v55, %v317_v56  ;;  %v329_v13 = vsub.f32 0.0, %v3220_v40  ;;  %vm5535_vm8 = vmmov %vm5516_vm0 }
  0x61   :  { %v319_v59 = vmax.f32 %v312_v50, %v318_v57  ;;  %v321_v60 = vmax.f32 %v313_v32, %v320_v58  ;;  %5527 = vst [vmem:[#allocation2_spill] sm:$0xff] %v3268_v2  ;;  %v3271_v4 = vsub.s32 7, %v3266_v1  ;;  %v330_v15 = vsub.f32 0.0, %v3225_v18 }
  0x62   :  { %v331_v17 = vsub.f32 0.0, %v3230_v21  ;;  %v332_v31 = vsub.f32 0.0, %v3235_v22  ;;  %v333_v39 = vsub.f32 0.0, %v3240_v24  ;;  %v3314_v21 = vmov 4294967295  }
  0x63   :  { %v323_v63 = vmax.f32 %v319_v59, %v321_v60  ;;  %5528 = vst [vmem:[#allocation3_spill] sm:$0xff] %v3271_v4  ;;  %v3316_v22 = vmov 0.0  }
  0x65   :  { %v324_v3 = vmax.f32 %v322_v61, %v323_v63 }
  0x67   :  { %v325_v38 = vmax.f32 %v324_v3, 1e-06 }
  0x69   :  { %2865 = vrcp.f32 %v325_v38  ;;  %v345_v45 = vand.u32 2147483648, %v325_v38  ;;  %vm339_vm1 = vweird.f32 %v325_v38  ;;  %v343_v6 = vand.u32 2147483647, %v325_v38 }
  0x6b   :  { %v346_v9 = vor.u32 1.1754944e-38, %v345_v45  ;;  %vm344_vm12 = vcmp.eq.f32.partialorder %v343_v6, 8.507059e+37 }
  0x6f   :  { %v2866_v49 = vpop.eup %2865 }
  0x70   :  { %v335_v5 = vmul.f32 %v2866_v49, %v325_v38  ;;  %vm340_vm5 = vweird.f32 %v2866_v49 }
  0x71   :  { %vm341_vm14 = vmor %vm339_vm1, %vm340_vm5 }
  0x72   :  { %v336_v0 = vsub.f32 1.0, %v335_v5 }
  0x74   :  { %v337_v7 = vmul.f32 %v2866_v49, %v336_v0 }
  0x76   :  { %v338_v10 = vadd.f32 %v2866_v49, %v337_v7 }
  0x78   :  { %v342_v14 = vsel %vm341_vm14, %v2866_v49, %v338_v10 }
  0x79   :  { %v347_v16 = vsel %vm344_vm12, %v346_v9, %v342_v14 }
  0x7a   :  { %v348_v19 = vmul.f32 %v347_v16, %v326_v8  ;;  %v349_v20 = vmul.f32 %v347_v16, %v327_v11  ;;  %v350_v23 = vmul.f32 %v347_v16, %v328_v12  ;;  %v351_v35 = vmul.f32 %v347_v16, %v329_v13 }
  0x7b   :  { %v352_v33 = vmul.f32 %v347_v16, %v330_v15  ;;  %v353_v37 = vmul.f32 %v347_v16, %v331_v17  ;;  %v354_v40 = vmul.f32 %v347_v16, %v332_v31  ;;  %v355_v18 = vmul.f32 %v347_v16, %v333_v39 }
  0x7c   :  { %356 = vst.msk [vmem:[%s5443_s0] sm:$0xff] %vm5516_vm0, %v348_v19 }
  0x7d   :  { %357 = vst.msk [vmem:[%s5443_s0 + $0x8] sm:$0xff] %vm5529_vm10, %v349_v20 }
  0x7e   :  { %358 = vst.msk [vmem:[%s5443_s0 + $0x10] sm:$0xff] %vm5530_vm15, %v350_v23 }
  0x7f   :  { %359 = vst.msk [vmem:[%s5443_s0 + $0x18] sm:$0xff] %vm5531_vm4, %v351_v35 }
  0x80   :  { %360 = vst.msk [vmem:[%s5443_s0 + $0x20] sm:$0xff] %vm5532_vm9, %v352_v33 }
  0x81   :  { %361 = vst.msk [vmem:[%s5443_s0 + $0x28] sm:$0xff] %vm5533_vm2, %v353_v37 }
  0x82   :  { %362 = vst.msk [vmem:[%s5443_s0 + $0x30] sm:$0xff] %vm5534_vm6, %v354_v40 }
  0x83   :  { %363 = vst.msk [vmem:[%s5443_s0 + $0x38] sm:$0xff] %vm5535_vm8, %v355_v18 }
  0x84 LB: > { %v5536_v4 = vld [vmem:[#allocation3_spill] sm:$0xff]  ;;  %vm391_vm11 = vcmp.eq.s32.totalorder %v2937_v21, 0  ;;  %vm392_vm13 = vcmp.eq.s32.totalorder %v2937_v21, 1  ;;  %vm393_vm7 = vcmp.eq.s32.totalorder %v2937_v21, 2  ;;  %vm394_vm1 = vcmp.eq.s32.totalorder %v2937_v21, 3  ;;  %v3374_v23 = vld [vmem:[%s5443_s0] sm:$0xff]  ;;  %v2937_v21 = vphi %v3314_v21, %v5867_v21   ;;  %s2953_s11 = sphi %s3322_s11, %s5870_s11   ;;  %s2949_s10 = sphi %s3320_s10, %s5869_s10   ;;  %s2945_s9 = sphi %s3318_s9, %s5868_s9   ;;  %v2941_v22 = vphi %v3316_v22, %v2439_v22  }
  0x85   : > { %vm395_vm5 = vcmp.eq.s32.totalorder %v2937_v21, 4  ;;  %vm396_vm14 = vcmp.eq.s32.totalorder %v2937_v21, 5  ;;  %vm397_vm12 = vcmp.eq.s32.totalorder %v2937_v21, 6  ;;  %vm398_vm0 = vcmp.eq.s32.totalorder %v2937_v21, 7  ;;  %v3379_v31 = vld [vmem:[%s5443_s0 + $0x8] sm:$0xff]  ;;  %v3384_v35 = vld [vmem:[%s5443_s0 + $0x10] sm:$0xff] }
  0x86   : > { %v5445_v24 = vmov 0   ;;  %vm5537_vm10 = vcmask 15360   ;;  %v3389_v39 = vld [vmem:[%s5443_s0 + $0x18] sm:$0xff]  ;;  %p2472_p0 = scmp.eq.s32.totalorder %s2953_s11, 5  ;;  %s2474_s19 = sadd.s32 1, %s2945_s9 }
  0x87   : > { %v399_v34 = vsel %vm391_vm11, 1, %v5445_v24  ;;  %v400_v36 = vsel %vm392_vm13, 1, %v5445_v24  ;;  %v401_v46 = vsel %vm393_vm7, 1, %v5445_v24  ;;  %v402_v48 = vsel %vm394_vm1, 1, %v5445_v24  ;;  %vm5538_vm15 = vmmov %vm5537_vm10  ;;  %s2477_s21 = sadd.s32 1, %s2953_s11  ;;  %p2482_p4 = scmp.ne.s32.totalorder %s2953_s11, 5 }
  0x88   : > { %v403_v25 = vsel %vm395_vm5, 1, %v5445_v24  ;;  %v404_v27 = vsel %vm396_vm14, 1, %v5445_v24  ;;  %v405_v29 = vsel %vm397_vm12, 1, %v5445_v24  ;;  %v406_v41 = vsel %vm398_vm0, 1, %v5445_v24  ;;  %vm5539_vm4 = vmmov %vm5537_vm10  ;;  %s2473_s18 = scalar_select %p2472_p0, 256, 48 }
  0x89   : > { %v407_v26 = vsel %vm5537_vm10, %v399_v34, 2147483648  ;;  %v417_v42 = vsel %vm5538_vm15, %v400_v36, 2147483648  ;;  %v427_v43 = vsel %vm5539_vm4, %v401_v46, 2147483648  ;;  %vm5540_vm9 = vmmov %vm5539_vm4  ;;  %s2479_s22 = smul.f32 0.2, %s2949_s10 }
  0x8a   : > { %v437_v28 = vsel %vm5540_vm9, %v402_v48, 2147483648  ;;  %v408_v44 = vrot.slane %v407_v26, 4  ;;  %v418_v30 = vrot.slane %v417_v42, 4  ;;  %v428_v47 = vrot.slane %v427_v43, 4  ;;  %vm5541_vm2 = vmmov %vm5539_vm4  ;;  %p2475_p1 = scmp.ge.s32.totalorder %s2474_s19, %s2473_s18 }
  0x8b   : > { %v438_v50 = vrot.slane %v437_v28, 4  ;;  %v447_v32 = vsel %vm5541_vm2, %v403_v25, 2147483648  ;;  %vm5542_vm6 = vmmov %vm5541_vm2  ;;  %v3402_v25 = vld [vmem:[%s5443_s0 + $0x20] sm:$0xff] }
  0x8c   : > { %v457_v51 = vsel %vm5542_vm6, %v404_v27, 2147483648  ;;  %vm5543_vm8 = vmmov %vm5541_vm2  ;;  %vm409_vm13 = vcmp.gt.s32.totalorder %v407_v26, %v408_v44  ;;  %vm419_vm7 = vcmp.gt.s32.totalorder %v417_v42, %v418_v30  ;;  %vm429_vm1 = vcmp.gt.s32.totalorder %v427_v43, %v428_v47  ;;  %5553 = vst [vmem:[#allocation4_spill] sm:$0xff] %v3402_v25 }
  0x8d   : > { %v467_v52 = vsel %vm5543_vm8, %v405_v29, 2147483648  ;;  %vm5544_vm11 = vmmov %vm5541_vm2  ;;  %vm439_vm5 = vcmp.gt.s32.totalorder %v437_v28, %v438_v50  ;;  %v410_v54 = vsel %vm409_vm13, %v407_v26, %v408_v44  ;;  %v420_v55 = vsel %vm419_vm7, %v417_v42, %v418_v30  ;;  %v3418_v26 = vld [vmem:[%s5443_s0 + $0x30] sm:$0xff]  ;;  %v3423_v42 = vld [vmem:[%s5443_s0 + $0x38] sm:$0xff] }
  0x8e   : > { %v477_v53 = vsel %vm5544_vm11, %v406_v41, 2147483648  ;;  %v430_v56 = vsel %vm429_vm1, %v427_v43, %v428_v47  ;;  %v440_v57 = vsel %vm439_vm5, %v437_v28, %v438_v50  ;;  %v411_v58 = vrot.slane %v410_v54, 2  ;;  %v3413_v41 = vld [vmem:[%s5443_s0 + $0x28] sm:$0xff]  ;;  %5555 = vst [vmem:[#allocation6_spill] sm:$0xff] %v3418_v26 }
  0x8f   : > { %v421_v59 = vrot.slane %v420_v55, 2  ;;  %v431_v60 = vrot.slane %v430_v56, 2  ;;  %v441_v61 = vrot.slane %v440_v57, 2  ;;  %v448_v62 = vrot.slane %v447_v32, 4  ;;  %5554 = vst [vmem:[#allocation5_spill] sm:$0xff] %v3413_v41 }
  0x90   : > { %v458_v63 = vrot.slane %v457_v51, 4  ;;  %v468_v3 = vrot.slane %v467_v52, 4  ;;  %v478_v38 = vrot.slane %v477_v53, 4  ;;  %vm412_vm14 = vcmp.gt.s32.totalorder %v410_v54, %v411_v58  ;;  %5556 = vst [vmem:[#allocation7_spill] sm:$0xff] %v3423_v42 }
  0x91   : > { %vm422_vm12 = vcmp.gt.s32.totalorder %v420_v55, %v421_v59  ;;  %vm432_vm0 = vcmp.gt.s32.totalorder %v430_v56, %v431_v60  ;;  %vm442_vm10 = vcmp.gt.s32.totalorder %v440_v57, %v441_v61  ;;  %v413_v49 = vsel %vm412_vm14, %v410_v54, %v411_v58 }
  0x92   : > { %v423_v5 = vsel %vm422_vm12, %v420_v55, %v421_v59  ;;  %v433_v45 = vsel %vm432_vm0, %v430_v56, %v431_v60  ;;  %v443_v0 = vsel %vm442_vm10, %v440_v57, %v441_v61  ;;  %vm449_vm15 = vcmp.gt.s32.totalorder %v447_v32, %v448_v62 }
  0x93   : > { %vm459_vm4 = vcmp.gt.s32.totalorder %v457_v51, %v458_v63  ;;  %vm469_vm9 = vcmp.gt.s32.totalorder %v467_v52, %v468_v3  ;;  %vm479_vm2 = vcmp.gt.s32.totalorder %v477_v53, %v478_v38  ;;  %v414_v6 = vrot.slane %v413_v49, 1 }
  0x94   : > { %v424_v7 = vrot.slane %v423_v5, 1  ;;  %v434_v8 = vrot.slane %v433_v45, 1  ;;  %v444_v9 = vrot.slane %v443_v0, 1  ;;  %v450_v10 = vsel %vm449_vm15, %v447_v32, %v448_v62 }
  0x95   : > { %v460_v11 = vsel %vm459_vm4, %v457_v51, %v458_v63  ;;  %v470_v12 = vsel %vm469_vm9, %v467_v52, %v468_v3  ;;  %v480_v13 = vsel %vm479_vm2, %v477_v53, %v478_v38  ;;  %v451_v14 = vrot.slane %v450_v10, 2 }
  0x96   : > { %v461_v15 = vrot.slane %v460_v11, 2  ;;  %v471_v16 = vrot.slane %v470_v12, 2  ;;  %v481_v17 = vrot.slane %v480_v13, 2  ;;  %vm3363_vm6 = vcmp.gt.s32.totalorder %v413_v49, %v414_v6 }
  0x97   : > { %vm3367_vm8 = vcmp.gt.s32.totalorder %v423_v5, %v424_v7  ;;  %vm452_vm11 = vcmp.gt.s32.totalorder %v450_v10, %v451_v14  ;;  %vm3391_vm5 = vcmp.gt.s32.totalorder %v433_v45, %v434_v8  ;;  %vm3395_vm14 = vcmp.gt.s32.totalorder %v443_v0, %v444_v9 }
  0x98   : > { %vm462_vm13 = vcmp.gt.s32.totalorder %v460_v11, %v461_v15  ;;  %vm472_vm7 = vcmp.gt.s32.totalorder %v470_v12, %v471_v16  ;;  %vm482_vm1 = vcmp.gt.s32.totalorder %v480_v13, %v481_v17  ;;  %v453_v37 = vsel %vm452_vm11, %v450_v10, %v451_v14 }
  0x99   : > { %v463_v40 = vsel %vm462_vm13, %v460_v11, %v461_v15  ;;  %v473_v18 = vsel %vm472_vm7, %v470_v12, %v471_v16  ;;  %v454_v36 = vrot.slane %v453_v37, 1  ;;  %v3404_v27 = vsel %vm482_vm1, %v480_v13, %v481_v17 }
  0x9a   : > { %v464_v46 = vrot.slane %v463_v40, 1  ;;  %v474_v48 = vrot.slane %v473_v18, 1  ;;  %v3408_v29 = vsub.f32 %v3374_v23, %v2941_v22  ;;  %v3427_v43 = vsub.f32 %v3379_v31, %v2941_v22 }
  0x9b   : > { %vm455_vm12 = vcmp.gt.s32.totalorder %v453_v37, %v454_v36  ;;  %v3431_v28 = vsub.f32 %v3384_v35, %v2941_v22  ;;  %v3435_v44 = vsub.f32 %v3389_v39, %v2941_v22  ;;  %v3439_v30 = vsel %vm3363_vm6, %v413_v49, %v414_v6 }
  0x9c   : > { %v3443_v47 = vsel %vm3367_vm8, %v423_v5, %v424_v7  ;;  %v3447_v50 = vsel %vm3391_vm5, %v433_v45, %v434_v8  ;;  %v3451_v32 = vsel %vm3395_vm14, %v443_v0, %v444_v9  ;;  %v3453_v51 = vsel %vm455_vm12, %v453_v37, %v454_v36 }
  0x9d   : > { %vm465_vm0 = vcmp.gt.s32.totalorder %v463_v40, %v464_v46  ;;  %vm3455_vm10 = vcmp.gt.s32.totalorder %v473_v18, %v474_v48  ;;  %v5447_v53 = vrot.slane %v3404_v27, 1  ;;  %v3462_v54 = vsub.f32 %v3402_v25, %v2941_v22 }
  0x9e   : > { %v3466_v55 = vsub.f32 %v3413_v41, %v2941_v22  ;;  %v3470_v56 = vsub.f32 %v3418_v26, %v2941_v22  ;;  %v3474_v57 = vsub.f32 %v3423_v42, %v2941_v22  ;;  %v519_v58 = vshra.s32 %v3408_v29, 31 }
  0x9f   : > { %v520_v59 = vshra.s32 %v3427_v43, 31  ;;  %v521_v60 = vshra.s32 %v3431_v28, 31  ;;  %v522_v61 = vshra.s32 %v3435_v44, 31  ;;  %v523_v62 = vshra.s32 %v3462_v54, 31 }
  0xa0   : > { %v524_v63 = vshra.s32 %v3466_v55, 31  ;;  %v525_v3 = vshra.s32 %v3470_v56, 31  ;;  %v526_v38 = vshra.s32 %v3474_v57, 31  ;;  %v3484_v49 = vsel %vm465_vm0, %v463_v40, %v464_v46 }
  0xa1   : > { %v527_v5 = vand.u32 2147483647, %v519_v58  ;;  %v528_v45 = vand.u32 2147483647, %v520_v59  ;;  %v529_v0 = vand.u32 2147483647, %v521_v60  ;;  %v3488_v6 = vsel %vm3455_vm10, %v473_v18, %v474_v48 }
  0xa2   : > { %v530_v7 = vand.u32 2147483647, %v522_v61  ;;  %v531_v8 = vand.u32 2147483647, %v523_v62  ;;  %v532_v9 = vand.u32 2147483647, %v524_v63 }
  0xa3   : > { %v533_v10 = vand.u32 2147483647, %v525_v3  ;;  %v534_v11 = vand.u32 2147483647, %v526_v38  ;;  %v535_v12 = vxor.u32 %v527_v5, %v3408_v29  ;;  %v536_v13 = vxor.u32 %v528_v45, %v3427_v43 }
  0xa4   : > { %v537_v14 = vxor.u32 %v529_v0, %v3431_v28  ;;  %v538_v15 = vxor.u32 %v530_v7, %v3435_v44  ;;  %v539_v16 = vxor.u32 %v531_v8, %v3462_v54  ;;  %v540_v17 = vxor.u32 %v532_v9, %v3466_v55 }
  0xa5   : > { %v541_v19 = vxor.u32 %v533_v10, %v3470_v56  ;;  %v542_v20 = vxor.u32 %v534_v11, %v3474_v57  ;;  %v543_v33 = vand.u32 4294967288, %v535_v12  ;;  %v544_v37 = vand.u32 4294967288, %v536_v13 }
  0xa6   : > { %v545_v40 = vand.u32 4294967288, %v537_v14  ;;  %v546_v18 = vand.u32 4294967288, %v538_v15  ;;  %v547_v34 = vand.u32 4294967288, %v539_v16  ;;  %v548_v36 = vand.u32 4294967288, %v540_v17 }
  0xa7   : > { %v549_v46 = vand.u32 4294967288, %v541_v19  ;;  %v550_v48 = vand.u32 4294967288, %v542_v20  ;;  %v551_v52 = vor.u32 %v543_v33, %v5536_v4  ;;  %v552_v58 = vor.u32 %v544_v37, %v5536_v4 }
  0xa8   : > { %v553_v59 = vor.u32 %v545_v40, %v5536_v4  ;;  %v554_v60 = vor.u32 %v546_v18, %v5536_v4  ;;  %v555_v61 = vor.u32 %v547_v34, %v5536_v4  ;;  %v556_v62 = vor.u32 %v548_v36, %v5536_v4 }
  0xa9   : > { %v557_v63 = vor.u32 %v549_v46, %v5536_v4  ;;  %v558_v3 = vor.u32 %v550_v48, %v5536_v4  ;;  %vm5559_vm15 = vcmask 15360   ;;  %v5568_v2 = vrot.slane %v3404_v27, 1 }
  0xaa   : > { %v559_v38 = vsel %vm5559_vm15, %v551_v52, 2147483648  ;;  %vm5560_vm4 = vmmov %vm5559_vm15 }
  0xab   : > { %v569_v5 = vsel %vm5560_vm4, %v552_v58, 2147483648  ;;  %v560_v45 = vrot.slane %v559_v38, 4  ;;  %vm5561_vm9 = vmmov %vm5560_vm4 }
  0xac   : > { %v570_v0 = vrot.slane %v569_v5, 4  ;;  %v579_v7 = vsel %vm5561_vm9, %v553_v59, 2147483648  ;;  %vm5562_vm2 = vmmov %vm5560_vm4 }
  0xad   : > { %v589_v8 = vsel %vm5562_vm2, %v554_v60, 2147483648  ;;  %v580_v9 = vrot.slane %v579_v7, 4  ;;  %vm5563_vm6 = vmmov %vm5562_vm2  ;;  %vm561_vm11 = vcmp.gt.s32.totalorder %v559_v38, %v560_v45 }
  0xae   : > { %v590_v10 = vrot.slane %v589_v8, 4  ;;  %v599_v11 = vsel %vm5563_vm6, %v555_v61, 2147483648  ;;  %vm5564_vm8 = vmmov %vm5562_vm2  ;;  %vm571_vm13 = vcmp.gt.s32.totalorder %v569_v5, %v570_v0  ;;  %v562_v15 = vsel %vm561_vm11, %v559_v38, %v560_v45 }
  0xaf   : > { %v609_v12 = vsel %vm5564_vm8, %v556_v62, 2147483648  ;;  %v600_v13 = vrot.slane %v599_v11, 4  ;;  %v572_v16 = vsel %vm571_vm13, %v569_v5, %v570_v0  ;;  %vm581_vm7 = vcmp.gt.s32.totalorder %v579_v7, %v580_v9  ;;  %vm5565_vm6 = vmmov %vm5562_vm2 }
  0xb0   : > { %v610_v14 = vrot.slane %v609_v12, 4  ;;  %vm591_vm1 = vcmp.gt.s32.totalorder %v589_v8, %v590_v10  ;;  %v563_v17 = vrot.slane %v562_v15, 2  ;;  %v573_v19 = vrot.slane %v572_v16, 2 }
  0xb1   : > { %v582_v20 = vsel %vm581_vm7, %v579_v7, %v580_v9  ;;  %v592_v33 = vsel %vm591_vm1, %v589_v8, %v590_v10  ;;  %vm601_vm5 = vcmp.gt.s32.totalorder %v599_v11, %v600_v13  ;;  %v619_v5 = vsel %vm5562_vm2, %v557_v63, 2147483648 }
  0xb2   : > { %v583_v37 = vrot.slane %v582_v20, 2  ;;  %v593_v40 = vrot.slane %v592_v33, 2  ;;  %vm611_vm14 = vcmp.gt.s32.totalorder %v609_v12, %v610_v14  ;;  %vm564_vm12 = vcmp.gt.s32.totalorder %v562_v15, %v563_v17 }
  0xb3   : > { %vm574_vm0 = vcmp.gt.s32.totalorder %v572_v16, %v573_v19  ;;  %v602_v18 = vsel %vm601_vm5, %v599_v11, %v600_v13  ;;  %v612_v34 = vsel %vm611_vm14, %v609_v12, %v610_v14  ;;  %v565_v36 = vsel %vm564_vm12, %v562_v15, %v563_v17 }
  0xb4   : > { %v575_v46 = vsel %vm574_vm0, %v572_v16, %v573_v19  ;;  %vm584_vm10 = vcmp.gt.s32.totalorder %v582_v20, %v583_v37  ;;  %vm594_vm15 = vcmp.gt.s32.totalorder %v592_v33, %v593_v40  ;;  %v566_v48 = vrot.slane %v565_v36, 1 }
  0xb5   : > { %v576_v52 = vrot.slane %v575_v46, 1  ;;  %v585_v58 = vsel %vm584_vm10, %v582_v20, %v583_v37  ;;  %v595_v59 = vsel %vm594_vm15, %v592_v33, %v593_v40  ;;  %v603_v62 = vrot.slane %v602_v18, 2 }
  0xb6   : > { %v586_v60 = vrot.slane %v585_v58, 1  ;;  %v596_v61 = vrot.slane %v595_v59, 1  ;;  %v613_v38 = vrot.slane %v612_v34, 2  ;;  %vm567_vm4 = vcmp.gt.s32.totalorder %v565_v36, %v566_v48 }
  0xb7   : > { %vm577_vm9 = vcmp.gt.s32.totalorder %v575_v46, %v576_v52  ;;  %v629_v45 = vsel %vm5565_vm6, %v558_v3, 2147483648  ;;  %v3514_v0 = vsel %vm567_vm4, %v565_v36, %v566_v48  ;;  %vm604_vm13 = vcmp.gt.s32.totalorder %v602_v18, %v603_v62 }
  0xb8   : > { %v3516_v7 = vsel %vm577_vm9, %v575_v46, %v576_v52  ;;  %vm587_vm8 = vcmp.gt.s32.totalorder %v585_v58, %v586_v60  ;;  %vm597_vm11 = vcmp.gt.s32.totalorder %v595_v59, %v596_v61  ;;  %vm614_vm7 = vcmp.gt.s32.totalorder %v612_v34, %v613_v38 }
  0xb9   : > { %v3518_v8 = vsel %vm587_vm8, %v585_v58, %v586_v60  ;;  %v3520_v9 = vsel %vm597_vm11, %v595_v59, %v596_v61  ;;  %v605_v10 = vsel %vm604_vm13, %v602_v18, %v603_v62  ;;  %v615_v11 = vsel %vm614_vm7, %v612_v34, %v613_v38 }
  0xba   : > { %v620_v12 = vrot.slane %v619_v5, 4  ;;  %v630_v13 = vrot.slane %v629_v45, 4  ;;  %v606_v14 = vrot.slane %v605_v10, 1  ;;  %v616_v63 = vrot.slane %v615_v11, 1 }
  0xbb   : > { %v639_v3 = vand.u32 7, %v3514_v0  ;;  %v640_v15 = vand.u32 7, %v3516_v7  ;;  %v641_v16 = vand.u32 7, %v3518_v8  ;;  %v642_v17 = vand.u32 7, %v3520_v9 }
  0xbc   : > { %vm621_vm1 = vcmp.gt.s32.totalorder %v619_v5, %v620_v12  ;;  %vm631_vm5 = vcmp.gt.s32.totalorder %v629_v45, %v630_v13  ;;  %vm607_vm14 = vcmp.gt.s32.totalorder %v605_v10, %v606_v14  ;;  %vm617_vm12 = vcmp.gt.s32.totalorder %v615_v11, %v616_v63 }
  0xbd   : > { %v622_v19 = vsel %vm621_vm1, %v619_v5, %v620_v12  ;;  %v632_v20 = vsel %vm631_vm5, %v629_v45, %v630_v13  ;;  %vm3529_vm0 = vcmp.gt.s32.totalorder %v3404_v27, %v5447_v53  ;;  %v608_v37 = vsel %vm607_vm14, %v605_v10, %v606_v14 }
  0xbe   : > { %v618_v40 = vsel %vm617_vm12, %v615_v11, %v616_v63  ;;  %v623_v18 = vrot.slane %v622_v19, 2  ;;  %v633_v34 = vrot.slane %v632_v20, 2  ;;  %v643_v36 = vand.u32 7, %v608_v37 }
  0xbf   : > { %v644_v46 = vand.u32 7, %v618_v40  ;;  %v3533_v48 = vsub.s32 7, %v639_v3  ;;  %v3535_v52 = vsub.s32 7, %v640_v15  ;;  %v3537_v58 = vsub.s32 7, %v641_v16 }
  0xc0   : > { %vm624_vm10 = vcmp.gt.s32.totalorder %v622_v19, %v623_v18  ;;  %vm634_vm15 = vcmp.gt.s32.totalorder %v632_v20, %v633_v34  ;;  %v3539_v59 = vsub.s32 7, %v642_v17  ;;  %v3541_v62 = vsub.s32 7, %v643_v36 }
  0xc1   : > { %v625_v60 = vsel %vm624_vm10, %v622_v19, %v623_v18  ;;  %v635_v61 = vsel %vm634_vm15, %v632_v20, %v633_v34  ;;  %v3543_v38 = vsub.s32 7, %v644_v46  ;;  %v655_v10 = vand.u32 4294967288, %v3514_v0 }
  0xc2   : > { %v626_v5 = vrot.slane %v625_v60, 1  ;;  %v636_v45 = vrot.slane %v635_v61, 1  ;;  %v656_v11 = vand.u32 4294967288, %v3516_v7  ;;  %v657_v12 = vand.u32 4294967288, %v3518_v8 }
  0xc3   : > { %v658_v13 = vand.u32 4294967288, %v3520_v9  ;;  %v659_v14 = vand.u32 4294967288, %v608_v37  ;;  %v660_v63 = vand.u32 4294967288, %v618_v40  ;;  %v663_v3 = vshra.s32 %v655_v10, 31 }
  0xc4   : > { %vm627_vm4 = vcmp.gt.s32.totalorder %v625_v60, %v626_v5  ;;  %vm637_vm9 = vcmp.gt.s32.totalorder %v635_v61, %v636_v45  ;;  %v664_v15 = vshra.s32 %v656_v11, 31  ;;  %v665_v19 = vshra.s32 %v657_v12, 31 }
  0xc5   : > { %v628_v16 = vsel %vm627_vm4, %v625_v60, %v626_v5  ;;  %v638_v17 = vsel %vm637_vm9, %v635_v61, %v636_v45  ;;  %v666_v20 = vshra.s32 %v658_v13, 31  ;;  %v667_v46 = vshra.s32 %v659_v14, 31 }
  0xc6   : > { %v645_v18 = vand.u32 7, %v628_v16  ;;  %v646_v34 = vand.u32 7, %v638_v17  ;;  %v661_v36 = vand.u32 4294967288, %v628_v16  ;;  %v662_v0 = vand.u32 4294967288, %v638_v17 }
  0xc7   : > { %v668_v7 = vshra.s32 %v660_v63, 31  ;;  %v671_v24 = vand.u32 2147483647, %v663_v3  ;;  %v672_v8 = vand.u32 2147483647, %v664_v15  ;;  %v3558_v60 = vsel %vm3529_vm0, %v3404_v27, %v5568_v2 }
  0xc8   : > { %v3549_v53 = vsub.s32 7, %v645_v18  ;;  %v3551_v9 = vsub.s32 7, %v646_v34  ;;  %v669_v37 = vshra.s32 %v661_v36, 31  ;;  %v670_v40 = vshra.s32 %v662_v0, 31 }
  0xc9   : > { %v673_v61 = vand.u32 2147483647, %v665_v19  ;;  %v674_v5 = vand.u32 2147483647, %v666_v20  ;;  %v675_v45 = vand.u32 2147483647, %v667_v46  ;;  %v3560_v15 = vxor.u32 %v671_v24, %v655_v10 }
  0xca   : > { %v676_v16 = vand.u32 2147483647, %v668_v7  ;;  %v677_v17 = vand.u32 2147483647, %v669_v37  ;;  %v678_v3 = vand.u32 2147483647, %v670_v40  ;;  %v3562_v18 = vxor.u32 %v672_v8, %v656_v11 }
  0xcb   : > { %v3564_v34 = vxor.u32 %v673_v61, %v657_v12  ;;  %v3566_v4 = vxor.u32 %v674_v5, %v658_v13  ;;  %vm695_vm2 = vcmp.eq.s32.totalorder %v3266_v1, %v3533_v48  ;;  %v3570_v33 = vxor.u32 %v675_v45, %v659_v14 }
  0xcc   : > { %v3572_v2 = vxor.u32 %v676_v16, %v660_v63  ;;  %v3574_v27 = vxor.u32 %v677_v17, %v661_v36  ;;  %vm696_vm6 = vcmp.eq.s32.totalorder %v3266_v1, %v3535_v52  ;;  %vm697_vm8 = vcmp.eq.s32.totalorder %v3266_v1, %v3537_v58 }
  0xcd   : > { %vm698_vm11 = vcmp.eq.s32.totalorder %v3266_v1, %v3539_v59  ;;  %vm699_vm13 = vcmp.eq.s32.totalorder %v3266_v1, %v3541_v62  ;;  %vm5457_vm7 = vcmp.eq.s32.totalorder %v3266_v1, %v3543_v38  ;;  %vm5455_vm1 = vcmp.eq.s32.totalorder %v3266_v1, %v3549_v53 }
  0xce   : > { %vm5456_vm5 = vcmp.eq.s32.totalorder %v3266_v1, %v3551_v9  ;;  %v703_v24 = vsel %vm695_vm2, -1e+30, %v3408_v29  ;;  %v704_v10 = vsel %vm696_vm6, -1e+30, %v3427_v43  ;;  %v3598_v11 = vxor.u32 %v678_v3, %v662_v0 }
  0xcf   : > { %v705_v12 = vsel %vm697_vm8, -1e+30, %v3431_v28  ;;  %v706_v13 = vsel %vm698_vm11, -1e+30, %v3435_v44  ;;  %v707_v29 = vsel %vm699_vm13, -1e+30, %v3462_v54  ;;  %v3625_v14 = vstv %s2949_s10 }
  0xd0   : > { %v708_v43 = vsel %vm5457_vm7, -1e+30, %v3466_v55  ;;  %v709_v28 = vsel %vm5455_vm1, -1e+30, %v3470_v56  ;;  %v710_v44 = vsel %vm5456_vm5, -1e+30, %v3474_v57 }
  0xd1   : > { %vm5569_vm14 = vcmask 15360   ;;  %vm2996_vm1 = vmmov 1  }
  0xd2   : > { %v711_v63 = vsel %vm5569_vm14, %v703_v24, -inf  ;;  %vm5570_vm12 = vmmov %vm5569_vm14  ;;  %vm487_vm14 = vcmp.gt.s32.totalorder %v3439_v30, 0 }
  0xd3   : > { %v718_v54 = vsel %vm5570_vm12, %v704_v10, -inf  ;;  %vm5571_vm0 = vmmov %vm5570_vm12  ;;  %v712_v20 = vrot.slane %v711_v63, 4  ;;  %vm488_vm12 = vcmp.gt.s32.totalorder %v3443_v47, 0 }
  0xd4   : > { %v725_v19 = vsel %vm5571_vm0, %v705_v12, -inf  ;;  %vm5572_vm10 = vmmov %vm5571_vm0  ;;  %v719_v36 = vrot.slane %v718_v54, 4 }
  0xd5   : > { %v732_v55 = vsel %vm5572_vm10, %v706_v13, -inf  ;;  %v726_v0 = vrot.slane %v725_v19, 4  ;;  %vm5573_vm15 = vmmov %vm5571_vm0  ;;  %v713_v37 = vmax.f32 %v711_v63, %v712_v20  ;;  %vm491_vm10 = vcmp.gt.s32.totalorder %v3453_v51, 0 }
  0xd6   : > { %v733_v46 = vrot.slane %v732_v55, 4  ;;  %v739_v56 = vsel %vm5573_vm15, %v707_v29, -inf  ;;  %vm5574_vm4 = vmmov %vm5571_vm0  ;;  %v720_v40 = vmax.f32 %v718_v54, %v719_v36  ;;  %vm492_vm15 = vcmp.gt.s32.totalorder %v3484_v49, 0 }
  0xd7   : > { %v746_v7 = vsel %vm5574_vm4, %v708_v43, -inf  ;;  %vm5575_vm9 = vmmov %vm5571_vm0  ;;  %v727_v61 = vmax.f32 %v725_v19, %v726_v0  ;;  %v740_v45 = vrot.slane %v739_v56, 4  ;;  %v714_v24 = vrot.slane %v713_v37, 2 }
  0xd8   : > { %v753_v57 = vsel %vm5575_vm9, %v709_v28, -inf  ;;  %vm5576_vm3 = vmmov %vm5571_vm0  ;;  %v734_v5 = vmax.f32 %v732_v55, %v733_v46  ;;  %v747_v16 = vrot.slane %v746_v7, 4  ;;  %vm489_vm0 = vcmp.gt.s32.totalorder %v3447_v50, 0 }
  0xd9   : > { %v760_v8 = vsel %vm5576_vm3, %v710_v44, -inf  ;;  %v754_v17 = vrot.slane %v753_v57, 4  ;;  %v721_v10 = vrot.slane %v720_v40, 2  ;;  %v728_v12 = vrot.slane %v727_v61, 2  ;;  %vm3650_vm5 = vmxor %vm487_vm14, %vm2996_vm1 }
  0xda   : > { %v761_v3 = vrot.slane %v760_v8, 4  ;;  %v735_v13 = vrot.slane %v734_v5, 2  ;;  %vm490_vm3 = vcmp.gt.s32.totalorder %v3451_v32, 0  ;;  %v741_v29 = vmax.f32 %v739_v56, %v740_v45  ;;  %vm3657_vm7 = vmxor %vm488_vm12, %vm2996_vm1 }
  0xdb   : > { %v748_v43 = vmax.f32 %v746_v7, %v747_v16  ;;  %v755_v28 = vmax.f32 %v753_v57, %v754_v17  ;;  %v715_v63 = vmax.f32 %v713_v37, %v714_v24  ;;  %v722_v54 = vmax.f32 %v720_v40, %v721_v10  ;;  %vm3664_vm14 = vmxor %vm489_vm0, %vm2996_vm1 }
  0xdc   : > { %v762_v44 = vmax.f32 %v760_v8, %v761_v3  ;;  %v729_v19 = vmax.f32 %v727_v61, %v728_v12  ;;  %v736_v55 = vmax.f32 %v734_v5, %v735_v13  ;;  %v742_v20 = vrot.slane %v741_v29, 2  ;;  %vm3675_vm12 = vmxor %vm490_vm3, %vm2996_vm1 }
  0xdd   : > { %v749_v36 = vrot.slane %v748_v43, 2  ;;  %v756_v0 = vrot.slane %v755_v28, 2  ;;  %vm493_vm4 = vcmp.gt.s32.totalorder %v3488_v6, 0  ;;  %v716_v42 = vrot.slane %v715_v63, 1  ;;  %vm3686_vm0 = vmxor %vm491_vm10, %vm2996_vm1 }
  0xde   : > { %v763_v46 = vrot.slane %v762_v44, 2  ;;  %v723_v26 = vrot.slane %v722_v54, 1  ;;  %v730_v56 = vrot.slane %v729_v19, 1  ;;  %v737_v7 = vrot.slane %v736_v55, 1  ;;  %vm3693_vm3 = vmxor %vm492_vm15, %vm2996_vm1 }
  0xdf   : > { %vm494_vm9 = vcmp.gt.s32.totalorder %v3558_v60, 0  ;;  %v743_v57 = vmax.f32 %v741_v29, %v742_v20  ;;  %v750_v8 = vmax.f32 %v748_v43, %v749_v36  ;;  %v757_v37 = vmax.f32 %v755_v28, %v756_v0  ;;  %vm3700_vm10 = vmxor %vm493_vm4, %vm2996_vm1 }
  0xe0   : > { %v764_v40 = vmax.f32 %v762_v44, %v763_v46  ;;  %v717_v61 = vmax.f32 %v715_v63, %v716_v42  ;;  %v724_v5 = vmax.f32 %v722_v54, %v723_v26  ;;  %v731_v45 = vmax.f32 %v729_v19, %v730_v56  ;;  %vm3711_vm15 = vmxor %vm494_vm9, %vm2996_vm1 }
  0xe1   : > { %v738_v16 = vmax.f32 %v736_v55, %v737_v7  ;;  %v744_v17 = vrot.slane %v743_v57, 1  ;;  %v751_v3 = vrot.slane %v750_v8, 1  ;;  %v758_v24 = vrot.slane %v757_v37, 1  ;;  %vm3720_vm4 = vmand %vm695_vm2, %vm3650_vm5 }
  0xe2   : > { %v765_v10 = vrot.slane %v764_v40, 1  ;;  %v767_v12 = vsub.f32 %v3560_v15, %v717_v61  ;;  %v768_v13 = vsub.f32 %v3562_v18, %v724_v5  ;;  %v769_v41 = vsub.f32 %v3564_v34, %v731_v45  ;;  %vm3729_vm9 = vmand %vm696_vm6, %vm3657_vm7 }
  0xe3   : > { %v770_v25 = vsub.f32 %v3566_v4, %v738_v16  ;;  %v745_v42 = vmax.f32 %v743_v57, %v744_v17  ;;  %v752_v29 = vmax.f32 %v750_v8, %v751_v3  ;;  %v759_v43 = vmax.f32 %v757_v37, %v758_v24  ;;  %vm3738_vm2 = vmand %vm697_vm8, %vm3664_vm14 }
  0xe4   : > { %v766_v28 = vmax.f32 %v764_v40, %v765_v10  ;;  %v775_v4 = vmax.f32 %v767_v12, 0.0  ;;  %v776_v18 = vmax.f32 %v768_v13, 0.0  ;;  %v777_v34 = vmax.f32 %v769_v41, 0.0  ;;  %vm3747_vm6 = vmand %vm698_vm11, %vm3675_vm12 }
  0xe5   : > { %v778_v44 = vmax.f32 %v770_v25, 0.0  ;;  %v771_v63 = vsub.f32 %v3570_v33, %v745_v42  ;;  %v772_v54 = vsub.f32 %v3572_v2, %v752_v29  ;;  %v773_v47 = vsub.f32 %v3574_v27, %v759_v43  ;;  %vm3756_vm8 = vmand %vm699_vm13, %vm3686_vm0 }
  0xe6   : > { %v774_v19 = vsub.f32 %v3598_v11, %v766_v28  ;;  %v784_v41 = vadd.f32 %v3625_v14, %v775_v4  ;;  %v785_v50 = vadd.f32 %v3625_v14, %v776_v18  ;;  %v786_v55 = vadd.f32 %v3625_v14, %v777_v34 }
  0xe7   : > { %v787_v33 = vadd.f32 %v3625_v14, %v778_v44  ;;  %v779_v32 = vmax.f32 %v771_v63, 0.0  ;;  %v780_v27 = vmax.f32 %v772_v54, 0.0  ;;  %v781_v11 = vmax.f32 %v773_v47, 0.0 }
  0xe8   : > { %v782_v20 = vmax.f32 %v774_v19, 0.0  ;;  %v800_v0 = vshra.s32 %v784_v41, 31  ;;  %v801_v46 = vshra.s32 %v785_v50, 31  ;;  %v802_v56 = vshra.s32 %v786_v55, 31 }
  0xe9   : > { %v803_v7 = vshra.s32 %v787_v33, 31  ;;  %v788_v57 = vadd.f32 %v3625_v14, %v779_v32  ;;  %v789_v8 = vadd.f32 %v3625_v14, %v780_v27  ;;  %v790_v49 = vadd.f32 %v3625_v14, %v781_v11 }
  0xea   : > { %v791_v37 = vadd.f32 %v3625_v14, %v782_v20  ;;  %v808_v6 = vand.u32 2147483647, %v800_v0  ;;  %v809_v61 = vand.u32 2147483647, %v801_v46  ;;  %v810_v5 = vand.u32 2147483647, %v802_v56 }
  0xeb   : > { %v804_v45 = vshra.s32 %v788_v57, 31  ;;  %v805_v16 = vshra.s32 %v789_v8, 31  ;;  %v806_v17 = vshra.s32 %v790_v49, 31  ;;  %v811_v60 = vand.u32 2147483647, %v803_v7 }
  0xec   : > { %v807_v3 = vshra.s32 %v791_v37, 31  ;;  %v816_v10 = vxor.u32 %v808_v6, %v784_v41  ;;  %v817_v12 = vxor.u32 %v809_v61, %v785_v50  ;;  %v818_v13 = vxor.u32 %v810_v5, %v786_v55 }
  0xed   : > { %v812_v26 = vand.u32 2147483647, %v804_v45  ;;  %v813_v29 = vand.u32 2147483647, %v805_v16  ;;  %v814_v48 = vand.u32 2147483647, %v806_v17  ;;  %v819_v15 = vxor.u32 %v811_v60, %v787_v33 }
  0xee   : > { %v815_v28 = vand.u32 2147483647, %v807_v3  ;;  %v824_v4 = vand.u32 4294967288, %v816_v10  ;;  %v825_v52 = vand.u32 4294967288, %v817_v12  ;;  %v826_v30 = vand.u32 4294967288, %v818_v13 }
  0xef   : > { %v820_v34 = vxor.u32 %v812_v26, %v788_v57  ;;  %v821_v44 = vxor.u32 %v813_v29, %v789_v8  ;;  %v822_v58 = vxor.u32 %v814_v48, %v790_v49  ;;  %v827_v47 = vand.u32 4294967288, %v819_v15 }
  0xf0   : > { %v823_v54 = vxor.u32 %v815_v28, %v791_v37  ;;  %v832_v59 = vor.u32 7, %v824_v4  ;;  %v833_v19 = vor.u32 6, %v825_v52  ;;  %vm5603_vm11 = vcmp.eq.s32.totalorder %v3266_v1, %v3543_v38 }
  0xf1   : > { %vm3765_vm7 = vmand %vm5603_vm11, %vm3693_vm3  ;;  %v828_v41 = vand.u32 4294967288, %v820_v34  ;;  %v829_v50 = vand.u32 4294967288, %v821_v44  ;;  %v830_v62 = vand.u32 4294967288, %v822_v58  ;;  %v834_v55 = vor.u32 5, %v826_v30 }
  0xf2   : > { %vm5606_vm13 = vcmp.eq.s32.totalorder %v3266_v1, %v3551_v9  ;;  %v831_v2 = vand.u32 4294967288, %v823_v54  ;;  %v835_v32 = vor.u32 4, %v827_v47  ;;  %vm5609_vm14 = vcmp.eq.s32.totalorder %v3266_v1, %v3549_v53 }
  0xf3   : > { %vm3774_vm5 = vmand %vm5606_vm13, %vm3711_vm15  ;;  %v863_v38 = vsel %vm3720_vm4, %v832_v59, 2147483648  ;;  %v864_v27 = vsel %vm3729_vm9, %v833_v19, 2147483648  ;;  %v836_v11 = vor.u32 3, %v828_v41  ;;  %v837_v9 = vor.u32 2, %v829_v50 }
  0xf4   : > { %vm861_vm12 = vmand %vm5609_vm14, %vm3700_vm10  ;;  %v838_v20 = vor.u32 1, %v830_v62  ;;  %v865_v36 = vsel %vm3738_vm2, %v834_v55, 2147483648  ;;  %v866_v0 = vsel %vm3747_vm6, %v835_v32, 2147483648  ;;  %v870_v46 = vsel %vm3774_vm5, %v831_v2, 2147483648 }
  0xf5   : > { %vm5610_vm0 = vcmask 15360   ;;  %v867_v7 = vsel %vm3756_vm8, %v836_v11, 2147483648  ;;  %v868_v51 = vsel %vm3765_vm7, %v837_v9, 2147483648  ;;  %v5618_v48 = vmov 0  }
  0xf6   : > { %v871_v53 = vsel %vm5610_vm0, %v863_v38, 2147483648  ;;  %vm5611_vm3 = vmmov %vm5610_vm0  ;;  %v869_v57 = vsel %vm861_vm12, %v838_v20, 2147483648 }
  0xf7   : > { %v872_v56 = vsel %vm5611_vm3, %v864_v27, 2147483648  ;;  %vm5612_vm10 = vmmov %vm5610_vm0 }
  0xf8   : > { %v873_v8 = vsel %vm5612_vm10, %v865_v36, 2147483648  ;;  %vm5613_vm15 = vmmov %vm5610_vm0 }
  0xf9   : > { %v874_v49 = vsel %vm5613_vm15, %v866_v0, 2147483648  ;;  %vm5614_vm4 = vmmov %vm5610_vm0 }
  0xfa   : > { %v875_v37 = vsel %vm5614_vm4, %v867_v7, 2147483648  ;;  %vm5615_vm9 = vmmov %vm5610_vm0 }
  0xfb   : > { %v878_v40 = vsel %vm5615_vm9, %v868_v51, 2147483648  ;;  %vm5616_vm2 = vmmov %vm5610_vm0  ;;  %vm876_vm6 = vcmp.gt.s32.totalorder %v871_v53, %v875_v37 }
  0xfc   : > { %v881_v6 = vsel %vm5616_vm2, %v869_v57, 2147483648  ;;  %vm879_vm11 = vcmp.gt.s32.totalorder %v872_v56, %v878_v40  ;;  %vm5617_vm5 = vmmov %vm5610_vm0  ;;  %v877_v5 = vsel %vm876_vm6, %v871_v53, %v875_v37 }
  0xfd   : > { %vm882_vm13 = vcmp.gt.s32.totalorder %v873_v8, %v881_v6  ;;  %v884_v61 = vsel %vm5617_vm5, %v870_v46, 2147483648  ;;  %v880_v45 = vsel %vm879_vm11, %v872_v56, %v878_v40  ;;  %vm5619_vm6 = vmmov %vm5617_vm5 }
  0xfe   : > { %v883_v16 = vsel %vm882_vm13, %v873_v8, %v881_v6  ;;  %vm885_vm8 = vcmp.gt.s32.totalorder %v874_v49, %v884_v61  ;;  %vm887_vm7 = vcmp.gt.s32.totalorder %v877_v5, %v880_v45  ;;  %vm5620_vm11 = vmmov %vm5617_vm5 }
  0xff   : > { %v886_v17 = vsel %vm885_vm8, %v874_v49, %v884_v61  ;;  %v888_v3 = vsel %vm887_vm7, %v877_v5, %v880_v45  ;;  %vm5621_vm8 = vmmov %vm5617_vm5 }
 0x100   : > { %vm889_vm14 = vcmp.gt.s32.totalorder %v883_v16, %v886_v17  ;;  %vm5622_vm7 = vmmov %vm5617_vm5 }
 0x101   : > { %v890_v24 = vsel %vm889_vm14, %v883_v16, %v886_v17  ;;  %vm5623_vm14 = vmmov %vm5617_vm5 }
 0x102   : > { %vm891_vm12 = vcmp.gt.s32.totalorder %v888_v3, %v890_v24 }
 0x103   : > { %v3805_v60 = vsel %vm891_vm12, %v888_v3, %v890_v24 }
 0x104   : > { %v894_v10 = vand.u32 7, %v3805_v60  ;;  %v896_v12 = vand.u32 4294967288, %v3805_v60  ;;  %vm893_vm0 = vcmp.ge.s32.totalorder %v3805_v60, 0 }
 0x106   : > { %v895_v13 = vsub.s32 7, %v894_v10  ;;  %v897_v42 = vshra.s32 %v896_v12, 31 }
 0x108   : > { %v898_v26 = vand.u32 2147483647, %v897_v42  ;;  %v3813_v29 = vsel %vm893_vm0, %v895_v13, %v2937_v21 }
 0x109   : > { %vm904_vm3 = vcmp.eq.s32.totalorder %v3813_v29, 0  ;;  %vm905_vm10 = vcmp.eq.s32.totalorder %v3813_v29, 1  ;;  %vm906_vm15 = vcmp.eq.s32.totalorder %v3813_v29, 2  ;;  %vm907_vm4 = vcmp.eq.s32.totalorder %v3813_v29, 3 }
 0x10a   : > { %vm908_vm9 = vcmp.eq.s32.totalorder %v3813_v29, 4  ;;  %vm909_vm2 = vcmp.eq.s32.totalorder %v3813_v29, 5  ;;  %v912_v43 = vsel %vm904_vm3, 1, %v5618_v48  ;;  %v913_v28 = vsel %vm905_vm10, 1, %v5618_v48 }
 0x10b   : > { %v914_v15 = vsel %vm906_vm15, 1, %v5618_v48  ;;  %v915_v21 = vsel %vm907_vm4, 1, %v5618_v48  ;;  %v916_v4 = vsel %vm908_vm9, 1, %v5618_v48  ;;  %v917_v52 = vsel %vm909_vm2, 1, %v5618_v48 }
 0x10c   : > { %v899_v18 = vxor.u32 %v898_v26, %v896_v12  ;;  %v920_v34 = vsel %vm5619_vm6, %v912_v43, 2147483648  ;;  %v930_v44 = vsel %vm5620_vm11, %v913_v28, 2147483648  ;;  %vm910_vm13 = vcmp.eq.s32.totalorder %v3813_v29, 6 }
 0x10d   : > { %v921_v58 = vrot.slane %v920_v34, 4  ;;  %v931_v30 = vrot.slane %v930_v44, 4  ;;  %v940_v63 = vsel %vm5617_vm5, %v914_v15, 2147483648  ;;  %v950_v47 = vsel %vm5621_vm8, %v915_v21, 2147483648 }
 0x10e   : > { %v941_v54 = vrot.slane %v940_v63, 4  ;;  %v960_v59 = vsel %vm5622_vm7, %v916_v4, 2147483648  ;;  %v970_v19 = vsel %vm5623_vm14, %v917_v52, 2147483648  ;;  %v951_v25 = vrot.slane %v950_v47, 4 }
 0x10f   : > { %vm922_vm12 = vcmp.gt.s32.totalorder %v920_v34, %v921_v58  ;;  %vm932_vm3 = vcmp.gt.s32.totalorder %v930_v44, %v931_v30  ;;  %v961_v41 = vrot.slane %v960_v59, 4  ;;  %v971_v55 = vrot.slane %v970_v19, 4 }
 0x110   : > { %v923_v50 = vsel %vm922_vm12, %v920_v34, %v921_v58  ;;  %v933_v62 = vsel %vm932_vm3, %v930_v44, %v931_v30  ;;  %vm942_vm10 = vcmp.gt.s32.totalorder %v940_v63, %v941_v54  ;;  %vm952_vm15 = vcmp.gt.s32.totalorder %v950_v47, %v951_v25  ;;  %vm5624_vm3 = vmmov %vm5623_vm14  ;;  %v5632_v34 = vld [vmem:[#allocation5_spill] sm:$0xff]  ;;  %v5637_v30 = vld [vmem:[#allocation6_spill] sm:$0xff] }
 0x111   : > { %v924_v33 = vrot.slane %v923_v50, 2  ;;  %v934_v2 = vrot.slane %v933_v62, 2  ;;  %v943_v32 = vsel %vm942_vm10, %v940_v63, %v941_v54  ;;  %v953_v27 = vsel %vm952_vm15, %v950_v47, %v951_v25  ;;  %v5638_v54 = vld [vmem:[#allocation7_spill] sm:$0xff] }
 0x112   : > { %v944_v38 = vrot.slane %v943_v32, 2  ;;  %vm962_vm4 = vcmp.gt.s32.totalorder %v960_v59, %v961_v41  ;;  %vm972_vm9 = vcmp.gt.s32.totalorder %v970_v19, %v971_v55  ;;  %v954_v11 = vrot.slane %v953_v27, 2 }
 0x113   : > { %vm925_vm2 = vcmp.gt.s32.totalorder %v923_v50, %v924_v33  ;;  %vm935_vm6 = vcmp.gt.s32.totalorder %v933_v62, %v934_v2  ;;  %v963_v9 = vsel %vm962_vm4, %v960_v59, %v961_v41  ;;  %vm911_vm11 = vcmp.eq.s32.totalorder %v3813_v29, 7 }
 0x114   : > { %v926_v20 = vsel %vm925_vm2, %v923_v50, %v924_v33  ;;  %v964_v36 = vrot.slane %v963_v9, 2  ;;  %v936_v0 = vsel %vm935_vm6, %v933_v62, %v934_v2  ;;  %v918_v46 = vsel %vm910_vm13, 1, %v5618_v48 }
 0x115   : > { %v927_v53 = vrot.slane %v926_v20, 1  ;;  %vm945_vm5 = vcmp.gt.s32.totalorder %v943_v32, %v944_v38  ;;  %v973_v56 = vsel %vm972_vm9, %v970_v19, %v971_v55  ;;  %v902_v7 = vadd.f32 %v2941_v22, %v899_v18 }
 0x116   : > { %v919_v51 = vsel %vm911_vm11, 1, %v5618_v48  ;;  %vm955_vm8 = vcmp.gt.s32.totalorder %v953_v27, %v954_v11  ;;  %v937_v57 = vrot.slane %v936_v0, 1  ;;  %vm965_vm7 = vcmp.gt.s32.totalorder %v963_v9, %v964_v36 }
 0x117   : > { %v946_v8 = vsel %vm945_vm5, %v943_v32, %v944_v38  ;;  %v974_v49 = vrot.slane %v973_v56, 2  ;;  %v980_v37 = vsel %vm5623_vm14, %v918_v46, 2147483648  ;;  %vm928_vm12 = vcmp.gt.s32.totalorder %v926_v20, %v927_v53  ;;  %vm5642_vm14 = vmmov %vm5624_vm3 }
 0x118   : > { %v956_v40 = vsel %vm955_vm8, %v953_v27, %v954_v11  ;;  %v981_v6 = vrot.slane %v980_v37, 4  ;;  %v990_v61 = vsel %vm5624_vm3, %v919_v51, 2147483648  ;;  %v3845_v5 = vsel %vm893_vm0, %v902_v7, %v2941_v22  ;;  %vm5640_vm8 = vmmov %vm5624_vm3 }
 0x119   : > { %v966_v45 = vsel %vm965_vm7, %v963_v9, %v964_v36  ;;  %vm975_vm13 = vcmp.gt.s32.totalorder %v973_v56, %v974_v49  ;;  %v991_v16 = vrot.slane %v990_v61, 4  ;;  %vm3847_vm10 = vcmp.gt.s32.totalorder %v936_v0, %v937_v57  ;;  %vm5641_vm7 = vmmov %vm5624_vm3 }
 0x11a   : > { %v947_v3 = vrot.slane %v946_v8, 1  ;;  %v976_v24 = vsel %vm975_vm13, %v973_v56, %v974_v49  ;;  %vm982_vm15 = vcmp.gt.s32.totalorder %v980_v37, %v981_v6  ;;  %v3851_v10 = vsel %vm928_vm12, %v926_v20, %v927_v53  ;;  %vm5643_vm12 = vmmov %vm5624_vm3 }
 0x11b   : > { %v957_v12 = vrot.slane %v956_v40, 1  ;;  %v983_v13 = vsel %vm982_vm15, %v980_v37, %v981_v6  ;;  %vm992_vm4 = vcmp.gt.s32.totalorder %v990_v61, %v991_v16  ;;  %v967_v42 = vrot.slane %v966_v45, 1 }
 0x11c   : > { %v977_v26 = vrot.slane %v976_v24, 1  ;;  %v984_v60 = vrot.slane %v983_v13, 2  ;;  %v993_v22 = vsel %vm992_vm4, %v990_v61, %v991_v16  ;;  %v3855_v28 = vsub.f32 %v3374_v23, %v3845_v5  ;;  %v5627_v23 = vld [vmem:[#allocation4_spill] sm:$0xff] }
 0x11d   : > { %v994_v43 = vrot.slane %v993_v22, 2  ;;  %v3859_v15 = vsub.f32 %v3379_v31, %v3845_v5  ;;  %v3863_v21 = vsub.f32 %v3384_v35, %v3845_v5  ;;  %v3867_v4 = vsel %vm3847_vm10, %v936_v0, %v937_v57  ;;  %vm5644_vm10 = vmmov %vm5624_vm3 }
 0x11e   : > { %vm985_vm0 = vcmp.gt.s32.totalorder %v983_v13, %v984_v60  ;;  %v3871_v52 = vsub.f32 %v3389_v39, %v3845_v5  ;;  %v3875_v18 = vsub.f32 %v5627_v23, %v3845_v5  ;;  %vm3877_vm9 = vcmp.gt.s32.totalorder %v946_v8, %v947_v3 }
 0x11f   : > { %vm3881_vm2 = vcmp.gt.s32.totalorder %v956_v40, %v957_v12  ;;  %vm995_vm6 = vcmp.gt.s32.totalorder %v993_v22, %v994_v43  ;;  %v3887_v44 = vsub.f32 %v5632_v34, %v3845_v5  ;;  %vm3889_vm11 = vcmp.gt.s32.totalorder %v966_v45, %v967_v42 }
 0x120   : > { %vm3893_vm5 = vcmp.gt.s32.totalorder %v976_v24, %v977_v26  ;;  %v3899_v63 = vsub.f32 %v5637_v30, %v3845_v5  ;;  %v3903_v47 = vsub.f32 %v5638_v54, %v3845_v5  ;;  %v3905_v59 = vsel %vm985_vm0, %v983_v13, %v984_v60 }
 0x121   : > { %v1032_v19 = vshra.s32 %v3855_v28, 31  ;;  %v1033_v25 = vshra.s32 %v3859_v15, 31  ;;  %v1034_v41 = vshra.s32 %v3863_v21, 31  ;;  %v3910_v50 = vsel %vm995_vm6, %v993_v22, %v994_v43  ;;  %v5639_v22 = vld [vmem:[#allocation3_spill] sm:$0xff] }
 0x122   : > { %v1035_v62 = vshra.s32 %v3871_v52, 31  ;;  %v1036_v55 = vshra.s32 %v3875_v18, 31  ;;  %v1037_v33 = vshra.s32 %v3887_v44, 31  ;;  %v3917_v2 = vsel %vm3877_vm9, %v946_v8, %v947_v3 }
 0x123   : > { %v3921_v32 = vsel %vm3881_vm2, %v956_v40, %v957_v12  ;;  %v1038_v38 = vshra.s32 %v3899_v63, 31  ;;  %v1039_v27 = vshra.s32 %v3903_v47, 31  ;;  %v3927_v11 = vsel %vm3889_vm11, %v966_v45, %v967_v42 }
 0x124   : > { %v3931_v9 = vsel %vm3893_vm5, %v976_v24, %v977_v26  ;;  %v1040_v20 = vand.u32 2147483647, %v1032_v19  ;;  %v1041_v36 = vand.u32 2147483647, %v1033_v25  ;;  %v987_v0 = vrot.slane %v3905_v59, 1 }
 0x125   : > { %v997_v46 = vrot.slane %v3910_v50, 1  ;;  %v1042_v53 = vand.u32 2147483647, %v1034_v41  ;;  %v1043_v56 = vand.u32 2147483647, %v1035_v62 }
 0x126   : > { %v1044_v7 = vand.u32 2147483647, %v1036_v55  ;;  %v1045_v51 = vand.u32 2147483647, %v1037_v33  ;;  %v1046_v57 = vand.u32 2147483647, %v1038_v38  ;;  %v1048_v8 = vxor.u32 %v1040_v20, %v3855_v28 }
 0x127   : > { %v1047_v49 = vand.u32 2147483647, %v1039_v27  ;;  %v1049_v37 = vxor.u32 %v1041_v36, %v3859_v15  ;;  %v1050_v40 = vxor.u32 %v1042_v53, %v3863_v21  ;;  %v1051_v6 = vxor.u32 %v1043_v56, %v3871_v52 }
 0x128   : > { %v1052_v61 = vxor.u32 %v1044_v7, %v3875_v18  ;;  %v1053_v45 = vxor.u32 %v1045_v51, %v3887_v44  ;;  %v1054_v16 = vxor.u32 %v1046_v57, %v3899_v63  ;;  %v1056_v17 = vand.u32 4294967288, %v1048_v8 }
 0x129   : > { %v1055_v3 = vxor.u32 %v1047_v49, %v3903_v47  ;;  %v1057_v24 = vand.u32 4294967288, %v1049_v37  ;;  %v1058_v12 = vand.u32 4294967288, %v1050_v40  ;;  %v1059_v13 = vand.u32 4294967288, %v1051_v6 }
 0x12a   : > { %v1060_v42 = vand.u32 4294967288, %v1052_v61  ;;  %v1061_v26 = vand.u32 4294967288, %v1053_v45  ;;  %v3943_v60 = vand.u32 4294967288, %v1054_v16  ;;  %v1064_v43 = vor.u32 %v1056_v17, %v5639_v22 }
 0x12b   : > { %v3946_v23 = vand.u32 4294967288, %v1055_v3  ;;  %v1065_v31 = vor.u32 %v1057_v24, %v5639_v22  ;;  %v1066_v35 = vor.u32 %v1058_v12, %v5639_v22  ;;  %v1067_v34 = vor.u32 %v1059_v13, %v5639_v22 }
 0x12c   : > { %v1068_v39 = vor.u32 %v1060_v42, %v5639_v22  ;;  %v1069_v58 = vor.u32 %v1061_v26, %v5639_v22  ;;  %v1070_v30 = vor.u32 %v3943_v60, %v5639_v22  ;;  %v1072_v54 = vsel %vm5640_vm8, %v1064_v43, 2147483648 }
 0x12d   : > { %v1071_v19 = vor.u32 %v3946_v23, %v5639_v22  ;;  %v1073_v25 = vrot.slane %v1072_v54, 4  ;;  %v1082_v41 = vsel %vm5641_vm7, %v1065_v31, 2147483648  ;;  %v1092_v62 = vsel %vm5642_vm14, %v1066_v35, 2147483648 }
 0x12e   : > { %v1083_v55 = vrot.slane %v1082_v41, 4  ;;  %v1093_v33 = vrot.slane %v1092_v62, 4  ;;  %v1102_v38 = vsel %vm5643_vm12, %v1067_v34, 2147483648  ;;  %v1112_v27 = vsel %vm5624_vm3, %v1068_v39, 2147483648 }
 0x12f   : > { %vm1074_vm13 = vcmp.gt.s32.totalorder %v1072_v54, %v1073_v25  ;;  %v1103_v20 = vrot.slane %v1102_v38, 4  ;;  %v1113_v36 = vrot.slane %v1112_v27, 4  ;;  %v1122_v53 = vsel %vm5644_vm10, %v1069_v58, 2147483648 }
 0x130   : > { %v1075_v56 = vsel %vm1074_vm13, %v1072_v54, %v1073_v25  ;;  %vm1084_vm15 = vcmp.gt.s32.totalorder %v1082_v41, %v1083_v55  ;;  %vm1094_vm4 = vcmp.gt.s32.totalorder %v1092_v62, %v1093_v33  ;;  %v1123_v7 = vrot.slane %v1122_v53, 4 }
 0x131   : > { %v1076_v51 = vrot.slane %v1075_v56, 2  ;;  %v1085_v57 = vsel %vm1084_vm15, %v1082_v41, %v1083_v55  ;;  %v1095_v8 = vsel %vm1094_vm4, %v1092_v62, %v1093_v33  ;;  %vm1104_vm0 = vcmp.gt.s32.totalorder %v1102_v38, %v1103_v20 }
 0x132   : > { %v1086_v49 = vrot.slane %v1085_v57, 2  ;;  %v1096_v37 = vrot.slane %v1095_v8, 2  ;;  %v1105_v40 = vsel %vm1104_vm0, %v1102_v38, %v1103_v20  ;;  %vm1114_vm9 = vcmp.gt.s32.totalorder %v1112_v27, %v1113_v36 }
 0x133   : > { %vm1077_vm2 = vcmp.gt.s32.totalorder %v1075_v56, %v1076_v51  ;;  %v1106_v6 = vrot.slane %v1105_v40, 2  ;;  %v1115_v61 = vsel %vm1114_vm9, %v1112_v27, %v1113_v36  ;;  %vm3963_vm6 = vcmp.gt.s32.totalorder %v1122_v53, %v1123_v7 }
 0x134   : > { %v1078_v16 = vsel %vm1077_vm2, %v1075_v56, %v1076_v51  ;;  %vm1087_vm11 = vcmp.gt.s32.totalorder %v1085_v57, %v1086_v49  ;;  %vm1097_vm5 = vcmp.gt.s32.totalorder %v1095_v8, %v1096_v37  ;;  %v1116_v17 = vrot.slane %v1115_v61, 2 }
 0x135   : > { %v1079_v3 = vrot.slane %v1078_v16, 1  ;;  %v1088_v24 = vsel %vm1087_vm11, %v1085_v57, %v1086_v49  ;;  %v1098_v12 = vsel %vm1097_vm5, %v1095_v8, %v1096_v37  ;;  %vm1107_vm8 = vcmp.gt.s32.totalorder %v1105_v40, %v1106_v6 }
 0x136   : > { %v1089_v13 = vrot.slane %v1088_v24, 1  ;;  %v1099_v42 = vrot.slane %v1098_v12, 1  ;;  %v1108_v26 = vsel %vm1107_vm8, %v1105_v40, %v1106_v6  ;;  %vm1117_vm7 = vcmp.gt.s32.totalorder %v1115_v61, %v1116_v17 }
 0x137   : > { %vm1080_vm14 = vcmp.gt.s32.totalorder %v1078_v16, %v1079_v3  ;;  %v1109_v60 = vrot.slane %v1108_v26, 1  ;;  %v1118_v43 = vsel %vm1117_vm7, %v1115_v61, %v1116_v17  ;;  %v1125_v23 = vsel %vm3963_vm6, %v1122_v53, %v1123_v7 }
 0x138   : > { %v3969_v31 = vsel %vm1080_vm14, %v1078_v16, %v1079_v3  ;;  %vm1090_vm12 = vcmp.gt.s32.totalorder %v1088_v24, %v1089_v13  ;;  %vm1100_vm3 = vcmp.gt.s32.totalorder %v1098_v12, %v1099_v42  ;;  %v1119_v35 = vrot.slane %v1118_v43, 1 }
 0x139   : > { %v3971_v34 = vsel %vm1090_vm12, %v1088_v24, %v1089_v13  ;;  %v3973_v39 = vsel %vm1100_vm3, %v1098_v12, %v1099_v42  ;;  %vm1110_vm13 = vcmp.gt.s32.totalorder %v1108_v26, %v1109_v60  ;;  %v1126_v58 = vrot.slane %v1125_v23, 2 }
 0x13a   : > { %v3975_v54 = vsel %vm1110_vm13, %v1108_v26, %v1109_v60  ;;  %vm1120_vm10 = vcmp.gt.s32.totalorder %v1118_v43, %v1119_v35  ;;  %vm5647_vm15 = vcmask 15360   ;;  %v1152_v27 = vand.u32 7, %v3969_v31 }
 0x13b   : > { %v1132_v25 = vsel %vm5647_vm15, %v1070_v30, 2147483648  ;;  %vm5648_vm4 = vmmov %vm5647_vm15  ;;  %v3979_v62 = vsel %vm1120_vm10, %v1118_v43, %v1119_v35  ;;  %vm1127_vm0 = vcmp.gt.s32.totalorder %v1125_v23, %v1126_v58  ;;  %v1153_v20 = vand.u32 7, %v3971_v34 }
 0x13c   : > { %v1142_v41 = vsel %vm5648_vm4, %v1071_v19, 2147483648  ;;  %v1133_v55 = vrot.slane %v1132_v25, 4  ;;  %v1128_v38 = vsel %vm1127_vm0, %v1125_v23, %v1126_v58  ;;  %v1154_v36 = vand.u32 7, %v3973_v39 }
 0x13d   : > { %v1143_v33 = vrot.slane %v1142_v41, 4  ;;  %vm3987_vm9 = vcmp.gt.s32.totalorder %v3905_v59, %v987_v0  ;;  %v1129_v30 = vrot.slane %v1128_v38, 1  ;;  %v1155_v19 = vand.u32 7, %v3975_v54 }
 0x13e   : > { %vm1134_vm2 = vcmp.gt.s32.totalorder %v1132_v25, %v1133_v55  ;;  %v1156_v51 = vand.u32 7, %v3979_v62  ;;  %v3993_v57 = vsub.s32 7, %v1152_v27  ;;  %vm3998_vm11 = vcmp.gt.s32.totalorder %v3910_v50, %v997_v46 }
 0x13f   : > { %vm1144_vm6 = vcmp.gt.s32.totalorder %v1142_v41, %v1143_v33  ;;  %v1135_v56 = vsel %vm1134_vm2, %v1132_v25, %v1133_v55  ;;  %vm1130_vm5 = vcmp.gt.s32.totalorder %v1128_v38, %v1129_v30  ;;  %v4002_v40 = vsub.s32 7, %v1153_v20 }
 0x140   : > { %v1145_v7 = vsel %vm1144_vm6, %v1142_v41, %v1143_v33  ;;  %v1136_v49 = vrot.slane %v1135_v56, 2  ;;  %v1131_v6 = vsel %vm1130_vm5, %v1128_v38, %v1129_v30  ;;  %v4004_v61 = vsub.s32 7, %v1154_v36 }
 0x141   : > { %v1146_v37 = vrot.slane %v1145_v7, 2  ;;  %v4006_v45 = vsub.s32 7, %v1155_v19  ;;  %v4008_v16 = vsub.s32 7, %v1156_v51  ;;  %v1157_v17 = vand.u32 7, %v1131_v6 }
 0x142   : > { %vm1137_vm8 = vcmp.gt.s32.totalorder %v1135_v56, %v1136_v49  ;;  %v1168_v3 = vand.u32 4294967288, %v3969_v31  ;;  %v1169_v13 = vand.u32 4294967288, %v3971_v34  ;;  %v1170_v42 = vand.u32 4294967288, %v3973_v39 }
 0x143   : > { %vm1147_vm7 = vcmp.gt.s32.totalorder %v1145_v7, %v1146_v37  ;;  %v1138_v24 = vsel %vm1137_vm8, %v1135_v56, %v1136_v49  ;;  %v4013_v43 = vsub.s32 7, %v1157_v17  ;;  %v1171_v23 = vand.u32 4294967288, %v3975_v54 }
 0x144   : > { %v1148_v12 = vsel %vm1147_vm7, %v1145_v7, %v1146_v37  ;;  %v1139_v26 = vrot.slane %v1138_v24, 1  ;;  %v1172_v35 = vand.u32 4294967288, %v3979_v62  ;;  %v1173_v58 = vand.u32 4294967288, %v1131_v6 }
 0x145   : > { %v1149_v60 = vrot.slane %v1148_v12, 1  ;;  %v1176_v25 = vshra.s32 %v1168_v3, 31  ;;  %v1177_v41 = vshra.s32 %v1169_v13, 31  ;;  %v1178_v31 = vshra.s32 %v1170_v42, 31 }
 0x146   : > { %vm1140_vm14 = vcmp.gt.s32.totalorder %v1138_v24, %v1139_v26  ;;  %v1179_v55 = vshra.s32 %v1171_v23, 31  ;;  %v1180_v34 = vshra.s32 %v1172_v35, 31  ;;  %v1181_v27 = vshra.s32 %v1173_v58, 31 }
 0x147   : > { %vm1150_vm12 = vcmp.gt.s32.totalorder %v1148_v12, %v1149_v60  ;;  %v1141_v33 = vsel %vm1140_vm14, %v1138_v24, %v1139_v26  ;;  %v4022_v54 = vsel %vm3987_vm9, %v3905_v59, %v987_v0  ;;  %v1184_v62 = vand.u32 2147483647, %v1176_v25 }
 0x148   : > { %v1151_v38 = vsel %vm1150_vm12, %v1148_v12, %v1149_v60  ;;  %v1158_v39 = vand.u32 7, %v1141_v33  ;;  %v1174_v36 = vand.u32 4294967288, %v1141_v33  ;;  %v1185_v19 = vand.u32 2147483647, %v1177_v41 }
 0x149   : > { %v1159_v20 = vand.u32 7, %v1151_v38  ;;  %v1175_v30 = vand.u32 4294967288, %v1151_v38  ;;  %v1186_v56 = vand.u32 2147483647, %v1178_v31  ;;  %v4033_v6 = vsel %vm3998_vm11, %v3910_v50, %v997_v46 }
 0x14a   : > { %v4024_v7 = vsub.s32 7, %v1158_v39  ;;  %v1182_v49 = vshra.s32 %v1174_v36, 31  ;;  %v1187_v17 = vand.u32 2147483647, %v1179_v55  ;;  %v1188_v53 = vand.u32 2147483647, %v1180_v34 }
 0x14b   : > { %v4026_v51 = vsub.s32 7, %v1159_v20  ;;  %v1183_v37 = vshra.s32 %v1175_v30, 31  ;;  %v1189_v59 = vand.u32 2147483647, %v1181_v27  ;;  %v4035_v12 = vxor.u32 %v1184_v62, %v1168_v3 }
 0x14c   : > { %v1190_v0 = vand.u32 2147483647, %v1182_v49  ;;  %vm1208_vm3 = vcmp.eq.s32.totalorder %v3266_v1, %v3993_v57  ;;  %v4039_v26 = vxor.u32 %v1185_v19, %v1169_v13  ;;  %v4041_v60 = vxor.u32 %v1186_v56, %v1170_v42 }
 0x14d   : > { %v1191_v24 = vand.u32 2147483647, %v1183_v37  ;;  %v4043_v25 = vxor.u32 %v1187_v17, %v1171_v23  ;;  %vm1209_vm13 = vcmp.eq.s32.totalorder %v3266_v1, %v4002_v40  ;;  %v4047_v50 = vxor.u32 %v1188_v53, %v1172_v35 }
 0x14e   : > { %v4049_v46 = vxor.u32 %v1189_v59, %v1173_v58  ;;  %vm1210_vm10 = vcmp.eq.s32.totalorder %v3266_v1, %v4004_v61  ;;  %vm1211_vm15 = vcmp.eq.s32.totalorder %v3266_v1, %v4006_v45  ;;  %vm1212_vm4 = vcmp.eq.s32.totalorder %v3266_v1, %v4008_v16 }
 0x14f   : > { %vm5460_vm0 = vcmp.eq.s32.totalorder %v3266_v1, %v4013_v43  ;;  %vm5458_vm9 = vcmp.eq.s32.totalorder %v3266_v1, %v4024_v7  ;;  %vm5459_vm2 = vcmp.eq.s32.totalorder %v3266_v1, %v4026_v51  ;;  %v4063_v8 = vxor.u32 %v1190_v0, %v1174_v36 }
 0x150   : > { %v1216_v3 = vsel %vm1208_vm3, -1e+30, %v3855_v28  ;;  %v1217_v13 = vsel %vm1209_vm13, -1e+30, %v3859_v15  ;;  %v1218_v42 = vsel %vm1210_vm10, -1e+30, %v3863_v21  ;;  %v4077_v23 = vxor.u32 %v1191_v24, %v1175_v30 }
 0x151   : > { %v1219_v35 = vsel %vm1211_vm15, -1e+30, %v3871_v52  ;;  %v1220_v28 = vsel %vm1212_vm4, -1e+30, %v3875_v18  ;;  %v1221_v15 = vsel %vm5460_vm0, -1e+30, %v3887_v44 }
 0x152   : > { %v1222_v21 = vsel %vm5458_vm9, -1e+30, %v3899_v63  ;;  %v1223_v52 = vsel %vm5459_vm2, -1e+30, %v3903_v47  ;;  %vm5653_vm6 = vcmask 15360   ;;  %vm1000_vm12 = vcmp.gt.s32.totalorder %v3851_v10, 0 }
 0x153   : > { %v1224_v58 = vsel %vm5653_vm6, %v1216_v3, -inf  ;;  %vm5654_vm11 = vmmov %vm5653_vm6  ;;  %vm1007_vm9 = vcmp.gt.s32.totalorder %v4033_v6, 0 }
 0x154   : > { %v1231_v41 = vsel %vm5654_vm11, %v1217_v13, -inf  ;;  %v1225_v18 = vrot.slane %v1224_v58, 4  ;;  %vm5655_vm5 = vmmov %vm5653_vm6 }
 0x155   : > { %v1232_v31 = vrot.slane %v1231_v41, 4  ;;  %v1238_v55 = vsel %vm5655_vm5, %v1218_v42, -inf  ;;  %vm5656_vm8 = vmmov %vm5655_vm5 }
 0x156   : > { %v1245_v44 = vsel %vm5656_vm8, %v1219_v35, -inf  ;;  %v1239_v33 = vrot.slane %v1238_v55, 4  ;;  %vm5657_vm7 = vmmov %vm5655_vm5  ;;  %v1226_v27 = vmax.f32 %v1224_v58, %v1225_v18  ;;  %vm1002_vm8 = vcmp.gt.s32.totalorder %v3917_v2, 0 }
 0x157   : > { %v1246_v38 = vrot.slane %v1245_v44, 4  ;;  %v1252_v34 = vsel %vm5657_vm7, %v1220_v28, -inf  ;;  %vm5658_vm14 = vmmov %vm5655_vm5  ;;  %v1233_v39 = vmax.f32 %v1231_v41, %v1232_v31  ;;  %vm1003_vm7 = vcmp.gt.s32.totalorder %v3921_v32, 0 }
 0x158   : > { %v1259_v63 = vsel %vm5658_vm14, %v1221_v15, -inf  ;;  %v1253_v20 = vrot.slane %v1252_v34, 4  ;;  %v1240_v36 = vmax.f32 %v1238_v55, %v1239_v33  ;;  %vm5659_vm6 = vmmov %vm5655_vm5  ;;  %v1227_v56 = vrot.slane %v1226_v27, 2 }
 0x159   : > { %v1260_v47 = vrot.slane %v1259_v63, 4  ;;  %v1247_v30 = vmax.f32 %v1245_v44, %v1246_v38  ;;  %v1266_v62 = vsel %vm5659_vm6, %v1222_v21, -inf  ;;  %vm5660_vm11 = vmmov %vm5655_vm5  ;;  %vm1001_vm5 = vcmp.gt.s32.totalorder %v3867_v4, 0 }
 0x15a   : > { %v1273_v19 = vsel %vm5660_vm11, %v1223_v52, -inf  ;;  %v1234_v49 = vrot.slane %v1233_v39, 2  ;;  %v1254_v37 = vmax.f32 %v1252_v34, %v1253_v20  ;;  %v1241_v53 = vrot.slane %v1240_v36, 2  ;;  %vm4122_vm2 = vmxor %vm1000_vm12, %vm2996_vm1 }
 0x15b   : > { %v1261_v17 = vmax.f32 %v1259_v63, %v1260_v47  ;;  %v1248_v59 = vrot.slane %v1247_v30, 2  ;;  %v1267_v0 = vrot.slane %v1266_v62, 4  ;;  %v1274_v24 = vrot.slane %v1273_v19, 4  ;;  %vm4131_vm0 = vmxor %vm1001_vm5, %vm2996_vm1 }
 0x15c   : > { %v1228_v3 = vmax.f32 %v1226_v27, %v1227_v56  ;;  %v1235_v13 = vmax.f32 %v1233_v39, %v1234_v49  ;;  %v1255_v42 = vrot.slane %v1254_v37, 2  ;;  %vm1004_vm14 = vcmp.gt.s32.totalorder %v3927_v11, 0  ;;  %vm4138_vm12 = vmxor %vm1002_vm8, %vm2996_vm1 }
 0x15d   : > { %v1262_v35 = vrot.slane %v1261_v17, 2  ;;  %v1242_v28 = vmax.f32 %v1240_v36, %v1241_v53  ;;  %v1249_v15 = vmax.f32 %v1247_v30, %v1248_v59  ;;  %v1268_v21 = vmax.f32 %v1266_v62, %v1267_v0  ;;  %vm4147_vm5 = vmxor %vm1003_vm7, %vm2996_vm1 }
 0x15e   : > { %v1275_v52 = vmax.f32 %v1273_v19, %v1274_v24  ;;  %vm1005_vm6 = vcmp.gt.s32.totalorder %v3931_v9, 0  ;;  %v1229_v58 = vrot.slane %v1228_v3, 1  ;;  %v1236_v41 = vrot.slane %v1235_v13, 1  ;;  %vm4158_vm8 = vmxor %vm1004_vm14, %vm2996_vm1 }
 0x15f   : > { %v1256_v18 = vmax.f32 %v1254_v37, %v1255_v42  ;;  %v1263_v31 = vmax.f32 %v1261_v17, %v1262_v35  ;;  %vm1006_vm11 = vcmp.gt.s32.totalorder %v4022_v54, 0  ;;  %v1243_v55 = vrot.slane %v1242_v28, 1  ;;  %vm4167_vm7 = vmxor %vm1005_vm6, %vm2996_vm1 }
 0x160   : > { %v1250_v44 = vrot.slane %v1249_v15, 1  ;;  %v1269_v33 = vrot.slane %v1268_v21, 2  ;;  %v1276_v38 = vrot.slane %v1275_v52, 2  ;;  %v1230_v34 = vmax.f32 %v1228_v3, %v1229_v58  ;;  %vm4174_vm14 = vmxor %vm1006_vm11, %vm2996_vm1 }
 0x161   : > { %v1237_v63 = vmax.f32 %v1235_v13, %v1236_v41  ;;  %v1257_v27 = vrot.slane %v1256_v18, 1  ;;  %v1264_v39 = vrot.slane %v1263_v31, 1  ;;  %v1244_v20 = vmax.f32 %v1242_v28, %v1243_v55  ;;  %vm4181_vm6 = vmxor %vm1007_vm9, %vm2996_vm1 }
 0x162   : > { %v1251_v47 = vmax.f32 %v1249_v15, %v1250_v44  ;;  %v1270_v36 = vmax.f32 %v1268_v21, %v1269_v33  ;;  %v1277_v30 = vmax.f32 %v1275_v52, %v1276_v38  ;;  %v1280_v56 = vsub.f32 %v4035_v12, %v1230_v34  ;;  %vm4192_vm11 = vmand %vm1208_vm3, %vm4122_vm2 }
 0x163   : > { %v1258_v62 = vmax.f32 %v1256_v18, %v1257_v27  ;;  %v1265_v19 = vmax.f32 %v1263_v31, %v1264_v39  ;;  %v1281_v49 = vsub.f32 %v4039_v26, %v1237_v63  ;;  %v1282_v53 = vsub.f32 %v4041_v60, %v1244_v20  ;;  %vm4201_vm9 = vmand %vm1209_vm13, %vm4131_vm0 }
 0x164   : > { %v1271_v37 = vrot.slane %v1270_v36, 1  ;;  %v1278_v17 = vrot.slane %v1277_v30, 1  ;;  %v1283_v59 = vsub.f32 %v4043_v25, %v1251_v47  ;;  %v1288_v12 = vmax.f32 %v1280_v56, 0.0  ;;  %vm4210_vm3 = vmand %vm1210_vm10, %vm4138_vm12 }
 0x165   : > { %v1284_v24 = vsub.f32 %v4047_v50, %v1258_v62  ;;  %v1285_v3 = vsub.f32 %v4049_v46, %v1265_v19  ;;  %v1289_v13 = vmax.f32 %v1281_v49, 0.0  ;;  %v1290_v10 = vmax.f32 %v1282_v53, 0.0  ;;  %vm4219_vm13 = vmand %vm1211_vm15, %vm4147_vm5 }
 0x166   : > { %v1272_v60 = vmax.f32 %v1270_v36, %v1271_v37  ;;  %v1279_v25 = vmax.f32 %v1277_v30, %v1278_v17  ;;  %v1291_v42 = vmax.f32 %v1283_v59, 0.0  ;;  %v1296_v28 = vadd.f32 %v1288_v12, %v3625_v14  ;;  %vm4228_vm10 = vmand %vm1212_vm4, %vm4158_vm8 }
 0x167   : > { %v1292_v46 = vmax.f32 %v1284_v24, 0.0  ;;  %v1293_v35 = vmax.f32 %v1285_v3, 0.0  ;;  %v1297_v4 = vadd.f32 %v1289_v13, %v3625_v14  ;;  %v1298_v52 = vadd.f32 %v1290_v10, %v3625_v14 }
 0x168   : > { %v1286_v21 = vsub.f32 %v4063_v8, %v1272_v60  ;;  %v1287_v2 = vsub.f32 %v4077_v23, %v1279_v25  ;;  %v1299_v58 = vadd.f32 %v1291_v42, %v3625_v14  ;;  %v1312_v31 = vshra.s32 %v1296_v28, 31 }
 0x169   : > { %v1300_v32 = vadd.f32 %v1292_v46, %v3625_v14  ;;  %v1301_v18 = vadd.f32 %v1293_v35, %v3625_v14  ;;  %v1313_v55 = vshra.s32 %v1297_v4, 31  ;;  %v1314_v11 = vshra.s32 %v1298_v52, 31 }
 0x16a   : > { %v1294_v23 = vmax.f32 %v1286_v21, 0.0  ;;  %v1295_v44 = vmax.f32 %v1287_v2, 0.0  ;;  %v1315_v33 = vshra.s32 %v1299_v58, 31  ;;  %v1320_v27 = vand.u32 2147483647, %v1312_v31 }
 0x16b   : > { %v1316_v34 = vshra.s32 %v1300_v32, 31  ;;  %v1317_v63 = vshra.s32 %v1301_v18, 31  ;;  %v1321_v39 = vand.u32 2147483647, %v1313_v55  ;;  %v1322_v54 = vand.u32 2147483647, %v1314_v11 }
 0x16c   : > { %v1302_v20 = vadd.f32 %v1294_v23, %v3625_v14  ;;  %v1303_v47 = vadd.f32 %v1295_v44, %v3625_v14  ;;  %v1323_v36 = vand.u32 2147483647, %v1315_v33  ;;  %v1328_v19 = vxor.u32 %v1320_v27, %v1296_v28 }
 0x16d   : > { %v1324_v30 = vand.u32 2147483647, %v1316_v34  ;;  %v1325_v62 = vand.u32 2147483647, %v1317_v63  ;;  %v1329_v56 = vxor.u32 %v1321_v39, %v1297_v4  ;;  %v1330_v17 = vxor.u32 %v1322_v54, %v1298_v52 }
 0x16e   : > { %v1318_v49 = vshra.s32 %v1302_v20, 31  ;;  %v1319_v37 = vshra.s32 %v1303_v47, 31  ;;  %v1331_v53 = vxor.u32 %v1323_v36, %v1299_v58  ;;  %v1336_v57 = vand.u32 4294967288, %v1328_v19 }
 0x16f   : > { %v1332_v0 = vxor.u32 %v1324_v30, %v1300_v32  ;;  %v1333_v24 = vxor.u32 %v1325_v62, %v1301_v18  ;;  %v1337_v3 = vand.u32 4294967288, %v1329_v56  ;;  %v1338_v40 = vand.u32 4294967288, %v1330_v17 }
 0x170   : > { %v1326_v13 = vand.u32 2147483647, %v1318_v49  ;;  %v1327_v26 = vand.u32 2147483647, %v1319_v37  ;;  %v1339_v60 = vand.u32 4294967288, %v1331_v53  ;;  %v1344_v61 = vor.u32 7, %v1336_v57 }
 0x171   : > { %v1340_v10 = vand.u32 4294967288, %v1332_v0  ;;  %v1341_v42 = vand.u32 4294967288, %v1333_v24  ;;  %v1345_v50 = vor.u32 6, %v1337_v3  ;;  %v1346_v45 = vor.u32 5, %v1338_v40 }
 0x172   : > { %v1334_v35 = vxor.u32 %v1326_v13, %v1302_v20  ;;  %v1335_v28 = vxor.u32 %v1327_v26, %v1303_v47  ;;  %v1347_v4 = vor.u32 4, %v1339_v60  ;;  %vm5687_vm15 = vcmp.eq.s32.totalorder %v3266_v1, %v4013_v43 }
 0x173   : > { %vm1372_vm0 = vmand %vm5687_vm15, %vm4167_vm7  ;;  %v1348_v15 = vor.u32 3, %v1340_v10  ;;  %v1349_v21 = vor.u32 2, %v1341_v42  ;;  %vm5688_vm4 = vcmp.eq.s32.totalorder %v3266_v1, %v4026_v51  ;;  %v1375_v2 = vsel %vm4192_vm11, %v1344_v61, 2147483648 }
 0x174   : > { %vm4242_vm2 = vmand %vm5688_vm4, %vm4181_vm6  ;;  %v1376_v52 = vsel %vm4201_vm9, %v1345_v50, 2147483648  ;;  %v1342_v58 = vand.u32 4294967288, %v1334_v35  ;;  %v1343_v43 = vand.u32 4294967288, %v1335_v28  ;;  %v1377_v41 = vsel %vm4210_vm3, %v1346_v45, 2147483648 }
 0x175   : > { %v1378_v32 = vsel %vm4219_vm13, %v1347_v4, 2147483648  ;;  %vm5691_vm12 = vcmp.eq.s32.totalorder %v3266_v1, %v4024_v7  ;;  %v1379_v51 = vsel %vm4228_vm10, %v1348_v15, 2147483648  ;;  %v1380_v18 = vsel %vm1372_vm0, %v1349_v21, 2147483648 }
 0x176   : > { %vm1373_vm5 = vmand %vm5691_vm12, %vm4174_vm14  ;;  %vm5692_vm8 = vcmask 15360   ;;  %v1350_v8 = vor.u32 1, %v1342_v58  ;;  %v1382_v23 = vsel %vm4242_vm2, %v1343_v43, 2147483648 }
 0x177   : > { %v1383_v31 = vsel %vm5692_vm8, %v1375_v2, 2147483648  ;;  %vm5693_vm7 = vmmov %vm5692_vm8 }
 0x178   : > { %v1384_v55 = vsel %vm5693_vm7, %v1376_v52, 2147483648  ;;  %vm5694_vm6 = vmmov %vm5693_vm7  ;;  %v1381_v34 = vsel %vm1373_vm5, %v1350_v8, 2147483648 }
 0x179   : > { %v1386_v44 = vsel %vm5694_vm6, %v1378_v32, 2147483648  ;;  %vm5695_vm11 = vmmov %vm5694_vm6 }
 0x17a   : > { %v1385_v11 = vsel %vm5695_vm11, %v1377_v41, 2147483648  ;;  %vm5696_vm9 = vmmov %vm5694_vm6 }
 0x17b   : > { %v1387_v33 = vsel %vm5696_vm9, %v1379_v51, 2147483648  ;;  %vm5697_vm3 = vmmov %vm5694_vm6 }
 0x17c   : > { %v1390_v7 = vsel %vm5697_vm3, %v1380_v18, 2147483648  ;;  %vm5698_vm14 = vmmov %vm5697_vm3  ;;  %vm1388_vm13 = vcmp.gt.s32.totalorder %v1383_v31, %v1387_v33 }
 0x17d   : > { %v1396_v38 = vsel %vm5698_vm14, %v1382_v23, 2147483648  ;;  %vm1391_vm10 = vcmp.gt.s32.totalorder %v1384_v55, %v1390_v7  ;;  %v1389_v63 = vsel %vm1388_vm13, %v1383_v31, %v1387_v33  ;;  %vm5699_vm0 = vmmov %vm5697_vm3 }
 0x17e   : > { %vm1397_vm15 = vcmp.gt.s32.totalorder %v1386_v44, %v1396_v38  ;;  %v1392_v27 = vsel %vm1391_vm10, %v1384_v55, %v1390_v7  ;;  %v1393_v39 = vsel %vm5699_vm0, %v1381_v34, 2147483648  ;;  %vm5700_vm13 = vmmov %vm5699_vm0 }
 0x17f   : > { %v1398_v9 = vsel %vm1397_vm15, %v1386_v44, %v1396_v38  ;;  %vm1394_vm4 = vcmp.gt.s32.totalorder %v1385_v11, %v1393_v39  ;;  %vm1399_vm2 = vcmp.gt.s32.totalorder %v1389_v63, %v1392_v27  ;;  %vm5701_vm10 = vmmov %vm5699_vm0 }
 0x180   : > { %v1395_v20 = vsel %vm1394_vm4, %v1385_v11, %v1393_v39  ;;  %v1400_v47 = vsel %vm1399_vm2, %v1389_v63, %v1392_v27  ;;  %vm5702_vm4 = vmmov %vm5699_vm0 }
 0x181   : > { %vm1401_vm12 = vcmp.gt.s32.totalorder %v1395_v20, %v1398_v9  ;;  %vm5703_vm2 = vmmov %vm5699_vm0 }
 0x182   : > { %v1402_v54 = vsel %vm1401_vm12, %v1395_v20, %v1398_v9  ;;  %vm5704_vm12 = vmmov %vm5699_vm0 }
 0x183   : > { %vm1403_vm8 = vcmp.gt.s32.totalorder %v1400_v47, %v1402_v54 }
 0x184   : > { %v4271_v36 = vsel %vm1403_vm8, %v1400_v47, %v1402_v54 }
 0x185   : > { %v1406_v30 = vand.u32 7, %v4271_v36  ;;  %v1408_v62 = vand.u32 4294967288, %v4271_v36  ;;  %vm1405_vm5 = vcmp.ge.s32.totalorder %v4271_v36, 0 }
 0x187   : > { %v1407_v19 = vsub.s32 7, %v1406_v30  ;;  %v1409_v56 = vshra.s32 %v1408_v62, 31 }
 0x189   : > { %v1410_v6 = vand.u32 2147483647, %v1409_v56  ;;  %v4279_v49 = vsel %vm1405_vm5, %v1407_v19, %v3813_v29  ;;  %v4322_v56 = vld [vmem:[%s5443_s0] sm:$0xff] }
 0x18a   : > { %vm1416_vm7 = vcmp.eq.s32.totalorder %v4279_v49, 0  ;;  %vm1417_vm6 = vcmp.eq.s32.totalorder %v4279_v49, 1  ;;  %vm1418_vm11 = vcmp.eq.s32.totalorder %v4279_v49, 2  ;;  %vm1419_vm9 = vcmp.eq.s32.totalorder %v4279_v49, 3 }
 0x18b   : > { %vm1420_vm3 = vcmp.eq.s32.totalorder %v4279_v49, 4  ;;  %vm1421_vm14 = vcmp.eq.s32.totalorder %v4279_v49, 5  ;;  %v1424_v37 = vsel %vm1416_vm7, 1, %v5618_v48  ;;  %v1425_v17 = vsel %vm1417_vm6, 1, %v5618_v48 }
 0x18c   : > { %v1426_v53 = vsel %vm1418_vm11, 1, %v5618_v48  ;;  %v1427_v29 = vsel %vm1419_vm9, 1, %v5618_v48  ;;  %v1428_v59 = vsel %vm1420_vm3, 1, %v5618_v48  ;;  %v1429_v0 = vsel %vm1421_vm14, 1, %v5618_v48 }
 0x18d   : > { %v1411_v24 = vxor.u32 %v1410_v6, %v1408_v62  ;;  %v1432_v57 = vsel %vm5700_vm13, %v1424_v37, 2147483648  ;;  %v1442_v3 = vsel %vm5701_vm10, %v1425_v17, 2147483648  ;;  %vm1422_vm15 = vcmp.eq.s32.totalorder %v4279_v49, 6  ;;  %v4331_v37 = vld [vmem:[%s5443_s0 + $0x8] sm:$0xff] }
 0x18e   : > { %v1433_v12 = vrot.slane %v1432_v57, 4  ;;  %v1443_v13 = vrot.slane %v1442_v3, 4  ;;  %v1452_v26 = vsel %vm5699_vm0, %v1426_v53, 2147483648  ;;  %v1462_v60 = vsel %vm5702_vm4, %v1427_v29, 2147483648  ;;  %v4340_v53 = vld [vmem:[%s5443_s0 + $0x10] sm:$0xff] }
 0x18f   : > { %v1453_v40 = vrot.slane %v1452_v26, 4  ;;  %v1472_v25 = vsel %vm5703_vm2, %v1428_v59, 2147483648  ;;  %v1482_v10 = vsel %vm5704_vm12, %v1429_v0, 2147483648  ;;  %v1463_v42 = vrot.slane %v1462_v60, 4 }
 0x190   : > { %vm1434_vm8 = vcmp.gt.s32.totalorder %v1432_v57, %v1433_v12  ;;  %vm1444_vm7 = vcmp.gt.s32.totalorder %v1442_v3, %v1443_v13  ;;  %v1473_v61 = vrot.slane %v1472_v25, 4  ;;  %v1483_v35 = vrot.slane %v1482_v10, 4 }
 0x191   : > { %v1435_v50 = vsel %vm1434_vm8, %v1432_v57, %v1433_v12  ;;  %v1445_v46 = vsel %vm1444_vm7, %v1442_v3, %v1443_v13  ;;  %vm1454_vm6 = vcmp.gt.s32.totalorder %v1452_v26, %v1453_v40  ;;  %vm1464_vm11 = vcmp.gt.s32.totalorder %v1462_v60, %v1463_v42  ;;  %vm5705_vm7 = vmmov %vm5704_vm12  ;;  %v4366_v3 = vld [vmem:[%s5443_s0 + $0x20] sm:$0xff] }
 0x192   : > { %v1436_v28 = vrot.slane %v1435_v50, 2  ;;  %v1446_v45 = vrot.slane %v1445_v46, 2  ;;  %v1455_v4 = vsel %vm1454_vm6, %v1452_v26, %v1453_v40  ;;  %v1465_v21 = vsel %vm1464_vm11, %v1462_v60, %v1463_v42  ;;  %v4383_v40 = vld [vmem:[%s5443_s0 + $0x28] sm:$0xff]  ;;  %v4400_v42 = vld [vmem:[%s5443_s0 + $0x30] sm:$0xff] }
 0x193   : > { %v1456_v15 = vrot.slane %v1455_v4, 2  ;;  %vm1474_vm9 = vcmp.gt.s32.totalorder %v1472_v25, %v1473_v61  ;;  %vm1484_vm3 = vcmp.gt.s32.totalorder %v1482_v10, %v1483_v35  ;;  %v1466_v16 = vrot.slane %v1465_v21, 2  ;;  %5714 = vst [vmem:[#allocation4_spill] sm:$0xff] %v4383_v40 }
 0x194   : > { %vm1437_vm14 = vcmp.gt.s32.totalorder %v1435_v50, %v1436_v28  ;;  %vm1447_vm13 = vcmp.gt.s32.totalorder %v1445_v46, %v1446_v45  ;;  %v1475_v2 = vsel %vm1474_vm9, %v1472_v25, %v1473_v61  ;;  %vm1423_vm10 = vcmp.eq.s32.totalorder %v4279_v49, 7  ;;  %5719 = vst [vmem:[#allocation5_spill] sm:$0xff] %v4400_v42 }
 0x195   : > { %v1438_v52 = vsel %vm1437_vm14, %v1435_v50, %v1436_v28  ;;  %v1476_v58 = vrot.slane %v1475_v2, 2  ;;  %v1448_v43 = vsel %vm1447_vm13, %v1445_v46, %v1446_v45  ;;  %v1430_v41 = vsel %vm1422_vm15, 1, %v5618_v48  ;;  %v4409_v50 = vld [vmem:[%s5443_s0 + $0x38] sm:$0xff] }
 0x196   : > { %v1439_v32 = vrot.slane %v1438_v52, 1  ;;  %vm1457_vm0 = vcmp.gt.s32.totalorder %v1455_v4, %v1456_v15  ;;  %v1485_v51 = vsel %vm1484_vm3, %v1482_v10, %v1483_v35  ;;  %v1414_v18 = vadd.f32 %v1411_v24, %v3845_v5  ;;  %v4357_v24 = vld [vmem:[%s5443_s0 + $0x18] sm:$0xff]  ;;  %5720 = vst [vmem:[#allocation6_spill] sm:$0xff] %v4409_v50 }
 0x197   : > { %v1431_v31 = vsel %vm1423_vm10, 1, %v5618_v48  ;;  %vm1467_vm4 = vcmp.gt.s32.totalorder %v1465_v21, %v1466_v16  ;;  %v1449_v55 = vrot.slane %v1448_v43, 1  ;;  %vm1477_vm2 = vcmp.gt.s32.totalorder %v1475_v2, %v1476_v58 }
 0x198   : > { %v1458_v8 = vsel %vm1457_vm0, %v1455_v4, %v1456_v15  ;;  %v1486_v23 = vrot.slane %v1485_v51, 2  ;;  %v1492_v44 = vsel %vm5704_vm12, %v1430_v41, 2147483648  ;;  %vm1440_vm8 = vcmp.gt.s32.totalorder %v1438_v52, %v1439_v32 }
 0x199   : > { %v1468_v11 = vsel %vm1467_vm4, %v1465_v21, %v1466_v16  ;;  %v1493_v33 = vrot.slane %v1492_v44, 4  ;;  %v1502_v7 = vsel %vm5705_vm7, %v1431_v31, 2147483648  ;;  %v4311_v38 = vsel %vm1405_vm5, %v1414_v18, %v3845_v5  ;;  %vm5721_vm4 = vmmov %vm5705_vm7 }
 0x19a   : > { %v1478_v34 = vsel %vm1477_vm2, %v1475_v2, %v1476_v58  ;;  %vm1487_vm15 = vcmp.gt.s32.totalorder %v1485_v51, %v1486_v23  ;;  %v1503_v63 = vrot.slane %v1502_v7, 4  ;;  %vm4313_vm6 = vcmp.gt.s32.totalorder %v1448_v43, %v1449_v55  ;;  %vm5722_vm2 = vmmov %vm5721_vm4 }
 0x19b   : > { %v1459_v39 = vrot.slane %v1458_v8, 1  ;;  %v1488_v9 = vsel %vm1487_vm15, %v1485_v51, %v1486_v23  ;;  %vm1494_vm11 = vcmp.gt.s32.totalorder %v1492_v44, %v1493_v33  ;;  %v4317_v20 = vsel %vm1440_vm8, %v1438_v52, %v1439_v32  ;;  %vm5723_vm12 = vmmov %vm5722_vm2 }
 0x19c   : > { %v1469_v47 = vrot.slane %v1468_v11, 1  ;;  %v1495_v54 = vsel %vm1494_vm11, %v1492_v44, %v1493_v33  ;;  %vm1504_vm9 = vcmp.gt.s32.totalorder %v1502_v7, %v1503_v63  ;;  %v1479_v30 = vrot.slane %v1478_v34, 1  ;;  %vm5724_vm8 = vmmov %vm5722_vm2 }
 0x19d   : > { %v1489_v62 = vrot.slane %v1488_v9, 1  ;;  %v1496_v36 = vrot.slane %v1495_v54, 2  ;;  %v1505_v5 = vsel %vm1504_vm9, %v1502_v7, %v1503_v63  ;;  %v4326_v6 = vsub.f32 %v4322_v56, %v4311_v38  ;;  %vm5725_vm7 = vmmov %vm5722_vm2 }
 0x19e   : > { %v1506_v19 = vrot.slane %v1505_v5, 2  ;;  %v4335_v17 = vsub.f32 %v4331_v37, %v4311_v38  ;;  %v4344_v29 = vsub.f32 %v4340_v53, %v4311_v38  ;;  %v4348_v59 = vsel %vm4313_vm6, %v1448_v43, %v1449_v55  ;;  %vm5726_vm6 = vmmov %vm5722_vm2 }
 0x19f   : > { %vm4350_vm5 = vcmp.gt.s32.totalorder %v1495_v54, %v1496_v36  ;;  %v4361_v57 = vsub.f32 %v4357_v24, %v4311_v38  ;;  %v4370_v12 = vsub.f32 %v4366_v3, %v4311_v38  ;;  %vm4372_vm3 = vcmp.gt.s32.totalorder %v1458_v8, %v1459_v39 }
 0x1a0   : > { %vm4376_vm14 = vcmp.gt.s32.totalorder %v1468_v11, %v1469_v47  ;;  %vm1507_vm13 = vcmp.gt.s32.totalorder %v1505_v5, %v1506_v19  ;;  %v4387_v60 = vsub.f32 %v4383_v40, %v4311_v38  ;;  %vm4389_vm10 = vcmp.gt.s32.totalorder %v1478_v34, %v1479_v30 }
 0x1a1   : > { %vm4393_vm0 = vcmp.gt.s32.totalorder %v1488_v9, %v1489_v62  ;;  %v4404_v61 = vsub.f32 %v4400_v42, %v4311_v38  ;;  %v4413_v46 = vsub.f32 %v4409_v50, %v4311_v38  ;;  %v4417_v35 = vsel %vm4350_vm5, %v1495_v54, %v1496_v36 }
 0x1a2   : > { %v1544_v28 = vshra.s32 %v4326_v6, 31  ;;  %v1545_v45 = vshra.s32 %v4335_v17, 31  ;;  %v1546_v4 = vshra.s32 %v4344_v29, 31  ;;  %v4422_v15 = vsel %vm1507_vm13, %v1505_v5, %v1506_v19 }
 0x1a3   : > { %v1547_v21 = vshra.s32 %v4361_v57, 31  ;;  %v1548_v16 = vshra.s32 %v4370_v12, 31  ;;  %v1549_v2 = vshra.s32 %v4387_v60, 31  ;;  %v4429_v52 = vsel %vm4372_vm3, %v1458_v8, %v1459_v39 }
 0x1a4   : > { %v4433_v58 = vsel %vm4376_vm14, %v1468_v11, %v1469_v47  ;;  %v1550_v43 = vshra.s32 %v4404_v61, 31  ;;  %v1551_v41 = vshra.s32 %v4413_v46, 31  ;;  %v4439_v32 = vsel %vm4389_vm10, %v1478_v34, %v1479_v30 }
 0x1a5   : > { %v4443_v51 = vsel %vm4393_vm0, %v1488_v9, %v1489_v62  ;;  %v1552_v18 = vand.u32 2147483647, %v1544_v28  ;;  %v1553_v31 = vand.u32 2147483647, %v1545_v45  ;;  %v1499_v55 = vrot.slane %v4417_v35, 1 }
 0x1a6   : > { %v5461_v8 = vrot.slane %v4422_v15, 1  ;;  %v1554_v23 = vand.u32 2147483647, %v1546_v4  ;;  %v1555_v44 = vand.u32 2147483647, %v1547_v21 }
 0x1a7   : > { %v1556_v11 = vand.u32 2147483647, %v1548_v16  ;;  %v1557_v33 = vand.u32 2147483647, %v1549_v2  ;;  %v1558_v7 = vand.u32 2147483647, %v1550_v43  ;;  %v1560_v63 = vxor.u32 %v1552_v18, %v4326_v6 }
 0x1a8   : > { %v1559_v27 = vand.u32 2147483647, %v1551_v41  ;;  %v1561_v34 = vxor.u32 %v1553_v31, %v4335_v17  ;;  %v1562_v39 = vxor.u32 %v1554_v23, %v4344_v29  ;;  %v1563_v9 = vxor.u32 %v1555_v44, %v4361_v57 }
 0x1a9   : > { %v1564_v47 = vxor.u32 %v1556_v11, %v4370_v12  ;;  %v1565_v54 = vxor.u32 %v1557_v33, %v4387_v60  ;;  %v1566_v30 = vxor.u32 %v1558_v7, %v4404_v61  ;;  %v1568_v62 = vand.u32 4294967288, %v1560_v63 }
 0x1aa   : > { %v1567_v36 = vxor.u32 %v1559_v27, %v4413_v46  ;;  %v1569_v5 = vand.u32 4294967288, %v1561_v34  ;;  %v1570_v19 = vand.u32 4294967288, %v1562_v39  ;;  %v1571_v0 = vand.u32 4294967288, %v1563_v9 }
 0x1ab   : > { %v1572_v13 = vand.u32 4294967288, %v1564_v47  ;;  %v1573_v26 = vand.u32 4294967288, %v1565_v54  ;;  %v4455_v25 = vand.u32 4294967288, %v1566_v30  ;;  %v1576_v10 = vor.u32 %v1568_v62, %v5639_v22 }
 0x1ac   : > { %v4458_v28 = vand.u32 4294967288, %v1567_v36  ;;  %v1577_v45 = vor.u32 %v1569_v5, %v5639_v22  ;;  %v1578_v4 = vor.u32 %v1570_v19, %v5639_v22  ;;  %v1579_v21 = vor.u32 %v1571_v0, %v5639_v22 }
 0x1ad   : > { %v1580_v16 = vor.u32 %v1572_v13, %v5639_v22  ;;  %v1581_v2 = vor.u32 %v1573_v26, %v5639_v22  ;;  %v1582_v43 = vor.u32 %v4455_v25, %v5639_v22  ;;  %v1584_v41 = vsel %vm5721_vm4, %v1576_v10, 2147483648 }
 0x1ae   : > { %v1583_v18 = vor.u32 %v4458_v28, %v5639_v22  ;;  %v1585_v31 = vrot.slane %v1584_v41, 4  ;;  %v1594_v23 = vsel %vm5722_vm2, %v1577_v45, 2147483648  ;;  %v1604_v44 = vsel %vm5723_vm12, %v1578_v4, 2147483648 }
 0x1af   : > { %v1595_v11 = vrot.slane %v1594_v23, 4  ;;  %v1605_v33 = vrot.slane %v1604_v44, 4  ;;  %v1614_v7 = vsel %vm5724_vm8, %v1579_v21, 2147483648  ;;  %v1624_v63 = vsel %vm5725_vm7, %v1580_v16, 2147483648 }
 0x1b0   : > { %vm1586_vm15 = vcmp.gt.s32.totalorder %v1584_v41, %v1585_v31  ;;  %v1615_v27 = vrot.slane %v1614_v7, 4  ;;  %v1625_v34 = vrot.slane %v1624_v63, 4  ;;  %v1634_v39 = vsel %vm5726_vm6, %v1581_v2, 2147483648 }
 0x1b1   : > { %v1587_v9 = vsel %vm1586_vm15, %v1584_v41, %v1585_v31  ;;  %vm1596_vm11 = vcmp.gt.s32.totalorder %v1594_v23, %v1595_v11  ;;  %vm1606_vm9 = vcmp.gt.s32.totalorder %v1604_v44, %v1605_v33  ;;  %v1635_v47 = vrot.slane %v1634_v39, 4 }
 0x1b2   : > { %v1588_v54 = vrot.slane %v1587_v9, 2  ;;  %v1597_v30 = vsel %vm1596_vm11, %v1594_v23, %v1595_v11  ;;  %v1607_v62 = vsel %vm1606_vm9, %v1604_v44, %v1605_v33  ;;  %vm1616_vm5 = vcmp.gt.s32.totalorder %v1614_v7, %v1615_v27 }
 0x1b3   : > { %v1598_v36 = vrot.slane %v1597_v30, 2  ;;  %v1608_v5 = vrot.slane %v1607_v62, 2  ;;  %v1617_v19 = vsel %vm1616_vm5, %v1614_v7, %v1615_v27  ;;  %vm1626_vm3 = vcmp.gt.s32.totalorder %v1624_v63, %v1625_v34 }
 0x1b4   : > { %vm1589_vm14 = vcmp.gt.s32.totalorder %v1587_v9, %v1588_v54  ;;  %v1618_v0 = vrot.slane %v1617_v19, 2  ;;  %v1627_v13 = vsel %vm1626_vm3, %v1624_v63, %v1625_v34  ;;  %vm4475_vm13 = vcmp.gt.s32.totalorder %v1634_v39, %v1635_v47 }
 0x1b5   : > { %v1590_v25 = vsel %vm1589_vm14, %v1587_v9, %v1588_v54  ;;  %vm1599_vm10 = vcmp.gt.s32.totalorder %v1597_v30, %v1598_v36  ;;  %vm1609_vm0 = vcmp.gt.s32.totalorder %v1607_v62, %v1608_v5  ;;  %v1628_v10 = vrot.slane %v1627_v13, 2 }
 0x1b6   : > { %v1591_v28 = vrot.slane %v1590_v25, 1  ;;  %v1600_v45 = vsel %vm1599_vm10, %v1597_v30, %v1598_v36  ;;  %v1610_v4 = vsel %vm1609_vm0, %v1607_v62, %v1608_v5  ;;  %vm1619_vm4 = vcmp.gt.s32.totalorder %v1617_v19, %v1618_v0 }
 0x1b7   : > { %v1601_v21 = vrot.slane %v1600_v45, 1  ;;  %v1611_v16 = vrot.slane %v1610_v4, 1  ;;  %v1620_v2 = vsel %vm1619_vm4, %v1617_v19, %v1618_v0  ;;  %vm1629_vm2 = vcmp.gt.s32.totalorder %v1627_v13, %v1628_v10 }
 0x1b8   : > { %vm1592_vm12 = vcmp.gt.s32.totalorder %v1590_v25, %v1591_v28  ;;  %v1621_v41 = vrot.slane %v1620_v2, 1  ;;  %v1630_v31 = vsel %vm1629_vm2, %v1627_v13, %v1628_v10  ;;  %v1637_v23 = vsel %vm4475_vm13, %v1634_v39, %v1635_v47 }
 0x1b9   : > { %v4481_v44 = vsel %vm1592_vm12, %v1590_v25, %v1591_v28  ;;  %vm1602_vm8 = vcmp.gt.s32.totalorder %v1600_v45, %v1601_v21  ;;  %vm1612_vm7 = vcmp.gt.s32.totalorder %v1610_v4, %v1611_v16  ;;  %v1631_v11 = vrot.slane %v1630_v31, 1 }
 0x1ba   : > { %v4483_v33 = vsel %vm1602_vm8, %v1600_v45, %v1601_v21  ;;  %v4485_v7 = vsel %vm1612_vm7, %v1610_v4, %v1611_v16  ;;  %vm1622_vm15 = vcmp.gt.s32.totalorder %v1620_v2, %v1621_v41  ;;  %v1638_v63 = vrot.slane %v1637_v23, 2 }
 0x1bb   : > { %v4487_v27 = vsel %vm1622_vm15, %v1620_v2, %v1621_v41  ;;  %vm1632_vm6 = vcmp.gt.s32.totalorder %v1630_v31, %v1631_v11  ;;  %vm5729_vm11 = vcmask 15360   ;;  %v1664_v62 = vand.u32 7, %v4481_v44 }
 0x1bc   : > { %v1644_v34 = vsel %vm5729_vm11, %v1582_v43, 2147483648  ;;  %vm5730_vm9 = vmmov %vm5729_vm11  ;;  %v4491_v54 = vsel %vm1632_vm6, %v1630_v31, %v1631_v11  ;;  %vm1639_vm5 = vcmp.gt.s32.totalorder %v1637_v23, %v1638_v63  ;;  %v1665_v36 = vand.u32 7, %v4483_v33 }
 0x1bd   : > { %v1654_v9 = vsel %vm5730_vm9, %v1583_v18, 2147483648  ;;  %v1645_v39 = vrot.slane %v1644_v34, 4  ;;  %v1640_v30 = vsel %vm1639_vm5, %v1637_v23, %v1638_v63  ;;  %v1666_v5 = vand.u32 7, %v4485_v7 }
 0x1be   : > { %v1655_v47 = vrot.slane %v1654_v9, 4  ;;  %vm4499_vm3 = vcmp.gt.s32.totalorder %v4417_v35, %v1499_v55  ;;  %v1641_v43 = vrot.slane %v1640_v30, 1  ;;  %v1667_v18 = vand.u32 7, %v4487_v27 }
 0x1bf   : > { %vm1646_vm14 = vcmp.gt.s32.totalorder %v1644_v34, %v1645_v39  ;;  %v1668_v26 = vand.u32 7, %v4491_v54  ;;  %v4505_v25 = vsub.s32 7, %v1664_v62  ;;  %vm4510_vm10 = vcmp.gt.s32.totalorder %v4422_v15, %v5461_v8 }
 0x1c0   : > { %vm1656_vm13 = vcmp.gt.s32.totalorder %v1654_v9, %v1655_v47  ;;  %v1647_v0 = vsel %vm1646_vm14, %v1644_v34, %v1645_v39  ;;  %vm1642_vm0 = vcmp.gt.s32.totalorder %v1640_v30, %v1641_v43  ;;  %v4514_v4 = vsub.s32 7, %v1665_v36 }
 0x1c1   : > { %v1657_v13 = vsel %vm1656_vm13, %v1654_v9, %v1655_v47  ;;  %v1648_v28 = vrot.slane %v1647_v0, 2  ;;  %v1643_v21 = vsel %vm1642_vm0, %v1640_v30, %v1641_v43  ;;  %v4516_v16 = vsub.s32 7, %v1666_v5 }
 0x1c2   : > { %v1658_v45 = vrot.slane %v1657_v13, 2  ;;  %v4518_v2 = vsub.s32 7, %v1667_v18  ;;  %v4520_v41 = vsub.s32 7, %v1668_v26  ;;  %v1669_v31 = vand.u32 7, %v1643_v21 }
 0x1c3   : > { %vm1649_vm4 = vcmp.gt.s32.totalorder %v1647_v0, %v1648_v28  ;;  %v1680_v23 = vand.u32 4294967288, %v4481_v44  ;;  %v1681_v34 = vand.u32 4294967288, %v4483_v33  ;;  %v1682_v9 = vand.u32 4294967288, %v4485_v7 }
 0x1c4   : > { %vm1659_vm2 = vcmp.gt.s32.totalorder %v1657_v13, %v1658_v45  ;;  %v1650_v11 = vsel %vm1649_vm4, %v1647_v0, %v1648_v28  ;;  %v4525_v30 = vsub.s32 7, %v1669_v31  ;;  %v1683_v62 = vand.u32 4294967288, %v4487_v27 }
 0x1c5   : > { %v1660_v63 = vsel %vm1659_vm2, %v1657_v13, %v1658_v45  ;;  %v1651_v39 = vrot.slane %v1650_v11, 1  ;;  %v1684_v36 = vand.u32 4294967288, %v4491_v54  ;;  %v1685_v5 = vand.u32 4294967288, %v1643_v21 }
 0x1c6   : > { %v1661_v47 = vrot.slane %v1660_v63, 1  ;;  %v1688_v43 = vshra.s32 %v1680_v23, 31  ;;  %v1689_v18 = vshra.s32 %v1681_v34, 31  ;;  %v1690_v44 = vshra.s32 %v1682_v9, 31 }
 0x1c7   : > { %vm1652_vm12 = vcmp.gt.s32.totalorder %v1650_v11, %v1651_v39  ;;  %v1691_v0 = vshra.s32 %v1683_v62, 31  ;;  %v1692_v33 = vshra.s32 %v1684_v36, 31  ;;  %v1693_v28 = vshra.s32 %v1685_v5, 31 }
 0x1c8   : > { %vm1662_vm8 = vcmp.gt.s32.totalorder %v1660_v63, %v1661_v47  ;;  %v1653_v13 = vsel %vm1652_vm12, %v1650_v11, %v1651_v39  ;;  %v4534_v27 = vsel %vm4499_vm3, %v4417_v35, %v1499_v55  ;;  %v1696_v54 = vand.u32 2147483647, %v1688_v43 }
 0x1c9   : > { %v1663_v26 = vsel %vm1662_vm8, %v1660_v63, %v1661_v47  ;;  %v1670_v7 = vand.u32 7, %v1653_v13  ;;  %v1686_v8 = vand.u32 4294967288, %v1653_v13  ;;  %v1697_v21 = vand.u32 2147483647, %v1689_v18 }
 0x1ca   : > { %v1671_v45 = vand.u32 7, %v1663_v26  ;;  %v1687_v31 = vand.u32 4294967288, %v1663_v26  ;;  %v1698_v22 = vand.u32 2147483647, %v1690_v44  ;;  %v5735_v47 = vrot.slane %v4422_v15, 1 }
 0x1cb   : > { %v4536_v50 = vsub.s32 7, %v1670_v7  ;;  %v1694_v63 = vshra.s32 %v1686_v8, 31  ;;  %v1699_v26 = vand.u32 2147483647, %v1691_v0  ;;  %v1700_v19 = vand.u32 2147483647, %v1692_v33 }
 0x1cc   : > { %v4538_v11 = vsub.s32 7, %v1671_v45  ;;  %v1695_v39 = vshra.s32 %v1687_v31, 31  ;;  %v4545_v13 = vsel %vm4510_vm10, %v4422_v15, %v5735_v47  ;;  %v1701_v35 = vand.u32 2147483647, %v1693_v28 }
 0x1cd   : > { %v1702_v55 = vand.u32 2147483647, %v1694_v63  ;;  %v4547_v18 = vxor.u32 %v1696_v54, %v1680_v23  ;;  %vm1720_vm7 = vcmp.eq.s32.totalorder %v3266_v1, %v4505_v25  ;;  %v4551_v44 = vxor.u32 %v1697_v21, %v1681_v34 }
 0x1ce   : > { %v1703_v43 = vand.u32 2147483647, %v1695_v39  ;;  %v4553_v7 = vxor.u32 %v1698_v22, %v1682_v9  ;;  %v4555_v45 = vxor.u32 %v1699_v26, %v1683_v62  ;;  %vm1721_vm15 = vcmp.eq.s32.totalorder %v3266_v1, %v4514_v4 }
 0x1cf   : > { %v4559_v15 = vxor.u32 %v1700_v19, %v1684_v36  ;;  %v4561_v10 = vxor.u32 %v1701_v35, %v1685_v5  ;;  %vm1722_vm6 = vcmp.eq.s32.totalorder %v3266_v1, %v4516_v16  ;;  %vm1723_vm11 = vcmp.eq.s32.totalorder %v3266_v1, %v4518_v2 }
 0x1d0   : > { %vm1724_vm9 = vcmp.eq.s32.totalorder %v3266_v1, %v4520_v41  ;;  %vm5468_vm5 = vcmp.eq.s32.totalorder %v3266_v1, %v4525_v30  ;;  %vm5464_vm3 = vcmp.eq.s32.totalorder %v3266_v1, %v4536_v50  ;;  %vm5467_vm14 = vcmp.eq.s32.totalorder %v3266_v1, %v4538_v11 }
 0x1d1   : > { %v4575_v22 = vxor.u32 %v1702_v55, %v1686_v8  ;;  %v1728_v23 = vsel %vm1720_vm7, -1e+30, %v4326_v6  ;;  %v1729_v34 = vsel %vm1721_vm15, -1e+30, %v4335_v17  ;;  %v1730_v9 = vsel %vm1722_vm6, -1e+30, %v4344_v29 }
 0x1d2   : > { %v4589_v62 = vxor.u32 %v1703_v43, %v1687_v31  ;;  %v1731_v8 = vsel %vm1723_vm11, -1e+30, %v4361_v57  ;;  %v1732_v6 = vsel %vm1724_vm9, -1e+30, %v4370_v12  ;;  %v1733_v17 = vsel %vm5468_vm5, -1e+30, %v4387_v60 }
 0x1d3   : > { %v1734_v29 = vsel %vm5464_vm3, -1e+30, %v4404_v61  ;;  %v1735_v57 = vsel %vm5467_vm14, -1e+30, %v4413_v46  ;;  %vm5736_vm13 = vcmask 15360   ;;  %vm1512_vm8 = vcmp.gt.s32.totalorder %v4317_v20, 0 }
 0x1d4   : > { %v1736_v36 = vsel %vm5736_vm13, %v1728_v23, -inf  ;;  %vm5737_vm10 = vmmov %vm5736_vm13  ;;  %vm1519_vm3 = vcmp.gt.s32.totalorder %v4545_v13, 0 }
 0x1d5   : > { %v1743_v5 = vsel %vm5737_vm10, %v1729_v34, -inf  ;;  %v1737_v12 = vrot.slane %v1736_v36, 4  ;;  %vm5738_vm0 = vmmov %vm5737_vm10 }
 0x1d6   : > { %v1744_v0 = vrot.slane %v1743_v5, 4  ;;  %v1750_v33 = vsel %vm5738_vm0, %v1730_v9, -inf  ;;  %vm5739_vm4 = vmmov %vm5738_vm0 }
 0x1d7   : > { %v1757_v60 = vsel %vm5739_vm4, %v1731_v8, -inf  ;;  %v1751_v28 = vrot.slane %v1750_v33, 4  ;;  %vm5740_vm2 = vmmov %vm5738_vm0  ;;  %v1738_v21 = vmax.f32 %v1736_v36, %v1737_v12  ;;  %vm1514_vm4 = vcmp.gt.s32.totalorder %v4429_v52, 0 }
 0x1d8   : > { %v1758_v31 = vrot.slane %v1757_v60, 4  ;;  %v1764_v54 = vsel %vm5740_vm2, %v1732_v6, -inf  ;;  %vm5741_vm12 = vmmov %vm5738_vm0  ;;  %v1745_v63 = vmax.f32 %v1743_v5, %v1744_v0  ;;  %vm1515_vm2 = vcmp.gt.s32.totalorder %v4433_v58, 0 }
 0x1d9   : > { %v1771_v61 = vsel %vm5741_vm12, %v1733_v17, -inf  ;;  %v1765_v39 = vrot.slane %v1764_v54, 4  ;;  %v1752_v47 = vmax.f32 %v1750_v33, %v1751_v28  ;;  %vm5742_vm13 = vmmov %vm5738_vm0  ;;  %v1739_v55 = vrot.slane %v1738_v21, 2 }
 0x1da   : > { %v1772_v46 = vrot.slane %v1771_v61, 4  ;;  %v1759_v26 = vmax.f32 %v1757_v60, %v1758_v31  ;;  %v1778_v19 = vsel %vm5742_vm13, %v1734_v29, -inf  ;;  %vm5743_vm10 = vmmov %vm5738_vm0  ;;  %vm1513_vm0 = vcmp.gt.s32.totalorder %v4348_v59, 0 }
 0x1db   : > { %v1785_v35 = vsel %vm5743_vm10, %v1735_v57, -inf  ;;  %v1746_v43 = vrot.slane %v1745_v63, 2  ;;  %v1766_v23 = vmax.f32 %v1764_v54, %v1765_v39  ;;  %v1753_v9 = vrot.slane %v1752_v47, 2  ;;  %vm4634_vm14 = vmxor %vm1512_vm8, %vm2996_vm1 }
 0x1dc   : > { %v1773_v34 = vmax.f32 %v1771_v61, %v1772_v46  ;;  %v1760_v8 = vrot.slane %v1759_v26, 2  ;;  %v1779_v6 = vrot.slane %v1778_v19, 4  ;;  %v1786_v17 = vrot.slane %v1785_v35, 4  ;;  %vm4643_vm5 = vmxor %vm1513_vm0, %vm2996_vm1 }
 0x1dd   : > { %v1740_v36 = vmax.f32 %v1738_v21, %v1739_v55  ;;  %v1747_v5 = vmax.f32 %v1745_v63, %v1746_v43  ;;  %v1767_v12 = vrot.slane %v1766_v23, 2  ;;  %vm1516_vm12 = vcmp.gt.s32.totalorder %v4439_v32, 0  ;;  %vm4650_vm8 = vmxor %vm1514_vm4, %vm2996_vm1 }
 0x1de   : > { %v1774_v29 = vrot.slane %v1773_v34, 2  ;;  %v1754_v57 = vmax.f32 %v1752_v47, %v1753_v9  ;;  %v1761_v0 = vmax.f32 %v1759_v26, %v1760_v8  ;;  %v1780_v33 = vmax.f32 %v1778_v19, %v1779_v6  ;;  %vm4659_vm0 = vmxor %vm1515_vm2, %vm2996_vm1 }
 0x1df   : > { %v1787_v60 = vmax.f32 %v1785_v35, %v1786_v17  ;;  %vm1517_vm13 = vcmp.gt.s32.totalorder %v4443_v51, 0  ;;  %v1741_v28 = vrot.slane %v1740_v36, 1  ;;  %v1748_v31 = vrot.slane %v1747_v5, 1  ;;  %vm4670_vm4 = vmxor %vm1516_vm12, %vm2996_vm1 }
 0x1e0   : > { %v1768_v54 = vmax.f32 %v1766_v23, %v1767_v12  ;;  %v1775_v61 = vmax.f32 %v1773_v34, %v1774_v29  ;;  %vm1518_vm10 = vcmp.gt.s32.totalorder %v4534_v27, 0  ;;  %v1755_v39 = vrot.slane %v1754_v57, 1  ;;  %vm4679_vm2 = vmxor %vm1517_vm13, %vm2996_vm1 }
 0x1e1   : > { %v1762_v46 = vrot.slane %v1761_v0, 1  ;;  %v1781_v21 = vrot.slane %v1780_v33, 2  ;;  %v1788_v63 = vrot.slane %v1787_v60, 2  ;;  %v1742_v55 = vmax.f32 %v1740_v36, %v1741_v28  ;;  %vm4686_vm12 = vmxor %vm1518_vm10, %vm2996_vm1 }
 0x1e2   : > { %v1749_v43 = vmax.f32 %v1747_v5, %v1748_v31  ;;  %v1769_v47 = vrot.slane %v1768_v54, 1  ;;  %v1776_v26 = vrot.slane %v1775_v61, 1  ;;  %v1756_v19 = vmax.f32 %v1754_v57, %v1755_v39  ;;  %vm4693_vm13 = vmxor %vm1519_vm3, %vm2996_vm1 }
 0x1e3   : > { %v1763_v35 = vmax.f32 %v1761_v0, %v1762_v46  ;;  %v1782_v9 = vmax.f32 %v1780_v33, %v1781_v21  ;;  %v1789_v8 = vmax.f32 %v1787_v60, %v1788_v63  ;;  %v1792_v23 = vsub.f32 %v4547_v18, %v1742_v55  ;;  %vm4704_vm10 = vmand %vm1720_vm7, %vm4634_vm14 }
 0x1e4   : > { %v1770_v6 = vmax.f32 %v1768_v54, %v1769_v47  ;;  %v1777_v17 = vmax.f32 %v1775_v61, %v1776_v26  ;;  %v1793_v34 = vsub.f32 %v4551_v44, %v1749_v43  ;;  %v1794_v42 = vsub.f32 %v4553_v7, %v1756_v19  ;;  %vm4713_vm3 = vmand %vm1721_vm15, %vm4643_vm5 }
 0x1e5   : > { %v1783_v12 = vrot.slane %v1782_v9, 1  ;;  %v1790_v29 = vrot.slane %v1789_v8, 1  ;;  %v1795_v40 = vsub.f32 %v4555_v45, %v1763_v35  ;;  %v1800_v18 = vmax.f32 %v1792_v23, 0.0  ;;  %vm4722_vm7 = vmand %vm1722_vm6, %vm4650_vm8 }
 0x1e6   : > { %v1796_v5 = vsub.f32 %v4559_v15, %v1770_v6  ;;  %v1797_v57 = vsub.f32 %v4561_v10, %v1777_v17  ;;  %v1801_v0 = vmax.f32 %v1793_v34, 0.0  ;;  %v1802_v20 = vmax.f32 %v1794_v42, 0.0  ;;  %vm4731_vm15 = vmand %vm1723_vm11, %vm4659_vm0 }
 0x1e7   : > { %v1784_v7 = vmax.f32 %v1782_v9, %v1783_v12  ;;  %v1791_v45 = vmax.f32 %v1789_v8, %v1790_v29  ;;  %v1803_v33 = vmax.f32 %v1795_v40, 0.0  ;;  %v1808_v28 = vadd.f32 %v1800_v18, %v3625_v14  ;;  %vm4740_vm6 = vmand %vm1724_vm9, %vm4670_vm4 }
 0x1e8   : > { %v1804_v10 = vmax.f32 %v1796_v5, 0.0  ;;  %v1805_v60 = vmax.f32 %v1797_v57, 0.0  ;;  %v1809_v59 = vadd.f32 %v1801_v0, %v3625_v14  ;;  %v1810_v52 = vadd.f32 %v1802_v20, %v3625_v14 }
 0x1e9   : > { %v1798_v40 = vsub.f32 %v4575_v22, %v1784_v7  ;;  %v1799_v42 = vsub.f32 %v4589_v62, %v1791_v45  ;;  %v1811_v54 = vadd.f32 %v1803_v33, %v3625_v14  ;;  %v1824_v46 = vshra.s32 %v1808_v28, 31 }
 0x1ea   : > { %v1812_v58 = vadd.f32 %v1804_v10, %v3625_v14  ;;  %v1813_v39 = vadd.f32 %v1805_v60, %v3625_v14  ;;  %v1825_v21 = vshra.s32 %v1809_v59, 31  ;;  %v1826_v32 = vshra.s32 %v1810_v52, 31 }
 0x1eb   : > { %v1806_v62 = vmax.f32 %v1798_v40, 0.0  ;;  %v1807_v63 = vmax.f32 %v1799_v42, 0.0  ;;  %v1827_v55 = vshra.s32 %v1811_v54, 31  ;;  %v1832_v19 = vand.u32 2147483647, %v1824_v46 }
 0x1ec   : > { %v1828_v47 = vshra.s32 %v1812_v58, 31  ;;  %v1829_v26 = vshra.s32 %v1813_v39, 31  ;;  %v1833_v35 = vand.u32 2147483647, %v1825_v21  ;;  %v1834_v27 = vand.u32 2147483647, %v1826_v32 }
 0x1ed   : > { %v1814_v9 = vadd.f32 %v1806_v62, %v3625_v14  ;;  %v1815_v8 = vadd.f32 %v1807_v63, %v3625_v14  ;;  %v1835_v6 = vand.u32 2147483647, %v1827_v55  ;;  %v1840_v34 = vxor.u32 %v1832_v19, %v1808_v28 }
 0x1ee   : > { %v1836_v17 = vand.u32 2147483647, %v1828_v47  ;;  %v1837_v23 = vand.u32 2147483647, %v1829_v26  ;;  %v1841_v12 = vxor.u32 %v1833_v35, %v1809_v59  ;;  %v1842_v57 = vxor.u32 %v1834_v27, %v1810_v52 }
 0x1ef   : > { %v1830_v29 = vshra.s32 %v1814_v9, 31  ;;  %v1831_v5 = vshra.s32 %v1815_v8, 31  ;;  %v1843_v18 = vxor.u32 %v1835_v6, %v1811_v54  ;;  %v1848_v25 = vand.u32 4294967288, %v1840_v34 }
 0x1f0   : > { %v1844_v36 = vxor.u32 %v1836_v17, %v1812_v58  ;;  %v1845_v7 = vxor.u32 %v1837_v23, %v1813_v39  ;;  %v1849_v45 = vand.u32 4294967288, %v1841_v12  ;;  %v1850_v4 = vand.u32 4294967288, %v1842_v57 }
 0x1f1   : > { %v1838_v44 = vand.u32 2147483647, %v1830_v29  ;;  %v1839_v33 = vand.u32 2147483647, %v1831_v5  ;;  %v1851_v10 = vand.u32 4294967288, %v1843_v18  ;;  %v1856_v16 = vor.u32 7, %v1848_v25 }
 0x1f2   : > { %v1852_v15 = vand.u32 4294967288, %v1844_v36  ;;  %v1853_v28 = vand.u32 4294967288, %v1845_v7  ;;  %v1857_v59 = vor.u32 6, %v1849_v45  ;;  %v1858_v2 = vor.u32 5, %v1850_v4 }
 0x1f3   : > { %v1846_v31 = vxor.u32 %v1838_v44, %v1814_v9  ;;  %v1847_v42 = vxor.u32 %v1839_v33, %v1815_v8  ;;  %v1859_v52 = vor.u32 4, %v1851_v10  ;;  %vm5770_vm11 = vcmp.eq.s32.totalorder %v3266_v1, %v4525_v30 }
 0x1f4   : > { %vm1884_vm5 = vmand %vm5770_vm11, %vm4679_vm2  ;;  %v1860_v54 = vor.u32 3, %v1852_v15  ;;  %v1861_v58 = vor.u32 2, %v1853_v28  ;;  %vm5771_vm9 = vcmp.eq.s32.totalorder %v3266_v1, %v4538_v11  ;;  %v1887_v61 = vsel %vm4704_vm10, %v1856_v16, 2147483648 }
 0x1f5   : > { %vm4754_vm14 = vmand %vm5771_vm9, %vm4693_vm13  ;;  %v1888_v39 = vsel %vm4713_vm3, %v1857_v59, 2147483648  ;;  %v1854_v46 = vand.u32 4294967288, %v1846_v31  ;;  %v1855_v30 = vand.u32 4294967288, %v1847_v42  ;;  %v1889_v21 = vsel %vm4722_vm7, %v1858_v2, 2147483648 }
 0x1f6   : > { %v1890_v22 = vsel %vm4731_vm15, %v1859_v52, 2147483648  ;;  %vm5774_vm8 = vcmp.eq.s32.totalorder %v3266_v1, %v4536_v50  ;;  %v1891_v11 = vsel %vm4740_vm6, %v1860_v54, 2147483648  ;;  %v1892_v62 = vsel %vm1884_vm5, %v1861_v58, 2147483648 }
 0x1f7   : > { %vm1885_vm0 = vmand %vm5774_vm8, %vm4686_vm12  ;;  %vm5775_vm4 = vcmask 15360   ;;  %v1862_v55 = vor.u32 1, %v1854_v46  ;;  %v1894_v47 = vsel %vm4754_vm14, %v1855_v30, 2147483648 }
 0x1f8   : > { %v1895_v63 = vsel %vm5775_vm4, %v1887_v61, 2147483648  ;;  %vm5776_vm2 = vmmov %vm5775_vm4 }
 0x1f9   : > { %v1896_v32 = vsel %vm5776_vm2, %v1888_v39, 2147483648  ;;  %vm5777_vm13 = vmmov %vm5776_vm2  ;;  %v1893_v51 = vsel %vm1885_vm0, %v1862_v55, 2147483648 }
 0x1fa   : > { %v1898_v26 = vsel %vm5777_vm13, %v1890_v22, 2147483648  ;;  %vm5778_vm10 = vmmov %vm5776_vm2 }
 0x1fb   : > { %v1897_v43 = vsel %vm5778_vm10, %v1889_v21, 2147483648  ;;  %vm5779_vm3 = vmmov %vm5776_vm2 }
 0x1fc   : > { %v1899_v19 = vsel %vm5779_vm3, %v1891_v11, 2147483648  ;;  %vm5780_vm7 = vmmov %vm5776_vm2 }
 0x1fd   : > { %v1902_v50 = vsel %vm5780_vm7, %v1892_v62, 2147483648  ;;  %vm5781_vm12 = vmmov %vm5776_vm2  ;;  %vm1900_vm15 = vcmp.gt.s32.totalorder %v1895_v63, %v1899_v19 }
 0x1fe   : > { %v1908_v35 = vsel %vm5781_vm12, %v1894_v47, 2147483648  ;;  %vm1903_vm6 = vcmp.gt.s32.totalorder %v1896_v32, %v1902_v50  ;;  %v1901_v9 = vsel %vm1900_vm15, %v1895_v63, %v1899_v19  ;;  %vm5782_vm5 = vmmov %vm5776_vm2 }
 0x1ff   : > { %vm1909_vm11 = vcmp.gt.s32.totalorder %v1898_v26, %v1908_v35  ;;  %v1904_v8 = vsel %vm1903_vm6, %v1896_v32, %v1902_v50  ;;  %v1905_v27 = vsel %vm5782_vm5, %v1893_v51, 2147483648  ;;  %vm5783_vm15 = vmmov %vm5782_vm5 }
 0x200   : > { %v1910_v6 = vsel %vm1909_vm11, %v1898_v26, %v1908_v35  ;;  %vm1906_vm9 = vcmp.gt.s32.totalorder %v1897_v43, %v1905_v27  ;;  %vm1911_vm14 = vcmp.gt.s32.totalorder %v1901_v9, %v1904_v8  ;;  %vm5784_vm6 = vmmov %vm5782_vm5 }
 0x201   : > { %v1907_v17 = vsel %vm1906_vm9, %v1897_v43, %v1905_v27  ;;  %v1912_v23 = vsel %vm1911_vm14, %v1901_v9, %v1904_v8  ;;  %vm5785_vm9 = vmmov %vm5782_vm5 }
 0x202   : > { %vm1913_vm8 = vcmp.gt.s32.totalorder %v1907_v17, %v1910_v6  ;;  %vm5786_vm14 = vmmov %vm5782_vm5 }
 0x203   : > { %v1914_v34 = vsel %vm1913_vm8, %v1907_v17, %v1910_v6  ;;  %vm5787_vm8 = vmmov %vm5782_vm5 }
 0x204   : > { %vm1915_vm4 = vcmp.gt.s32.totalorder %v1912_v23, %v1914_v34 }
 0x205   : > { %v4783_v12 = vsel %vm1915_vm4, %v1912_v23, %v1914_v34 }
 0x206   : > { %v1918_v13 = vand.u32 7, %v4783_v12  ;;  %v1920_v29 = vand.u32 4294967288, %v4783_v12  ;;  %vm1917_vm0 = vcmp.ge.s32.totalorder %v4783_v12, 0 }
 0x208   : > { %v1919_v5 = vsub.s32 7, %v1918_v13  ;;  %v1921_v57 = vshra.s32 %v1920_v29, 31 }
 0x20a   : > { %v1922_v18 = vand.u32 2147483647, %v1921_v57  ;;  %v4791_v0 = vsel %vm1917_vm0, %v1919_v5, %v4279_v49 }
 0x20b   : > { %vm1928_vm2 = vcmp.eq.s32.totalorder %v4791_v0, 0  ;;  %vm1929_vm13 = vcmp.eq.s32.totalorder %v4791_v0, 1  ;;  %vm1930_vm10 = vcmp.eq.s32.totalorder %v4791_v0, 2  ;;  %vm1931_vm3 = vcmp.eq.s32.totalorder %v4791_v0, 3 }
 0x20c   : > { %vm1932_vm7 = vcmp.eq.s32.totalorder %v4791_v0, 4  ;;  %vm1933_vm12 = vcmp.eq.s32.totalorder %v4791_v0, 5  ;;  %v1936_v36 = vsel %vm1928_vm2, 1, %v5618_v48  ;;  %v1937_v7 = vsel %vm1929_vm13, 1, %v5618_v48 }
 0x20d   : > { %v1938_v25 = vsel %vm1930_vm10, 1, %v5618_v48  ;;  %v1939_v49 = vsel %vm1931_vm3, 1, %v5618_v48  ;;  %v1940_v45 = vsel %vm1932_vm7, 1, %v5618_v48  ;;  %v1941_v20 = vsel %vm1933_vm12, 1, %v5618_v48 }
 0x20e   : > { %v1923_v44 = vxor.u32 %v1922_v18, %v1920_v29  ;;  %v1944_v33 = vsel %vm5783_vm15, %v1936_v36, 2147483648  ;;  %v1954_v4 = vsel %vm5784_vm6, %v1937_v7, 2147483648  ;;  %vm1934_vm11 = vcmp.eq.s32.totalorder %v4791_v0, 6 }
 0x20f   : > { %v1945_v10 = vrot.slane %v1944_v33, 4  ;;  %v1955_v60 = vrot.slane %v1954_v4, 4  ;;  %v1964_v15 = vsel %vm5782_vm5, %v1938_v25, 2147483648  ;;  %v1974_v16 = vsel %vm5785_vm9, %v1939_v49, 2147483648 }
 0x210   : > { %v1965_v28 = vrot.slane %v1964_v15, 4  ;;  %v1984_v59 = vsel %vm5786_vm14, %v1940_v45, 2147483648  ;;  %v1994_v40 = vsel %vm5787_vm8, %v1941_v20, 2147483648  ;;  %v1975_v31 = vrot.slane %v1974_v16, 4 }
 0x211   : > { %vm1946_vm4 = vcmp.gt.s32.totalorder %v1944_v33, %v1945_v10  ;;  %vm1956_vm2 = vcmp.gt.s32.totalorder %v1954_v4, %v1955_v60  ;;  %v1985_v42 = vrot.slane %v1984_v59, 4  ;;  %v1995_v54 = vrot.slane %v1994_v40, 4 }
 0x212   : > { %v1947_v2 = vsel %vm1946_vm4, %v1944_v33, %v1945_v10  ;;  %v1957_v52 = vsel %vm1956_vm2, %v1954_v4, %v1955_v60  ;;  %vm1966_vm13 = vcmp.gt.s32.totalorder %v1964_v15, %v1965_v28  ;;  %vm1976_vm10 = vcmp.gt.s32.totalorder %v1974_v16, %v1975_v31  ;;  %vm5788_vm2 = vmmov %vm5787_vm8  ;;  %v5795_v33 = vld [vmem:[#allocation4_spill] sm:$0xff]  ;;  %v5800_v10 = vld [vmem:[#allocation5_spill] sm:$0xff] }
 0x213   : > { %v1948_v58 = vrot.slane %v1947_v2, 2  ;;  %v1958_v41 = vrot.slane %v1957_v52, 2  ;;  %v1967_v61 = vsel %vm1966_vm13, %v1964_v15, %v1965_v28  ;;  %v1977_v46 = vsel %vm1976_vm10, %v1974_v16, %v1975_v31  ;;  %v5801_v15 = vld [vmem:[#allocation6_spill] sm:$0xff] }
 0x214   : > { %v1968_v39 = vrot.slane %v1967_v61, 2  ;;  %vm1986_vm3 = vcmp.gt.s32.totalorder %v1984_v59, %v1985_v42  ;;  %vm1996_vm7 = vcmp.gt.s32.totalorder %v1994_v40, %v1995_v54  ;;  %v1978_v30 = vrot.slane %v1977_v46, 2 }
 0x215   : > { %vm1949_vm12 = vcmp.gt.s32.totalorder %v1947_v2, %v1948_v58  ;;  %vm1959_vm15 = vcmp.gt.s32.totalorder %v1957_v52, %v1958_v41  ;;  %v1987_v21 = vsel %vm1986_vm3, %v1984_v59, %v1985_v42  ;;  %vm1935_vm6 = vcmp.eq.s32.totalorder %v4791_v0, 7 }
 0x216   : > { %v1950_v22 = vsel %vm1949_vm12, %v1947_v2, %v1948_v58  ;;  %v1988_v11 = vrot.slane %v1987_v21, 2  ;;  %v1960_v62 = vsel %vm1959_vm15, %v1957_v52, %v1958_v41  ;;  %v1942_v63 = vsel %vm1934_vm11, 1, %v5618_v48 }
 0x217   : > { %v1951_v32 = vrot.slane %v1950_v22, 1  ;;  %vm1969_vm5 = vcmp.gt.s32.totalorder %v1967_v61, %v1968_v39  ;;  %v1997_v55 = vsel %vm1996_vm7, %v1994_v40, %v1995_v54  ;;  %v1926_v47 = vadd.f32 %v1923_v44, %v4311_v38 }
 0x218   : > { %v1943_v26 = vsel %vm1935_vm6, 1, %v5618_v48  ;;  %vm1979_vm9 = vcmp.gt.s32.totalorder %v1977_v46, %v1978_v30  ;;  %v1961_v43 = vrot.slane %v1960_v62, 1  ;;  %vm1989_vm14 = vcmp.gt.s32.totalorder %v1987_v21, %v1988_v11 }
 0x219   : > { %v1970_v19 = vsel %vm1969_vm5, %v1967_v61, %v1968_v39  ;;  %v1998_v50 = vrot.slane %v1997_v55, 2  ;;  %v2004_v35 = vsel %vm5787_vm8, %v1942_v63, 2147483648  ;;  %vm1952_vm4 = vcmp.gt.s32.totalorder %v1950_v22, %v1951_v32  ;;  %vm5805_vm8 = vmmov %vm5788_vm2 }
 0x21a   : > { %v1980_v51 = vsel %vm1979_vm9, %v1977_v46, %v1978_v30  ;;  %v2005_v9 = vrot.slane %v2004_v35, 4  ;;  %v2014_v8 = vsel %vm5788_vm2, %v1943_v26, 2147483648  ;;  %v4823_v27 = vsel %vm1917_vm0, %v1926_v47, %v4311_v38  ;;  %vm5803_vm9 = vmmov %vm5788_vm2 }
 0x21b   : > { %v1990_v6 = vsel %vm1989_vm14, %v1987_v21, %v1988_v11  ;;  %vm1999_vm11 = vcmp.gt.s32.totalorder %v1997_v55, %v1998_v50  ;;  %v2015_v17 = vrot.slane %v2014_v8, 4  ;;  %vm4825_vm13 = vcmp.gt.s32.totalorder %v1960_v62, %v1961_v43  ;;  %vm5804_vm14 = vmmov %vm5788_vm2 }
 0x21c   : > { %v1971_v34 = vrot.slane %v1970_v19, 1  ;;  %v2000_v13 = vsel %vm1999_vm11, %v1997_v55, %v1998_v50  ;;  %vm2006_vm10 = vcmp.gt.s32.totalorder %v2004_v35, %v2005_v9  ;;  %v4829_v29 = vsel %vm1952_vm4, %v1950_v22, %v1951_v32  ;;  %vm5806_vm4 = vmmov %vm5788_vm2 }
 0x21d   : > { %v1981_v5 = vrot.slane %v1980_v51, 1  ;;  %v2007_v57 = vsel %vm2006_vm10, %v2004_v35, %v2005_v9  ;;  %vm2016_vm3 = vcmp.gt.s32.totalorder %v2014_v8, %v2015_v17  ;;  %v1991_v18 = vrot.slane %v1990_v6, 1 }
 0x21e   : > { %v2001_v36 = vrot.slane %v2000_v13, 1  ;;  %v2008_v12 = vrot.slane %v2007_v57, 2  ;;  %v2017_v38 = vsel %vm2016_vm3, %v2014_v8, %v2015_v17  ;;  %v4833_v25 = vsub.f32 %v4322_v56, %v4823_v27 }
 0x21f   : > { %v2018_v7 = vrot.slane %v2017_v38, 2  ;;  %v4837_v49 = vsub.f32 %v4331_v37, %v4823_v27  ;;  %v4841_v45 = vsub.f32 %v4340_v53, %v4823_v27  ;;  %v4845_v20 = vsel %vm4825_vm13, %v1960_v62, %v1961_v43  ;;  %vm5807_vm13 = vmmov %vm5788_vm2 }
 0x220   : > { %vm2009_vm0 = vcmp.gt.s32.totalorder %v2007_v57, %v2008_v12  ;;  %v4849_v44 = vsub.f32 %v4357_v24, %v4823_v27  ;;  %v4853_v56 = vsub.f32 %v4366_v3, %v4823_v27  ;;  %vm4855_vm7 = vcmp.gt.s32.totalorder %v1970_v19, %v1971_v34 }
 0x221   : > { %vm4859_vm12 = vcmp.gt.s32.totalorder %v1980_v51, %v1981_v5  ;;  %vm2019_vm15 = vcmp.gt.s32.totalorder %v2017_v38, %v2018_v7  ;;  %v4865_v4 = vsub.f32 %v5795_v33, %v4823_v27  ;;  %vm4867_vm6 = vcmp.gt.s32.totalorder %v1990_v6, %v1991_v18 }
 0x222   : > { %vm4871_vm5 = vcmp.gt.s32.totalorder %v2000_v13, %v2001_v36  ;;  %v4877_v60 = vsub.f32 %v5800_v10, %v4823_v27  ;;  %v4881_v28 = vsub.f32 %v5801_v15, %v4823_v27  ;;  %v4883_v16 = vsel %vm2009_vm0, %v2007_v57, %v2008_v12  ;;  %v5802_v12 = vld [vmem:[#allocation3_spill] sm:$0xff] }
 0x223   : > { %v2056_v59 = vshra.s32 %v4833_v25, 31  ;;  %v2057_v40 = vshra.s32 %v4837_v49, 31  ;;  %v2058_v31 = vshra.s32 %v4841_v45, 31  ;;  %v4888_v42 = vsel %vm2019_vm15, %v2017_v38, %v2018_v7 }
 0x224   : > { %v2059_v2 = vshra.s32 %v4849_v44, 31  ;;  %v2060_v52 = vshra.s32 %v4853_v56, 31  ;;  %v2061_v54 = vshra.s32 %v4865_v4, 31  ;;  %v4895_v58 = vsel %vm4855_vm7, %v1970_v19, %v1971_v34 }
 0x225   : > { %v4899_v41 = vsel %vm4859_vm12, %v1980_v51, %v1981_v5  ;;  %v2062_v61 = vshra.s32 %v4877_v60, 31  ;;  %v2063_v39 = vshra.s32 %v4881_v28, 31  ;;  %v4905_v46 = vsel %vm4867_vm6, %v1990_v6, %v1991_v18 }
 0x226   : > { %v4909_v30 = vsel %vm4871_vm5, %v2000_v13, %v2001_v36  ;;  %v2064_v21 = vand.u32 2147483647, %v2056_v59  ;;  %v2065_v22 = vand.u32 2147483647, %v2057_v40  ;;  %v2011_v11 = vrot.slane %v4883_v16, 1 }
 0x227   : > { %v2021_v62 = vrot.slane %v4888_v42, 1  ;;  %v2066_v63 = vand.u32 2147483647, %v2058_v31  ;;  %v2067_v32 = vand.u32 2147483647, %v2059_v2 }
 0x228   : > { %v2068_v55 = vand.u32 2147483647, %v2060_v52  ;;  %v2069_v47 = vand.u32 2147483647, %v2061_v54  ;;  %v2070_v26 = vand.u32 2147483647, %v2062_v61  ;;  %v2072_v43 = vxor.u32 %v2064_v21, %v4833_v25 }
 0x229   : > { %v2071_v19 = vand.u32 2147483647, %v2063_v39  ;;  %v2073_v50 = vxor.u32 %v2065_v22, %v4837_v49  ;;  %v2074_v35 = vxor.u32 %v2066_v63, %v4841_v45  ;;  %v2075_v51 = vxor.u32 %v2067_v32, %v4849_v44 }
 0x22a   : > { %v2076_v9 = vxor.u32 %v2068_v55, %v4853_v56  ;;  %v2077_v8 = vxor.u32 %v2069_v47, %v4865_v4  ;;  %v2078_v6 = vxor.u32 %v2070_v26, %v4877_v60  ;;  %v2080_v17 = vand.u32 4294967288, %v2072_v43 }
 0x22b   : > { %v2079_v23 = vxor.u32 %v2071_v19, %v4881_v28  ;;  %v2081_v34 = vand.u32 4294967288, %v2073_v50  ;;  %v2082_v13 = vand.u32 4294967288, %v2074_v35  ;;  %v2083_v5 = vand.u32 4294967288, %v2075_v51 }
 0x22c   : > { %v2084_v57 = vand.u32 4294967288, %v2076_v9  ;;  %v2085_v18 = vand.u32 4294967288, %v2077_v8  ;;  %v4921_v36 = vand.u32 4294967288, %v2078_v6  ;;  %v2088_v38 = vor.u32 %v2080_v17, %v5802_v12 }
 0x22d   : > { %v4924_v7 = vand.u32 4294967288, %v2079_v23  ;;  %v2089_v37 = vor.u32 %v2081_v34, %v5802_v12  ;;  %v2090_v53 = vor.u32 %v2082_v13, %v5802_v12  ;;  %v2091_v33 = vor.u32 %v2083_v5, %v5802_v12 }
 0x22e   : > { %v2092_v24 = vor.u32 %v2084_v57, %v5802_v12  ;;  %v2093_v3 = vor.u32 %v2085_v18, %v5802_v12  ;;  %v2094_v10 = vor.u32 %v4921_v36, %v5802_v12  ;;  %v2096_v15 = vsel %vm5803_vm9, %v2088_v38, 2147483648 }
 0x22f   : > { %v2095_v59 = vor.u32 %v4924_v7, %v5802_v12  ;;  %v2097_v40 = vrot.slane %v2096_v15, 4  ;;  %v2106_v31 = vsel %vm5804_vm14, %v2089_v37, 2147483648  ;;  %v2116_v2 = vsel %vm5805_vm8, %v2090_v53, 2147483648 }
 0x230   : > { %v2107_v52 = vrot.slane %v2106_v31, 4  ;;  %v2117_v54 = vrot.slane %v2116_v2, 4  ;;  %v2126_v61 = vsel %vm5806_vm4, %v2091_v33, 2147483648  ;;  %v2136_v39 = vsel %vm5788_vm2, %v2092_v24, 2147483648 }
 0x231   : > { %vm2098_vm11 = vcmp.gt.s32.totalorder %v2096_v15, %v2097_v40  ;;  %v2127_v21 = vrot.slane %v2126_v61, 4  ;;  %v2137_v22 = vrot.slane %v2136_v39, 4  ;;  %v2146_v63 = vsel %vm5807_vm13, %v2093_v3, 2147483648 }
 0x232   : > { %v2099_v32 = vsel %vm2098_vm11, %v2096_v15, %v2097_v40  ;;  %vm2108_vm10 = vcmp.gt.s32.totalorder %v2106_v31, %v2107_v52  ;;  %vm2118_vm3 = vcmp.gt.s32.totalorder %v2116_v2, %v2117_v54  ;;  %v2147_v55 = vrot.slane %v2146_v63, 4 }
 0x233   : > { %v2100_v47 = vrot.slane %v2099_v32, 2  ;;  %v2109_v26 = vsel %vm2108_vm10, %v2106_v31, %v2107_v52  ;;  %v2119_v43 = vsel %vm2118_vm3, %v2116_v2, %v2117_v54  ;;  %vm2128_vm0 = vcmp.gt.s32.totalorder %v2126_v61, %v2127_v21 }
 0x234   : > { %v2110_v19 = vrot.slane %v2109_v26, 2  ;;  %v2120_v50 = vrot.slane %v2119_v43, 2  ;;  %v2129_v35 = vsel %vm2128_vm0, %v2126_v61, %v2127_v21  ;;  %vm2138_vm7 = vcmp.gt.s32.totalorder %v2136_v39, %v2137_v22 }
 0x235   : > { %vm2101_vm12 = vcmp.gt.s32.totalorder %v2099_v32, %v2100_v47  ;;  %v2130_v51 = vrot.slane %v2129_v35, 2  ;;  %v2139_v9 = vsel %vm2138_vm7, %v2136_v39, %v2137_v22  ;;  %vm4941_vm15 = vcmp.gt.s32.totalorder %v2146_v63, %v2147_v55 }
 0x236   : > { %v2102_v6 = vsel %vm2101_vm12, %v2099_v32, %v2100_v47  ;;  %vm2111_vm6 = vcmp.gt.s32.totalorder %v2109_v26, %v2110_v19  ;;  %vm2121_vm5 = vcmp.gt.s32.totalorder %v2119_v43, %v2120_v50  ;;  %v2140_v17 = vrot.slane %v2139_v9, 2 }
 0x237   : > { %v2103_v23 = vrot.slane %v2102_v6, 1  ;;  %v2112_v34 = vsel %vm2111_vm6, %v2109_v26, %v2110_v19  ;;  %v2122_v13 = vsel %vm2121_vm5, %v2119_v43, %v2120_v50  ;;  %vm2131_vm9 = vcmp.gt.s32.totalorder %v2129_v35, %v2130_v51 }
 0x238   : > { %v2113_v5 = vrot.slane %v2112_v34, 1  ;;  %v2123_v57 = vrot.slane %v2122_v13, 1  ;;  %v2132_v18 = vsel %vm2131_vm9, %v2129_v35, %v2130_v51  ;;  %vm2141_vm14 = vcmp.gt.s32.totalorder %v2139_v9, %v2140_v17 }
 0x239   : > { %vm2104_vm8 = vcmp.gt.s32.totalorder %v2102_v6, %v2103_v23  ;;  %v2133_v36 = vrot.slane %v2132_v18, 1  ;;  %v2142_v12 = vsel %vm2141_vm14, %v2139_v9, %v2140_v17  ;;  %v2149_v38 = vsel %vm4941_vm15, %v2146_v63, %v2147_v55 }
 0x23a   : > { %v4947_v7 = vsel %vm2104_vm8, %v2102_v6, %v2103_v23  ;;  %vm2114_vm4 = vcmp.gt.s32.totalorder %v2112_v34, %v2113_v5  ;;  %vm2124_vm2 = vcmp.gt.s32.totalorder %v2122_v13, %v2123_v57  ;;  %v2143_v37 = vrot.slane %v2142_v12, 1 }
 0x23b   : > { %v4949_v53 = vsel %vm2114_vm4, %v2112_v34, %v2113_v5  ;;  %v4951_v33 = vsel %vm2124_vm2, %v2122_v13, %v2123_v57  ;;  %vm2134_vm11 = vcmp.gt.s32.totalorder %v2132_v18, %v2133_v36  ;;  %v2150_v24 = vrot.slane %v2149_v38, 2 }
 0x23c   : > { %v4953_v3 = vsel %vm2134_vm11, %v2132_v18, %v2133_v36  ;;  %vm2144_vm13 = vcmp.gt.s32.totalorder %v2142_v12, %v2143_v37  ;;  %vm5810_vm10 = vcmask 15360   ;;  %v2176_v61 = vand.u32 7, %v4947_v7 }
 0x23d   : > { %v2156_v15 = vsel %vm5810_vm10, %v2094_v10, 2147483648  ;;  %vm5811_vm3 = vmmov %vm5810_vm10  ;;  %v4957_v31 = vsel %vm2144_vm13, %v2142_v12, %v2143_v37  ;;  %vm2151_vm0 = vcmp.gt.s32.totalorder %v2149_v38, %v2150_v24  ;;  %v2177_v39 = vand.u32 7, %v4949_v53 }
 0x23e   : > { %v2166_v40 = vsel %vm5811_vm3, %v2095_v59, 2147483648  ;;  %v2157_v2 = vrot.slane %v2156_v15, 4  ;;  %v2152_v54 = vsel %vm2151_vm0, %v2149_v38, %v2150_v24  ;;  %v2178_v21 = vand.u32 7, %v4951_v33 }
 0x23f   : > { %v2167_v52 = vrot.slane %v2166_v40, 4  ;;  %vm4965_vm7 = vcmp.gt.s32.totalorder %v4883_v16, %v2011_v11  ;;  %v2153_v10 = vrot.slane %v2152_v54, 1  ;;  %v2179_v59 = vand.u32 7, %v4953_v3 }
 0x240   : > { %vm2158_vm12 = vcmp.gt.s32.totalorder %v2156_v15, %v2157_v2  ;;  %v2180_v55 = vand.u32 7, %v4957_v31  ;;  %v4971_v47 = vsub.s32 7, %v2176_v61  ;;  %vm4976_vm6 = vcmp.gt.s32.totalorder %v4888_v42, %v2021_v62 }
 0x241   : > { %vm2168_vm15 = vcmp.gt.s32.totalorder %v2166_v40, %v2167_v52  ;;  %v2159_v63 = vsel %vm2158_vm12, %v2156_v15, %v2157_v2  ;;  %vm2154_vm5 = vcmp.gt.s32.totalorder %v2152_v54, %v2153_v10  ;;  %v4980_v50 = vsub.s32 7, %v2177_v39 }
 0x242   : > { %v2169_v32 = vsel %vm2168_vm15, %v2166_v40, %v2167_v52  ;;  %v2160_v43 = vrot.slane %v2159_v63, 2  ;;  %v2155_v35 = vsel %vm2154_vm5, %v2152_v54, %v2153_v10  ;;  %v4982_v51 = vsub.s32 7, %v2178_v21 }
 0x243   : > { %v2170_v19 = vrot.slane %v2169_v32, 2  ;;  %v4984_v9 = vsub.s32 7, %v2179_v59  ;;  %v4986_v8 = vsub.s32 7, %v2180_v55  ;;  %v2181_v6 = vand.u32 7, %v2155_v35 }
 0x244   : > { %vm2161_vm9 = vcmp.gt.s32.totalorder %v2159_v63, %v2160_v43  ;;  %v2192_v17 = vand.u32 4294967288, %v4947_v7  ;;  %v2193_v13 = vand.u32 4294967288, %v4949_v53  ;;  %v2194_v5 = vand.u32 4294967288, %v4951_v33 }
 0x245   : > { %vm2171_vm14 = vcmp.gt.s32.totalorder %v2169_v32, %v2170_v19  ;;  %v2162_v23 = vsel %vm2161_vm9, %v2159_v63, %v2160_v43  ;;  %v4991_v36 = vsub.s32 7, %v2181_v6  ;;  %v2195_v12 = vand.u32 4294967288, %v4953_v3 }
 0x246   : > { %v2172_v34 = vsel %vm2171_vm14, %v2169_v32, %v2170_v19  ;;  %v2163_v57 = vrot.slane %v2162_v23, 1  ;;  %v2196_v38 = vand.u32 4294967288, %v4957_v31  ;;  %v2197_v37 = vand.u32 4294967288, %v2155_v35 }
 0x247   : > { %v2173_v18 = vrot.slane %v2172_v34, 1  ;;  %v2200_v24 = vshra.s32 %v2192_v17, 31  ;;  %v2201_v15 = vshra.s32 %v2193_v13, 31  ;;  %v2202_v7 = vshra.s32 %v2194_v5, 31 }
 0x248   : > { %vm2164_vm8 = vcmp.gt.s32.totalorder %v2162_v23, %v2163_v57  ;;  %v2203_v40 = vshra.s32 %v2195_v12, 31  ;;  %v2204_v53 = vshra.s32 %v2196_v38, 31  ;;  %v2205_v54 = vshra.s32 %v2197_v37, 31 }
 0x249   : > { %vm2174_vm4 = vcmp.gt.s32.totalorder %v2172_v34, %v2173_v18  ;;  %v2165_v2 = vsel %vm2164_vm8, %v2162_v23, %v2163_v57  ;;  %v5000_v3 = vsel %vm4965_vm7, %v4883_v16, %v2011_v11  ;;  %v2208_v31 = vand.u32 2147483647, %v2200_v24 }
 0x24a   : > { %v2175_v52 = vsel %vm2174_vm4, %v2172_v34, %v2173_v18  ;;  %v2182_v33 = vand.u32 7, %v2165_v2  ;;  %v2198_v39 = vand.u32 4294967288, %v2165_v2  ;;  %v2209_v10 = vand.u32 2147483647, %v2201_v15 }
 0x24b   : > { %v2183_v61 = vand.u32 7, %v2175_v52  ;;  %v2199_v21 = vand.u32 4294967288, %v2175_v52  ;;  %v2210_v59 = vand.u32 2147483647, %v2202_v7  ;;  %v5011_v19 = vsel %vm4976_vm6, %v4888_v42, %v2021_v62 }
 0x24c   : > { %v5002_v63 = vsub.s32 7, %v2182_v33  ;;  %v2206_v55 = vshra.s32 %v2198_v39, 31  ;;  %v2211_v35 = vand.u32 2147483647, %v2203_v40  ;;  %v2212_v22 = vand.u32 2147483647, %v2204_v53 }
 0x24d   : > { %v5004_v32 = vsub.s32 7, %v2183_v61  ;;  %v2207_v43 = vshra.s32 %v2199_v21, 31  ;;  %v2213_v16 = vand.u32 2147483647, %v2205_v54  ;;  %v5013_v23 = vxor.u32 %v2208_v31, %v2192_v17 }
 0x24e   : > { %v2214_v11 = vand.u32 2147483647, %v2206_v55  ;;  %vm2232_vm2 = vcmp.eq.s32.totalorder %v3266_v1, %v4971_v47  ;;  %v5017_v34 = vxor.u32 %v2209_v10, %v2193_v13  ;;  %v5019_v57 = vxor.u32 %v2210_v59, %v2194_v5 }
 0x24f   : > { %v2215_v6 = vand.u32 2147483647, %v2207_v43  ;;  %v5021_v18 = vxor.u32 %v2211_v35, %v2195_v12  ;;  %vm2233_vm11 = vcmp.eq.s32.totalorder %v3266_v1, %v4980_v50  ;;  %v5025_v42 = vxor.u32 %v2212_v22, %v2196_v38 }
 0x250   : > { %v5027_v62 = vxor.u32 %v2213_v16, %v2197_v37  ;;  %vm2234_vm13 = vcmp.eq.s32.totalorder %v3266_v1, %v4982_v51  ;;  %vm2235_vm10 = vcmp.eq.s32.totalorder %v3266_v1, %v4984_v9  ;;  %vm2236_vm3 = vcmp.eq.s32.totalorder %v3266_v1, %v4986_v8 }
 0x251   : > { %vm5471_vm0 = vcmp.eq.s32.totalorder %v3266_v1, %v4991_v36  ;;  %vm5469_vm7 = vcmp.eq.s32.totalorder %v3266_v1, %v5002_v63  ;;  %vm5470_vm12 = vcmp.eq.s32.totalorder %v3266_v1, %v5004_v32  ;;  %v5041_v26 = vxor.u32 %v2214_v11, %v2198_v39 }
 0x252   : > { %v2240_v17 = vsel %vm2232_vm2, -1e+30, %v4833_v25  ;;  %v2241_v13 = vsel %vm2233_vm11, -1e+30, %v4837_v49  ;;  %v2242_v5 = vsel %vm2234_vm13, -1e+30, %v4841_v45  ;;  %v5055_v12 = vxor.u32 %v2215_v6, %v2199_v21 }
 0x253   : > { %v2243_v38 = vsel %vm2235_vm10, -1e+30, %v4849_v44  ;;  %v2244_v25 = vsel %vm2236_vm3, -1e+30, %v4853_v56  ;;  %v2245_v49 = vsel %vm5471_vm0, -1e+30, %v4865_v4 }
 0x254   : > { %v2246_v45 = vsel %vm5469_vm7, -1e+30, %v4877_v60  ;;  %v2247_v44 = vsel %vm5470_vm12, -1e+30, %v4881_v28  ;;  %vm5816_vm15 = vcmask 15360   ;;  %vm2024_vm4 = vcmp.gt.s32.totalorder %v4829_v29, 0 }
 0x255   : > { %v2248_v37 = vsel %vm5816_vm15, %v2240_v17, -inf  ;;  %vm5817_vm6 = vmmov %vm5816_vm15  ;;  %vm2031_vm7 = vcmp.gt.s32.totalorder %v5011_v19, 0 }
 0x256   : > { %v2255_v24 = vsel %vm5817_vm6, %v2241_v13, -inf  ;;  %v2249_v56 = vrot.slane %v2248_v37, 4  ;;  %vm5818_vm5 = vmmov %vm5817_vm6 }
 0x257   : > { %v2256_v15 = vrot.slane %v2255_v24, 4  ;;  %v2262_v7 = vsel %vm5818_vm5, %v2242_v5, -inf  ;;  %vm5819_vm9 = vmmov %vm5818_vm5 }
 0x258   : > { %v2269_v4 = vsel %vm5819_vm9, %v2243_v38, -inf  ;;  %v2263_v40 = vrot.slane %v2262_v7, 4  ;;  %vm5820_vm14 = vmmov %vm5818_vm5  ;;  %v2250_v53 = vmax.f32 %v2248_v37, %v2249_v56  ;;  %vm2026_vm9 = vcmp.gt.s32.totalorder %v4895_v58, 0 }
 0x259   : > { %v2270_v2 = vrot.slane %v2269_v4, 4  ;;  %v2276_v52 = vsel %vm5820_vm14, %v2244_v25, -inf  ;;  %vm5821_vm8 = vmmov %vm5818_vm5  ;;  %v2257_v54 = vmax.f32 %v2255_v24, %v2256_v15  ;;  %vm2027_vm14 = vcmp.gt.s32.totalorder %v4899_v41, 0 }
 0x25a   : > { %v2283_v60 = vsel %vm5821_vm8, %v2245_v49, -inf  ;;  %v2277_v33 = vrot.slane %v2276_v52, 4  ;;  %v2264_v61 = vmax.f32 %v2262_v7, %v2263_v40  ;;  %vm5822_vm15 = vmmov %vm5818_vm5  ;;  %v2251_v10 = vrot.slane %v2250_v53, 2 }
 0x25b   : > { %v2284_v28 = vrot.slane %v2283_v60, 4  ;;  %v2271_v39 = vmax.f32 %v2269_v4, %v2270_v2  ;;  %v2290_v21 = vsel %vm5822_vm15, %v2246_v45, -inf  ;;  %vm5823_vm6 = vmmov %vm5818_vm5  ;;  %vm2025_vm5 = vcmp.gt.s32.totalorder %v4845_v20, 0 }
 0x25c   : > { %v2297_v31 = vsel %vm5823_vm6, %v2247_v44, -inf  ;;  %v2258_v59 = vrot.slane %v2257_v54, 2  ;;  %v2278_v55 = vmax.f32 %v2276_v52, %v2277_v33  ;;  %v2265_v35 = vrot.slane %v2264_v61, 2  ;;  %vm5100_vm12 = vmxor %vm2024_vm4, %vm2996_vm1 }
 0x25d   : > { %v2285_v43 = vmax.f32 %v2283_v60, %v2284_v28  ;;  %v2272_v22 = vrot.slane %v2271_v39, 2  ;;  %v2291_v16 = vrot.slane %v2290_v21, 4  ;;  %v2298_v11 = vrot.slane %v2297_v31, 4  ;;  %vm5109_vm0 = vmxor %vm2025_vm5, %vm2996_vm1 }
 0x25e   : > { %v2252_v6 = vmax.f32 %v2250_v53, %v2251_v10  ;;  %v2259_v17 = vmax.f32 %v2257_v54, %v2258_v59  ;;  %v2279_v13 = vrot.slane %v2278_v55, 2  ;;  %vm2028_vm8 = vcmp.gt.s32.totalorder %v4905_v46, 0  ;;  %vm5116_vm4 = vmxor %vm2026_vm9, %vm2996_vm1 }
 0x25f   : > { %v2286_v5 = vrot.slane %v2285_v43, 2  ;;  %v2266_v38 = vmax.f32 %v2264_v61, %v2265_v35  ;;  %v2273_v25 = vmax.f32 %v2271_v39, %v2272_v22  ;;  %v2292_v49 = vmax.f32 %v2290_v21, %v2291_v16  ;;  %vm5125_vm5 = vmxor %vm2027_vm14, %vm2996_vm1 }
 0x260   : > { %v2299_v45 = vmax.f32 %v2297_v31, %v2298_v11  ;;  %vm2029_vm15 = vcmp.gt.s32.totalorder %v4909_v30, 0  ;;  %v2253_v44 = vrot.slane %v2252_v6, 1  ;;  %v2260_v37 = vrot.slane %v2259_v17, 1  ;;  %vm5136_vm9 = vmxor %vm2028_vm8, %vm2996_vm1 }
 0x261   : > { %v2280_v24 = vmax.f32 %v2278_v55, %v2279_v13  ;;  %v2287_v56 = vmax.f32 %v2285_v43, %v2286_v5  ;;  %vm2030_vm6 = vcmp.gt.s32.totalorder %v5000_v3, 0  ;;  %v2267_v15 = vrot.slane %v2266_v38, 1  ;;  %vm5145_vm14 = vmxor %vm2029_vm15, %vm2996_vm1 }
 0x262   : > { %v2274_v7 = vrot.slane %v2273_v25, 1  ;;  %v2293_v4 = vrot.slane %v2292_v49, 2  ;;  %v2300_v40 = vrot.slane %v2299_v45, 2  ;;  %v2254_v2 = vmax.f32 %v2252_v6, %v2253_v44  ;;  %vm5152_vm8 = vmxor %vm2030_vm6, %vm2996_vm1 }
 0x263   : > { %v2261_v52 = vmax.f32 %v2259_v17, %v2260_v37  ;;  %v2281_v60 = vrot.slane %v2280_v24, 1  ;;  %v2288_v53 = vrot.slane %v2287_v56, 1  ;;  %v2268_v54 = vmax.f32 %v2266_v38, %v2267_v15  ;;  %vm5159_vm15 = vmxor %vm2031_vm7, %vm2996_vm1 }
 0x264   : > { %v2275_v33 = vmax.f32 %v2273_v25, %v2274_v7  ;;  %v2294_v28 = vmax.f32 %v2292_v49, %v2293_v4  ;;  %v2301_v61 = vmax.f32 %v2299_v45, %v2300_v40  ;;  %v2304_v31 = vsub.f32 %v5013_v23, %v2254_v2  ;;  %vm5170_vm6 = vmand %vm2232_vm2, %vm5100_vm12 }
 0x265   : > { %v2282_v39 = vmax.f32 %v2280_v24, %v2281_v60  ;;  %v2289_v21 = vmax.f32 %v2287_v56, %v2288_v53  ;;  %v2305_v10 = vsub.f32 %v5017_v34, %v2261_v52  ;;  %v2306_v43 = vsub.f32 %v5019_v57, %v2268_v54  ;;  %vm5179_vm7 = vmand %vm2233_vm11, %vm5109_vm0 }
 0x266   : > { %v2295_v59 = vrot.slane %v2294_v28, 1  ;;  %v2302_v55 = vrot.slane %v2301_v61, 1  ;;  %v2307_v35 = vsub.f32 %v5021_v18, %v2275_v33  ;;  %v2312_v23 = vmax.f32 %v2304_v31, 0.0  ;;  %vm5188_vm2 = vmand %vm2234_vm13, %vm5116_vm4 }
 0x267   : > { %v2308_v16 = vsub.f32 %v5025_v42, %v2282_v39  ;;  %v2309_v11 = vsub.f32 %v5027_v62, %v2289_v21  ;;  %v2313_v6 = vmax.f32 %v2305_v10, 0.0  ;;  %v2314_v29 = vmax.f32 %v2306_v43, 0.0  ;;  %vm5197_vm11 = vmand %vm2235_vm10, %vm5125_vm5 }
 0x268   : > { %v2296_v57 = vmax.f32 %v2294_v28, %v2295_v59  ;;  %v2303_v18 = vmax.f32 %v2301_v61, %v2302_v55  ;;  %v2315_v17 = vmax.f32 %v2307_v35, 0.0  ;;  %v2320_v5 = vadd.f32 %v2312_v23, %v3625_v14  ;;  %vm5206_vm13 = vmand %vm2236_vm3, %vm5136_vm9 }
 0x269   : > { %v2316_v62 = vmax.f32 %v2308_v16, 0.0  ;;  %v2317_v13 = vmax.f32 %v2309_v11, 0.0  ;;  %v2321_v20 = vadd.f32 %v2313_v6, %v3625_v14  ;;  %v2322_v49 = vadd.f32 %v2314_v29, %v3625_v14 }
 0x26a   : > { %v2310_v25 = vsub.f32 %v5041_v26, %v2296_v57  ;;  %v2311_v58 = vsub.f32 %v5055_v12, %v2303_v18  ;;  %v2323_v45 = vadd.f32 %v2315_v17, %v3625_v14  ;;  %v2336_v24 = vshra.s32 %v2320_v5, 31 }
 0x26b   : > { %v2324_v41 = vadd.f32 %v2316_v62, %v3625_v14  ;;  %v2325_v37 = vadd.f32 %v2317_v13, %v3625_v14  ;;  %v2337_v56 = vshra.s32 %v2321_v20, 31  ;;  %v2338_v46 = vshra.s32 %v2322_v49, 31 }
 0x26c   : > { %v2318_v12 = vmax.f32 %v2310_v25, 0.0  ;;  %v2319_v15 = vmax.f32 %v2311_v58, 0.0  ;;  %v2339_v7 = vshra.s32 %v2323_v45, 31  ;;  %v2344_v52 = vand.u32 2147483647, %v2336_v24 }
 0x26d   : > { %v2340_v40 = vshra.s32 %v2324_v41, 31  ;;  %v2341_v2 = vshra.s32 %v2325_v37, 31  ;;  %v2345_v60 = vand.u32 2147483647, %v2337_v56  ;;  %v2346_v3 = vand.u32 2147483647, %v2338_v46 }
 0x26e   : > { %v2326_v53 = vadd.f32 %v2318_v12, %v3625_v14  ;;  %v2327_v54 = vadd.f32 %v2319_v15, %v3625_v14  ;;  %v2347_v33 = vand.u32 2147483647, %v2339_v7  ;;  %v2352_v39 = vxor.u32 %v2344_v52, %v2320_v5 }
 0x26f   : > { %v2348_v28 = vand.u32 2147483647, %v2340_v40  ;;  %v2349_v61 = vand.u32 2147483647, %v2341_v2  ;;  %v2353_v21 = vxor.u32 %v2345_v60, %v2321_v20  ;;  %v2354_v59 = vxor.u32 %v2346_v3, %v2322_v49 }
 0x270   : > { %v2342_v31 = vshra.s32 %v2326_v53, 31  ;;  %v2343_v10 = vshra.s32 %v2327_v54, 31  ;;  %v2355_v55 = vxor.u32 %v2347_v33, %v2323_v45  ;;  %v2360_v47 = vand.u32 4294967288, %v2352_v39 }
 0x271   : > { %v2356_v43 = vxor.u32 %v2348_v28, %v2324_v41  ;;  %v2357_v35 = vxor.u32 %v2349_v61, %v2325_v37  ;;  %v2361_v22 = vand.u32 4294967288, %v2353_v21  ;;  %v2362_v50 = vand.u32 4294967288, %v2354_v59  ;;  %v5863_v28 = vld [vmem:[#allocation2_spill] sm:$0xff] }
 0x272   : > { %v2350_v11 = vand.u32 2147483647, %v2342_v31  ;;  %v2351_v23 = vand.u32 2147483647, %v2343_v10  ;;  %v2363_v6 = vand.u32 4294967288, %v2355_v55  ;;  %v2368_v51 = vor.u32 7, %v2360_v47 }
 0x273   : > { %v2364_v57 = vand.u32 4294967288, %v2356_v43  ;;  %v2365_v18 = vand.u32 4294967288, %v2357_v35  ;;  %v2369_v29 = vor.u32 6, %v2361_v22  ;;  %v2370_v9 = vor.u32 5, %v2362_v50 }
 0x274   : > { %v2358_v42 = vxor.u32 %v2350_v11, %v2326_v53  ;;  %v2359_v62 = vxor.u32 %v2351_v23, %v2327_v54  ;;  %v2371_v13 = vor.u32 4, %v2363_v6  ;;  %vm5850_vm10 = vcmp.eq.s32.totalorder %v3266_v1, %v4991_v36 }
 0x275   : > { %vm2396_vm0 = vmand %vm5850_vm10, %vm5145_vm14  ;;  %v2372_v5 = vor.u32 3, %v2364_v57  ;;  %v2373_v20 = vor.u32 2, %v2365_v18  ;;  %vm5851_vm3 = vcmp.eq.s32.totalorder %v3266_v1, %v5004_v32  ;;  %v2399_v38 = vsel %vm5170_vm6, %v2368_v51, 2147483648 }
 0x276   : > { %vm5220_vm12 = vmand %vm5851_vm3, %vm5159_vm15  ;;  %v2400_v25 = vsel %vm5179_vm7, %v2369_v29, 2147483648  ;;  %v2366_v58 = vand.u32 4294967288, %v2358_v42  ;;  %v2367_v36 = vand.u32 4294967288, %v2359_v62  ;;  %v2401_v49 = vsel %vm5188_vm2, %v2370_v9, 2147483648 }
 0x277   : > { %v2402_v45 = vsel %vm5197_vm11, %v2371_v13, 2147483648  ;;  %vm5854_vm4 = vcmp.eq.s32.totalorder %v3266_v1, %v5002_v63  ;;  %v2403_v32 = vsel %vm5206_vm13, %v2372_v5, 2147483648  ;;  %v2404_v44 = vsel %vm2396_vm0, %v2373_v20, 2147483648 }
 0x278   : > { %vm2397_vm5 = vmand %vm5854_vm4, %vm5152_vm8  ;;  %vm5855_vm9 = vcmask 15360   ;;  %v2374_v24 = vor.u32 1, %v2366_v58  ;;  %v2406_v56 = vsel %vm5220_vm12, %v2367_v36, 2147483648 }
 0x279   : > { %v2407_v41 = vsel %vm5855_vm9, %v2399_v38, 2147483648  ;;  %vm5856_vm14 = vmmov %vm5855_vm9 }
 0x27a   : > { %v2408_v37 = vsel %vm5856_vm14, %v2400_v25, 2147483648  ;;  %vm5857_vm15 = vmmov %vm5855_vm9  ;;  %v2405_v7 = vsel %vm2397_vm5, %v2374_v24, 2147483648  ;;  %vm5864_vm5 = vcmp.lt.s32.totalorder %v5863_v28, 2 }
 0x27b   : > { %v2410_v26 = vsel %vm5857_vm15, %v2402_v45, 2147483648  ;;  %vm5858_vm6 = vmmov %vm5855_vm9 }
 0x27c   : > { %v2409_v12 = vsel %vm5858_vm6, %v2401_v49, 2147483648  ;;  %vm5859_vm7 = vmmov %vm5858_vm6 }
 0x27d   : > { %v2411_v15 = vsel %vm5859_vm7, %v2403_v32, 2147483648  ;;  %vm5860_vm2 = vmmov %vm5858_vm6 }
 0x27e   : > { %v2414_v63 = vsel %vm5860_vm2, %v2404_v44, 2147483648  ;;  %vm5861_vm8 = vmmov %vm5860_vm2  ;;  %vm2412_vm11 = vcmp.gt.s32.totalorder %v2407_v41, %v2411_v15 }
 0x27f   : > { %v2420_v46 = vsel %vm5861_vm8, %v2406_v56, 2147483648  ;;  %vm2415_vm13 = vcmp.gt.s32.totalorder %v2408_v37, %v2414_v63  ;;  %v2413_v4 = vsel %vm2412_vm11, %v2407_v41, %v2411_v15  ;;  %vm5862_vm0 = vmmov %vm5860_vm2 }
 0x280   : > { %vm2421_vm10 = vcmp.gt.s32.totalorder %v2410_v26, %v2420_v46  ;;  %v2416_v40 = vsel %vm2415_vm13, %v2408_v37, %v2414_v63  ;;  %v2417_v2 = vsel %vm5862_vm0, %v2405_v7, 2147483648  ;;  %vm2441_vm15 = vmxor %vm5864_vm5, %vm2996_vm1 }
 0x281   : > { %v2422_v52 = vsel %vm2421_vm10, %v2410_v26, %v2420_v46  ;;  %vm2418_vm3 = vcmp.gt.s32.totalorder %v2409_v12, %v2417_v2  ;;  %vm2423_vm12 = vcmp.gt.s32.totalorder %v2413_v4, %v2416_v40  ;;  %vm5865_vm2 = vmmov %vm5862_vm0 }
 0x282   : > { %v2419_v60 = vsel %vm2418_vm3, %v2409_v12, %v2417_v2  ;;  %v2424_v30 = vsel %vm2423_vm12, %v2413_v4, %v2416_v40 }
 0x283   : > { %vm2425_vm4 = vcmp.gt.s32.totalorder %v2419_v60, %v2422_v52 }
 0x284   : > { %v2426_v53 = vsel %vm2425_vm4, %v2419_v60, %v2422_v52 }
 0x285   : > { %vm2427_vm9 = vcmp.gt.s32.totalorder %v2424_v30, %v2426_v53 }
 0x286   : > { %v2428_v54 = vsel %vm2427_vm9, %v2424_v30, %v2426_v53 }
 0x287   : > { %v2430_v3 = vand.u32 7, %v2428_v54  ;;  %vm2429_vm14 = vcmp.ge.s32.totalorder %v2428_v54, 0  ;;  %v2432_v43 = vand.u32 4294967288, %v2428_v54 }
 0x289   : > { %v2431_v33 = vsub.s32 7, %v2430_v3  ;;  %v2433_v35 = vshra.s32 %v2432_v43, 31 }
 0x28b   : > { %v2437_v61 = vsel %vm2429_vm14, %v2431_v33, %v4791_v0  ;;  %v2434_v47 = vand.u32 2147483647, %v2433_v35 }
 0x28c   : > { %vm2440_vm6 = vcmp.ge.s32.totalorder %v2437_v61, 0 }
 0x28d   : > { %vm2444_vm7 = vmor %vm2440_vm6, %vm2441_vm15  ;;  %v2435_v22 = vxor.u32 %v2434_v47, %v2432_v43 }
 0x28e   : > { %v2445_v39 = vsel %vm2444_vm7, 1, %v5618_v48 }
 0x28f   : > { %v2446_v21 = vsel %vm5865_vm2, %v2445_v39, 2147483647  ;;  %v2438_v0 = vadd.f32 %v2435_v22, %v4823_v27 }
 0x290   : > { %v2448_v19 = vshra.s32 %v2446_v21, 16  ;;  %v2447_v10 = vand.u32 65535, %v2446_v21 }
 0x291   : > { %v2439_v22 = vsel %vm2429_vm14, %v2438_v0, %v4823_v27  }
 0x292   : > { %v2450_v31 = vcvt.s32.f32 %v2448_v19  ;;  %v2449_v59 = vcvt.s32.f32 %v2447_v10 }
 0x294   : > { %2451 = vmin.xlane.f32.xlu0 %v2450_v31 }
 0x307   : > { %v2452_v55 = vpop.xlane.xlu0 %2451 }
 0x308   : > { %vm2453_vm8 = vcmp.eq.f32.partialorder %v2450_v31, %v2452_v55  ;;  %v2458_v48 = vcvt.f32.s32 %v2452_v55 }
 0x309   : > { %v2454_v14 = vsel %vm2453_vm8, %v2449_v59, inf }
 0x30a   : > { %2455 = vmin.xlane.f32.xlu0 %v2454_v14  ;;  %v2459_v23 = vshll.u32 %v2458_v48, 16 }
 0x37d   : > { %v2456_v16 = vpop.xlane.xlu0 %2455 }
 0x37e   : > { %v2457_v11 = vcvt.f32.s32 %v2456_v16 }
 0x380   : > { %v2460_v50 = vadd.s32 %v2459_v23, %v2457_v11 }
 0x382   : > { %v2461_v6 = vrot.slane %v2460_v50, 4 }
 0x384   : > { %vm2462_vm1 = vcmp.lt.s32.totalorder %v2460_v50, %v2461_v6 }
 0x385   : > { %v2463_v34 = vsel %vm2462_vm1, %v2460_v50, %v2461_v6 }
 0x386   : > { %v2464_v57 = vrot.slane %v2463_v34, 2 }
 0x388   : > { %vm2465_vm11 = vcmp.lt.s32.totalorder %v2463_v34, %v2464_v57 }
 0x389   : > { %v2466_v18 = vsel %vm2465_vm11, %v2463_v34, %v2464_v57 }
 0x38a   : > { %v2467_v51 = vrot.slane %v2466_v18, 1 }
 0x38c   : > { %vm2468_vm13 = vcmp.lt.s32.totalorder %v2466_v18, %v2467_v51 }
 0x38d   : > { %v2469_v27 = vsel %vm2468_vm13, %v2466_v18, %v2467_v51 }
 0x38e   : > { %2739 = vpush %v2469_v27 }
 0x3bf   : > { %s2740_s20 = spop %2739 }
 0x3c0   : > { %p2471_p2 = scmp.eq.s32.totalorder %s2740_s20, 1 }
 0x3c2   : > { %p2476_p3 = por %p2475_p1, %p2471_p2 }
 0x3c4   : > { %s5901_s21 = smov (!%p2476_p3, %s2477_s21), %s2953_s11  ;;  %s5903_s22 = smov (!%p2476_p3, %s2479_s22), %s2949_s10 }
 0x3c5   : > { %s5905_s19 = smov (%p2476_p3, %s2474_s19), 0  ;;  %p2483_p5 = pnand %p2482_p4, %p2476_p3 }
 0x3c6   : > { %p2738_p6 = scmp.ge.s32.totalorder %s5901_s21, 6  ;;  %s5868_s9 = smov %s5905_s19 }
 0x3c7   : > { %s2737_s23 = scalar_select %p2483_p5, 0, 1  ;;  %v2997_v42 = vmov (%p2738_p6), 0   ;;  %vm5871_vm6 = vcmask (%p2738_p6), 15360  }
 0x3c8   : > { %s5869_s10 = smov %s5903_s22  ;;  %s5870_s11 = smov %s5901_s21  ;;  %vm5872_vm7 = vmmov (%p2738_p6), %vm5871_vm6 }
 0x3c9   : > { %v2486_v29 = vstv %s2737_s23  ;;  %382 = sbr.rel (!%p2738_p6) target bundleno = 132 (0x84), region = 38  ;;  %vm5873_vm2 = vmmov (%p2738_p6), %vm5871_vm6  ;;  %s5314_s0 = smov (%p2738_p6), 0  }
 0x3ca   : > { %vm2487_vm10 = vcmp.eq.s32.totalorder %v2486_v29, 1  ;;  %vm5874_vm8 = vmmov (%p2738_p6), %vm5873_vm2 }
 0x3cb   : > { %v5266_v21 = vsel %vm2487_vm10, 4294967295, %v2437_v61   ;;  %vm5875_vm1 = vmmov (%p2738_p6), %vm5873_vm2 }
 0x3cc   : > { %v5866_v17 = vmov %v5266_v21  ;;  %vm5876_vm11 = vmmov (%p2738_p6), %vm5875_vm1 }
 0x3cd   : > { %v5867_v21 = vmov %v5866_v17  ;;  %vm2489_vm0 = vcmp.eq.s32.totalorder (%p2738_p6), %v5866_v17, 0  ;;  %vm2490_vm3 = vcmp.eq.s32.totalorder (%p2738_p6), %v5866_v17, 1  ;;  %vm2491_vm12 = vcmp.eq.s32.totalorder (%p2738_p6), %v5866_v17, 2  ;;  %vm5877_vm13 = vmmov (%p2738_p6), %vm5875_vm1 }
 0x3ce   :  { %vm2492_vm4 = vcmp.eq.s32.totalorder %v5866_v17, 3  ;;  %vm2493_vm9 = vcmp.eq.s32.totalorder %v5866_v17, 4  ;;  %vm2494_vm14 = vcmp.eq.s32.totalorder %v5866_v17, 5  ;;  %vm2495_vm5 = vcmp.eq.s32.totalorder %v5866_v17, 6  ;;  %vm5878_vm10 = vmmov %vm5875_vm1 }
 0x3cf   :  { %vm2496_vm15 = vcmp.eq.s32.totalorder %v5866_v17, 7  ;;  %v2497_v62 = vsel %vm2489_vm0, 1, %v2997_v42  ;;  %v2498_v9 = vsel %vm2490_vm3, 1, %v2997_v42  ;;  %v2499_v13 = vsel %vm2491_vm12, 1, %v2997_v42 }
 0x3d0   :  { %v2500_v5 = vsel %vm2492_vm4, 1, %v2997_v42  ;;  %v2501_v20 = vsel %vm2493_vm9, 1, %v2997_v42  ;;  %v2502_v8 = vsel %vm2494_vm14, 1, %v2997_v42  ;;  %v2503_v38 = vsel %vm2495_vm5, 1, %v2997_v42 }
 0x3d1   :  { %v2504_v25 = vsel %vm2496_vm15, 1, %v2997_v42  ;;  %v2505_v58 = vsel %vm5871_vm6, %v2497_v62, 2147483648  ;;  %v2515_v36 = vsel %vm5872_vm7, %v2498_v9, 2147483648  ;;  %v2525_v49 = vsel %vm5873_vm2, %v2499_v13, 2147483648 }
 0x3d2   :  { %v2535_v45 = vsel %vm5874_vm8, %v2500_v5, 2147483648  ;;  %v2506_v32 = vrot.slane %v2505_v58, 4  ;;  %v2516_v44 = vrot.slane %v2515_v36, 4  ;;  %v2526_v41 = vrot.slane %v2525_v49, 4 }
 0x3d3   :  { %v2536_v37 = vrot.slane %v2535_v45, 4  ;;  %v2545_v24 = vsel %vm5875_vm1, %v2501_v20, 2147483648  ;;  %v2555_v56 = vsel %vm5876_vm11, %v2502_v8, 2147483648  ;;  %v2565_v26 = vsel %vm5877_vm13, %v2503_v38, 2147483648 }
 0x3d4   :  { %v2575_v12 = vsel %vm5878_vm10, %v2504_v25, 2147483648  ;;  %vm2507_vm0 = vcmp.gt.s32.totalorder %v2505_v58, %v2506_v32  ;;  %vm2517_vm3 = vcmp.gt.s32.totalorder %v2515_v36, %v2516_v44  ;;  %vm2527_vm12 = vcmp.gt.s32.totalorder %v2525_v49, %v2526_v41 }
 0x3d5   :  { %vm2537_vm4 = vcmp.gt.s32.totalorder %v2535_v45, %v2536_v37  ;;  %v2508_v15 = vsel %vm2507_vm0, %v2505_v58, %v2506_v32  ;;  %v2518_v63 = vsel %vm2517_vm3, %v2515_v36, %v2516_v44  ;;  %v2528_v46 = vsel %vm2527_vm12, %v2525_v49, %v2526_v41 }
 0x3d6   :  { %v2538_v7 = vsel %vm2537_vm4, %v2535_v45, %v2536_v37  ;;  %v2509_v4 = vrot.slane %v2508_v15, 2  ;;  %v2519_v40 = vrot.slane %v2518_v63, 2  ;;  %v2529_v2 = vrot.slane %v2528_v46, 2 }
 0x3d7   :  { %v2539_v52 = vrot.slane %v2538_v7, 2  ;;  %v2546_v60 = vrot.slane %v2545_v24, 4  ;;  %v2556_v30 = vrot.slane %v2555_v56, 4  ;;  %v2566_v53 = vrot.slane %v2565_v26, 4 }
 0x3d8   :  { %v2576_v54 = vrot.slane %v2575_v12, 4  ;;  %vm2510_vm9 = vcmp.gt.s32.totalorder %v2508_v15, %v2509_v4  ;;  %vm2520_vm14 = vcmp.gt.s32.totalorder %v2518_v63, %v2519_v40  ;;  %vm2530_vm5 = vcmp.gt.s32.totalorder %v2528_v46, %v2529_v2 }
 0x3d9   :  { %vm2540_vm15 = vcmp.gt.s32.totalorder %v2538_v7, %v2539_v52  ;;  %v2511_v3 = vsel %vm2510_vm9, %v2508_v15, %v2509_v4  ;;  %v2521_v33 = vsel %vm2520_vm14, %v2518_v63, %v2519_v40  ;;  %v2531_v28 = vsel %vm2530_vm5, %v2528_v46, %v2529_v2 }
 0x3da   :  { %v2541_v61 = vsel %vm2540_vm15, %v2538_v7, %v2539_v52  ;;  %v2512_v39 = vrot.slane %v2511_v3, 1  ;;  %v2522_v21 = vrot.slane %v2521_v33, 1  ;;  %v2532_v19 = vrot.slane %v2531_v28, 1 }
 0x3db   :  { %v2542_v31 = vrot.slane %v2541_v61, 1  ;;  %vm2547_vm6 = vcmp.gt.s32.totalorder %v2545_v24, %v2546_v60  ;;  %vm2557_vm7 = vcmp.gt.s32.totalorder %v2555_v56, %v2556_v30  ;;  %vm2567_vm2 = vcmp.gt.s32.totalorder %v2565_v26, %v2566_v53 }
 0x3dc   :  { %vm2577_vm8 = vcmp.gt.s32.totalorder %v2575_v12, %v2576_v54  ;;  %vm2513_vm1 = vcmp.gt.s32.totalorder %v2511_v3, %v2512_v39  ;;  %vm2523_vm11 = vcmp.gt.s32.totalorder %v2521_v33, %v2522_v21  ;;  %vm2533_vm13 = vcmp.gt.s32.totalorder %v2531_v28, %v2532_v19 }
 0x3dd   :  { %vm2543_vm10 = vcmp.gt.s32.totalorder %v2541_v61, %v2542_v31  ;;  %v2514_v10 = vsel %vm2513_vm1, %v2511_v3, %v2512_v39   ;;  %v2524_v59 = vsel %vm2523_vm11, %v2521_v33, %v2522_v21   ;;  %v2534_v55 = vsel %vm2533_vm13, %v2531_v28, %v2532_v19  }
 0x3de   :  { %v2544_v14 = vsel %vm2543_vm10, %v2541_v61, %v2542_v31   ;;  %v2548_v43 = vsel %vm2547_vm6, %v2545_v24, %v2546_v60  ;;  %v2558_v35 = vsel %vm2557_vm7, %v2555_v56, %v2556_v30  ;;  %v2568_v47 = vsel %vm2567_vm2, %v2565_v26, %v2566_v53 }
 0x3df   :  { %v2578_v22 = vsel %vm2577_vm8, %v2575_v12, %v2576_v54  ;;  %v2549_v0 = vrot.slane %v2548_v43, 2  ;;  %v2559_v48 = vrot.slane %v2558_v35, 2  ;;  %v2569_v16 = vrot.slane %v2568_v47, 2 }
 0x3e0   :  { %v2579_v11 = vrot.slane %v2578_v22, 2 }
 0x3e1   :  { %vm2550_vm0 = vcmp.gt.s32.totalorder %v2548_v43, %v2549_v0  ;;  %vm2560_vm3 = vcmp.gt.s32.totalorder %v2558_v35, %v2559_v48  ;;  %vm2570_vm12 = vcmp.gt.s32.totalorder %v2568_v47, %v2569_v16 }
 0x3e2   :  { %vm2580_vm4 = vcmp.gt.s32.totalorder %v2578_v22, %v2579_v11  ;;  %v2551_v23 = vsel %vm2550_vm0, %v2548_v43, %v2549_v0  ;;  %v2561_v50 = vsel %vm2560_vm3, %v2558_v35, %v2559_v48  ;;  %v2571_v6 = vsel %vm2570_vm12, %v2568_v47, %v2569_v16 }
 0x3e3   :  { %v2581_v34 = vsel %vm2580_vm4, %v2578_v22, %v2579_v11  ;;  %v2552_v57 = vrot.slane %v2551_v23, 1  ;;  %v2562_v18 = vrot.slane %v2561_v50, 1  ;;  %v2572_v51 = vrot.slane %v2571_v6, 1 }
 0x3e4   :  { %v2582_v27 = vrot.slane %v2581_v34, 1 }
 0x3e5   :  { %vm2553_vm9 = vcmp.gt.s32.totalorder %v2551_v23, %v2552_v57  ;;  %vm2563_vm14 = vcmp.gt.s32.totalorder %v2561_v50, %v2562_v18  ;;  %vm2573_vm5 = vcmp.gt.s32.totalorder %v2571_v6, %v2572_v51 }
 0x3e6   :  { %vm2583_vm15 = vcmp.gt.s32.totalorder %v2581_v34, %v2582_v27  ;;  %v2554_v29 = vsel %vm2553_vm9, %v2551_v23, %v2552_v57   ;;  %v2564_v42 = vsel %vm2563_vm14, %v2561_v50, %v2562_v18   ;;  %v2574_v62 = vsel %vm2573_vm5, %v2571_v6, %v2572_v51  }
 0x3e7   :  { %v2584_v9 = vsel %vm2583_vm15, %v2581_v34, %v2582_v27  }
 0x3e8 LB: > { %vm2600_vm6 = vcmp.eq.s32.totalorder %v2985_v10, 0  ;;  %vm2601_vm7 = vcmp.eq.s32.totalorder %v2981_v59, 0  ;;  %vm2602_vm2 = vcmp.eq.s32.totalorder %v2977_v55, 0  ;;  %vm2603_vm8 = vcmp.eq.s32.totalorder %v2973_v14, 0  ;;  %s2590_s0 = sadd.s32 1, %s2993_s0   ;;  %s2993_s0 = sphi %s5314_s0, %s2590_s0   ;;  %v2989_v17 = vphi %v5866_v17, %v5898_v17   ;;  %v2985_v10 = vphi %v2514_v10, %v2674_v10   ;;  %v2981_v59 = vphi %v2524_v59, %v2675_v59   ;;  %v2977_v55 = vphi %v2534_v55, %v2676_v55   ;;  %v2973_v14 = vphi %v2544_v14, %v2677_v14   ;;  %v2969_v29 = vphi %v2554_v29, %v2678_v29   ;;  %v2965_v42 = vphi %v2564_v42, %v2679_v42   ;;  %v2961_v62 = vphi %v2574_v62, %v2680_v62   ;;  %v2957_v9 = vphi %v2584_v9, %v2681_v9  }
 0x3e9   : > { %vm2604_vm1 = vcmp.eq.s32.totalorder %v2969_v29, 0  ;;  %vm2605_vm11 = vcmp.eq.s32.totalorder %v2965_v42, 0  ;;  %vm2606_vm13 = vcmp.eq.s32.totalorder %v2961_v62, 0  ;;  %vm2607_vm10 = vcmp.eq.s32.totalorder %v2957_v9, 0  ;;  %p2587_p7 = scmp.ge.s32.totalorder %s2590_s0, 8  }
 0x3ea   : > { %vm2608_vm0 = vcmp.lt.s32.totalorder %v2989_v17, 0  ;;  %v2998_v13 = vmov 8   ;;  %vm5879_vm3 = vcmask 15360  }
 0x3eb   : > { %v2609_v5 = vsel %vm2600_vm6, 0, %v2998_v13  ;;  %v2610_v20 = vsel %vm2601_vm7, 1, %v2998_v13  ;;  %v2611_v8 = vsel %vm2602_vm2, 2, %v2998_v13  ;;  %v2612_v38 = vsel %vm2603_vm8, 3, %v2998_v13  ;;  %vm5880_vm12 = vmmov %vm5879_vm3 }
 0x3ec   : > { %v2613_v25 = vsel %vm2604_vm1, 4, %v2998_v13  ;;  %v2614_v58 = vsel %vm2605_vm11, 5, %v2998_v13  ;;  %v2615_v36 = vsel %vm2606_vm13, 6, %v2998_v13  ;;  %v2616_v49 = vsel %vm2607_vm10, 7, %v2998_v13  ;;  %vm5881_vm4 = vmmov %vm5879_vm3 }
 0x3ed   : > { %v2617_v45 = vsel %vm5879_vm3, %v2609_v5, 2147483647  ;;  %v2618_v32 = vsel %vm5880_vm12, %v2610_v20, 2147483647  ;;  %v2619_v44 = vsel %vm5881_vm4, %v2611_v8, 2147483647  ;;  %vm5882_vm9 = vmmov %vm5879_vm3 }
 0x3ee   : > { %v2620_v41 = vsel %vm5882_vm9, %v2612_v38, 2147483647  ;;  %vm5883_vm14 = vmmov %vm5879_vm3  ;;  %v2639_v7 = vsel %vm2608_vm0, %v3266_v1, 8 }
 0x3ef   : > { %v2621_v37 = vsel %vm5883_vm14, %v2613_v25, 2147483647  ;;  %vm5884_vm5 = vmmov %vm5879_vm3 }
 0x3f0   : > { %v2624_v24 = vsel %vm5884_vm5, %v2614_v58, 2147483647  ;;  %vm2622_vm15 = vcmp.lt.s32.totalorder %v2617_v45, %v2621_v37  ;;  %vm5885_vm7 = vmmov %vm5879_vm3 }
 0x3f1   : > { %vm2625_vm6 = vcmp.lt.s32.totalorder %v2618_v32, %v2624_v24  ;;  %v2627_v56 = vsel %vm5885_vm7, %v2615_v36, 2147483647  ;;  %vm5886_vm2 = vmmov %vm5879_vm3  ;;  %v2623_v12 = vsel %vm2622_vm15, %v2617_v45, %v2621_v37 }
 0x3f2   : > { %v2630_v26 = vsel %vm5886_vm2, %v2616_v49, 2147483647  ;;  %v2626_v15 = vsel %vm2625_vm6, %v2618_v32, %v2624_v24  ;;  %vm2628_vm8 = vcmp.lt.s32.totalorder %v2619_v44, %v2627_v56  ;;  %vm5887_vm10 = vmmov %vm5886_vm2 }
 0x3f3   : > { %vm2631_vm1 = vcmp.lt.s32.totalorder %v2620_v41, %v2630_v26  ;;  %v2629_v63 = vsel %vm2628_vm8, %v2619_v44, %v2627_v56  ;;  %vm2633_vm11 = vcmp.lt.s32.totalorder %v2623_v12, %v2626_v15  ;;  %v2640_v4 = vsel %vm5887_vm10, %v2639_v7, 2147483647 }
 0x3f4   : > { %v2632_v46 = vsel %vm2631_vm1, %v2620_v41, %v2630_v26  ;;  %v2641_v40 = vrot.slane %v2640_v4, 4  ;;  %v2634_v2 = vsel %vm2633_vm11, %v2623_v12, %v2626_v15 }
 0x3f5   : > { %vm2635_vm13 = vcmp.lt.s32.totalorder %v2629_v63, %v2632_v46 }
 0x3f6   : > { %v2636_v52 = vsel %vm2635_vm13, %v2629_v63, %v2632_v46  ;;  %vm2642_vm3 = vcmp.lt.s32.totalorder %v2640_v4, %v2641_v40 }
 0x3f7   : > { %v2643_v60 = vsel %vm2642_vm3, %v2640_v4, %v2641_v40  ;;  %vm2637_vm12 = vcmp.lt.s32.totalorder %v2634_v2, %v2636_v52 }
 0x3f8   : > { %v2644_v30 = vrot.slane %v2643_v60, 2  ;;  %v2638_v53 = vsel %vm2637_vm12, %v2634_v2, %v2636_v52 }
 0x3f9   : > { %vm2650_vm14 = vcmp.lt.s32.totalorder %v2638_v53, 8  ;;  %vm2658_vm15 = vcmp.eq.s32.totalorder %v2638_v53, 0  ;;  %vm2659_vm7 = vcmp.eq.s32.totalorder %v2638_v53, 1  ;;  %vm2660_vm8 = vcmp.eq.s32.totalorder %v2638_v53, 2 }
 0x3fa   : > { %vm2645_vm4 = vcmp.lt.s32.totalorder %v2643_v60, %v2644_v30  ;;  %vm2661_vm1 = vcmp.eq.s32.totalorder %v2638_v53, 3  ;;  %vm2662_vm13 = vcmp.eq.s32.totalorder %v2638_v53, 4  ;;  %vm2663_vm3 = vcmp.eq.s32.totalorder %v2638_v53, 5 }
 0x3fb   : > { %v2646_v54 = vsel %vm2645_vm4, %v2643_v60, %v2644_v30  ;;  %vm2664_vm4 = vcmp.eq.s32.totalorder %v2638_v53, 6 }
 0x3fc   : > { %v2647_v3 = vrot.slane %v2646_v54, 1 }
 0x3fe   : > { %vm2648_vm9 = vcmp.lt.s32.totalorder %v2646_v54, %v2647_v3 }
 0x3ff   : > { %v2649_v33 = vsel %vm2648_vm9, %v2646_v54, %v2647_v3 }
 0x400   : > { %vm2651_vm5 = vcmp.lt.s32.totalorder %v2649_v33, 8  ;;  %vm2653_vm0 = vcmp.eq.s32.totalorder %v3266_v1, %v2649_v33 }
 0x401   : > { %vm5364_vm6 = vmand %vm2650_vm14, %vm2651_vm5  ;;  %vm2665_vm14 = vcmp.eq.s32.totalorder %v2638_v53, 7 }
 0x402   : > { %vm2656_vm2 = vmand %vm5364_vm6, %vm2653_vm0 }
 0x403   : > { %v2657_v61 = vsel %vm2656_vm2, %v2638_v53, %v2989_v17   ;;  %vm5372_vm11 = vmand %vm5364_vm6, %vm2658_vm15 }
 0x404   : > { %vm5378_vm10 = vmand %vm5364_vm6, %vm2659_vm7  ;;  %v2674_v10 = vsel %vm5372_vm11, 1, %v2985_v10   ;;  %v5898_v17 = vmov %v2657_v61 }
 0x405   : > { %vm5387_vm12 = vmand %vm5364_vm6, %vm2660_vm8  ;;  %v2675_v59 = vsel %vm5378_vm10, 1, %v2981_v59  }
 0x406   : > { %vm5396_vm9 = vmand %vm5364_vm6, %vm2661_vm1  ;;  %v2676_v55 = vsel %vm5387_vm12, 1, %v2977_v55  }
 0x407   : > { %vm2670_vm5 = vmand %vm5364_vm6, %vm2662_vm13  ;;  %v2677_v14 = vsel %vm5396_vm9, 1, %v2973_v14   ;;  %2589 = sbr.rel (!%p2587_p7) target bundleno = 1000 (0x3e8), region = 49 }
 0x408   : > { %vm2671_vm0 = vmand %vm5364_vm6, %vm2663_vm3  ;;  %v2678_v29 = vsel %vm2670_vm5, 1, %v2969_v29  }
 0x409   : > { %vm2672_vm15 = vmand %vm5364_vm6, %vm2664_vm4  ;;  %v2679_v42 = vsel %vm2671_vm0, 1, %v2965_v42  }
 0x40a   : > { %vm2673_vm7 = vmand %vm5364_vm6, %vm2665_vm14  ;;  %v2680_v62 = vsel %vm2672_vm15, 1, %v2961_v62   ;;  %vm5899_vm6 = vcmask (%p2587_p7), 15360  }
 0x40b   : > { %v2681_v9 = vsel %vm2673_vm7, 1, %v2957_v9   ;;  %2682 = vst.msk [vmem:[%s5444_s1] sm:$0xff] (%p2587_p7), %vm5899_vm6, %v2657_v61 }

// kernel: tpu_custom_call.1
= control target key start
LH: loop header
LB: loop body
LE: loop exit
PB: predicated region body
PF: predicated region fallthrough
CT: control target
= control target key end

     0   :  { %s3318_s9 = smov 0   ;;  %s3320_s10 = smov 0.25   ;;  %s5443_s0 = inlined_call_operand.vmem [shape: f32[8,8,2], index: 0, kind: input, shape index: {}]   ;;  %s5444_s1 = inlined_call_operand.vmem [shape: s32[8,2], index: 1, kind: output, shape index: {}]  }
   0x1   :  { %v8_v0 = vld [vmem:[%s5443_s0] sm:$0xff]  ;;  %v9_v1 = vld [vmem:[%s5443_s0 + $0x8] sm:$0xff]  ;;  %v10_v2 = vld [vmem:[%s5443_s0 + $0x10] sm:$0xff]  ;;  %s3322_s11 = smov 0  }
   0x2   :  { %v11_v3 = vld [vmem:[%s5443_s0 + $0x18] sm:$0xff]  ;;  %v12_v4 = vld [vmem:[%s5443_s0 + $0x20] sm:$0xff]  ;;  %v13_v5 = vld [vmem:[%s5443_s0 + $0x28] sm:$0xff]  ;;  %v24_v6 = vand.u32 2147483647, %v8_v0  ;;  %vm16_vm0 = vcmp.ne.f32.partialorder %v8_v0, %v8_v0  ;;  %vm17_vm1 = vcmp.ne.f32.partialorder %v9_v1, %v9_v1  ;;  %vm18_vm2 = vcmp.ne.f32.partialorder %v10_v2, %v10_v2 }
   0x3   :  { %v14_v7 = vld [vmem:[%s5443_s0 + $0x30] sm:$0xff]  ;;  %v15_v8 = vld [vmem:[%s5443_s0 + $0x38] sm:$0xff]  ;;  %v25_v9 = vand.u32 2147483647, %v9_v1  ;;  %v26_v10 = vand.u32 2147483647, %v10_v2  ;;  %vm19_vm6 = vcmp.ne.f32.partialorder %v11_v3, %v11_v3 }
   0x4   :  { %v27_v11 = vand.u32 2147483647, %v11_v3  ;;  %v28_v12 = vand.u32 2147483647, %v12_v4  ;;  %v29_v13 = vand.u32 2147483647, %v13_v5  ;;  %vm22_vm10 = vcmp.ne.f32.partialorder %v14_v7, %v14_v7 }
   0x5   :  { %v30_v14 = vand.u32 2147483647, %v14_v7  ;;  %v31_v15 = vand.u32 2147483647, %v15_v8  ;;  %vm32_vm3 = vcmp.eq.f32.partialorder %v24_v6, inf  ;;  %vm33_vm4 = vcmp.eq.f32.partialorder %v25_v9, inf }
   0x6   :  { %vm34_vm5 = vcmp.eq.f32.partialorder %v26_v10, inf  ;;  %vm35_vm8 = vcmp.eq.f32.partialorder %v27_v11, inf  ;;  %vm40_vm9 = vmor %vm16_vm0, %vm32_vm3  ;;  %vm3034_vm12 = vcmp.eq.f32.partialorder %v28_v12, inf  ;;  %vm3038_vm13 = vcmp.eq.f32.partialorder %v29_v13, inf }
   0x7   :  { %vm41_vm14 = vmor %vm17_vm1, %vm33_vm4  ;;  %v3043_v18 = vsel %vm40_vm9, 1000000.0, %v8_v0  ;;  %vm3045_vm15 = vcmp.eq.f32.partialorder %v30_v14, inf  ;;  %vm3049_vm7 = vcmp.eq.f32.partialorder %v31_v15, inf  ;;  %vm23_vm4 = vcmp.ne.f32.partialorder %v15_v8, %v15_v8 }
   0x8   :  { %vm42_vm0 = vmor %vm18_vm2, %vm34_vm5  ;;  %v3054_v21 = vsel %vm41_vm14, 1000000.0, %v9_v1  ;;  %vm56_vm3 = vcmp.ge.f32.partialorder %v3043_v18, 1000000.0  ;;  %vm5480_vm9 = vcmp.ne.f32.partialorder %v12_v4, %v12_v4 }
   0x9   :  { %vm43_vm11 = vmor %vm19_vm6, %vm35_vm8  ;;  %v3058_v22 = vsel %vm42_vm0, 1000000.0, %v10_v2  ;;  %vm57_vm1 = vcmp.ge.f32.partialorder %v3054_v21, 1000000.0  ;;  %v64_v23 = vsel %vm56_vm3, -3e+38, %v3043_v18  ;;  %vm5481_vm6 = vcmp.ne.f32.partialorder %v13_v5, %v13_v5 }
   0xa   :  { %vm44_vm2 = vmor %vm5480_vm9, %vm3034_vm12  ;;  %v3067_v24 = vsel %vm43_vm11, 1000000.0, %v11_v3  ;;  %vm58_vm5 = vcmp.ge.f32.partialorder %v3058_v22, 1000000.0  ;;  %v65_v25 = vsel %vm57_vm1, -3e+38, %v3054_v21 }
   0xb   :  { %vm45_vm8 = vmor %vm5481_vm6, %vm3038_vm13  ;;  %v3076_v26 = vsel %vm44_vm2, 1000000.0, %v12_v4  ;;  %vm59_vm14 = vcmp.ge.f32.partialorder %v3067_v24, 1000000.0  ;;  %v66_v27 = vsel %vm58_vm5, -3e+38, %v3058_v22 }
   0xc   :  { %vm46_vm11 = vmor %vm22_vm10, %vm3045_vm15  ;;  %v3084_v28 = vsel %vm45_vm8, 1000000.0, %v13_v5  ;;  %vm60_vm12 = vcmp.ge.f32.partialorder %v3076_v26, 1000000.0  ;;  %v67_v29 = vsel %vm59_vm14, -3e+38, %v3067_v24 }
   0xd   :  { %vm47_vm13 = vmor %vm23_vm4, %vm3049_vm7  ;;  %v3092_v30 = vsel %vm46_vm11, 1000000.0, %v14_v7  ;;  %vm61_vm0 = vcmp.ge.f32.partialorder %v3084_v28, 1000000.0  ;;  %v68_v31 = vsel %vm60_vm12, -3e+38, %v3076_v26 }
   0xe   :  { %v3098_v32 = vsel %vm47_vm13, 1000000.0, %v15_v8  ;;  %vm62_vm10 = vcmp.ge.f32.partialorder %v3092_v30, 1000000.0  ;;  %v69_v33 = vsel %vm61_vm0, -3e+38, %v3084_v28 }
   0xf   :  { %vm63_vm15 = vcmp.ge.f32.partialorder %v3098_v32, 1000000.0  ;;  %v70_v34 = vsel %vm62_vm10, -3e+38, %v3092_v30  ;;  %vm5482_vm7 = vcmask 15360  }
  0x10   :  { %v73_v35 = vsel %vm5482_vm7, %v64_v23, -inf  ;;  %vm5483_vm4 = vmmov %vm5482_vm7  ;;  %v71_v37 = vsel %vm63_vm15, -3e+38, %v3098_v32 }
  0x11   :  { %v80_v36 = vsel %vm5483_vm4, %v65_v25, -inf  ;;  %v74_v38 = vrot.slane %v73_v35, 4  ;;  %vm5484_vm9 = vmmov %vm5483_vm4 }
  0x12   :  { %v81_v39 = vrot.slane %v80_v36, 4  ;;  %v87_v40 = vsel %vm5484_vm9, %v66_v27, -inf  ;;  %vm5485_vm2 = vmmov %vm5483_vm4 }
  0x13   :  { %v88_v41 = vrot.slane %v87_v40, 4  ;;  %v94_v42 = vsel %vm5485_vm2, %v67_v29, -inf  ;;  %vm5486_vm6 = vmmov %vm5485_vm2  ;;  %v75_v45 = vmax.f32 %v73_v35, %v74_v38 }
  0x14   :  { %v101_v43 = vsel %vm5486_vm6, %v68_v31, -inf  ;;  %vm5487_vm8 = vmmov %vm5485_vm2  ;;  %v82_v46 = vmax.f32 %v80_v36, %v81_v39  ;;  %v95_v47 = vrot.slane %v94_v42, 4 }
  0x15   :  { %v108_v44 = vsel %vm5487_vm8, %v69_v33, -inf  ;;  %v102_v48 = vrot.slane %v101_v43, 4  ;;  %v89_v49 = vmax.f32 %v87_v40, %v88_v41  ;;  %vm5488_vm11 = vmmov %vm5485_vm2  ;;  %v76_v53 = vrot.slane %v75_v45, 2 }
  0x16   :  { %v109_v50 = vrot.slane %v108_v44, 4  ;;  %v115_v51 = vsel %vm5488_vm11, %v70_v34, -inf  ;;  %vm5489_vm13 = vmmov %vm5485_vm2  ;;  %v83_v54 = vrot.slane %v82_v46, 2  ;;  %v96_v55 = vmax.f32 %v94_v42, %v95_v47 }
  0x17   :  { %v122_v52 = vsel %vm5489_vm13, %v71_v37, -inf  ;;  %v103_v56 = vmax.f32 %v101_v43, %v102_v48  ;;  %v90_v57 = vrot.slane %v89_v49, 2  ;;  %v116_v59 = vrot.slane %v115_v51, 4  ;;  %vm5490_vm7 = vmmov %vm5485_vm2 }
  0x18   :  { %v110_v58 = vmax.f32 %v108_v44, %v109_v50  ;;  %v123_v60 = vrot.slane %v122_v52, 4  ;;  %v77_v61 = vmax.f32 %v75_v45, %v76_v53  ;;  %v84_v62 = vmax.f32 %v82_v46, %v83_v54  ;;  %vm5491_vm4 = vmmov %vm5485_vm2 }
  0x19   :  { %v97_v63 = vrot.slane %v96_v55, 2  ;;  %v104_v0 = vrot.slane %v103_v56, 2  ;;  %v91_v1 = vmax.f32 %v89_v49, %v90_v57  ;;  %v117_v3 = vmax.f32 %v115_v51, %v116_v59  ;;  %vm5492_vm9 = vmmov %vm5485_vm2 }
  0x1a   :  { %v111_v2 = vrot.slane %v110_v58, 2  ;;  %v124_v4 = vmax.f32 %v122_v52, %v123_v60  ;;  %v78_v5 = vrot.slane %v77_v61, 1  ;;  %v85_v6 = vrot.slane %v84_v62, 1  ;;  %vm5493_vm6 = vmmov %vm5485_vm2 }
  0x1b   :  { %v98_v7 = vmax.f32 %v96_v55, %v97_v63  ;;  %v105_v8 = vmax.f32 %v103_v56, %v104_v0  ;;  %v92_v9 = vrot.slane %v91_v1, 1  ;;  %v118_v11 = vrot.slane %v117_v3, 2  ;;  %vm5494_vm8 = vmmov %vm5485_vm2 }
  0x1c   :  { %v112_v10 = vmax.f32 %v110_v58, %v111_v2  ;;  %v125_v12 = vrot.slane %v124_v4, 2  ;;  %v79_v13 = vmax.f32 %v77_v61, %v78_v5  ;;  %v86_v14 = vmax.f32 %v84_v62, %v85_v6  ;;  %vm5495_vm11 = vmmov %vm5485_vm2 }
  0x1d   :  { %v99_v15 = vrot.slane %v98_v7, 1  ;;  %v106_v16 = vrot.slane %v105_v8, 1  ;;  %v93_v17 = vmax.f32 %v91_v1, %v92_v9  ;;  %v119_v20 = vmax.f32 %v117_v3, %v118_v11  ;;  %vm5496_vm13 = vmmov %vm5485_vm2 }
  0x1e   :  { %v113_v19 = vrot.slane %v112_v10, 1  ;;  %v126_v23 = vmax.f32 %v124_v4, %v125_v12  ;;  %v3120_v34 = vsel %vm5490_vm7, %v79_v13, -inf  ;;  %v3123_v35 = vsel %vm5491_vm4, %v86_v14, -inf  ;;  %vm5497_vm7 = vmmov %vm5485_vm2 }
  0x1f   :  { %v107_v25 = vmax.f32 %v105_v8, %v106_v16  ;;  %v100_v27 = vmax.f32 %v98_v7, %v99_v15  ;;  %v120_v31 = vrot.slane %v119_v20, 1  ;;  %v3129_v38 = vsel %vm5485_vm2, %v93_v17, -inf  ;;  %vm5498_vm4 = vmmov %vm5485_vm2 }
  0x20   :  { %v114_v29 = vmax.f32 %v112_v10, %v113_v19  ;;  %v127_v33 = vrot.slane %v126_v23, 1  ;;  %v144_v40 = vsel %vm56_vm3, 3e+38, %v3043_v18  ;;  %v145_v41 = vsel %vm57_vm1, 3e+38, %v3054_v21 }
  0x21   :  { %v3126_v36 = vsel %vm5492_vm9, %v107_v25, -inf  ;;  %v121_v37 = vmax.f32 %v119_v20, %v120_v31  ;;  %v146_v42 = vsel %vm58_vm5, 3e+38, %v3058_v22  ;;  %v147_v43 = vsel %vm59_vm14, 3e+38, %v3067_v24  ;;  %vm5499_vm9 = vmmov %vm5485_vm2 }
  0x22   :  { %v3132_v39 = vsel %vm5493_vm6, %v114_v29, -inf  ;;  %v128_v44 = vmax.f32 %v126_v23, %v127_v33  ;;  %v3147_v45 = vsel %vm5494_vm8, %v100_v27, -inf  ;;  %v134_v46 = vmax.f32 %v3120_v34, %v3126_v36  ;;  %vm5500_vm6 = vmmov %vm5485_vm2 }
  0x23   :  { %v148_v47 = vsel %vm60_vm12, 3e+38, %v3076_v26  ;;  %v136_v48 = vmax.f32 %v3123_v35, %v3132_v39  ;;  %v3157_v49 = vsel %vm5495_vm11, %v121_v37, -inf  ;;  %v149_v50 = vsel %vm61_vm0, 3e+38, %v3084_v28  ;;  %vm5501_vm8 = vmmov %vm5485_vm2 }
  0x24   :  { %v150_v51 = vsel %vm62_vm10, 3e+38, %v3092_v30  ;;  %v152_v52 = vsel %vm5496_vm13, %v144_v40, inf  ;;  %v159_v53 = vsel %vm5497_vm7, %v145_v41, inf  ;;  %v166_v54 = vsel %vm5498_vm4, %v146_v42, inf  ;;  %vm5502_vm11 = vmmov %vm5485_vm2 }
  0x25   :  { %v173_v55 = vsel %vm5499_vm9, %v147_v43, inf  ;;  %v151_v56 = vsel %vm63_vm15, 3e+38, %v3098_v32  ;;  %v153_v57 = vrot.slane %v152_v52, 4  ;;  %v160_v58 = vrot.slane %v159_v53, 4  ;;  %vm5503_vm13 = vmmov %vm5485_vm2 }
  0x26   :  { %v167_v59 = vrot.slane %v166_v54, 4  ;;  %v174_v60 = vrot.slane %v173_v55, 4  ;;  %v180_v61 = vsel %vm5485_vm2, %v148_v47, inf  ;;  %v187_v62 = vsel %vm5500_vm6, %v149_v50, inf  ;;  %vm5504_vm7 = vmmov %vm5485_vm2 }
  0x27   :  { %v194_v63 = vsel %vm5501_vm8, %v150_v51, inf  ;;  %v139_v0 = vsel %vm5502_vm11, %v128_v44, -inf  ;;  %v154_v1 = vmin.f32 %v152_v52, %v153_v57  ;;  %v161_v2 = vmin.f32 %v159_v53, %v160_v58  ;;  %vm5505_vm4 = vmmov %vm5485_vm2 }
  0x28   :  { %v168_v3 = vmin.f32 %v166_v54, %v167_v59  ;;  %v175_v4 = vmin.f32 %v173_v55, %v174_v60  ;;  %v181_v5 = vrot.slane %v180_v61, 4  ;;  %v188_v6 = vrot.slane %v187_v62, 4  ;;  %vm5506_vm9 = vmmov %vm5485_vm2 }
  0x29   :  { %v195_v7 = vrot.slane %v194_v63, 4  ;;  %v155_v8 = vrot.slane %v154_v1, 2  ;;  %v162_v9 = vrot.slane %v161_v2, 2  ;;  %v201_v11 = vsel %vm5503_vm13, %v151_v56, inf  ;;  %vm5507_vm6 = vmmov %vm5485_vm2 }
  0x2a   :  { %v169_v10 = vrot.slane %v168_v3, 2  ;;  %v176_v12 = vrot.slane %v175_v4, 2  ;;  %v182_v13 = vmin.f32 %v180_v61, %v181_v5  ;;  %v189_v14 = vmin.f32 %v187_v62, %v188_v6  ;;  %vm5508_vm8 = vmmov %vm5485_vm2 }
  0x2b   :  { %v196_v15 = vmin.f32 %v194_v63, %v195_v7  ;;  %v156_v16 = vmin.f32 %v154_v1, %v155_v8  ;;  %v163_v17 = vmin.f32 %v161_v2, %v162_v9  ;;  %v202_v20 = vrot.slane %v201_v11, 4  ;;  %vm5509_vm11 = vmmov %vm5485_vm2 }
  0x2c   :  { %v170_v19 = vmin.f32 %v168_v3, %v169_v10  ;;  %v177_v23 = vmin.f32 %v175_v4, %v176_v12  ;;  %v183_v25 = vrot.slane %v182_v13, 2  ;;  %v190_v27 = vrot.slane %v189_v14, 2  ;;  %vm5510_vm13 = vmmov %vm5485_vm2 }
  0x2d   :  { %v197_v29 = vrot.slane %v196_v15, 2  ;;  %v157_v31 = vrot.slane %v156_v16, 1  ;;  %v164_v33 = vrot.slane %v163_v17, 1  ;;  %v203_v40 = vmin.f32 %v201_v11, %v202_v20 }
  0x2e   :  { %v171_v37 = vrot.slane %v170_v19, 1  ;;  %v178_v41 = vrot.slane %v177_v23, 1  ;;  %v184_v42 = vmin.f32 %v182_v13, %v183_v25  ;;  %v191_v43 = vmin.f32 %v189_v14, %v190_v27 }
  0x2f   :  { %v198_v44 = vmin.f32 %v196_v15, %v197_v29  ;;  %v158_v47 = vmin.f32 %v156_v16, %v157_v31  ;;  %v165_v50 = vmin.f32 %v163_v17, %v164_v33  ;;  %v204_v52 = vrot.slane %v203_v40, 2 }
  0x30   :  { %v172_v51 = vmin.f32 %v170_v19, %v171_v37  ;;  %v138_v53 = vmax.f32 %v3129_v38, %v3157_v49  ;;  %v185_v54 = vrot.slane %v184_v42, 1  ;;  %v192_v55 = vrot.slane %v191_v43, 1 }
  0x31   :  { %v199_v56 = vrot.slane %v198_v44, 1  ;;  %v140_v57 = vmax.f32 %v3147_v45, %v139_v0  ;;  %v179_v58 = vmin.f32 %v177_v23, %v178_v41  ;;  %v205_v59 = vmin.f32 %v203_v40, %v204_v52 }
  0x32   :  { %v208_v60 = vsel %vm5504_vm7, %v158_v47, inf  ;;  %v186_v61 = vmin.f32 %v184_v42, %v185_v54  ;;  %v193_v62 = vmin.f32 %v191_v43, %v192_v55  ;;  %v209_v1 = vsel %vm5505_vm4, %v165_v50, inf }
  0x33   :  { %v200_v63 = vmin.f32 %v198_v44, %v199_v56  ;;  %v206_v2 = vrot.slane %v205_v59, 1  ;;  %v210_v3 = vsel %vm5506_vm9, %v172_v51, inf  ;;  %v211_v45 = vsel %vm5509_vm11, %v179_v58, inf }
  0x34   :  { %v212_v4 = vsel %vm5485_vm2, %v186_v61, inf  ;;  %v214_v38 = vsel %vm5507_vm6, %v193_v62, inf  ;;  %v141_v7 = vmax.f32 %v134_v46, %v136_v48  ;;  %v142_v8 = vmax.f32 %v138_v53, %v140_v57 }
  0x35   :  { %v216_v49 = vsel %vm5508_vm8, %v200_v63, inf  ;;  %v207_v5 = vmin.f32 %v205_v59, %v206_v2  ;;  %v213_v0 = vmin.f32 %v208_v60, %v212_v4  ;;  %v215_v6 = vmin.f32 %v209_v1, %v214_v38 }
  0x36   :  { %v217_v9 = vmin.f32 %v210_v3, %v216_v49  ;;  %v143_v13 = vmax.f32 %v141_v7, %v142_v8 }
  0x37   :  { %v218_v10 = vsel %vm5510_vm13, %v207_v5, inf  ;;  %v220_v12 = vmin.f32 %v213_v0, %v215_v6 }
  0x38   :  { %v219_v11 = vmin.f32 %v211_v45, %v218_v10 }
  0x3a   :  { %v221_v14 = vmin.f32 %v217_v9, %v219_v11 }
  0x3c   :  { %v222_v15 = vmin.f32 %v220_v12, %v221_v14 }
  0x3e   :  { %vm223_vm7 = vcmp.ge.f32.partialorder %v143_v13, %v222_v15 }
  0x3f   :  { %v224_v16 = vsel %vm223_vm7, %v143_v13, 0.0  ;;  %v225_v17 = vsel %vm223_vm7, %v222_v15, 0.0 }
  0x40   :  { %v226_v19 = vsub.f32 %v224_v16, %v225_v17 }
  0x42   :  { %v227_v20 = vmul.f32 8.0, %v226_v19 }
  0x44   :  { %v228_v23 = vadd.f32 %v227_v20, %v224_v16 }
  0x46   :  { %v229_v35 = vadd.f32 1.0, %v228_v23 }
  0x48   :  { %v230_v39 = vmin.f32 %v3043_v18, %v229_v35  ;;  %v231_v34 = vmin.f32 %v3054_v21, %v229_v35  ;;  %v232_v36 = vmin.f32 %v3058_v22, %v229_v35  ;;  %v233_v46 = vmin.f32 %v3067_v24, %v229_v35 }
  0x49   :  { %v234_v48 = vmin.f32 %v3076_v26, %v229_v35  ;;  %v235_v25 = vmin.f32 %v3084_v28, %v229_v35  ;;  %v236_v27 = vmin.f32 %v3092_v30, %v229_v35  ;;  %v237_v29 = vmin.f32 %v3098_v32, %v229_v35 }
  0x4a   :  { %v3205_v31 = vsel %vm56_vm3, %v230_v39, %v3043_v18  ;;  %v3210_v33 = vsel %vm57_vm1, %v231_v34, %v3054_v21  ;;  %v3215_v37 = vsel %vm58_vm5, %v232_v36, %v3058_v22  ;;  %v3220_v40 = vsel %vm59_vm14, %v233_v46, %v3067_v24  ;;  %vm5511_vm3 = vmmov %vm5485_vm2 }
  0x4b   :  { %v3225_v18 = vsel %vm60_vm12, %v234_v48, %v3076_v26  ;;  %v3230_v21 = vsel %vm61_vm0, %v235_v25, %v3084_v28  ;;  %v3235_v22 = vsel %vm62_vm10, %v236_v27, %v3092_v30  ;;  %v3240_v24 = vsel %vm63_vm15, %v237_v29, %v3098_v32  ;;  %vm5512_vm1 = vmmov %vm5485_vm2 }
  0x4c   :  { %v246_v41 = vand.u32 2147483647, %v3205_v31  ;;  %v247_v26 = vand.u32 2147483647, %v3210_v33  ;;  %v248_v42 = vand.u32 2147483647, %v3215_v37  ;;  %vm5513_vm5 = vmmov %vm5512_vm1 }
  0x4d   :  { %v249_v43 = vand.u32 2147483647, %v3220_v40  ;;  %v250_v28 = vand.u32 2147483647, %v3225_v18  ;;  %v251_v44 = vand.u32 2147483647, %v3230_v21  ;;  %vm5514_vm14 = vmmov %vm5512_vm1 }
  0x4e   :  { %v252_v30 = vand.u32 2147483647, %v3235_v22  ;;  %v253_v47 = vand.u32 2147483647, %v3240_v24  ;;  %v254_v50 = vsel %vm5511_vm3, %v246_v41, -inf  ;;  %v261_v32 = vsel %vm5512_vm1, %v247_v26, -inf  ;;  %vm5515_vm12 = vmmov %vm5512_vm1 }
  0x4f   :  { %v255_v51 = vrot.slane %v254_v50, 4  ;;  %v262_v52 = vrot.slane %v261_v32, 4  ;;  %v268_v53 = vsel %vm5513_vm5, %v248_v42, -inf  ;;  %v275_v54 = vsel %vm5514_vm14, %v249_v43, -inf  ;;  %vm5516_vm0 = vmmov %vm5512_vm1 }
  0x50   :  { %v269_v55 = vrot.slane %v268_v53, 4  ;;  %v276_v56 = vrot.slane %v275_v54, 4  ;;  %v282_v57 = vsel %vm5515_vm12, %v250_v28, -inf  ;;  %v289_v58 = vsel %vm5516_vm0, %v251_v44, -inf  ;;  %vm5517_vm10 = vmmov %vm5516_vm0 }
  0x51   :  { %v256_v59 = vmax.f32 %v254_v50, %v255_v51  ;;  %v263_v60 = vmax.f32 %v261_v32, %v262_v52  ;;  %v283_v61 = vrot.slane %v282_v57, 4  ;;  %v290_v62 = vrot.slane %v289_v58, 4  ;;  %vm5518_vm15 = vmmov %vm5516_vm0 }
  0x52   :  { %v270_v63 = vmax.f32 %v268_v53, %v269_v55  ;;  %v277_v1 = vmax.f32 %v275_v54, %v276_v56  ;;  %v296_v2 = vsel %vm5517_vm10, %v252_v30, -inf  ;;  %v303_v3 = vsel %vm5518_vm15, %v253_v47, -inf  ;;  %vm5519_vm4 = vmmov %vm5516_vm0 }
  0x53   :  { %v257_v4 = vrot.slane %v256_v59, 2  ;;  %v264_v38 = vrot.slane %v263_v60, 2  ;;  %v284_v49 = vmax.f32 %v282_v57, %v283_v61  ;;  %v291_v5 = vmax.f32 %v289_v58, %v290_v62  ;;  %vm5520_vm9 = vmmov %vm5516_vm0 }
  0x54   :  { %v271_v45 = vrot.slane %v270_v63, 2  ;;  %v278_v0 = vrot.slane %v277_v1, 2  ;;  %v297_v6 = vrot.slane %v296_v2, 4  ;;  %v304_v7 = vrot.slane %v303_v3, 4  ;;  %vm5521_vm2 = vmmov %vm5516_vm0 }
  0x55   :  { %v258_v8 = vmax.f32 %v256_v59, %v257_v4  ;;  %v265_v9 = vmax.f32 %v263_v60, %v264_v38  ;;  %v285_v10 = vrot.slane %v284_v49, 2  ;;  %v292_v11 = vrot.slane %v291_v5, 2  ;;  %vm5522_vm6 = vmmov %vm5516_vm0 }
  0x56   :  { %v272_v12 = vmax.f32 %v270_v63, %v271_v45  ;;  %v279_v13 = vmax.f32 %v277_v1, %v278_v0  ;;  %v298_v14 = vmax.f32 %v296_v2, %v297_v6  ;;  %v305_v15 = vmax.f32 %v303_v3, %v304_v7  ;;  %vm5523_vm8 = vmmov %vm5516_vm0 }
  0x57   :  { %v259_v16 = vrot.slane %v258_v8, 1  ;;  %v266_v17 = vrot.slane %v265_v9, 1  ;;  %v286_v19 = vmax.f32 %v284_v49, %v285_v10  ;;  %v293_v20 = vmax.f32 %v291_v5, %v292_v11  ;;  %vm5524_vm11 = vmmov %vm5516_vm0 }
  0x58   :  { %v273_v23 = vrot.slane %v272_v12, 1  ;;  %v280_v35 = vrot.slane %v279_v13, 1  ;;  %v299_v39 = vrot.slane %v298_v14, 2  ;;  %v306_v34 = vrot.slane %v305_v15, 2  ;;  %vm5525_vm13 = vmmov %vm5516_vm0 }
  0x59   :  { %v260_v36 = vmax.f32 %v258_v8, %v259_v16  ;;  %v267_v46 = vmax.f32 %v265_v9, %v266_v17  ;;  %v287_v48 = vrot.slane %v286_v19, 1  ;;  %v294_v25 = vrot.slane %v293_v20, 1  ;;  %vm5526_vm7 = vmmov %vm5516_vm0 }
  0x5a   :  { %v274_v27 = vmax.f32 %v272_v12, %v273_v23  ;;  %v281_v29 = vmax.f32 %v279_v13, %v280_v35  ;;  %v300_v41 = vmax.f32 %v298_v14, %v299_v39  ;;  %v307_v26 = vmax.f32 %v305_v15, %v306_v34  ;;  %vm5529_vm10 = vmmov %vm5516_vm0 }
  0x5b   :  { %v288_v42 = vmax.f32 %v286_v19, %v287_v48  ;;  %v295_v43 = vmax.f32 %v293_v20, %v294_v25  ;;  %v310_v28 = vsel %vm5519_vm4, %v260_v36, -inf  ;;  %v311_v44 = vsel %vm5520_vm9, %v267_v46, -inf  ;;  %vm5530_vm15 = vmmov %vm5516_vm0 }
  0x5c   :  { %v301_v30 = vrot.slane %v300_v41, 1  ;;  %v308_v47 = vrot.slane %v307_v26, 1  ;;  %v312_v50 = vsel %vm5521_vm2, %v274_v27, -inf  ;;  %v313_v32 = vsel %vm5522_vm6, %v281_v29, -inf  ;;  %vm5531_vm4 = vmmov %vm5516_vm0 }
  0x5d   :  { %v314_v51 = vsel %vm5523_vm8, %v288_v42, -inf  ;;  %v316_v52 = vsel %vm5524_vm11, %v295_v43, -inf  ;;  %v364_v62 = vlaneseq  ;;  %v326_v8 = vsub.f32 0.0, %v3205_v31  ;;  %vm5532_vm9 = vmmov %vm5516_vm0 }
  0x5e   :  { %v302_v53 = vmax.f32 %v300_v41, %v301_v30  ;;  %v309_v54 = vmax.f32 %v307_v26, %v308_v47  ;;  %v315_v55 = vmax.f32 %v310_v28, %v314_v51  ;;  %v317_v56 = vmax.f32 %v311_v44, %v316_v52  ;;  %vm5533_vm2 = vmmov %vm5516_vm0 }
  0x5f   :  { %v3266_v1 = vshrl.u32 %v364_v62, 7  ;;  %v3268_v2 = vand.u32 127, %v364_v62  ;;  %v327_v11 = vsub.f32 0.0, %v3210_v33  ;;  %v328_v12 = vsub.f32 0.0, %v3215_v37  ;;  %vm5534_vm6 = vmmov %vm5516_vm0 }
  0x60   :  { %v318_v57 = vsel %vm5525_vm13, %v302_v53, -inf  ;;  %v320_v58 = vsel %vm5526_vm7, %v309_v54, -inf  ;;  %v322_v61 = vmax.f32 %v315_v55, %v317_v56  ;;  %v329_v13 = vsub.f32 0.0, %v3220_v40  ;;  %vm5535_vm8 = vmmov %vm5516_vm0 }
  0x61   :  { %v319_v59 = vmax.f32 %v312_v50, %v318_v57  ;;  %v321_v60 = vmax.f32 %v313_v32, %v320_v58  ;;  %5527 = vst [vmem:[#allocation2_spill] sm:$0xff] %v3268_v2  ;;  %v3271_v4 = vsub.s32 7, %v3266_v1  ;;  %v330_v15 = vsub.f32 0.0, %v3225_v18 }
  0x62   :  { %v331_v17 = vsub.f32 0.0, %v3230_v21  ;;  %v332_v31 = vsub.f32 0.0, %v3235_v22  ;;  %v333_v39 = vsub.f32 0.0, %v3240_v24  ;;  %v3314_v21 = vmov 4294967295  }
  0x63   :  { %v323_v63 = vmax.f32 %v319_v59, %v321_v60  ;;  %5528 = vst [vmem:[#allocation3_spill] sm:$0xff] %v3271_v4  ;;  %v3316_v22 = vmov 0.0  }
  0x65   :  { %v324_v3 = vmax.f32 %v322_v61, %v323_v63 }
  0x67   :  { %v325_v38 = vmax.f32 %v324_v3, 1e-06 }
  0x69   :  { %2865 = vrcp.f32 %v325_v38  ;;  %v345_v45 = vand.u32 2147483648, %v325_v38  ;;  %vm339_vm1 = vweird.f32 %v325_v38  ;;  %v343_v6 = vand.u32 2147483647, %v325_v38 }
  0x6b   :  { %v346_v9 = vor.u32 1.1754944e-38, %v345_v45  ;;  %vm344_vm12 = vcmp.eq.f32.partialorder %v343_v6, 8.507059e+37 }
  0x6f   :  { %v2866_v49 = vpop.eup %2865 }
  0x70   :  { %v335_v5 = vmul.f32 %v2866_v49, %v325_v38  ;;  %vm340_vm5 = vweird.f32 %v2866_v49 }
  0x71   :  { %vm341_vm14 = vmor %vm339_vm1, %vm340_vm5 }
  0x72   :  { %v336_v0 = vsub.f32 1.0, %v335_v5 }
  0x74   :  { %v337_v7 = vmul.f32 %v2866_v49, %v336_v0 }
  0x76   :  { %v338_v10 = vadd.f32 %v2866_v49, %v337_v7 }
  0x78   :  { %v342_v14 = vsel %vm341_vm14, %v2866_v49, %v338_v10 }
  0x79   :  { %v347_v16 = vsel %vm344_vm12, %v346_v9, %v342_v14 }
  0x7a   :  { %v348_v19 = vmul.f32 %v347_v16, %v326_v8  ;;  %v349_v20 = vmul.f32 %v347_v16, %v327_v11  ;;  %v350_v23 = vmul.f32 %v347_v16, %v328_v12  ;;  %v351_v35 = vmul.f32 %v347_v16, %v329_v13 }
  0x7b   :  { %v352_v33 = vmul.f32 %v347_v16, %v330_v15  ;;  %v353_v37 = vmul.f32 %v347_v16, %v331_v17  ;;  %v354_v40 = vmul.f32 %v347_v16, %v332_v31  ;;  %v355_v18 = vmul.f32 %v347_v16, %v333_v39 }
  0x7c   :  { %356 = vst.msk [vmem:[%s5443_s0] sm:$0xff] %vm5516_vm0, %v348_v19 }
  0x7d   :  { %357 = vst.msk [vmem:[%s5443_s0 + $0x8] sm:$0xff] %vm5529_vm10, %v349_v20 }
  0x7e   :  { %358 = vst.msk [vmem:[%s5443_s0 + $0x10] sm:$0xff] %vm5530_vm15, %v350_v23 }
  0x7f   :  { %359 = vst.msk [vmem:[%s5443_s0 + $0x18] sm:$0xff] %vm5531_vm4, %v351_v35 }
  0x80   :  { %360 = vst.msk [vmem:[%s5443_s0 + $0x20] sm:$0xff] %vm5532_vm9, %v352_v33 }
  0x81   :  { %361 = vst.msk [vmem:[%s5443_s0 + $0x28] sm:$0xff] %vm5533_vm2, %v353_v37 }
  0x82   :  { %362 = vst.msk [vmem:[%s5443_s0 + $0x30] sm:$0xff] %vm5534_vm6, %v354_v40 }
  0x83   :  { %363 = vst.msk [vmem:[%s5443_s0 + $0x38] sm:$0xff] %vm5535_vm8, %v355_v18 }
  0x84 LB: > { %v5536_v4 = vld [vmem:[#allocation3_spill] sm:$0xff]  ;;  %vm391_vm11 = vcmp.eq.s32.totalorder %v2937_v21, 0  ;;  %vm392_vm13 = vcmp.eq.s32.totalorder %v2937_v21, 1  ;;  %vm393_vm7 = vcmp.eq.s32.totalorder %v2937_v21, 2  ;;  %vm394_vm1 = vcmp.eq.s32.totalorder %v2937_v21, 3  ;;  %v3374_v23 = vld [vmem:[%s5443_s0] sm:$0xff]  ;;  %v2937_v21 = vphi %v3314_v21, %v5867_v21   ;;  %s2953_s11 = sphi %s3322_s11, %s5870_s11   ;;  %s2949_s10 = sphi %s3320_s10, %s5869_s10   ;;  %s2945_s9 = sphi %s3318_s9, %s5868_s9   ;;  %v2941_v22 = vphi %v3316_v22, %v2439_v22  }
  0x85   : > { %vm395_vm5 = vcmp.eq.s32.totalorder %v2937_v21, 4  ;;  %vm396_vm14 = vcmp.eq.s32.totalorder %v2937_v21, 5  ;;  %vm397_vm12 = vcmp.eq.s32.totalorder %v2937_v21, 6  ;;  %vm398_vm0 = vcmp.eq.s32.totalorder %v2937_v21, 7  ;;  %v3379_v31 = vld [vmem:[%s5443_s0 + $0x8] sm:$0xff]  ;;  %v3384_v35 = vld [vmem:[%s5443_s0 + $0x10] sm:$0xff] }
  0x86   : > { %v5445_v24 = vmov 0   ;;  %vm5537_vm10 = vcmask 15360   ;;  %v3389_v39 = vld [vmem:[%s5443_s0 + $0x18] sm:$0xff]  ;;  %p2472_p0 = scmp.eq.s32.totalorder %s2953_s11, 5  ;;  %s2474_s19 = sadd.s32 1, %s2945_s9 }
  0x87   : > { %v399_v34 = vsel %vm391_vm11, 1, %v5445_v24  ;;  %v400_v36 = vsel %vm392_vm13, 1, %v5445_v24  ;;  %v401_v46 = vsel %vm393_vm7, 1, %v5445_v24  ;;  %v402_v48 = vsel %vm394_vm1, 1, %v5445_v24  ;;  %vm5538_vm15 = vmmov %vm5537_vm10  ;;  %s2477_s21 = sadd.s32 1, %s2953_s11  ;;  %p2482_p4 = scmp.ne.s32.totalorder %s2953_s11, 5 }
  0x88   : > { %v403_v25 = vsel %vm395_vm5, 1, %v5445_v24  ;;  %v404_v27 = vsel %vm396_vm14, 1, %v5445_v24  ;;  %v405_v29 = vsel %vm397_vm12, 1, %v5445_v24  ;;  %v406_v41 = vsel %vm398_vm0, 1, %v5445_v24  ;;  %vm5539_vm4 = vmmov %vm5537_vm10  ;;  %s2473_s18 = scalar_select %p2472_p0, 256, 48 }
  0x89   : > { %v407_v26 = vsel %vm5537_vm10, %v399_v34, 2147483648  ;;  %v417_v42 = vsel %vm5538_vm15, %v400_v36, 2147483648  ;;  %v427_v43 = vsel %vm5539_vm4, %v401_v46, 2147483648  ;;  %vm5540_vm9 = vmmov %vm5539_vm4  ;;  %s2479_s22 = smul.f32 0.2, %s2949_s10 }
  0x8a   : > { %v437_v28 = vsel %vm5540_vm9, %v402_v48, 2147483648  ;;  %v408_v44 = vrot.slane %v407_v26, 4  ;;  %v418_v30 = vrot.slane %v417_v42, 4  ;;  %v428_v47 = vrot.slane %v427_v43, 4  ;;  %vm5541_vm2 = vmmov %vm5539_vm4  ;;  %p2475_p1 = scmp.ge.s32.totalorder %s2474_s19, %s2473_s18 }
  0x8b   : > { %v438_v50 = vrot.slane %v437_v28, 4  ;;  %v447_v32 = vsel %vm5541_vm2, %v403_v25, 2147483648  ;;  %vm5542_vm6 = vmmov %vm5541_vm2  ;;  %v3402_v25 = vld [vmem:[%s5443_s0 + $0x20] sm:$0xff] }
  0x8c   : > { %v457_v51 = vsel %vm5542_vm6, %v404_v27, 2147483648  ;;  %vm5543_vm8 = vmmov %vm5541_vm2  ;;  %vm409_vm13 = vcmp.gt.s32.totalorder %v407_v26, %v408_v44  ;;  %vm419_vm7 = vcmp.gt.s32.totalorder %v417_v42, %v418_v30  ;;  %vm429_vm1 = vcmp.gt.s32.totalorder %v427_v43, %v428_v47  ;;  %5553 = vst [vmem:[#allocation4_spill] sm:$0xff] %v3402_v25 }
  0x8d   : > { %v467_v52 = vsel %vm5543_vm8, %v405_v29, 2147483648  ;;  %vm5544_vm11 = vmmov %vm5541_vm2  ;;  %vm439_vm5 = vcmp.gt.s32.totalorder %v437_v28, %v438_v50  ;;  %v410_v54 = vsel %vm409_vm13, %v407_v26, %v408_v44  ;;  %v420_v55 = vsel %vm419_vm7, %v417_v42, %v418_v30  ;;  %v3418_v26 = vld [vmem:[%s5443_s0 + $0x30] sm:$0xff]  ;;  %v3423_v42 = vld [vmem:[%s5443_s0 + $0x38] sm:$0xff] }
  0x8e   : > { %v477_v53 = vsel %vm5544_vm11, %v406_v41, 2147483648  ;;  %v430_v56 = vsel %vm429_vm1, %v427_v43, %v428_v47  ;;  %v440_v57 = vsel %vm439_vm5, %v437_v28, %v438_v50  ;;  %v411_v58 = vrot.slane %v410_v54, 2  ;;  %v3413_v41 = vld [vmem:[%s5443_s0 + $0x28] sm:$0xff]  ;;  %5555 = vst [vmem:[#allocation6_spill] sm:$0xff] %v3418_v26 }
  0x8f   : > { %v421_v59 = vrot.slane %v420_v55, 2  ;;  %v431_v60 = vrot.slane %v430_v56, 2  ;;  %v441_v61 = vrot.slane %v440_v57, 2  ;;  %v448_v62 = vrot.slane %v447_v32, 4  ;;  %5554 = vst [vmem:[#allocation5_spill] sm:$0xff] %v3413_v41 }
  0x90   : > { %v458_v63 = vrot.slane %v457_v51, 4  ;;  %v468_v3 = vrot.slane %v467_v52, 4  ;;  %v478_v38 = vrot.slane %v477_v53, 4  ;;  %vm412_vm14 = vcmp.gt.s32.totalorder %v410_v54, %v411_v58  ;;  %5556 = vst [vmem:[#allocation7_spill] sm:$0xff] %v3423_v42 }
  0x91   : > { %vm422_vm12 = vcmp.gt.s32.totalorder %v420_v55, %v421_v59  ;;  %vm432_vm0 = vcmp.gt.s32.totalorder %v430_v56, %v431_v60  ;;  %vm442_vm10 = vcmp.gt.s32.totalorder %v440_v57, %v441_v61  ;;  %v413_v49 = vsel %vm412_vm14, %v410_v54, %v411_v58 }
  0x92   : > { %v423_v5 = vsel %vm422_vm12, %v420_v55, %v421_v59  ;;  %v433_v45 = vsel %vm432_vm0, %v430_v56, %v431_v60  ;;  %v443_v0 = vsel %vm442_vm10, %v440_v57, %v441_v61  ;;  %vm449_vm15 = vcmp.gt.s32.totalorder %v447_v32, %v448_v62 }
  0x93   : > { %vm459_vm4 = vcmp.gt.s32.totalorder %v457_v51, %v458_v63  ;;  %vm469_vm9 = vcmp.gt.s32.totalorder %v467_v52, %v468_v3  ;;  %vm479_vm2 = vcmp.gt.s32.totalorder %v477_v53, %v478_v38  ;;  %v414_v6 = vrot.slane %v413_v49, 1 }
  0x94   : > { %v424_v7 = vrot.slane %v423_v5, 1  ;;  %v434_v8 = vrot.slane %v433_v45, 1  ;;  %v444_v9 = vrot.slane %v443_v0, 1  ;;  %v450_v10 = vsel %vm449_vm15, %v447_v32, %v448_v62 }
  0x95   : > { %v460_v11 = vsel %vm459_vm4, %v457_v51, %v458_v63  ;;  %v470_v12 = vsel %vm469_vm9, %v467_v52, %v468_v3  ;;  %v480_v13 = vsel %vm479_vm2, %v477_v53, %v478_v38  ;;  %v451_v14 = vrot.slane %v450_v10, 2 }
  0x96   : > { %v461_v15 = vrot.slane %v460_v11, 2  ;;  %v471_v16 = vrot.slane %v470_v12, 2  ;;  %v481_v17 = vrot.slane %v480_v13, 2  ;;  %vm3363_vm6 = vcmp.gt.s32.totalorder %v413_v49, %v414_v6 }
  0x97   : > { %vm3367_vm8 = vcmp.gt.s32.totalorder %v423_v5, %v424_v7  ;;  %vm452_vm11 = vcmp.gt.s32.totalorder %v450_v10, %v451_v14  ;;  %vm3391_vm5 = vcmp.gt.s32.totalorder %v433_v45, %v434_v8  ;;  %vm3395_vm14 = vcmp.gt.s32.totalorder %v443_v0, %v444_v9 }
  0x98   : > { %vm462_vm13 = vcmp.gt.s32.totalorder %v460_v11, %v461_v15  ;;  %vm472_vm7 = vcmp.gt.s32.totalorder %v470_v12, %v471_v16  ;;  %vm482_vm1 = vcmp.gt.s32.totalorder %v480_v13, %v481_v17  ;;  %v453_v37 = vsel %vm452_vm11, %v450_v10, %v451_v14 }
  0x99   : > { %v463_v40 = vsel %vm462_vm13, %v460_v11, %v461_v15  ;;  %v473_v18 = vsel %vm472_vm7, %v470_v12, %v471_v16  ;;  %v454_v36 = vrot.slane %v453_v37, 1  ;;  %v3404_v27 = vsel %vm482_vm1, %v480_v13, %v481_v17 }
  0x9a   : > { %v464_v46 = vrot.slane %v463_v40, 1  ;;  %v474_v48 = vrot.slane %v473_v18, 1  ;;  %v3408_v29 = vsub.f32 %v3374_v23, %v2941_v22  ;;  %v3427_v43 = vsub.f32 %v3379_v31, %v2941_v22 }
  0x9b   : > { %vm455_vm12 = vcmp.gt.s32.totalorder %v453_v37, %v454_v36  ;;  %v3431_v28 = vsub.f32 %v3384_v35, %v2941_v22  ;;  %v3435_v44 = vsub.f32 %v3389_v39, %v2941_v22  ;;  %v3439_v30 = vsel %vm3363_vm6, %v413_v49, %v414_v6 }
  0x9c   : > { %v3443_v47 = vsel %vm3367_vm8, %v423_v5, %v424_v7  ;;  %v3447_v50 = vsel %vm3391_vm5, %v433_v45, %v434_v8  ;;  %v3451_v32 = vsel %vm3395_vm14, %v443_v0, %v444_v9  ;;  %v3453_v51 = vsel %vm455_vm12, %v453_v37, %v454_v36 }
  0x9d   : > { %vm465_vm0 = vcmp.gt.s32.totalorder %v463_v40, %v464_v46  ;;  %vm3455_vm10 = vcmp.gt.s32.totalorder %v473_v18, %v474_v48  ;;  %v5447_v53 = vrot.slane %v3404_v27, 1  ;;  %v3462_v54 = vsub.f32 %v3402_v25, %v2941_v22 }
  0x9e   : > { %v3466_v55 = vsub.f32 %v3413_v41, %v2941_v22  ;;  %v3470_v56 = vsub.f32 %v3418_v26, %v2941_v22  ;;  %v3474_v57 = vsub.f32 %v3423_v42, %v2941_v22  ;;  %v519_v58 = vshra.s32 %v3408_v29, 31 }
  0x9f   : > { %v520_v59 = vshra.s32 %v3427_v43, 31  ;;  %v521_v60 = vshra.s32 %v3431_v28, 31  ;;  %v522_v61 = vshra.s32 %v3435_v44, 31  ;;  %v523_v62 = vshra.s32 %v3462_v54, 31 }
  0xa0   : > { %v524_v63 = vshra.s32 %v3466_v55, 31  ;;  %v525_v3 = vshra.s32 %v3470_v56, 31  ;;  %v526_v38 = vshra.s32 %v3474_v57, 31  ;;  %v3484_v49 = vsel %vm465_vm0, %v463_v40, %v464_v46 }
  0xa1   : > { %v527_v5 = vand.u32 2147483647, %v519_v58  ;;  %v528_v45 = vand.u32 2147483647, %v520_v59  ;;  %v529_v0 = vand.u32 2147483647, %v521_v60  ;;  %v3488_v6 = vsel %vm3455_vm10, %v473_v18, %v474_v48 }
  0xa2   : > { %v530_v7 = vand.u32 2147483647, %v522_v61  ;;  %v531_v8 = vand.u32 2147483647, %v523_v62  ;;  %v532_v9 = vand.u32 2147483647, %v524_v63 }
  0xa3   : > { %v533_v10 = vand.u32 2147483647, %v525_v3  ;;  %v534_v11 = vand.u32 2147483647, %v526_v38  ;;  %v535_v12 = vxor.u32 %v527_v5, %v3408_v29  ;;  %v536_v13 = vxor.u32 %v528_v45, %v3427_v43 }
  0xa4   : > { %v537_v14 = vxor.u32 %v529_v0, %v3431_v28  ;;  %v538_v15 = vxor.u32 %v530_v7, %v3435_v44  ;;  %v539_v16 = vxor.u32 %v531_v8, %v3462_v54  ;;  %v540_v17 = vxor.u32 %v532_v9, %v3466_v55 }
  0xa5   : > { %v541_v19 = vxor.u32 %v533_v10, %v3470_v56  ;;  %v542_v20 = vxor.u32 %v534_v11, %v3474_v57  ;;  %v543_v33 = vand.u32 4294967288, %v535_v12  ;;  %v544_v37 = vand.u32 4294967288, %v536_v13 }
  0xa6   : > { %v545_v40 = vand.u32 4294967288, %v537_v14  ;;  %v546_v18 = vand.u32 4294967288, %v538_v15  ;;  %v547_v34 = vand.u32 4294967288, %v539_v16  ;;  %v548_v36 = vand.u32 4294967288, %v540_v17 }
  0xa7   : > { %v549_v46 = vand.u32 4294967288, %v541_v19  ;;  %v550_v48 = vand.u32 4294967288, %v542_v20  ;;  %v551_v52 = vor.u32 %v543_v33, %v5536_v4  ;;  %v552_v58 = vor.u32 %v544_v37, %v5536_v4 }
  0xa8   : > { %v553_v59 = vor.u32 %v545_v40, %v5536_v4  ;;  %v554_v60 = vor.u32 %v546_v18, %v5536_v4  ;;  %v555_v61 = vor.u32 %v547_v34, %v5536_v4  ;;  %v556_v62 = vor.u32 %v548_v36, %v5536_v4 }
  0xa9   : > { %v557_v63 = vor.u32 %v549_v46, %v5536_v4  ;;  %v558_v3 = vor.u32 %v550_v48, %v5536_v4  ;;  %vm5559_vm15 = vcmask 15360   ;;  %v5568_v2 = vrot.slane %v3404_v27, 1 }
  0xaa   : > { %v559_v38 = vsel %vm5559_vm15, %v551_v52, 2147483648  ;;  %vm5560_vm4 = vmmov %vm5559_vm15 }
  0xab   : > { %v569_v5 = vsel %vm5560_vm4, %v552_v58, 2147483648  ;;  %v560_v45 = vrot.slane %v559_v38, 4  ;;  %vm5561_vm9 = vmmov %vm5560_vm4 }
  0xac   : > { %v570_v0 = vrot.slane %v569_v5, 4  ;;  %v579_v7 = vsel %vm5561_vm9, %v553_v59, 2147483648  ;;  %vm5562_vm2 = vmmov %vm5560_vm4 }
  0xad   : > { %v589_v8 = vsel %vm5562_vm2, %v554_v60, 2147483648  ;;  %v580_v9 = vrot.slane %v579_v7, 4  ;;  %vm5563_vm6 = vmmov %vm5562_vm2  ;;  %vm561_vm11 = vcmp.gt.s32.totalorder %v559_v38, %v560_v45 }
  0xae   : > { %v590_v10 = vrot.slane %v589_v8, 4  ;;  %v599_v11 = vsel %vm5563_vm6, %v555_v61, 2147483648  ;;  %vm5564_vm8 = vmmov %vm5562_vm2  ;;  %vm571_vm13 = vcmp.gt.s32.totalorder %v569_v5, %v570_v0  ;;  %v562_v15 = vsel %vm561_vm11, %v559_v38, %v560_v45 }
  0xaf   : > { %v609_v12 = vsel %vm5564_vm8, %v556_v62, 2147483648  ;;  %v600_v13 = vrot.slane %v599_v11, 4  ;;  %v572_v16 = vsel %vm571_vm13, %v569_v5, %v570_v0  ;;  %vm581_vm7 = vcmp.gt.s32.totalorder %v579_v7, %v580_v9  ;;  %vm5565_vm6 = vmmov %vm5562_vm2 }
  0xb0   : > { %v610_v14 = vrot.slane %v609_v12, 4  ;;  %vm591_vm1 = vcmp.gt.s32.totalorder %v589_v8, %v590_v10  ;;  %v563_v17 = vrot.slane %v562_v15, 2  ;;  %v573_v19 = vrot.slane %v572_v16, 2 }
  0xb1   : > { %v582_v20 = vsel %vm581_vm7, %v579_v7, %v580_v9  ;;  %v592_v33 = vsel %vm591_vm1, %v589_v8, %v590_v10  ;;  %vm601_vm5 = vcmp.gt.s32.totalorder %v599_v11, %v600_v13  ;;  %v619_v5 = vsel %vm5562_vm2, %v557_v63, 2147483648 }
  0xb2   : > { %v583_v37 = vrot.slane %v582_v20, 2  ;;  %v593_v40 = vrot.slane %v592_v33, 2  ;;  %vm611_vm14 = vcmp.gt.s32.totalorder %v609_v12, %v610_v14  ;;  %vm564_vm12 = vcmp.gt.s32.totalorder %v562_v15, %v563_v17 }
  0xb3   : > { %vm574_vm0 = vcmp.gt.s32.totalorder %v572_v16, %v573_v19  ;;  %v602_v18 = vsel %vm601_vm5, %v599_v11, %v600_v13  ;;  %v612_v34 = vsel %vm611_vm14, %v609_v12, %v610_v14  ;;  %v565_v36 = vsel %vm564_vm12, %v562_v15, %v563_v17 }
  0xb4   : > { %v575_v46 = vsel %vm574_vm0, %v572_v16, %v573_v19  ;;  %vm584_vm10 = vcmp.gt.s32.totalorder %v582_v20, %v583_v37  ;;  %vm594_vm15 = vcmp.gt.s32.totalorder %v592_v33, %v593_v40  ;;  %v566_v48 = vrot.slane %v565_v36, 1 }
  0xb5   : > { %v576_v52 = vrot.slane %v575_v46, 1  ;;  %v585_v58 = vsel %vm584_vm10, %v582_v20, %v583_v37  ;;  %v595_v59 = vsel %vm594_vm15, %v592_v33, %v593_v40  ;;  %v603_v62 = vrot.slane %v602_v18, 2 }
  0xb6   : > { %v586_v60 = vrot.slane %v585_v58, 1  ;;  %v596_v61 = vrot.slane %v595_v59, 1  ;;  %v613_v38 = vrot.slane %v612_v34, 2  ;;  %vm567_vm4 = vcmp.gt.s32.totalorder %v565_v36, %v566_v48 }
  0xb7   : > { %vm577_vm9 = vcmp.gt.s32.totalorder %v575_v46, %v576_v52  ;;  %v629_v45 = vsel %vm5565_vm6, %v558_v3, 2147483648  ;;  %v3514_v0 = vsel %vm567_vm4, %v565_v36, %v566_v48  ;;  %vm604_vm13 = vcmp.gt.s32.totalorder %v602_v18, %v603_v62 }
  0xb8   : > { %v3516_v7 = vsel %vm577_vm9, %v575_v46, %v576_v52  ;;  %vm587_vm8 = vcmp.gt.s32.totalorder %v585_v58, %v586_v60  ;;  %vm597_vm11 = vcmp.gt.s32.totalorder %v595_v59, %v596_v61  ;;  %vm614_vm7 = vcmp.gt.s32.totalorder %v612_v34, %v613_v38 }
  0xb9   : > { %v3518_v8 = vsel %vm587_vm8, %v585_v58, %v586_v60  ;;  %v3520_v9 = vsel %vm597_vm11, %v595_v59, %v596_v61  ;;  %v605_v10 = vsel %vm604_vm13, %v602_v18, %v603_v62  ;;  %v615_v11 = vsel %vm614_vm7, %v612_v34, %v613_v38 }
  0xba   : > { %v620_v12 = vrot.slane %v619_v5, 4  ;;  %v630_v13 = vrot.slane %v629_v45, 4  ;;  %v606_v14 = vrot.slane %v605_v10, 1  ;;  %v616_v63 = vrot.slane %v615_v11, 1 }
  0xbb   : > { %v639_v3 = vand.u32 7, %v3514_v0  ;;  %v640_v15 = vand.u32 7, %v3516_v7  ;;  %v641_v16 = vand.u32 7, %v3518_v8  ;;  %v642_v17 = vand.u32 7, %v3520_v9 }
  0xbc   : > { %vm621_vm1 = vcmp.gt.s32.totalorder %v619_v5, %v620_v12  ;;  %vm631_vm5 = vcmp.gt.s32.totalorder %v629_v45, %v630_v13  ;;  %vm607_vm14 = vcmp.gt.s32.totalorder %v605_v10, %v606_v14  ;;  %vm617_vm12 = vcmp.gt.s32.totalorder %v615_v11, %v616_v63 }
  0xbd   : > { %v622_v19 = vsel %vm621_vm1, %v619_v5, %v620_v12  ;;  %v632_v20 = vsel %vm631_vm5, %v629_v45, %v630_v13  ;;  %vm3529_vm0 = vcmp.gt.s32.totalorder %v3404_v27, %v5447_v53  ;;  %v608_v37 = vsel %vm607_vm14, %v605_v10, %v606_v14 }
  0xbe   : > { %v618_v40 = vsel %vm617_vm12, %v615_v11, %v616_v63  ;;  %v623_v18 = vrot.slane %v622_v19, 2  ;;  %v633_v34 = vrot.slane %v632_v20, 2  ;;  %v643_v36 = vand.u32 7, %v608_v37 }
  0xbf   : > { %v644_v46 = vand.u32 7, %v618_v40  ;;  %v3533_v48 = vsub.s32 7, %v639_v3  ;;  %v3535_v52 = vsub.s32 7, %v640_v15  ;;  %v3537_v58 = vsub.s32 7, %v641_v16 }
  0xc0   : > { %vm624_vm10 = vcmp.gt.s32.totalorder %v622_v19, %v623_v18  ;;  %vm634_vm15 = vcmp.gt.s32.totalorder %v632_v20, %v633_v34  ;;  %v3539_v59 = vsub.s32 7, %v642_v17  ;;  %v3541_v62 = vsub.s32 7, %v643_v36 }
  0xc1   : > { %v625_v60 = vsel %vm624_vm10, %v622_v19, %v623_v18  ;;  %v635_v61 = vsel %vm634_vm15, %v632_v20, %v633_v34  ;;  %v3543_v38 = vsub.s32 7, %v644_v46  ;;  %v655_v10 = vand.u32 4294967288, %v3514_v0 }
  0xc2   : > { %v626_v5 = vrot.slane %v625_v60, 1  ;;  %v636_v45 = vrot.slane %v635_v61, 1  ;;  %v656_v11 = vand.u32 4294967288, %v3516_v7  ;;  %v657_v12 = vand.u32 4294967288, %v3518_v8 }
  0xc3   : > { %v658_v13 = vand.u32 4294967288, %v3520_v9  ;;  %v659_v14 = vand.u32 4294967288, %v608_v37  ;;  %v660_v63 = vand.u32 4294967288, %v618_v40  ;;  %v663_v3 = vshra.s32 %v655_v10, 31 }
  0xc4   : > { %vm627_vm4 = vcmp.gt.s32.totalorder %v625_v60, %v626_v5  ;;  %vm637_vm9 = vcmp.gt.s32.totalorder %v635_v61, %v636_v45  ;;  %v664_v15 = vshra.s32 %v656_v11, 31  ;;  %v665_v19 = vshra.s32 %v657_v12, 31 }
  0xc5   : > { %v628_v16 = vsel %vm627_vm4, %v625_v60, %v626_v5  ;;  %v638_v17 = vsel %vm637_vm9, %v635_v61, %v636_v45  ;;  %v666_v20 = vshra.s32 %v658_v13, 31  ;;  %v667_v46 = vshra.s32 %v659_v14, 31 }
  0xc6   : > { %v645_v18 = vand.u32 7, %v628_v16  ;;  %v646_v34 = vand.u32 7, %v638_v17  ;;  %v661_v36 = vand.u32 4294967288, %v628_v16  ;;  %v662_v0 = vand.u32 4294967288, %v638_v17 }
  0xc7   : > { %v668_v7 = vshra.s32 %v660_v63, 31  ;;  %v671_v24 = vand.u32 2147483647, %v663_v3  ;;  %v672_v8 = vand.u32 2147483647, %v664_v15  ;;  %v3558_v60 = vsel %vm3529_vm0, %v3404_v27, %v5568_v2 }
  0xc8   : > { %v3549_v53 = vsub.s32 7, %v645_v18  ;;  %v3551_v9 = vsub.s32 7, %v646_v34  ;;  %v669_v37 = vshra.s32 %v661_v36, 31  ;;  %v670_v40 = vshra.s32 %v662_v0, 31 }
  0xc9   : > { %v673_v61 = vand.u32 2147483647, %v665_v19  ;;  %v674_v5 = vand.u32 2147483647, %v666_v20  ;;  %v675_v45 = vand.u32 2147483647, %v667_v46  ;;  %v3560_v15 = vxor.u32 %v671_v24, %v655_v10 }
  0xca   : > { %v676_v16 = vand.u32 2147483647, %v668_v7  ;;  %v677_v17 = vand.u32 2147483647, %v669_v37  ;;  %v678_v3 = vand.u32 2147483647, %v670_v40  ;;  %v3562_v18 = vxor.u32 %v672_v8, %v656_v11 }
  0xcb   : > { %v3564_v34 = vxor.u32 %v673_v61, %v657_v12  ;;  %v3566_v4 = vxor.u32 %v674_v5, %v658_v13  ;;  %vm695_vm2 = vcmp.eq.s32.totalorder %v3266_v1, %v3533_v48  ;;  %v3570_v33 = vxor.u32 %v675_v45, %v659_v14 }
  0xcc   : > { %v3572_v2 = vxor.u32 %v676_v16, %v660_v63  ;;  %v3574_v27 = vxor.u32 %v677_v17, %v661_v36  ;;  %vm696_vm6 = vcmp.eq.s32.totalorder %v3266_v1, %v3535_v52  ;;  %vm697_vm8 = vcmp.eq.s32.totalorder %v3266_v1, %v3537_v58 }
  0xcd   : > { %vm698_vm11 = vcmp.eq.s32.totalorder %v3266_v1, %v3539_v59  ;;  %vm699_vm13 = vcmp.eq.s32.totalorder %v3266_v1, %v3541_v62  ;;  %vm5457_vm7 = vcmp.eq.s32.totalorder %v3266_v1, %v3543_v38  ;;  %vm5455_vm1 = vcmp.eq.s32.totalorder %v3266_v1, %v3549_v53 }
  0xce   : > { %vm5456_vm5 = vcmp.eq.s32.totalorder %v3266_v1, %v3551_v9  ;;  %v703_v24 = vsel %vm695_vm2, -1e+30, %v3408_v29  ;;  %v704_v10 = vsel %vm696_vm6, -1e+30, %v3427_v43  ;;  %v3598_v11 = vxor.u32 %v678_v3, %v662_v0 }
  0xcf   : > { %v705_v12 = vsel %vm697_vm8, -1e+30, %v3431_v28  ;;  %v706_v13 = vsel %vm698_vm11, -1e+30, %v3435_v44  ;;  %v707_v29 = vsel %vm699_vm13, -1e+30, %v3462_v54  ;;  %v3625_v14 = vstv %s2949_s10 }
  0xd0   : > { %v708_v43 = vsel %vm5457_vm7, -1e+30, %v3466_v55  ;;  %v709_v28 = vsel %vm5455_vm1, -1e+30, %v3470_v56  ;;  %v710_v44 = vsel %vm5456_vm5, -1e+30, %v3474_v57 }
  0xd1   : > { %vm5569_vm14 = vcmask 15360   ;;  %vm2996_vm1 = vmmov 1  }
  0xd2   : > { %v711_v63 = vsel %vm5569_vm14, %v703_v24, -inf  ;;  %vm5570_vm12 = vmmov %vm5569_vm14  ;;  %vm487_vm14 = vcmp.gt.s32.totalorder %v3439_v30, 0 }
  0xd3   : > { %v718_v54 = vsel %vm5570_vm12, %v704_v10, -inf  ;;  %vm5571_vm0 = vmmov %vm5570_vm12  ;;  %v712_v20 = vrot.slane %v711_v63, 4  ;;  %vm488_vm12 = vcmp.gt.s32.totalorder %v3443_v47, 0 }
  0xd4   : > { %v725_v19 = vsel %vm5571_vm0, %v705_v12, -inf  ;;  %vm5572_vm10 = vmmov %vm5571_vm0  ;;  %v719_v36 = vrot.slane %v718_v54, 4 }
  0xd5   : > { %v732_v55 = vsel %vm5572_vm10, %v706_v13, -inf  ;;  %v726_v0 = vrot.slane %v725_v19, 4  ;;  %vm5573_vm15 = vmmov %vm5571_vm0  ;;  %v713_v37 = vmax.f32 %v711_v63, %v712_v20  ;;  %vm491_vm10 = vcmp.gt.s32.totalorder %v3453_v51, 0 }
  0xd6   : > { %v733_v46 = vrot.slane %v732_v55, 4  ;;  %v739_v56 = vsel %vm5573_vm15, %v707_v29, -inf  ;;  %vm5574_vm4 = vmmov %vm5571_vm0  ;;  %v720_v40 = vmax.f32 %v718_v54, %v719_v36  ;;  %vm492_vm15 = vcmp.gt.s32.totalorder %v3484_v49, 0 }
  0xd7   : > { %v746_v7 = vsel %vm5574_vm4, %v708_v43, -inf  ;;  %vm5575_vm9 = vmmov %vm5571_vm0  ;;  %v727_v61 = vmax.f32 %v725_v19, %v726_v0  ;;  %v740_v45 = vrot.slane %v739_v56, 4  ;;  %v714_v24 = vrot.slane %v713_v37, 2 }
  0xd8   : > { %v753_v57 = vsel %vm5575_vm9, %v709_v28, -inf  ;;  %vm5576_vm3 = vmmov %vm5571_vm0  ;;  %v734_v5 = vmax.f32 %v732_v55, %v733_v46  ;;  %v747_v16 = vrot.slane %v746_v7, 4  ;;  %vm489_vm0 = vcmp.gt.s32.totalorder %v3447_v50, 0 }
  0xd9   : > { %v760_v8 = vsel %vm5576_vm3, %v710_v44, -inf  ;;  %v754_v17 = vrot.slane %v753_v57, 4  ;;  %v721_v10 = vrot.slane %v720_v40, 2  ;;  %v728_v12 = vrot.slane %v727_v61, 2  ;;  %vm3650_vm5 = vmxor %vm487_vm14, %vm2996_vm1 }
  0xda   : > { %v761_v3 = vrot.slane %v760_v8, 4  ;;  %v735_v13 = vrot.slane %v734_v5, 2  ;;  %vm490_vm3 = vcmp.gt.s32.totalorder %v3451_v32, 0  ;;  %v741_v29 = vmax.f32 %v739_v56, %v740_v45  ;;  %vm3657_vm7 = vmxor %vm488_vm12, %vm2996_vm1 }
  0xdb   : > { %v748_v43 = vmax.f32 %v746_v7, %v747_v16  ;;  %v755_v28 = vmax.f32 %v753_v57, %v754_v17  ;;  %v715_v63 = vmax.f32 %v713_v37, %v714_v24  ;;  %v722_v54 = vmax.f32 %v720_v40, %v721_v10  ;;  %vm3664_vm14 = vmxor %vm489_vm0, %vm2996_vm1 }
  0xdc   : > { %v762_v44 = vmax.f32 %v760_v8, %v761_v3  ;;  %v729_v19 = vmax.f32 %v727_v61, %v728_v12  ;;  %v736_v55 = vmax.f32 %v734_v5, %v735_v13  ;;  %v742_v20 = vrot.slane %v741_v29, 2  ;;  %vm3675_vm12 = vmxor %vm490_vm3, %vm2996_vm1 }
  0xdd   : > { %v749_v36 = vrot.slane %v748_v43, 2  ;;  %v756_v0 = vrot.slane %v755_v28, 2  ;;  %vm493_vm4 = vcmp.gt.s32.totalorder %v3488_v6, 0  ;;  %v716_v42 = vrot.slane %v715_v63, 1  ;;  %vm3686_vm0 = vmxor %vm491_vm10, %vm2996_vm1 }
  0xde   : > { %v763_v46 = vrot.slane %v762_v44, 2  ;;  %v723_v26 = vrot.slane %v722_v54, 1  ;;  %v730_v56 = vrot.slane %v729_v19, 1  ;;  %v737_v7 = vrot.slane %v736_v55, 1  ;;  %vm3693_vm3 = vmxor %vm492_vm15, %vm2996_vm1 }
  0xdf   : > { %vm494_vm9 = vcmp.gt.s32.totalorder %v3558_v60, 0  ;;  %v743_v57 = vmax.f32 %v741_v29, %v742_v20  ;;  %v750_v8 = vmax.f32 %v748_v43, %v749_v36  ;;  %v757_v37 = vmax.f32 %v755_v28, %v756_v0  ;;  %vm3700_vm10 = vmxor %vm493_vm4, %vm2996_vm1 }
  0xe0   : > { %v764_v40 = vmax.f32 %v762_v44, %v763_v46  ;;  %v717_v61 = vmax.f32 %v715_v63, %v716_v42  ;;  %v724_v5 = vmax.f32 %v722_v54, %v723_v26  ;;  %v731_v45 = vmax.f32 %v729_v19, %v730_v56  ;;  %vm3711_vm15 = vmxor %vm494_vm9, %vm2996_vm1 }
  0xe1   : > { %v738_v16 = vmax.f32 %v736_v55, %v737_v7  ;;  %v744_v17 = vrot.slane %v743_v57, 1  ;;  %v751_v3 = vrot.slane %v750_v8, 1  ;;  %v758_v24 = vrot.slane %v757_v37, 1  ;;  %vm3720_vm4 = vmand %vm695_vm2, %vm3650_vm5 }
  0xe2   : > { %v765_v10 = vrot.slane %v764_v40, 1  ;;  %v767_v12 = vsub.f32 %v3560_v15, %v717_v61  ;;  %v768_v13 = vsub.f32 %v3562_v18, %v724_v5  ;;  %v769_v41 = vsub.f32 %v3564_v34, %v731_v45  ;;  %vm3729_vm9 = vmand %vm696_vm6, %vm3657_vm7 }
  0xe3   : > { %v770_v25 = vsub.f32 %v3566_v4, %v738_v16  ;;  %v745_v42 = vmax.f32 %v743_v57, %v744_v17  ;;  %v752_v29 = vmax.f32 %v750_v8, %v751_v3  ;;  %v759_v43 = vmax.f32 %v757_v37, %v758_v24  ;;  %vm3738_vm2 = vmand %vm697_vm8, %vm3664_vm14 }
  0xe4   : > { %v766_v28 = vmax.f32 %v764_v40, %v765_v10  ;;  %v775_v4 = vmax.f32 %v767_v12, 0.0  ;;  %v776_v18 = vmax.f32 %v768_v13, 0.0  ;;  %v777_v34 = vmax.f32 %v769_v41, 0.0  ;;  %vm3747_vm6 = vmand %vm698_vm11, %vm3675_vm12 }
  0xe5   : > { %v778_v44 = vmax.f32 %v770_v25, 0.0  ;;  %v771_v63 = vsub.f32 %v3570_v33, %v745_v42  ;;  %v772_v54 = vsub.f32 %v3572_v2, %v752_v29  ;;  %v773_v47 = vsub.f32 %v3574_v27, %v759_v43  ;;  %vm3756_vm8 = vmand %vm699_vm13, %vm3686_vm0 }
  0xe6   : > { %v774_v19 = vsub.f32 %v3598_v11, %v766_v28  ;;  %v784_v41 = vadd.f32 %v3625_v14, %v775_v4  ;;  %v785_v50 = vadd.f32 %v3625_v14, %v776_v18  ;;  %v786_v55 = vadd.f32 %v3625_v14, %v777_v34 }
  0xe7   : > { %v787_v33 = vadd.f32 %v3625_v14, %v778_v44  ;;  %v779_v32 = vmax.f32 %v771_v63, 0.0  ;;  %v780_v27 = vmax.f32 %v772_v54, 0.0  ;;  %v781_v11 = vmax.f32 %v773_v47, 0.0 }
  0xe8   : > { %v782_v20 = vmax.f32 %v774_v19, 0.0  ;;  %v800_v0 = vshra.s32 %v784_v41, 31  ;;  %v801_v46 = vshra.s32 %v785_v50, 31  ;;  %v802_v56 = vshra.s32 %v786_v55, 31 }
  0xe9   : > { %v803_v7 = vshra.s32 %v787_v33, 31  ;;  %v788_v57 = vadd.f32 %v3625_v14, %v779_v32  ;;  %v789_v8 = vadd.f32 %v3625_v14, %v780_v27  ;;  %v790_v49 = vadd.f32 %v3625_v14, %v781_v11 }
  0xea   : > { %v791_v37 = vadd.f32 %v3625_v14, %v782_v20  ;;  %v808_v6 = vand.u32 2147483647, %v800_v0  ;;  %v809_v61 = vand.u32 2147483647, %v801_v46  ;;  %v810_v5 = vand.u32 2147483647, %v802_v56 }
  0xeb   : > { %v804_v45 = vshra.s32 %v788_v57, 31  ;;  %v805_v16 = vshra.s32 %v789_v8, 31  ;;  %v806_v17 = vshra.s32 %v790_v49, 31  ;;  %v811_v60 = vand.u32 2147483647, %v803_v7 }
  0xec   : > { %v807_v3 = vshra.s32 %v791_v37, 31  ;;  %v816_v10 = vxor.u32 %v808_v6, %v784_v41  ;;  %v817_v12 = vxor.u32 %v809_v61, %v785_v50  ;;  %v818_v13 = vxor.u32 %v810_v5, %v786_v55 }
  0xed   : > { %v812_v26 = vand.u32 2147483647, %v804_v45  ;;  %v813_v29 = vand.u32 2147483647, %v805_v16  ;;  %v814_v48 = vand.u32 2147483647, %v806_v17  ;;  %v819_v15 = vxor.u32 %v811_v60, %v787_v33 }
  0xee   : > { %v815_v28 = vand.u32 2147483647, %v807_v3  ;;  %v824_v4 = vand.u32 4294967288, %v816_v10  ;;  %v825_v52 = vand.u32 4294967288, %v817_v12  ;;  %v826_v30 = vand.u32 4294967288, %v818_v13 }
  0xef   : > { %v820_v34 = vxor.u32 %v812_v26, %v788_v57  ;;  %v821_v44 = vxor.u32 %v813_v29, %v789_v8  ;;  %v822_v58 = vxor.u32 %v814_v48, %v790_v49  ;;  %v827_v47 = vand.u32 4294967288, %v819_v15 }
  0xf0   : > { %v823_v54 = vxor.u32 %v815_v28, %v791_v37  ;;  %v832_v59 = vor.u32 7, %v824_v4  ;;  %v833_v19 = vor.u32 6, %v825_v52  ;;  %vm5603_vm11 = vcmp.eq.s32.totalorder %v3266_v1, %v3543_v38 }
  0xf1   : > { %vm3765_vm7 = vmand %vm5603_vm11, %vm3693_vm3  ;;  %v828_v41 = vand.u32 4294967288, %v820_v34  ;;  %v829_v50 = vand.u32 4294967288, %v821_v44  ;;  %v830_v62 = vand.u32 4294967288, %v822_v58  ;;  %v834_v55 = vor.u32 5, %v826_v30 }
  0xf2   : > { %vm5606_vm13 = vcmp.eq.s32.totalorder %v3266_v1, %v3551_v9  ;;  %v831_v2 = vand.u32 4294967288, %v823_v54  ;;  %v835_v32 = vor.u32 4, %v827_v47  ;;  %vm5609_vm14 = vcmp.eq.s32.totalorder %v3266_v1, %v3549_v53 }
  0xf3   : > { %vm3774_vm5 = vmand %vm5606_vm13, %vm3711_vm15  ;;  %v863_v38 = vsel %vm3720_vm4, %v832_v59, 2147483648  ;;  %v864_v27 = vsel %vm3729_vm9, %v833_v19, 2147483648  ;;  %v836_v11 = vor.u32 3, %v828_v41  ;;  %v837_v9 = vor.u32 2, %v829_v50 }
  0xf4   : > { %vm861_vm12 = vmand %vm5609_vm14, %vm3700_vm10  ;;  %v838_v20 = vor.u32 1, %v830_v62  ;;  %v865_v36 = vsel %vm3738_vm2, %v834_v55, 2147483648  ;;  %v866_v0 = vsel %vm3747_vm6, %v835_v32, 2147483648  ;;  %v870_v46 = vsel %vm3774_vm5, %v831_v2, 2147483648 }
  0xf5   : > { %vm5610_vm0 = vcmask 15360   ;;  %v867_v7 = vsel %vm3756_vm8, %v836_v11, 2147483648  ;;  %v868_v51 = vsel %vm3765_vm7, %v837_v9, 2147483648  ;;  %v5618_v48 = vmov 0  }
  0xf6   : > { %v871_v53 = vsel %vm5610_vm0, %v863_v38, 2147483648  ;;  %vm5611_vm3 = vmmov %vm5610_vm0  ;;  %v869_v57 = vsel %vm861_vm12, %v838_v20, 2147483648 }
  0xf7   : > { %v872_v56 = vsel %vm5611_vm3, %v864_v27, 2147483648  ;;  %vm5612_vm10 = vmmov %vm5610_vm0 }
  0xf8   : > { %v873_v8 = vsel %vm5612_vm10, %v865_v36, 2147483648  ;;  %vm5613_vm15 = vmmov %vm5610_vm0 }
  0xf9   : > { %v874_v49 = vsel %vm5613_vm15, %v866_v0, 2147483648  ;;  %vm5614_vm4 = vmmov %vm5610_vm0 }
  0xfa   : > { %v875_v37 = vsel %vm5614_vm4, %v867_v7, 2147483648  ;;  %vm5615_vm9 = vmmov %vm5610_vm0 }
  0xfb   : > { %v878_v40 = vsel %vm5615_vm9, %v868_v51, 2147483648  ;;  %vm5616_vm2 = vmmov %vm5610_vm0  ;;  %vm876_vm6 = vcmp.gt.s32.totalorder %v871_v53, %v875_v37 }
  0xfc   : > { %v881_v6 = vsel %vm5616_vm2, %v869_v57, 2147483648  ;;  %vm879_vm11 = vcmp.gt.s32.totalorder %v872_v56, %v878_v40  ;;  %vm5617_vm5 = vmmov %vm5610_vm0  ;;  %v877_v5 = vsel %vm876_vm6, %v871_v53, %v875_v37 }
  0xfd   : > { %vm882_vm13 = vcmp.gt.s32.totalorder %v873_v8, %v881_v6  ;;  %v884_v61 = vsel %vm5617_vm5, %v870_v46, 2147483648  ;;  %v880_v45 = vsel %vm879_vm11, %v872_v56, %v878_v40  ;;  %vm5619_vm6 = vmmov %vm5617_vm5 }
  0xfe   : > { %v883_v16 = vsel %vm882_vm13, %v873_v8, %v881_v6  ;;  %vm885_vm8 = vcmp.gt.s32.totalorder %v874_v49, %v884_v61  ;;  %vm887_vm7 = vcmp.gt.s32.totalorder %v877_v5, %v880_v45  ;;  %vm5620_vm11 = vmmov %vm5617_vm5 }
  0xff   : > { %v886_v17 = vsel %vm885_vm8, %v874_v49, %v884_v61  ;;  %v888_v3 = vsel %vm887_vm7, %v877_v5, %v880_v45  ;;  %vm5621_vm8 = vmmov %vm5617_vm5 }
 0x100   : > { %vm889_vm14 = vcmp.gt.s32.totalorder %v883_v16, %v886_v17  ;;  %vm5622_vm7 = vmmov %vm5617_vm5 }
 0x101   : > { %v890_v24 = vsel %vm889_vm14, %v883_v16, %v886_v17  ;;  %vm5623_vm14 = vmmov %vm5617_vm5 }
 0x102   : > { %vm891_vm12 = vcmp.gt.s32.totalorder %v888_v3, %v890_v24 }
 0x103   : > { %v3805_v60 = vsel %vm891_vm12, %v888_v3, %v890_v24 }
 0x104   : > { %v894_v10 = vand.u32 7, %v3805_v60  ;;  %v896_v12 = vand.u32 4294967288, %v3805_v60  ;;  %vm893_vm0 = vcmp.ge.s32.totalorder %v3805_v60, 0 }
 0x106   : > { %v895_v13 = vsub.s32 7, %v894_v10  ;;  %v897_v42 = vshra.s32 %v896_v12, 31 }
 0x108   : > { %v898_v26 = vand.u32 2147483647, %v897_v42  ;;  %v3813_v29 = vsel %vm893_vm0, %v895_v13, %v2937_v21 }
 0x109   : > { %vm904_vm3 = vcmp.eq.s32.totalorder %v3813_v29, 0  ;;  %vm905_vm10 = vcmp.eq.s32.totalorder %v3813_v29, 1  ;;  %vm906_vm15 = vcmp.eq.s32.totalorder %v3813_v29, 2  ;;  %vm907_vm4 = vcmp.eq.s32.totalorder %v3813_v29, 3 }
 0x10a   : > { %vm908_vm9 = vcmp.eq.s32.totalorder %v3813_v29, 4  ;;  %vm909_vm2 = vcmp.eq.s32.totalorder %v3813_v29, 5  ;;  %v912_v43 = vsel %vm904_vm3, 1, %v5618_v48  ;;  %v913_v28 = vsel %vm905_vm10, 1, %v5618_v48 }
 0x10b   : > { %v914_v15 = vsel %vm906_vm15, 1, %v5618_v48  ;;  %v915_v21 = vsel %vm907_vm4, 1, %v5618_v48  ;;  %v916_v4 = vsel %vm908_vm9, 1, %v5618_v48  ;;  %v917_v52 = vsel %vm909_vm2, 1, %v5618_v48 }
 0x10c   : > { %v899_v18 = vxor.u32 %v898_v26, %v896_v12  ;;  %v920_v34 = vsel %vm5619_vm6, %v912_v43, 2147483648  ;;  %v930_v44 = vsel %vm5620_vm11, %v913_v28, 2147483648  ;;  %vm910_vm13 = vcmp.eq.s32.totalorder %v3813_v29, 6 }
 0x10d   : > { %v921_v58 = vrot.slane %v920_v34, 4  ;;  %v931_v30 = vrot.slane %v930_v44, 4  ;;  %v940_v63 = vsel %vm5617_vm5, %v914_v15, 2147483648  ;;  %v950_v47 = vsel %vm5621_vm8, %v915_v21, 2147483648 }
 0x10e   : > { %v941_v54 = vrot.slane %v940_v63, 4  ;;  %v960_v59 = vsel %vm5622_vm7, %v916_v4, 2147483648  ;;  %v970_v19 = vsel %vm5623_vm14, %v917_v52, 2147483648  ;;  %v951_v25 = vrot.slane %v950_v47, 4 }
 0x10f   : > { %vm922_vm12 = vcmp.gt.s32.totalorder %v920_v34, %v921_v58  ;;  %vm932_vm3 = vcmp.gt.s32.totalorder %v930_v44, %v931_v30  ;;  %v961_v41 = vrot.slane %v960_v59, 4  ;;  %v971_v55 = vrot.slane %v970_v19, 4 }
 0x110   : > { %v923_v50 = vsel %vm922_vm12, %v920_v34, %v921_v58  ;;  %v933_v62 = vsel %vm932_vm3, %v930_v44, %v931_v30  ;;  %vm942_vm10 = vcmp.gt.s32.totalorder %v940_v63, %v941_v54  ;;  %vm952_vm15 = vcmp.gt.s32.totalorder %v950_v47, %v951_v25  ;;  %vm5624_vm3 = vmmov %vm5623_vm14  ;;  %v5632_v34 = vld [vmem:[#allocation5_spill] sm:$0xff]  ;;  %v5637_v30 = vld [vmem:[#allocation6_spill] sm:$0xff] }
 0x111   : > { %v924_v33 = vrot.slane %v923_v50, 2  ;;  %v934_v2 = vrot.slane %v933_v62, 2  ;;  %v943_v32 = vsel %vm942_vm10, %v940_v63, %v941_v54  ;;  %v953_v27 = vsel %vm952_vm15, %v950_v47, %v951_v25  ;;  %v5638_v54 = vld [vmem:[#allocation7_spill] sm:$0xff] }
 0x112   : > { %v944_v38 = vrot.slane %v943_v32, 2  ;;  %vm962_vm4 = vcmp.gt.s32.totalorder %v960_v59, %v961_v41  ;;  %vm972_vm9 = vcmp.gt.s32.totalorder %v970_v19, %v971_v55  ;;  %v954_v11 = vrot.slane %v953_v27, 2 }
 0x113   : > { %vm925_vm2 = vcmp.gt.s32.totalorder %v923_v50, %v924_v33  ;;  %vm935_vm6 = vcmp.gt.s32.totalorder %v933_v62, %v934_v2  ;;  %v963_v9 = vsel %vm962_vm4, %v960_v59, %v961_v41  ;;  %vm911_vm11 = vcmp.eq.s32.totalorder %v3813_v29, 7 }
 0x114   : > { %v926_v20 = vsel %vm925_vm2, %v923_v50, %v924_v33  ;;  %v964_v36 = vrot.slane %v963_v9, 2  ;;  %v936_v0 = vsel %vm935_vm6, %v933_v62, %v934_v2  ;;  %v918_v46 = vsel %vm910_vm13, 1, %v5618_v48 }
 0x115   : > { %v927_v53 = vrot.slane %v926_v20, 1  ;;  %vm945_vm5 = vcmp.gt.s32.totalorder %v943_v32, %v944_v38  ;;  %v973_v56 = vsel %vm972_vm9, %v970_v19, %v971_v55  ;;  %v902_v7 = vadd.f32 %v2941_v22, %v899_v18 }
 0x116   : > { %v919_v51 = vsel %vm911_vm11, 1, %v5618_v48  ;;  %vm955_vm8 = vcmp.gt.s32.totalorder %v953_v27, %v954_v11  ;;  %v937_v57 = vrot.slane %v936_v0, 1  ;;  %vm965_vm7 = vcmp.gt.s32.totalorder %v963_v9, %v964_v36 }
 0x117   : > { %v946_v8 = vsel %vm945_vm5, %v943_v32, %v944_v38  ;;  %v974_v49 = vrot.slane %v973_v56, 2  ;;  %v980_v37 = vsel %vm5623_vm14, %v918_v46, 2147483648  ;;  %vm928_vm12 = vcmp.gt.s32.totalorder %v926_v20, %v927_v53  ;;  %vm5642_vm14 = vmmov %vm5624_vm3 }
 0x118   : > { %v956_v40 = vsel %vm955_vm8, %v953_v27, %v954_v11  ;;  %v981_v6 = vrot.slane %v980_v37, 4  ;;  %v990_v61 = vsel %vm5624_vm3, %v919_v51, 2147483648  ;;  %v3845_v5 = vsel %vm893_vm0, %v902_v7, %v2941_v22  ;;  %vm5640_vm8 = vmmov %vm5624_vm3 }
 0x119   : > { %v966_v45 = vsel %vm965_vm7, %v963_v9, %v964_v36  ;;  %vm975_vm13 = vcmp.gt.s32.totalorder %v973_v56, %v974_v49  ;;  %v991_v16 = vrot.slane %v990_v61, 4  ;;  %vm3847_vm10 = vcmp.gt.s32.totalorder %v936_v0, %v937_v57  ;;  %vm5641_vm7 = vmmov %vm5624_vm3 }
 0x11a   : > { %v947_v3 = vrot.slane %v946_v8, 1  ;;  %v976_v24 = vsel %vm975_vm13, %v973_v56, %v974_v49  ;;  %vm982_vm15 = vcmp.gt.s32.totalorder %v980_v37, %v981_v6  ;;  %v3851_v10 = vsel %vm928_vm12, %v926_v20, %v927_v53  ;;  %vm5643_vm12 = vmmov %vm5624_vm3 }
 0x11b   : > { %v957_v12 = vrot.slane %v956_v40, 1  ;;  %v983_v13 = vsel %vm982_vm15, %v980_v37, %v981_v6  ;;  %vm992_vm4 = vcmp.gt.s32.totalorder %v990_v61, %v991_v16  ;;  %v967_v42 = vrot.slane %v966_v45, 1 }
 0x11c   : > { %v977_v26 = vrot.slane %v976_v24, 1  ;;  %v984_v60 = vrot.slane %v983_v13, 2  ;;  %v993_v22 = vsel %vm992_vm4, %v990_v61, %v991_v16  ;;  %v3855_v28 = vsub.f32 %v3374_v23, %v3845_v5  ;;  %v5627_v23 = vld [vmem:[#allocation4_spill] sm:$0xff] }
 0x11d   : > { %v994_v43 = vrot.slane %v993_v22, 2  ;;  %v3859_v15 = vsub.f32 %v3379_v31, %v3845_v5  ;;  %v3863_v21 = vsub.f32 %v3384_v35, %v3845_v5  ;;  %v3867_v4 = vsel %vm3847_vm10, %v936_v0, %v937_v57  ;;  %vm5644_vm10 = vmmov %vm5624_vm3 }
 0x11e   : > { %vm985_vm0 = vcmp.gt.s32.totalorder %v983_v13, %v984_v60  ;;  %v3871_v52 = vsub.f32 %v3389_v39, %v3845_v5  ;;  %v3875_v18 = vsub.f32 %v5627_v23, %v3845_v5  ;;  %vm3877_vm9 = vcmp.gt.s32.totalorder %v946_v8, %v947_v3 }
 0x11f   : > { %vm3881_vm2 = vcmp.gt.s32.totalorder %v956_v40, %v957_v12  ;;  %vm995_vm6 = vcmp.gt.s32.totalorder %v993_v22, %v994_v43  ;;  %v3887_v44 = vsub.f32 %v5632_v34, %v3845_v5  ;;  %vm3889_vm11 = vcmp.gt.s32.totalorder %v966_v45, %v967_v42 }
 0x120   : > { %vm3893_vm5 = vcmp.gt.s32.totalorder %v976_v24, %v977_v26  ;;  %v3899_v63 = vsub.f32 %v5637_v30, %v3845_v5  ;;  %v3903_v47 = vsub.f32 %v5638_v54, %v3845_v5  ;;  %v3905_v59 = vsel %vm985_vm0, %v983_v13, %v984_v60 }
 0x121   : > { %v1032_v19 = vshra.s32 %v3855_v28, 31  ;;  %v1033_v25 = vshra.s32 %v3859_v15, 31  ;;  %v1034_v41 = vshra.s32 %v3863_v21, 31  ;;  %v3910_v50 = vsel %vm995_vm6, %v993_v22, %v994_v43  ;;  %v5639_v22 = vld [vmem:[#allocation3_spill] sm:$0xff] }
 0x122   : > { %v1035_v62 = vshra.s32 %v3871_v52, 31  ;;  %v1036_v55 = vshra.s32 %v3875_v18, 31  ;;  %v1037_v33 = vshra.s32 %v3887_v44, 31  ;;  %v3917_v2 = vsel %vm3877_vm9, %v946_v8, %v947_v3 }
 0x123   : > { %v3921_v32 = vsel %vm3881_vm2, %v956_v40, %v957_v12  ;;  %v1038_v38 = vshra.s32 %v3899_v63, 31  ;;  %v1039_v27 = vshra.s32 %v3903_v47, 31  ;;  %v3927_v11 = vsel %vm3889_vm11, %v966_v45, %v967_v42 }
 0x124   : > { %v3931_v9 = vsel %vm3893_vm5, %v976_v24, %v977_v26  ;;  %v1040_v20 = vand.u32 2147483647, %v1032_v19  ;;  %v1041_v36 = vand.u32 2147483647, %v1033_v25  ;;  %v987_v0 = vrot.slane %v3905_v59, 1 }
 0x125   : > { %v997_v46 = vrot.slane %v3910_v50, 1  ;;  %v1042_v53 = vand.u32 2147483647, %v1034_v41  ;;  %v1043_v56 = vand.u32 2147483647, %v1035_v62 }
 0x126   : > { %v1044_v7 = vand.u32 2147483647, %v1036_v55  ;;  %v1045_v51 = vand.u32 2147483647, %v1037_v33  ;;  %v1046_v57 = vand.u32 2147483647, %v1038_v38  ;;  %v1048_v8 = vxor.u32 %v1040_v20, %v3855_v28 }
 0x127   : > { %v1047_v49 = vand.u32 2147483647, %v1039_v27  ;;  %v1049_v37 = vxor.u32 %v1041_v36, %v3859_v15  ;;  %v1050_v40 = vxor.u32 %v1042_v53, %v3863_v21  ;;  %v1051_v6 = vxor.u32 %v1043_v56, %v3871_v52 }
 0x128   : > { %v1052_v61 = vxor.u32 %v1044_v7, %v3875_v18  ;;  %v1053_v45 = vxor.u32 %v1045_v51, %v3887_v44  ;;  %v1054_v16 = vxor.u32 %v1046_v57, %v3899_v63  ;;  %v1056_v17 = vand.u32 4294967288, %v1048_v8 }
 0x129   : > { %v1055_v3 = vxor.u32 %v1047_v49, %v3903_v47  ;;  %v1057_v24 = vand.u32 4294967288, %v1049_v37  ;;  %v1058_v12 = vand.u32 4294967288, %v1050_v40  ;;  %v1059_v13 = vand.u32 4294967288, %v1051_v6 }
 0x12a   : > { %v1060_v42 = vand.u32 4294967288, %v1052_v61  ;;  %v1061_v26 = vand.u32 4294967288, %v1053_v45  ;;  %v3943_v60 = vand.u32 4294967288, %v1054_v16  ;;  %v1064_v43 = vor.u32 %v1056_v17, %v5639_v22 }
 0x12b   : > { %v3946_v23 = vand.u32 4294967288, %v1055_v3  ;;  %v1065_v31 = vor.u32 %v1057_v24, %v5639_v22  ;;  %v1066_v35 = vor.u32 %v1058_v12, %v5639_v22  ;;  %v1067_v34 = vor.u32 %v1059_v13, %v5639_v22 }
 0x12c   : > { %v1068_v39 = vor.u32 %v1060_v42, %v5639_v22  ;;  %v1069_v58 = vor.u32 %v1061_v26, %v5639_v22  ;;  %v1070_v30 = vor.u32 %v3943_v60, %v5639_v22  ;;  %v1072_v54 = vsel %vm5640_vm8, %v1064_v43, 2147483648 }
 0x12d   : > { %v1071_v19 = vor.u32 %v3946_v23, %v5639_v22  ;;  %v1073_v25 = vrot.slane %v1072_v54, 4  ;;  %v1082_v41 = vsel %vm5641_vm7, %v1065_v31, 2147483648  ;;  %v1092_v62 = vsel %vm5642_vm14, %v1066_v35, 2147483648 }
 0x12e   : > { %v1083_v55 = vrot.slane %v1082_v41, 4  ;;  %v1093_v33 = vrot.slane %v1092_v62, 4  ;;  %v1102_v38 = vsel %vm5643_vm12, %v1067_v34, 2147483648  ;;  %v1112_v27 = vsel %vm5624_vm3, %v1068_v39, 2147483648 }
 0x12f   : > { %vm1074_vm13 = vcmp.gt.s32.totalorder %v1072_v54, %v1073_v25  ;;  %v1103_v20 = vrot.slane %v1102_v38, 4  ;;  %v1113_v36 = vrot.slane %v1112_v27, 4  ;;  %v1122_v53 = vsel %vm5644_vm10, %v1069_v58, 2147483648 }
 0x130   : > { %v1075_v56 = vsel %vm1074_vm13, %v1072_v54, %v1073_v25  ;;  %vm1084_vm15 = vcmp.gt.s32.totalorder %v1082_v41, %v1083_v55  ;;  %vm1094_vm4 = vcmp.gt.s32.totalorder %v1092_v62, %v1093_v33  ;;  %v1123_v7 = vrot.slane %v1122_v53, 4 }
 0x131   : > { %v1076_v51 = vrot.slane %v1075_v56, 2  ;;  %v1085_v57 = vsel %vm1084_vm15, %v1082_v41, %v1083_v55  ;;  %v1095_v8 = vsel %vm1094_vm4, %v1092_v62, %v1093_v33  ;;  %vm1104_vm0 = vcmp.gt.s32.totalorder %v1102_v38, %v1103_v20 }
 0x132   : > { %v1086_v49 = vrot.slane %v1085_v57, 2  ;;  %v1096_v37 = vrot.slane %v1095_v8, 2  ;;  %v1105_v40 = vsel %vm1104_vm0, %v1102_v38, %v1103_v20  ;;  %vm1114_vm9 = vcmp.gt.s32.totalorder %v1112_v27, %v1113_v36 }
 0x133   : > { %vm1077_vm2 = vcmp.gt.s32.totalorder %v1075_v56, %v1076_v51  ;;  %v1106_v6 = vrot.slane %v1105_v40, 2  ;;  %v1115_v61 = vsel %vm1114_vm9, %v1112_v27, %v1113_v36  ;;  %vm3963_vm6 = vcmp.gt.s32.totalorder %v1122_v53, %v1123_v7 }
 0x134   : > { %v1078_v16 = vsel %vm1077_vm2, %v1075_v56, %v1076_v51  ;;  %vm1087_vm11 = vcmp.gt.s32.totalorder %v1085_v57, %v1086_v49  ;;  %vm1097_vm5 = vcmp.gt.s32.totalorder %v1095_v8, %v1096_v37  ;;  %v1116_v17 = vrot.slane %v1115_v61, 2 }
 0x135   : > { %v1079_v3 = vrot.slane %v1078_v16, 1  ;;  %v1088_v24 = vsel %vm1087_vm11, %v1085_v57, %v1086_v49  ;;  %v1098_v12 = vsel %vm1097_vm5, %v1095_v8, %v1096_v37  ;;  %vm1107_vm8 = vcmp.gt.s32.totalorder %v1105_v40, %v1106_v6 }
 0x136   : > { %v1089_v13 = vrot.slane %v1088_v24, 1  ;;  %v1099_v42 = vrot.slane %v1098_v12, 1  ;;  %v1108_v26 = vsel %vm1107_vm8, %v1105_v40, %v1106_v6  ;;  %vm1117_vm7 = vcmp.gt.s32.totalorder %v1115_v61, %v1116_v17 }
 0x137   : > { %vm1080_vm14 = vcmp.gt.s32.totalorder %v1078_v16, %v1079_v3  ;;  %v1109_v60 = vrot.slane %v1108_v26, 1  ;;  %v1118_v43 = vsel %vm1117_vm7, %v1115_v61, %v1116_v17  ;;  %v1125_v23 = vsel %vm3963_vm6, %v1122_v53, %v1123_v7 }
 0x138   : > { %v3969_v31 = vsel %vm1080_vm14, %v1078_v16, %v1079_v3  ;;  %vm1090_vm12 = vcmp.gt.s32.totalorder %v1088_v24, %v1089_v13  ;;  %vm1100_vm3 = vcmp.gt.s32.totalorder %v1098_v12, %v1099_v42  ;;  %v1119_v35 = vrot.slane %v1118_v43, 1 }
 0x139   : > { %v3971_v34 = vsel %vm1090_vm12, %v1088_v24, %v1089_v13  ;;  %v3973_v39 = vsel %vm1100_vm3, %v1098_v12, %v1099_v42  ;;  %vm1110_vm13 = vcmp.gt.s32.totalorder %v1108_v26, %v1109_v60  ;;  %v1126_v58 = vrot.slane %v1125_v23, 2 }
 0x13a   : > { %v3975_v54 = vsel %vm1110_vm13, %v1108_v26, %v1109_v60  ;;  %vm1120_vm10 = vcmp.gt.s32.totalorder %v1118_v43, %v1119_v35  ;;  %vm5647_vm15 = vcmask 15360   ;;  %v1152_v27 = vand.u32 7, %v3969_v31 }
 0x13b   : > { %v1132_v25 = vsel %vm5647_vm15, %v1070_v30, 2147483648  ;;  %vm5648_vm4 = vmmov %vm5647_vm15  ;;  %v3979_v62 = vsel %vm1120_vm10, %v1118_v43, %v1119_v35  ;;  %vm1127_vm0 = vcmp.gt.s32.totalorder %v1125_v23, %v1126_v58  ;;  %v1153_v20 = vand.u32 7, %v3971_v34 }
 0x13c   : > { %v1142_v41 = vsel %vm5648_vm4, %v1071_v19, 2147483648  ;;  %v1133_v55 = vrot.slane %v1132_v25, 4  ;;  %v1128_v38 = vsel %vm1127_vm0, %v1125_v23, %v1126_v58  ;;  %v1154_v36 = vand.u32 7, %v3973_v39 }
 0x13d   : > { %v1143_v33 = vrot.slane %v1142_v41, 4  ;;  %vm3987_vm9 = vcmp.gt.s32.totalorder %v3905_v59, %v987_v0  ;;  %v1129_v30 = vrot.slane %v1128_v38, 1  ;;  %v1155_v19 = vand.u32 7, %v3975_v54 }
 0x13e   : > { %vm1134_vm2 = vcmp.gt.s32.totalorder %v1132_v25, %v1133_v55  ;;  %v1156_v51 = vand.u32 7, %v3979_v62  ;;  %v3993_v57 = vsub.s32 7, %v1152_v27  ;;  %vm3998_vm11 = vcmp.gt.s32.totalorder %v3910_v50, %v997_v46 }
 0x13f   : > { %vm1144_vm6 = vcmp.gt.s32.totalorder %v1142_v41, %v1143_v33  ;;  %v1135_v56 = vsel %vm1134_vm2, %v1132_v25, %v1133_v55  ;;  %vm1130_vm5 = vcmp.gt.s32.totalorder %v1128_v38, %v1129_v30  ;;  %v4002_v40 = vsub.s32 7, %v1153_v20 }
 0x140   : > { %v1145_v7 = vsel %vm1144_vm6, %v1142_v41, %v1143_v33  ;;  %v1136_v49 = vrot.slane %v1135_v56, 2  ;;  %v1131_v6 = vsel %vm1130_vm5, %v1128_v38, %v1129_v30  ;;  %v4004_v61 = vsub.s32 7, %v1154_v36 }
 0x141   : > { %v1146_v37 = vrot.slane %v1145_v7, 2  ;;  %v4006_v45 = vsub.s32 7, %v1155_v19  ;;  %v4008_v16 = vsub.s32 7, %v1156_v51  ;;  %v1157_v17 = vand.u32 7, %v1131_v6 }
 0x142   : > { %vm1137_vm8 = vcmp.gt.s32.totalorder %v1135_v56, %v1136_v49  ;;  %v1168_v3 = vand.u32 4294967288, %v3969_v31  ;;  %v1169_v13 = vand.u32 4294967288, %v3971_v34  ;;  %v1170_v42 = vand.u32 4294967288, %v3973_v39 }
 0x143   : > { %vm1147_vm7 = vcmp.gt.s32.totalorder %v1145_v7, %v1146_v37  ;;  %v1138_v24 = vsel %vm1137_vm8, %v1135_v56, %v1136_v49  ;;  %v4013_v43 = vsub.s32 7, %v1157_v17  ;;  %v1171_v23 = vand.u32 4294967288, %v3975_v54 }
 0x144   : > { %v1148_v12 = vsel %vm1147_vm7, %v1145_v7, %v1146_v37  ;;  %v1139_v26 = vrot.slane %v1138_v24, 1  ;;  %v1172_v35 = vand.u32 4294967288, %v3979_v62  ;;  %v1173_v58 = vand.u32 4294967288, %v1131_v6 }
 0x145   : > { %v1149_v60 = vrot.slane %v1148_v12, 1  ;;  %v1176_v25 = vshra.s32 %v1168_v3, 31  ;;  %v1177_v41 = vshra.s32 %v1169_v13, 31  ;;  %v1178_v31 = vshra.s32 %v1170_v42, 31 }
 0x146   : > { %vm1140_vm14 = vcmp.gt.s32.totalorder %v1138_v24, %v1139_v26  ;;  %v1179_v55 = vshra.s32 %v1171_v23, 31  ;;  %v1180_v34 = vshra.s32 %v1172_v35, 31  ;;  %v1181_v27 = vshra.s32 %v1173_v58, 31 }
 0x147   : > { %vm1150_vm12 = vcmp.gt.s32.totalorder %v1148_v12, %v1149_v60  ;;  %v1141_v33 = vsel %vm1140_vm14, %v1138_v24, %v1139_v26  ;;  %v4022_v54 = vsel %vm3987_vm9, %v3905_v59, %v987_v0  ;;  %v1184_v62 = vand.u32 2147483647, %v1176_v25 }
 0x148   : > { %v1151_v38 = vsel %vm1150_vm12, %v1148_v12, %v1149_v60  ;;  %v1158_v39 = vand.u32 7, %v1141_v33  ;;  %v1174_v36 = vand.u32 4294967288, %v1141_v33  ;;  %v1185_v19 = vand.u32 2147483647, %v1177_v41 }
 0x149   : > { %v1159_v20 = vand.u32 7, %v1151_v38  ;;  %v1175_v30 = vand.u32 4294967288, %v1151_v38  ;;  %v1186_v56 = vand.u32 2147483647, %v1178_v31  ;;  %v4033_v6 = vsel %vm3998_vm11, %v3910_v50, %v997_v46 }
 0x14a   : > { %v4024_v7 = vsub.s32 7, %v1158_v39  ;;  %v1182_v49 = vshra.s32 %v1174_v36, 31  ;;  %v1187_v17 = vand.u32 2147483647, %v1179_v55  ;;  %v1188_v53 = vand.u32 2147483647, %v1180_v34 }
 0x14b   : > { %v4026_v51 = vsub.s32 7, %v1159_v20  ;;  %v1183_v37 = vshra.s32 %v1175_v30, 31  ;;  %v1189_v59 = vand.u32 2147483647, %v1181_v27  ;;  %v4035_v12 = vxor.u32 %v1184_v62, %v1168_v3 }
 0x14c   : > { %v1190_v0 = vand.u32 2147483647, %v1182_v49  ;;  %vm1208_vm3 = vcmp.eq.s32.totalorder %v3266_v1, %v3993_v57  ;;  %v4039_v26 = vxor.u32 %v1185_v19, %v1169_v13  ;;  %v4041_v60 = vxor.u32 %v1186_v56, %v1170_v42 }
 0x14d   : > { %v1191_v24 = vand.u32 2147483647, %v1183_v37  ;;  %v4043_v25 = vxor.u32 %v1187_v17, %v1171_v23  ;;  %vm1209_vm13 = vcmp.eq.s32.totalorder %v3266_v1, %v4002_v40  ;;  %v4047_v50 = vxor.u32 %v1188_v53, %v1172_v35 }
 0x14e   : > { %v4049_v46 = vxor.u32 %v1189_v59, %v1173_v58  ;;  %vm1210_vm10 = vcmp.eq.s32.totalorder %v3266_v1, %v4004_v61  ;;  %vm1211_vm15 = vcmp.eq.s32.totalorder %v3266_v1, %v4006_v45  ;;  %vm1212_vm4 = vcmp.eq.s32.totalorder %v3266_v1, %v4008_v16 }
 0x14f   : > { %vm5460_vm0 = vcmp.eq.s32.totalorder %v3266_v1, %v4013_v43  ;;  %vm5458_vm9 = vcmp.eq.s32.totalorder %v3266_v1, %v4024_v7  ;;  %vm5459_vm2 = vcmp.eq.s32.totalorder %v3266_v1, %v4026_v51  ;;  %v4063_v8 = vxor.u32 %v1190_v0, %v1174_v36 }
 0x150   : > { %v1216_v3 = vsel %vm1208_vm3, -1e+30, %v3855_v28  ;;  %v1217_v13 = vsel %vm1209_vm13, -1e+30, %v3859_v15  ;;  %v1218_v42 = vsel %vm1210_vm10, -1e+30, %v3863_v21  ;;  %v4077_v23 = vxor.u32 %v1191_v24, %v1175_v30 }
 0x151   : > { %v1219_v35 = vsel %vm1211_vm15, -1e+30, %v3871_v52  ;;  %v1220_v28 = vsel %vm1212_vm4, -1e+30, %v3875_v18  ;;  %v1221_v15 = vsel %vm5460_vm0, -1e+30, %v3887_v44 }
 0x152   : > { %v1222_v21 = vsel %vm5458_vm9, -1e+30, %v3899_v63  ;;  %v1223_v52 = vsel %vm5459_vm2, -1e+30, %v3903_v47  ;;  %vm5653_vm6 = vcmask 15360   ;;  %vm1000_vm12 = vcmp.gt.s32.totalorder %v3851_v10, 0 }
 0x153   : > { %v1224_v58 = vsel %vm5653_vm6, %v1216_v3, -inf  ;;  %vm5654_vm11 = vmmov %vm5653_vm6  ;;  %vm1007_vm9 = vcmp.gt.s32.totalorder %v4033_v6, 0 }
 0x154   : > { %v1231_v41 = vsel %vm5654_vm11, %v1217_v13, -inf  ;;  %v1225_v18 = vrot.slane %v1224_v58, 4  ;;  %vm5655_vm5 = vmmov %vm5653_vm6 }
 0x155   : > { %v1232_v31 = vrot.slane %v1231_v41, 4  ;;  %v1238_v55 = vsel %vm5655_vm5, %v1218_v42, -inf  ;;  %vm5656_vm8 = vmmov %vm5655_vm5 }
 0x156   : > { %v1245_v44 = vsel %vm5656_vm8, %v1219_v35, -inf  ;;  %v1239_v33 = vrot.slane %v1238_v55, 4  ;;  %vm5657_vm7 = vmmov %vm5655_vm5  ;;  %v1226_v27 = vmax.f32 %v1224_v58, %v1225_v18  ;;  %vm1002_vm8 = vcmp.gt.s32.totalorder %v3917_v2, 0 }
 0x157   : > { %v1246_v38 = vrot.slane %v1245_v44, 4  ;;  %v1252_v34 = vsel %vm5657_vm7, %v1220_v28, -inf  ;;  %vm5658_vm14 = vmmov %vm5655_vm5  ;;  %v1233_v39 = vmax.f32 %v1231_v41, %v1232_v31  ;;  %vm1003_vm7 = vcmp.gt.s32.totalorder %v3921_v32, 0 }
 0x158   : > { %v1259_v63 = vsel %vm5658_vm14, %v1221_v15, -inf  ;;  %v1253_v20 = vrot.slane %v1252_v34, 4  ;;  %v1240_v36 = vmax.f32 %v1238_v55, %v1239_v33  ;;  %vm5659_vm6 = vmmov %vm5655_vm5  ;;  %v1227_v56 = vrot.slane %v1226_v27, 2 }
 0x159   : > { %v1260_v47 = vrot.slane %v1259_v63, 4  ;;  %v1247_v30 = vmax.f32 %v1245_v44, %v1246_v38  ;;  %v1266_v62 = vsel %vm5659_vm6, %v1222_v21, -inf  ;;  %vm5660_vm11 = vmmov %vm5655_vm5  ;;  %vm1001_vm5 = vcmp.gt.s32.totalorder %v3867_v4, 0 }
 0x15a   : > { %v1273_v19 = vsel %vm5660_vm11, %v1223_v52, -inf  ;;  %v1234_v49 = vrot.slane %v1233_v39, 2  ;;  %v1254_v37 = vmax.f32 %v1252_v34, %v1253_v20  ;;  %v1241_v53 = vrot.slane %v1240_v36, 2  ;;  %vm4122_vm2 = vmxor %vm1000_vm12, %vm2996_vm1 }
 0x15b   : > { %v1261_v17 = vmax.f32 %v1259_v63, %v1260_v47  ;;  %v1248_v59 = vrot.slane %v1247_v30, 2  ;;  %v1267_v0 = vrot.slane %v1266_v62, 4  ;;  %v1274_v24 = vrot.slane %v1273_v19, 4  ;;  %vm4131_vm0 = vmxor %vm1001_vm5, %vm2996_vm1 }
 0x15c   : > { %v1228_v3 = vmax.f32 %v1226_v27, %v1227_v56  ;;  %v1235_v13 = vmax.f32 %v1233_v39, %v1234_v49  ;;  %v1255_v42 = vrot.slane %v1254_v37, 2  ;;  %vm1004_vm14 = vcmp.gt.s32.totalorder %v3927_v11, 0  ;;  %vm4138_vm12 = vmxor %vm1002_vm8, %vm2996_vm1 }
 0x15d   : > { %v1262_v35 = vrot.slane %v1261_v17, 2  ;;  %v1242_v28 = vmax.f32 %v1240_v36, %v1241_v53  ;;  %v1249_v15 = vmax.f32 %v1247_v30, %v1248_v59  ;;  %v1268_v21 = vmax.f32 %v1266_v62, %v1267_v0  ;;  %vm4147_vm5 = vmxor %vm1003_vm7, %vm2996_vm1 }
 0x15e   : > { %v1275_v52 = vmax.f32 %v1273_v19, %v1274_v24  ;;  %vm1005_vm6 = vcmp.gt.s32.totalorder %v3931_v9, 0  ;;  %v1229_v58 = vrot.slane %v1228_v3, 1  ;;  %v1236_v41 = vrot.slane %v1235_v13, 1  ;;  %vm4158_vm8 = vmxor %vm1004_vm14, %vm2996_vm1 }
 0x15f   : > { %v1256_v18 = vmax.f32 %v1254_v37, %v1255_v42  ;;  %v1263_v31 = vmax.f32 %v1261_v17, %v1262_v35  ;;  %vm1006_vm11 = vcmp.gt.s32.totalorder %v4022_v54, 0  ;;  %v1243_v55 = vrot.slane %v1242_v28, 1  ;;  %vm4167_vm7 = vmxor %vm1005_vm6, %vm2996_vm1 }
 0x160   : > { %v1250_v44 = vrot.slane %v1249_v15, 1  ;;  %v1269_v33 = vrot.slane %v1268_v21, 2  ;;  %v1276_v38 = vrot.slane %v1275_v52, 2  ;;  %v1230_v34 = vmax.f32 %v1228_v3, %v1229_v58  ;;  %vm4174_vm14 = vmxor %vm1006_vm11, %vm2996_vm1 }
 0x161   : > { %v1237_v63 = vmax.f32 %v1235_v13, %v1236_v41  ;;  %v1257_v27 = vrot.slane %v1256_v18, 1  ;;  %v1264_v39 = vrot.slane %v1263_v31, 1  ;;  %v1244_v20 = vmax.f32 %v1242_v28, %v1243_v55  ;;  %vm4181_vm6 = vmxor %vm1007_vm9, %vm2996_vm1 }
 0x162   : > { %v1251_v47 = vmax.f32 %v1249_v15, %v1250_v44  ;;  %v1270_v36 = vmax.f32 %v1268_v21, %v1269_v33  ;;  %v1277_v30 = vmax.f32 %v1275_v52, %v1276_v38  ;;  %v1280_v56 = vsub.f32 %v4035_v12, %v1230_v34  ;;  %vm4192_vm11 = vmand %vm1208_vm3, %vm4122_vm2 }
 0x163   : > { %v1258_v62 = vmax.f32 %v1256_v18, %v1257_v27  ;;  %v1265_v19 = vmax.f32 %v1263_v31, %v1264_v39  ;;  %v1281_v49 = vsub.f32 %v4039_v26, %v1237_v63  ;;  %v1282_v53 = vsub.f32 %v4041_v60, %v1244_v20  ;;  %vm4201_vm9 = vmand %vm1209_vm13, %vm4131_vm0 }
 0x164   : > { %v1271_v37 = vrot.slane %v1270_v36, 1  ;;  %v1278_v17 = vrot.slane %v1277_v30, 1  ;;  %v1283_v59 = vsub.f32 %v4043_v25, %v1251_v47  ;;  %v1288_v12 = vmax.f32 %v1280_v56, 0.0  ;;  %vm4210_vm3 = vmand %vm1210_vm10, %vm4138_vm12 }
 0x165   : > { %v1284_v24 = vsub.f32 %v4047_v50, %v1258_v62  ;;  %v1285_v3 = vsub.f32 %v4049_v46, %v1265_v19  ;;  %v1289_v13 = vmax.f32 %v1281_v49, 0.0  ;;  %v1290_v10 = vmax.f32 %v1282_v53, 0.0  ;;  %vm4219_vm13 = vmand %vm1211_vm15, %vm4147_vm5 }
 0x166   : > { %v1272_v60 = vmax.f32 %v1270_v36, %v1271_v37  ;;  %v1279_v25 = vmax.f32 %v1277_v30, %v1278_v17  ;;  %v1291_v42 = vmax.f32 %v1283_v59, 0.0  ;;  %v1296_v28 = vadd.f32 %v1288_v12, %v3625_v14  ;;  %vm4228_vm10 = vmand %vm1212_vm4, %vm4158_vm8 }
 0x167   : > { %v1292_v46 = vmax.f32 %v1284_v24, 0.0  ;;  %v1293_v35 = vmax.f32 %v1285_v3, 0.0  ;;  %v1297_v4 = vadd.f32 %v1289_v13, %v3625_v14  ;;  %v1298_v52 = vadd.f32 %v1290_v10, %v3625_v14 }
 0x168   : > { %v1286_v21 = vsub.f32 %v4063_v8, %v1272_v60  ;;  %v1287_v2 = vsub.f32 %v4077_v23, %v1279_v25  ;;  %v1299_v58 = vadd.f32 %v1291_v42, %v3625_v14  ;;  %v1312_v31 = vshra.s32 %v1296_v28, 31 }
 0x169   : > { %v1300_v32 = vadd.f32 %v1292_v46, %v3625_v14  ;;  %v1301_v18 = vadd.f32 %v1293_v35, %v3625_v14  ;;  %v1313_v55 = vshra.s32 %v1297_v4, 31  ;;  %v1314_v11 = vshra.s32 %v1298_v52, 31 }
 0x16a   : > { %v1294_v23 = vmax.f32 %v1286_v21, 0.0  ;;  %v1295_v44 = vmax.f32 %v1287_v2, 0.0  ;;  %v1315_v33 = vshra.s32 %v1299_v58, 31  ;;  %v1320_v27 = vand.u32 2147483647, %v1312_v31 }
 0x16b   : > { %v1316_v34 = vshra.s32 %v1300_v32, 31  ;;  %v1317_v63 = vshra.s32 %v1301_v18, 31  ;;  %v1321_v39 = vand.u32 2147483647, %v1313_v55  ;;  %v1322_v54 = vand.u32 2147483647, %v1314_v11 }
 0x16c   : > { %v1302_v20 = vadd.f32 %v1294_v23, %v3625_v14  ;;  %v1303_v47 = vadd.f32 %v1295_v44, %v3625_v14  ;;  %v1323_v36 = vand.u32 2147483647, %v1315_v33  ;;  %v1328_v19 = vxor.u32 %v1320_v27, %v1296_v28 }
 0x16d   : > { %v1324_v30 = vand.u32 2147483647, %v1316_v34  ;;  %v1325_v62 = vand.u32 2147483647, %v1317_v63  ;;  %v1329_v56 = vxor.u32 %v1321_v39, %v1297_v4  ;;  %v1330_v17 = vxor.u32 %v1322_v54, %v1298_v52 }
 0x16e   : > { %v1318_v49 = vshra.s32 %v1302_v20, 31  ;;  %v1319_v37 = vshra.s32 %v1303_v47, 31  ;;  %v1331_v53 = vxor.u32 %v1323_v36, %v1299_v58  ;;  %v1336_v57 = vand.u32 4294967288, %v1328_v19 }
 0x16f   : > { %v1332_v0 = vxor.u32 %v1324_v30, %v1300_v32  ;;  %v1333_v24 = vxor.u32 %v1325_v62, %v1301_v18  ;;  %v1337_v3 = vand.u32 4294967288, %v1329_v56  ;;  %v1338_v40 = vand.u32 4294967288, %v1330_v17 }
 0x170   : > { %v1326_v13 = vand.u32 2147483647, %v1318_v49  ;;  %v1327_v26 = vand.u32 2147483647, %v1319_v37  ;;  %v1339_v60 = vand.u32 4294967288, %v1331_v53  ;;  %v1344_v61 = vor.u32 7, %v1336_v57 }
 0x171   : > { %v1340_v10 = vand.u32 4294967288, %v1332_v0  ;;  %v1341_v42 = vand.u32 4294967288, %v1333_v24  ;;  %v1345_v50 = vor.u32 6, %v1337_v3  ;;  %v1346_v45 = vor.u32 5, %v1338_v40 }
 0x172   : > { %v1334_v35 = vxor.u32 %v1326_v13, %v1302_v20  ;;  %v1335_v28 = vxor.u32 %v1327_v26, %v1303_v47  ;;  %v1347_v4 = vor.u32 4, %v1339_v60  ;;  %vm5687_vm15 = vcmp.eq.s32.totalorder %v3266_v1, %v4013_v43 }
 0x173   : > { %vm1372_vm0 = vmand %vm5687_vm15, %vm4167_vm7  ;;  %v1348_v15 = vor.u32 3, %v1340_v10  ;;  %v1349_v21 = vor.u32 2, %v1341_v42  ;;  %vm5688_vm4 = vcmp.eq.s32.totalorder %v3266_v1, %v4026_v51  ;;  %v1375_v2 = vsel %vm4192_vm11, %v1344_v61, 2147483648 }
 0x174   : > { %vm4242_vm2 = vmand %vm5688_vm4, %vm4181_vm6  ;;  %v1376_v52 = vsel %vm4201_vm9, %v1345_v50, 2147483648  ;;  %v1342_v58 = vand.u32 4294967288, %v1334_v35  ;;  %v1343_v43 = vand.u32 4294967288, %v1335_v28  ;;  %v1377_v41 = vsel %vm4210_vm3, %v1346_v45, 2147483648 }
 0x175   : > { %v1378_v32 = vsel %vm4219_vm13, %v1347_v4, 2147483648  ;;  %vm5691_vm12 = vcmp.eq.s32.totalorder %v3266_v1, %v4024_v7  ;;  %v1379_v51 = vsel %vm4228_vm10, %v1348_v15, 2147483648  ;;  %v1380_v18 = vsel %vm1372_vm0, %v1349_v21, 2147483648 }
 0x176   : > { %vm1373_vm5 = vmand %vm5691_vm12, %vm4174_vm14  ;;  %vm5692_vm8 = vcmask 15360   ;;  %v1350_v8 = vor.u32 1, %v1342_v58  ;;  %v1382_v23 = vsel %vm4242_vm2, %v1343_v43, 2147483648 }
 0x177   : > { %v1383_v31 = vsel %vm5692_vm8, %v1375_v2, 2147483648  ;;  %vm5693_vm7 = vmmov %vm5692_vm8 }
 0x178   : > { %v1384_v55 = vsel %vm5693_vm7, %v1376_v52, 2147483648  ;;  %vm5694_vm6 = vmmov %vm5693_vm7  ;;  %v1381_v34 = vsel %vm1373_vm5, %v1350_v8, 2147483648 }
 0x179   : > { %v1386_v44 = vsel %vm5694_vm6, %v1378_v32, 2147483648  ;;  %vm5695_vm11 = vmmov %vm5694_vm6 }
 0x17a   : > { %v1385_v11 = vsel %vm5695_vm11, %v1377_v41, 2147483648  ;;  %vm5696_vm9 = vmmov %vm5694_vm6 }
 0x17b   : > { %v1387_v33 = vsel %vm5696_vm9, %v1379_v51, 2147483648  ;;  %vm5697_vm3 = vmmov %vm5694_vm6 }
 0x17c   : > { %v1390_v7 = vsel %vm5697_vm3, %v1380_v18, 2147483648  ;;  %vm5698_vm14 = vmmov %vm5697_vm3  ;;  %vm1388_vm13 = vcmp.gt.s32.totalorder %v1383_v31, %v1387_v33 }
 0x17d   : > { %v1396_v38 = vsel %vm5698_vm14, %v1382_v23, 2147483648  ;;  %vm1391_vm10 = vcmp.gt.s32.totalorder %v1384_v55, %v1390_v7  ;;  %v1389_v63 = vsel %vm1388_vm13, %v1383_v31, %v1387_v33  ;;  %vm5699_vm0 = vmmov %vm5697_vm3 }
 0x17e   : > { %vm1397_vm15 = vcmp.gt.s32.totalorder %v1386_v44, %v1396_v38  ;;  %v1392_v27 = vsel %vm1391_vm10, %v1384_v55, %v1390_v7  ;;  %v1393_v39 = vsel %vm5699_vm0, %v1381_v34, 2147483648  ;;  %vm5700_vm13 = vmmov %vm5699_vm0 }
 0x17f   : > { %v1398_v9 = vsel %vm1397_vm15, %v1386_v44, %v1396_v38  ;;  %vm1394_vm4 = vcmp.gt.s32.totalorder %v1385_v11, %v1393_v39  ;;  %vm1399_vm2 = vcmp.gt.s32.totalorder %v1389_v63, %v1392_v27  ;;  %vm5701_vm10 = vmmov %vm5699_vm0 }
 0x180   : > { %v1395_v20 = vsel %vm1394_vm4, %v1385_v11, %v1393_v39  ;;  %v1400_v47 = vsel %vm1399_vm2, %v1389_v63, %v1392_v27  ;;  %vm5702_vm4 = vmmov %vm5699_vm0 }
 0x181   : > { %vm1401_vm12 = vcmp.gt.s32.totalorder %v1395_v20, %v1398_v9  ;;  %vm5703_vm2 = vmmov %vm5699_vm0 }
 0x182   : > { %v1402_v54 = vsel %vm1401_vm12, %v1395_v20, %v1398_v9  ;;  %vm5704_vm12 = vmmov %vm5699_vm0 }
 0x183   : > { %vm1403_vm8 = vcmp.gt.s32.totalorder %v1400_v47, %v1402_v54 }
 0x184   : > { %v4271_v36 = vsel %vm1403_vm8, %v1400_v47, %v1402_v54 }
 0x185   : > { %v1406_v30 = vand.u32 7, %v4271_v36  ;;  %v1408_v62 = vand.u32 4294967288, %v4271_v36  ;;  %vm1405_vm5 = vcmp.ge.s32.totalorder %v4271_v36, 0 }
 0x187   : > { %v1407_v19 = vsub.s32 7, %v1406_v30  ;;  %v1409_v56 = vshra.s32 %v1408_v62, 31 }
 0x189   : > { %v1410_v6 = vand.u32 2147483647, %v1409_v56  ;;  %v4279_v49 = vsel %vm1405_vm5, %v1407_v19, %v3813_v29  ;;  %v4322_v56 = vld [vmem:[%s5443_s0] sm:$0xff] }
 0x18a   : > { %vm1416_vm7 = vcmp.eq.s32.totalorder %v4279_v49, 0  ;;  %vm1417_vm6 = vcmp.eq.s32.totalorder %v4279_v49, 1  ;;  %vm1418_vm11 = vcmp.eq.s32.totalorder %v4279_v49, 2  ;;  %vm1419_vm9 = vcmp.eq.s32.totalorder %v4279_v49, 3 }
 0x18b   : > { %vm1420_vm3 = vcmp.eq.s32.totalorder %v4279_v49, 4  ;;  %vm1421_vm14 = vcmp.eq.s32.totalorder %v4279_v49, 5  ;;  %v1424_v37 = vsel %vm1416_vm7, 1, %v5618_v48  ;;  %v1425_v17 = vsel %vm1417_vm6, 1, %v5618_v48 }
 0x18c   : > { %v1426_v53 = vsel %vm1418_vm11, 1, %v5618_v48  ;;  %v1427_v29 = vsel %vm1419_vm9, 1, %v5618_v48  ;;  %v1428_v59 = vsel %vm1420_vm3, 1, %v5618_v48  ;;  %v1429_v0 = vsel %vm1421_vm14, 1, %v5618_v48 }
 0x18d   : > { %v1411_v24 = vxor.u32 %v1410_v6, %v1408_v62  ;;  %v1432_v57 = vsel %vm5700_vm13, %v1424_v37, 2147483648  ;;  %v1442_v3 = vsel %vm5701_vm10, %v1425_v17, 2147483648  ;;  %vm1422_vm15 = vcmp.eq.s32.totalorder %v4279_v49, 6  ;;  %v4331_v37 = vld [vmem:[%s5443_s0 + $0x8] sm:$0xff] }
 0x18e   : > { %v1433_v12 = vrot.slane %v1432_v57, 4  ;;  %v1443_v13 = vrot.slane %v1442_v3, 4  ;;  %v1452_v26 = vsel %vm5699_vm0, %v1426_v53, 2147483648  ;;  %v1462_v60 = vsel %vm5702_vm4, %v1427_v29, 2147483648  ;;  %v4340_v53 = vld [vmem:[%s5443_s0 + $0x10] sm:$0xff] }
 0x18f   : > { %v1453_v40 = vrot.slane %v1452_v26, 4  ;;  %v1472_v25 = vsel %vm5703_vm2, %v1428_v59, 2147483648  ;;  %v1482_v10 = vsel %vm5704_vm12, %v1429_v0, 2147483648  ;;  %v1463_v42 = vrot.slane %v1462_v60, 4 }
 0x190   : > { %vm1434_vm8 = vcmp.gt.s32.totalorder %v1432_v57, %v1433_v12  ;;  %vm1444_vm7 = vcmp.gt.s32.totalorder %v1442_v3, %v1443_v13  ;;  %v1473_v61 = vrot.slane %v1472_v25, 4  ;;  %v1483_v35 = vrot.slane %v1482_v10, 4 }
 0x191   : > { %v1435_v50 = vsel %vm1434_vm8, %v1432_v57, %v1433_v12  ;;  %v1445_v46 = vsel %vm1444_vm7, %v1442_v3, %v1443_v13  ;;  %vm1454_vm6 = vcmp.gt.s32.totalorder %v1452_v26, %v1453_v40  ;;  %vm1464_vm11 = vcmp.gt.s32.totalorder %v1462_v60, %v1463_v42  ;;  %vm5705_vm7 = vmmov %vm5704_vm12  ;;  %v4366_v3 = vld [vmem:[%s5443_s0 + $0x20] sm:$0xff] }
 0x192   : > { %v1436_v28 = vrot.slane %v1435_v50, 2  ;;  %v1446_v45 = vrot.slane %v1445_v46, 2  ;;  %v1455_v4 = vsel %vm1454_vm6, %v1452_v26, %v1453_v40  ;;  %v1465_v21 = vsel %vm1464_vm11, %v1462_v60, %v1463_v42  ;;  %v4383_v40 = vld [vmem:[%s5443_s0 + $0x28] sm:$0xff]  ;;  %v4400_v42 = vld [vmem:[%s5443_s0 + $0x30] sm:$0xff] }
 0x193   : > { %v1456_v15 = vrot.slane %v1455_v4, 2  ;;  %vm1474_vm9 = vcmp.gt.s32.totalorder %v1472_v25, %v1473_v61  ;;  %vm1484_vm3 = vcmp.gt.s32.totalorder %v1482_v10, %v1483_v35  ;;  %v1466_v16 = vrot.slane %v1465_v21, 2  ;;  %5714 = vst [vmem:[#allocation4_spill] sm:$0xff] %v4383_v40 }
 0x194   : > { %vm1437_vm14 = vcmp.gt.s32.totalorder %v1435_v50, %v1436_v28  ;;  %vm1447_vm13 = vcmp.gt.s32.totalorder %v1445_v46, %v1446_v45  ;;  %v1475_v2 = vsel %vm1474_vm9, %v1472_v25, %v1473_v61  ;;  %vm1423_vm10 = vcmp.eq.s32.totalorder %v4279_v49, 7  ;;  %5719 = vst [vmem:[#allocation5_spill] sm:$0xff] %v4400_v42 }
 0x195   : > { %v1438_v52 = vsel %vm1437_vm14, %v1435_v50, %v1436_v28  ;;  %v1476_v58 = vrot.slane %v1475_v2, 2  ;;  %v1448_v43 = vsel %vm1447_vm13, %v1445_v46, %v1446_v45  ;;  %v1430_v41 = vsel %vm1422_vm15, 1, %v5618_v48  ;;  %v4409_v50 = vld [vmem:[%s5443_s0 + $0x38] sm:$0xff] }
 0x196   : > { %v1439_v32 = vrot.slane %v1438_v52, 1  ;;  %vm1457_vm0 = vcmp.gt.s32.totalorder %v1455_v4, %v1456_v15  ;;  %v1485_v51 = vsel %vm1484_vm3, %v1482_v10, %v1483_v35  ;;  %v1414_v18 = vadd.f32 %v1411_v24, %v3845_v5  ;;  %v4357_v24 = vld [vmem:[%s5443_s0 + $0x18] sm:$0xff]  ;;  %5720 = vst [vmem:[#allocation6_spill] sm:$0xff] %v4409_v50 }
 0x197   : > { %v1431_v31 = vsel %vm1423_vm10, 1, %v5618_v48  ;;  %vm1467_vm4 = vcmp.gt.s32.totalorder %v1465_v21, %v1466_v16  ;;  %v1449_v55 = vrot.slane %v1448_v43, 1  ;;  %vm1477_vm2 = vcmp.gt.s32.totalorder %v1475_v2, %v1476_v58 }
 0x198   : > { %v1458_v8 = vsel %vm1457_vm0, %v1455_v4, %v1456_v15  ;;  %v1486_v23 = vrot.slane %v1485_v51, 2  ;;  %v1492_v44 = vsel %vm5704_vm12, %v1430_v41, 2147483648  ;;  %vm1440_vm8 = vcmp.gt.s32.totalorder %v1438_v52, %v1439_v32 }
 0x199   : > { %v1468_v11 = vsel %vm1467_vm4, %v1465_v21, %v1466_v16  ;;  %v1493_v33 = vrot.slane %v1492_v44, 4  ;;  %v1502_v7 = vsel %vm5705_vm7, %v1431_v31, 2147483648  ;;  %v4311_v38 = vsel %vm1405_vm5, %v1414_v18, %v3845_v5  ;;  %vm5721_vm4 = vmmov %vm5705_vm7 }
 0x19a   : > { %v1478_v34 = vsel %vm1477_vm2, %v1475_v2, %v1476_v58  ;;  %vm1487_vm15 = vcmp.gt.s32.totalorder %v1485_v51, %v1486_v23  ;;  %v1503_v63 = vrot.slane %v1502_v7, 4  ;;  %vm4313_vm6 = vcmp.gt.s32.totalorder %v1448_v43, %v1449_v55  ;;  %vm5722_vm2 = vmmov %vm5721_vm4 }
 0x19b   : > { %v1459_v39 = vrot.slane %v1458_v8, 1  ;;  %v1488_v9 = vsel %vm1487_vm15, %v1485_v51, %v1486_v23  ;;  %vm1494_vm11 = vcmp.gt.s32.totalorder %v1492_v44, %v1493_v33  ;;  %v4317_v20 = vsel %vm1440_vm8, %v1438_v52, %v1439_v32  ;;  %vm5723_vm12 = vmmov %vm5722_vm2 }
 0x19c   : > { %v1469_v47 = vrot.slane %v1468_v11, 1  ;;  %v1495_v54 = vsel %vm1494_vm11, %v1492_v44, %v1493_v33  ;;  %vm1504_vm9 = vcmp.gt.s32.totalorder %v1502_v7, %v1503_v63  ;;  %v1479_v30 = vrot.slane %v1478_v34, 1  ;;  %vm5724_vm8 = vmmov %vm5722_vm2 }
 0x19d   : > { %v1489_v62 = vrot.slane %v1488_v9, 1  ;;  %v1496_v36 = vrot.slane %v1495_v54, 2  ;;  %v1505_v5 = vsel %vm1504_vm9, %v1502_v7, %v1503_v63  ;;  %v4326_v6 = vsub.f32 %v4322_v56, %v4311_v38  ;;  %vm5725_vm7 = vmmov %vm5722_vm2 }
 0x19e   : > { %v1506_v19 = vrot.slane %v1505_v5, 2  ;;  %v4335_v17 = vsub.f32 %v4331_v37, %v4311_v38  ;;  %v4344_v29 = vsub.f32 %v4340_v53, %v4311_v38  ;;  %v4348_v59 = vsel %vm4313_vm6, %v1448_v43, %v1449_v55  ;;  %vm5726_vm6 = vmmov %vm5722_vm2 }
 0x19f   : > { %vm4350_vm5 = vcmp.gt.s32.totalorder %v1495_v54, %v1496_v36  ;;  %v4361_v57 = vsub.f32 %v4357_v24, %v4311_v38  ;;  %v4370_v12 = vsub.f32 %v4366_v3, %v4311_v38  ;;  %vm4372_vm3 = vcmp.gt.s32.totalorder %v1458_v8, %v1459_v39 }
 0x1a0   : > { %vm4376_vm14 = vcmp.gt.s32.totalorder %v1468_v11, %v1469_v47  ;;  %vm1507_vm13 = vcmp.gt.s32.totalorder %v1505_v5, %v1506_v19  ;;  %v4387_v60 = vsub.f32 %v4383_v40, %v4311_v38  ;;  %vm4389_vm10 = vcmp.gt.s32.totalorder %v1478_v34, %v1479_v30 }
 0x1a1   : > { %vm4393_vm0 = vcmp.gt.s32.totalorder %v1488_v9, %v1489_v62  ;;  %v4404_v61 = vsub.f32 %v4400_v42, %v4311_v38  ;;  %v4413_v46 = vsub.f32 %v4409_v50, %v4311_v38  ;;  %v4417_v35 = vsel %vm4350_vm5, %v1495_v54, %v1496_v36 }
 0x1a2   : > { %v1544_v28 = vshra.s32 %v4326_v6, 31  ;;  %v1545_v45 = vshra.s32 %v4335_v17, 31  ;;  %v1546_v4 = vshra.s32 %v4344_v29, 31  ;;  %v4422_v15 = vsel %vm1507_vm13, %v1505_v5, %v1506_v19 }
 0x1a3   : > { %v1547_v21 = vshra.s32 %v4361_v57, 31  ;;  %v1548_v16 = vshra.s32 %v4370_v12, 31  ;;  %v1549_v2 = vshra.s32 %v4387_v60, 31  ;;  %v4429_v52 = vsel %vm4372_vm3, %v1458_v8, %v1459_v39 }
 0x1a4   : > { %v4433_v58 = vsel %vm4376_vm14, %v1468_v11, %v1469_v47  ;;  %v1550_v43 = vshra.s32 %v4404_v61, 31  ;;  %v1551_v41 = vshra.s32 %v4413_v46, 31  ;;  %v4439_v32 = vsel %vm4389_vm10, %v1478_v34, %v1479_v30 }
 0x1a5   : > { %v4443_v51 = vsel %vm4393_vm0, %v1488_v9, %v1489_v62  ;;  %v1552_v18 = vand.u32 2147483647, %v1544_v28  ;;  %v1553_v31 = vand.u32 2147483647, %v1545_v45  ;;  %v1499_v55 = vrot.slane %v4417_v35, 1 }
 0x1a6   : > { %v5461_v8 = vrot.slane %v4422_v15, 1  ;;  %v1554_v23 = vand.u32 2147483647, %v1546_v4  ;;  %v1555_v44 = vand.u32 2147483647, %v1547_v21 }
 0x1a7   : > { %v1556_v11 = vand.u32 2147483647, %v1548_v16  ;;  %v1557_v33 = vand.u32 2147483647, %v1549_v2  ;;  %v1558_v7 = vand.u32 2147483647, %v1550_v43  ;;  %v1560_v63 = vxor.u32 %v1552_v18, %v4326_v6 }
 0x1a8   : > { %v1559_v27 = vand.u32 2147483647, %v1551_v41  ;;  %v1561_v34 = vxor.u32 %v1553_v31, %v4335_v17  ;;  %v1562_v39 = vxor.u32 %v1554_v23, %v4344_v29  ;;  %v1563_v9 = vxor.u32 %v1555_v44, %v4361_v57 }
 0x1a9   : > { %v1564_v47 = vxor.u32 %v1556_v11, %v4370_v12  ;;  %v1565_v54 = vxor.u32 %v1557_v33, %v4387_v60  ;;  %v1566_v30 = vxor.u32 %v1558_v7, %v4404_v61  ;;  %v1568_v62 = vand.u32 4294967288, %v1560_v63 }
 0x1aa   : > { %v1567_v36 = vxor.u32 %v1559_v27, %v4413_v46  ;;  %v1569_v5 = vand.u32 4294967288, %v1561_v34  ;;  %v1570_v19 = vand.u32 4294967288, %v1562_v39  ;;  %v1571_v0 = vand.u32 4294967288, %v1563_v9 }
 0x1ab   : > { %v1572_v13 = vand.u32 4294967288, %v1564_v47  ;;  %v1573_v26 = vand.u32 4294967288, %v1565_v54  ;;  %v4455_v25 = vand.u32 4294967288, %v1566_v30  ;;  %v1576_v10 = vor.u32 %v1568_v62, %v5639_v22 }
 0x1ac   : > { %v4458_v28 = vand.u32 4294967288, %v1567_v36  ;;  %v1577_v45 = vor.u32 %v1569_v5, %v5639_v22  ;;  %v1578_v4 = vor.u32 %v1570_v19, %v5639_v22  ;;  %v1579_v21 = vor.u32 %v1571_v0, %v5639_v22 }
 0x1ad   : > { %v1580_v16 = vor.u32 %v1572_v13, %v5639_v22  ;;  %v1581_v2 = vor.u32 %v1573_v26, %v5639_v22  ;;  %v1582_v43 = vor.u32 %v4455_v25, %v5639_v22  ;;  %v1584_v41 = vsel %vm5721_vm4, %v1576_v10, 2147483648 }
 0x1ae   : > { %v1583_v18 = vor.u32 %v4458_v28, %v5639_v22  ;;  %v1585_v31 = vrot.slane %v1584_v41, 4  ;;  %v1594_v23 = vsel %vm5722_vm2, %v1577_v45, 2147483648  ;;  %v1604_v44 = vsel %vm5723_vm12, %v1578_v4, 2147483648 }
 0x1af   : > { %v1595_v11 = vrot.slane %v1594_v23, 4  ;;  %v1605_v33 = vrot.slane %v1604_v44, 4  ;;  %v1614_v7 = vsel %vm5724_vm8, %v1579_v21, 2147483648  ;;  %v1624_v63 = vsel %vm5725_vm7, %v1580_v16, 2147483648 }
 0x1b0   : > { %vm1586_vm15 = vcmp.gt.s32.totalorder %v1584_v41, %v1585_v31  ;;  %v1615_v27 = vrot.slane %v1614_v7, 4  ;;  %v1625_v34 = vrot.slane %v1624_v63, 4  ;;  %v1634_v39 = vsel %vm5726_vm6, %v1581_v2, 2147483648 }
 0x1b1   : > { %v1587_v9 = vsel %vm1586_vm15, %v1584_v41, %v1585_v31  ;;  %vm1596_vm11 = vcmp.gt.s32.totalorder %v1594_v23, %v1595_v11  ;;  %vm1606_vm9 = vcmp.gt.s32.totalorder %v1604_v44, %v1605_v33  ;;  %v1635_v47 = vrot.slane %v1634_v39, 4 }
 0x1b2   : > { %v1588_v54 = vrot.slane %v1587_v9, 2  ;;  %v1597_v30 = vsel %vm1596_vm11, %v1594_v23, %v1595_v11  ;;  %v1607_v62 = vsel %vm1606_vm9, %v1604_v44, %v1605_v33  ;;  %vm1616_vm5 = vcmp.gt.s32.totalorder %v1614_v7, %v1615_v27 }
 0x1b3   : > { %v1598_v36 = vrot.slane %v1597_v30, 2  ;;  %v1608_v5 = vrot.slane %v1607_v62, 2  ;;  %v1617_v19 = vsel %vm1616_vm5, %v1614_v7, %v1615_v27  ;;  %vm1626_vm3 = vcmp.gt.s32.totalorder %v1624_v63, %v1625_v34 }
 0x1b4   : > { %vm1589_vm14 = vcmp.gt.s32.totalorder %v1587_v9, %v1588_v54  ;;  %v1618_v0 = vrot.slane %v1617_v19, 2  ;;  %v1627_v13 = vsel %vm1626_vm3, %v1624_v63, %v1625_v34  ;;  %vm4475_vm13 = vcmp.gt.s32.totalorder %v1634_v39, %v1635_v47 }
 0x1b5   : > { %v1590_v25 = vsel %vm1589_vm14, %v1587_v9, %v1588_v54  ;;  %vm1599_vm10 = vcmp.gt.s32.totalorder %v1597_v30, %v1598_v36  ;;  %vm1609_vm0 = vcmp.gt.s32.totalorder %v1607_v62, %v1608_v5  ;;  %v1628_v10 = vrot.slane %v1627_v13, 2 }
 0x1b6   : > { %v1591_v28 = vrot.slane %v1590_v25, 1  ;;  %v1600_v45 = vsel %vm1599_vm10, %v1597_v30, %v1598_v36  ;;  %v1610_v4 = vsel %vm1609_vm0, %v1607_v62, %v1608_v5  ;;  %vm1619_vm4 = vcmp.gt.s32.totalorder %v1617_v19, %v1618_v0 }
 0x1b7   : > { %v1601_v21 = vrot.slane %v1600_v45, 1  ;;  %v1611_v16 = vrot.slane %v1610_v4, 1  ;;  %v1620_v2 = vsel %vm1619_vm4, %v1617_v19, %v1618_v0  ;;  %vm1629_vm2 = vcmp.gt.s32.totalorder %v1627_v13, %v1628_v10 }
 0x1b8   : > { %vm1592_vm12 = vcmp.gt.s32.totalorder %v1590_v25, %v1591_v28  ;;  %v1621_v41 = vrot.slane %v1620_v2, 1  ;;  %v1630_v31 = vsel %vm1629_vm2, %v1627_v13, %v1628_v10  ;;  %v1637_v23 = vsel %vm4475_vm13, %v1634_v39, %v1635_v47 }
 0x1b9   : > { %v4481_v44 = vsel %vm1592_vm12, %v1590_v25, %v1591_v28  ;;  %vm1602_vm8 = vcmp.gt.s32.totalorder %v1600_v45, %v1601_v21  ;;  %vm1612_vm7 = vcmp.gt.s32.totalorder %v1610_v4, %v1611_v16  ;;  %v1631_v11 = vrot.slane %v1630_v31, 1 }
 0x1ba   : > { %v4483_v33 = vsel %vm1602_vm8, %v1600_v45, %v1601_v21  ;;  %v4485_v7 = vsel %vm1612_vm7, %v1610_v4, %v1611_v16  ;;  %vm1622_vm15 = vcmp.gt.s32.totalorder %v1620_v2, %v1621_v41  ;;  %v1638_v63 = vrot.slane %v1637_v23, 2 }
 0x1bb   : > { %v4487_v27 = vsel %vm1622_vm15, %v1620_v2, %v1621_v41  ;;  %vm1632_vm6 = vcmp.gt.s32.totalorder %v1630_v31, %v1631_v11  ;;  %vm5729_vm11 = vcmask 15360   ;;  %v1664_v62 = vand.u32 7, %v4481_v44 }
 0x1bc   : > { %v1644_v34 = vsel %vm5729_vm11, %v1582_v43, 2147483648  ;;  %vm5730_vm9 = vmmov %vm5729_vm11  ;;  %v4491_v54 = vsel %vm1632_vm6, %v1630_v31, %v1631_v11  ;;  %vm1639_vm5 = vcmp.gt.s32.totalorder %v1637_v23, %v1638_v63  ;;  %v1665_v36 = vand.u32 7, %v4483_v33 }
 0x1bd   : > { %v1654_v9 = vsel %vm5730_vm9, %v1583_v18, 2147483648  ;;  %v1645_v39 = vrot.slane %v1644_v34, 4  ;;  %v1640_v30 = vsel %vm1639_vm5, %v1637_v23, %v1638_v63  ;;  %v1666_v5 = vand.u32 7, %v4485_v7 }
 0x1be   : > { %v1655_v47 = vrot.slane %v1654_v9, 4  ;;  %vm4499_vm3 = vcmp.gt.s32.totalorder %v4417_v35, %v1499_v55  ;;  %v1641_v43 = vrot.slane %v1640_v30, 1  ;;  %v1667_v18 = vand.u32 7, %v4487_v27 }
 0x1bf   : > { %vm1646_vm14 = vcmp.gt.s32.totalorder %v1644_v34, %v1645_v39  ;;  %v1668_v26 = vand.u32 7, %v4491_v54  ;;  %v4505_v25 = vsub.s32 7, %v1664_v62  ;;  %vm4510_vm10 = vcmp.gt.s32.totalorder %v4422_v15, %v5461_v8 }
 0x1c0   : > { %vm1656_vm13 = vcmp.gt.s32.totalorder %v1654_v9, %v1655_v47  ;;  %v1647_v0 = vsel %vm1646_vm14, %v1644_v34, %v1645_v39  ;;  %vm1642_vm0 = vcmp.gt.s32.totalorder %v1640_v30, %v1641_v43  ;;  %v4514_v4 = vsub.s32 7, %v1665_v36 }
 0x1c1   : > { %v1657_v13 = vsel %vm1656_vm13, %v1654_v9, %v1655_v47  ;;  %v1648_v28 = vrot.slane %v1647_v0, 2  ;;  %v1643_v21 = vsel %vm1642_vm0, %v1640_v30, %v1641_v43  ;;  %v4516_v16 = vsub.s32 7, %v1666_v5 }
 0x1c2   : > { %v1658_v45 = vrot.slane %v1657_v13, 2  ;;  %v4518_v2 = vsub.s32 7, %v1667_v18  ;;  %v4520_v41 = vsub.s32 7, %v1668_v26  ;;  %v1669_v31 = vand.u32 7, %v1643_v21 }
 0x1c3   : > { %vm1649_vm4 = vcmp.gt.s32.totalorder %v1647_v0, %v1648_v28  ;;  %v1680_v23 = vand.u32 4294967288, %v4481_v44  ;;  %v1681_v34 = vand.u32 4294967288, %v4483_v33  ;;  %v1682_v9 = vand.u32 4294967288, %v4485_v7 }
 0x1c4   : > { %vm1659_vm2 = vcmp.gt.s32.totalorder %v1657_v13, %v1658_v45  ;;  %v1650_v11 = vsel %vm1649_vm4, %v1647_v0, %v1648_v28  ;;  %v4525_v30 = vsub.s32 7, %v1669_v31  ;;  %v1683_v62 = vand.u32 4294967288, %v4487_v27 }
 0x1c5   : > { %v1660_v63 = vsel %vm1659_vm2, %v1657_v13, %v1658_v45  ;;  %v1651_v39 = vrot.slane %v1650_v11, 1  ;;  %v1684_v36 = vand.u32 4294967288, %v4491_v54  ;;  %v1685_v5 = vand.u32 4294967288, %v1643_v21 }
 0x1c6   : > { %v1661_v47 = vrot.slane %v1660_v63, 1  ;;  %v1688_v43 = vshra.s32 %v1680_v23, 31  ;;  %v1689_v18 = vshra.s32 %v1681_v34, 31  ;;  %v1690_v44 = vshra.s32 %v1682_v9, 31 }
 0x1c7   : > { %vm1652_vm12 = vcmp.gt.s32.totalorder %v1650_v11, %v1651_v39  ;;  %v1691_v0 = vshra.s32 %v1683_v62, 31  ;;  %v1692_v33 = vshra.s32 %v1684_v36, 31  ;;  %v1693_v28 = vshra.s32 %v1685_v5, 31 }
 0x1c8   : > { %vm1662_vm8 = vcmp.gt.s32.totalorder %v1660_v63, %v1661_v47  ;;  %v1653_v13 = vsel %vm1652_vm12, %v1650_v11, %v1651_v39  ;;  %v4534_v27 = vsel %vm4499_vm3, %v4417_v35, %v1499_v55  ;;  %v1696_v54 = vand.u32 2147483647, %v1688_v43 }
 0x1c9   : > { %v1663_v26 = vsel %vm1662_vm8, %v1660_v63, %v1661_v47  ;;  %v1670_v7 = vand.u32 7, %v1653_v13  ;;  %v1686_v8 = vand.u32 4294967288, %v1653_v13  ;;  %v1697_v21 = vand.u32 2147483647, %v1689_v18 }
 0x1ca   : > { %v1671_v45 = vand.u32 7, %v1663_v26  ;;  %v1687_v31 = vand.u32 4294967288, %v1663_v26  ;;  %v1698_v22 = vand.u32 2147483647, %v1690_v44  ;;  %v5735_v47 = vrot.slane %v4422_v15, 1 }
 0x1cb   : > { %v4536_v50 = vsub.s32 7, %v1670_v7  ;;  %v1694_v63 = vshra.s32 %v1686_v8, 31  ;;  %v1699_v26 = vand.u32 2147483647, %v1691_v0  ;;  %v1700_v19 = vand.u32 2147483647, %v1692_v33 }
 0x1cc   : > { %v4538_v11 = vsub.s32 7, %v1671_v45  ;;  %v1695_v39 = vshra.s32 %v1687_v31, 31  ;;  %v4545_v13 = vsel %vm4510_vm10, %v4422_v15, %v5735_v47  ;;  %v1701_v35 = vand.u32 2147483647, %v1693_v28 }
 0x1cd   : > { %v1702_v55 = vand.u32 2147483647, %v1694_v63  ;;  %v4547_v18 = vxor.u32 %v1696_v54, %v1680_v23  ;;  %vm1720_vm7 = vcmp.eq.s32.totalorder %v3266_v1, %v4505_v25  ;;  %v4551_v44 = vxor.u32 %v1697_v21, %v1681_v34 }
 0x1ce   : > { %v1703_v43 = vand.u32 2147483647, %v1695_v39  ;;  %v4553_v7 = vxor.u32 %v1698_v22, %v1682_v9  ;;  %v4555_v45 = vxor.u32 %v1699_v26, %v1683_v62  ;;  %vm1721_vm15 = vcmp.eq.s32.totalorder %v3266_v1, %v4514_v4 }
 0x1cf   : > { %v4559_v15 = vxor.u32 %v1700_v19, %v1684_v36  ;;  %v4561_v10 = vxor.u32 %v1701_v35, %v1685_v5  ;;  %vm1722_vm6 = vcmp.eq.s32.totalorder %v3266_v1, %v4516_v16  ;;  %vm1723_vm11 = vcmp.eq.s32.totalorder %v3266_v1, %v4518_v2 }
 0x1d0   : > { %vm1724_vm9 = vcmp.eq.s32.totalorder %v3266_v1, %v4520_v41  ;;  %vm5468_vm5 = vcmp.eq.s32.totalorder %v3266_v1, %v4525_v30  ;;  %vm5464_vm3 = vcmp.eq.s32.totalorder %v3266_v1, %v4536_v50  ;;  %vm5467_vm14 = vcmp.eq.s32.totalorder %v3266_v1, %v4538_v11 }
 0x1d1   : > { %v4575_v22 = vxor.u32 %v1702_v55, %v1686_v8  ;;  %v1728_v23 = vsel %vm1720_vm7, -1e+30, %v4326_v6  ;;  %v1729_v34 = vsel %vm1721_vm15, -1e+30, %v4335_v17  ;;  %v1730_v9 = vsel %vm1722_vm6, -1e+30, %v4344_v29 }
 0x1d2   : > { %v4589_v62 = vxor.u32 %v1703_v43, %v1687_v31  ;;  %v1731_v8 = vsel %vm1723_vm11, -1e+30, %v4361_v57  ;;  %v1732_v6 = vsel %vm1724_vm9, -1e+30, %v4370_v12  ;;  %v1733_v17 = vsel %vm5468_vm5, -1e+30, %v4387_v60 }
 0x1d3   : > { %v1734_v29 = vsel %vm5464_vm3, -1e+30, %v4404_v61  ;;  %v1735_v57 = vsel %vm5467_vm14, -1e+30, %v4413_v46  ;;  %vm5736_vm13 = vcmask 15360   ;;  %vm1512_vm8 = vcmp.gt.s32.totalorder %v4317_v20, 0 }
 0x1d4   : > { %v1736_v36 = vsel %vm5736_vm13, %v1728_v23, -inf  ;;  %vm5737_vm10 = vmmov %vm5736_vm13  ;;  %vm1519_vm3 = vcmp.gt.s32.totalorder %v4545_v13, 0 }
 0x1d5   : > { %v1743_v5 = vsel %vm5737_vm10, %v1729_v34, -inf  ;;  %v1737_v12 = vrot.slane %v1736_v36, 4  ;;  %vm5738_vm0 = vmmov %vm5737_vm10 }
 0x1d6   : > { %v1744_v0 = vrot.slane %v1743_v5, 4  ;;  %v1750_v33 = vsel %vm5738_vm0, %v1730_v9, -inf  ;;  %vm5739_vm4 = vmmov %vm5738_vm0 }
 0x1d7   : > { %v1757_v60 = vsel %vm5739_vm4, %v1731_v8, -inf  ;;  %v1751_v28 = vrot.slane %v1750_v33, 4  ;;  %vm5740_vm2 = vmmov %vm5738_vm0  ;;  %v1738_v21 = vmax.f32 %v1736_v36, %v1737_v12  ;;  %vm1514_vm4 = vcmp.gt.s32.totalorder %v4429_v52, 0 }
 0x1d8   : > { %v1758_v31 = vrot.slane %v1757_v60, 4  ;;  %v1764_v54 = vsel %vm5740_vm2, %v1732_v6, -inf  ;;  %vm5741_vm12 = vmmov %vm5738_vm0  ;;  %v1745_v63 = vmax.f32 %v1743_v5, %v1744_v0  ;;  %vm1515_vm2 = vcmp.gt.s32.totalorder %v4433_v58, 0 }
 0x1d9   : > { %v1771_v61 = vsel %vm5741_vm12, %v1733_v17, -inf  ;;  %v1765_v39 = vrot.slane %v1764_v54, 4  ;;  %v1752_v47 = vmax.f32 %v1750_v33, %v1751_v28  ;;  %vm5742_vm13 = vmmov %vm5738_vm0  ;;  %v1739_v55 = vrot.slane %v1738_v21, 2 }
 0x1da   : > { %v1772_v46 = vrot.slane %v1771_v61, 4  ;;  %v1759_v26 = vmax.f32 %v1757_v60, %v1758_v31  ;;  %v1778_v19 = vsel %vm5742_vm13, %v1734_v29, -inf  ;;  %vm5743_vm10 = vmmov %vm5738_vm0  ;;  %vm1513_vm0 = vcmp.gt.s32.totalorder %v4348_v59, 0 }
 0x1db   : > { %v1785_v35 = vsel %vm5743_vm10, %v1735_v57, -inf  ;;  %v1746_v43 = vrot.slane %v1745_v63, 2  ;;  %v1766_v23 = vmax.f32 %v1764_v54, %v1765_v39  ;;  %v1753_v9 = vrot.slane %v1752_v47, 2  ;;  %vm4634_vm14 = vmxor %vm1512_vm8, %vm2996_vm1 }
 0x1dc   : > { %v1773_v34 = vmax.f32 %v1771_v61, %v1772_v46  ;;  %v1760_v8 = vrot.slane %v1759_v26, 2  ;;  %v1779_v6 = vrot.slane %v1778_v19, 4  ;;  %v1786_v17 = vrot.slane %v1785_v35, 4  ;;  %vm4643_vm5 = vmxor %vm1513_vm0, %vm2996_vm1 }
 0x1dd   : > { %v1740_v36 = vmax.f32 %v1738_v21, %v1739_v55  ;;  %v1747_v5 = vmax.f32 %v1745_v63, %v1746_v43  ;;  %v1767_v12 = vrot.slane %v1766_v23, 2  ;;  %vm1516_vm12 = vcmp.gt.s32.totalorder %v4439_v32, 0  ;;  %vm4650_vm8 = vmxor %vm1514_vm4, %vm2996_vm1 }
 0x1de   : > { %v1774_v29 = vrot.slane %v1773_v34, 2  ;;  %v1754_v57 = vmax.f32 %v1752_v47, %v1753_v9  ;;  %v1761_v0 = vmax.f32 %v1759_v26, %v1760_v8  ;;  %v1780_v33 = vmax.f32 %v1778_v19, %v1779_v6  ;;  %vm4659_vm0 = vmxor %vm1515_vm2, %vm2996_vm1 }
 0x1df   : > { %v1787_v60 = vmax.f32 %v1785_v35, %v1786_v17  ;;  %vm1517_vm13 = vcmp.gt.s32.totalorder %v4443_v51, 0  ;;  %v1741_v28 = vrot.slane %v1740_v36, 1  ;;  %v1748_v31 = vrot.slane %v1747_v5, 1  ;;  %vm4670_vm4 = vmxor %vm1516_vm12, %vm2996_vm1 }
 0x1e0   : > { %v1768_v54 = vmax.f32 %v1766_v23, %v1767_v12  ;;  %v1775_v61 = vmax.f32 %v1773_v34, %v1774_v29  ;;  %vm1518_vm10 = vcmp.gt.s32.totalorder %v4534_v27, 0  ;;  %v1755_v39 = vrot.slane %v1754_v57, 1  ;;  %vm4679_vm2 = vmxor %vm1517_vm13, %vm2996_vm1 }
 0x1e1   : > { %v1762_v46 = vrot.slane %v1761_v0, 1  ;;  %v1781_v21 = vrot.slane %v1780_v33, 2  ;;  %v1788_v63 = vrot.slane %v1787_v60, 2  ;;  %v1742_v55 = vmax.f32 %v1740_v36, %v1741_v28  ;;  %vm4686_vm12 = vmxor %vm1518_vm10, %vm2996_vm1 }
 0x1e2   : > { %v1749_v43 = vmax.f32 %v1747_v5, %v1748_v31  ;;  %v1769_v47 = vrot.slane %v1768_v54, 1  ;;  %v1776_v26 = vrot.slane %v1775_v61, 1  ;;  %v1756_v19 = vmax.f32 %v1754_v57, %v1755_v39  ;;  %vm4693_vm13 = vmxor %vm1519_vm3, %vm2996_vm1 }
 0x1e3   : > { %v1763_v35 = vmax.f32 %v1761_v0, %v1762_v46  ;;  %v1782_v9 = vmax.f32 %v1780_v33, %v1781_v21  ;;  %v1789_v8 = vmax.f32 %v1787_v60, %v1788_v63  ;;  %v1792_v23 = vsub.f32 %v4547_v18, %v1742_v55  ;;  %vm4704_vm10 = vmand %vm1720_vm7, %vm4634_vm14 }
 0x1e4   : > { %v1770_v6 = vmax.f32 %v1768_v54, %v1769_v47  ;;  %v1777_v17 = vmax.f32 %v1775_v61, %v1776_v26  ;;  %v1793_v34 = vsub.f32 %v4551_v44, %v1749_v43  ;;  %v1794_v42 = vsub.f32 %v4553_v7, %v1756_v19  ;;  %vm4713_vm3 = vmand %vm1721_vm15, %vm4643_vm5 }
 0x1e5   : > { %v1783_v12 = vrot.slane %v1782_v9, 1  ;;  %v1790_v29 = vrot.slane %v1789_v8, 1  ;;  %v1795_v40 = vsub.f32 %v4555_v45, %v1763_v35  ;;  %v1800_v18 = vmax.f32 %v1792_v23, 0.0  ;;  %vm4722_vm7 = vmand %vm1722_vm6, %vm4650_vm8 }
 0x1e6   : > { %v1796_v5 = vsub.f32 %v4559_v15, %v1770_v6  ;;  %v1797_v57 = vsub.f32 %v4561_v10, %v1777_v17  ;;  %v1801_v0 = vmax.f32 %v1793_v34, 0.0  ;;  %v1802_v20 = vmax.f32 %v1794_v42, 0.0  ;;  %vm4731_vm15 = vmand %vm1723_vm11, %vm4659_vm0 }
 0x1e7   : > { %v1784_v7 = vmax.f32 %v1782_v9, %v1783_v12  ;;  %v1791_v45 = vmax.f32 %v1789_v8, %v1790_v29  ;;  %v1803_v33 = vmax.f32 %v1795_v40, 0.0  ;;  %v1808_v28 = vadd.f32 %v1800_v18, %v3625_v14  ;;  %vm4740_vm6 = vmand %vm1724_vm9, %vm4670_vm4 }
 0x1e8   : > { %v1804_v10 = vmax.f32 %v1796_v5, 0.0  ;;  %v1805_v60 = vmax.f32 %v1797_v57, 0.0  ;;  %v1809_v59 = vadd.f32 %v1801_v0, %v3625_v14  ;;  %v1810_v52 = vadd.f32 %v1802_v20, %v3625_v14 }
 0x1e9   : > { %v1798_v40 = vsub.f32 %v4575_v22, %v1784_v7  ;;  %v1799_v42 = vsub.f32 %v4589_v62, %v1791_v45  ;;  %v1811_v54 = vadd.f32 %v1803_v33, %v3625_v14  ;;  %v1824_v46 = vshra.s32 %v1808_v28, 31 }
 0x1ea   : > { %v1812_v58 = vadd.f32 %v1804_v10, %v3625_v14  ;;  %v1813_v39 = vadd.f32 %v1805_v60, %v3625_v14  ;;  %v1825_v21 = vshra.s32 %v1809_v59, 31  ;;  %v1826_v32 = vshra.s32 %v1810_v52, 31 }
 0x1eb   : > { %v1806_v62 = vmax.f32 %v1798_v40, 0.0  ;;  %v1807_v63 = vmax.f32 %v1799_v42, 0.0  ;;  %v1827_v55 = vshra.s32 %v1811_v54, 31  ;;  %v1832_v19 = vand.u32 2147483647, %v1824_v46 }
 0x1ec   : > { %v1828_v47 = vshra.s32 %v1812_v58, 31  ;;  %v1829_v26 = vshra.s32 %v1813_v39, 31  ;;  %v1833_v35 = vand.u32 2147483647, %v1825_v21  ;;  %v1834_v27 = vand.u32 2147483647, %v1826_v32 }
 0x1ed   : > { %v1814_v9 = vadd.f32 %v1806_v62, %v3625_v14  ;;  %v1815_v8 = vadd.f32 %v1807_v63, %v3625_v14  ;;  %v1835_v6 = vand.u32 2147483647, %v1827_v55  ;;  %v1840_v34 = vxor.u32 %v1832_v19, %v1808_v28 }
 0x1ee   : > { %v1836_v17 = vand.u32 2147483647, %v1828_v47  ;;  %v1837_v23 = vand.u32 2147483647, %v1829_v26  ;;  %v1841_v12 = vxor.u32 %v1833_v35, %v1809_v59  ;;  %v1842_v57 = vxor.u32 %v1834_v27, %v1810_v52 }
 0x1ef   : > { %v1830_v29 = vshra.s32 %v1814_v9, 31  ;;  %v1831_v5 = vshra.s32 %v1815_v8, 31  ;;  %v1843_v18 = vxor.u32 %v1835_v6, %v1811_v54  ;;  %v1848_v25 = vand.u32 4294967288, %v1840_v34 }
 0x1f0   : > { %v1844_v36 = vxor.u32 %v1836_v17, %v1812_v58  ;;  %v1845_v7 = vxor.u32 %v1837_v23, %v1813_v39  ;;  %v1849_v45 = vand.u32 4294967288, %v1841_v12  ;;  %v1850_v4 = vand.u32 4294967288, %v1842_v57 }
 0x1f1   : > { %v1838_v44 = vand.u32 2147483647, %v1830_v29  ;;  %v1839_v33 = vand.u32 2147483647, %v1831_v5  ;;  %v1851_v10 = vand.u32 4294967288, %v1843_v18  ;;  %v1856_v16 = vor.u32 7, %v1848_v25 }
 0x1f2   : > { %v1852_v15 = vand.u32 4294967288, %v1844_v36  ;;  %v1853_v28 = vand.u32 4294967288, %v1845_v7  ;;  %v1857_v59 = vor.u32 6, %v1849_v45  ;;  %v1858_v2 = vor.u32 5, %v1850_v4 }
 0x1f3   : > { %v1846_v31 = vxor.u32 %v1838_v44, %v1814_v9  ;;  %v1847_v42 = vxor.u32 %v1839_v33, %v1815_v8  ;;  %v1859_v52 = vor.u32 4, %v1851_v10  ;;  %vm5770_vm11 = vcmp.eq.s32.totalorder %v3266_v1, %v4525_v30 }
 0x1f4   : > { %vm1884_vm5 = vmand %vm5770_vm11, %vm4679_vm2  ;;  %v1860_v54 = vor.u32 3, %v1852_v15  ;;  %v1861_v58 = vor.u32 2, %v1853_v28  ;;  %vm5771_vm9 = vcmp.eq.s32.totalorder %v3266_v1, %v4538_v11  ;;  %v1887_v61 = vsel %vm4704_vm10, %v1856_v16, 2147483648 }
 0x1f5   : > { %vm4754_vm14 = vmand %vm5771_vm9, %vm4693_vm13  ;;  %v1888_v39 = vsel %vm4713_vm3, %v1857_v59, 2147483648  ;;  %v1854_v46 = vand.u32 4294967288, %v1846_v31  ;;  %v1855_v30 = vand.u32 4294967288, %v1847_v42  ;;  %v1889_v21 = vsel %vm4722_vm7, %v1858_v2, 2147483648 }
 0x1f6   : > { %v1890_v22 = vsel %vm4731_vm15, %v1859_v52, 2147483648  ;;  %vm5774_vm8 = vcmp.eq.s32.totalorder %v3266_v1, %v4536_v50  ;;  %v1891_v11 = vsel %vm4740_vm6, %v1860_v54, 2147483648  ;;  %v1892_v62 = vsel %vm1884_vm5, %v1861_v58, 2147483648 }
 0x1f7   : > { %vm1885_vm0 = vmand %vm5774_vm8, %vm4686_vm12  ;;  %vm5775_vm4 = vcmask 15360   ;;  %v1862_v55 = vor.u32 1, %v1854_v46  ;;  %v1894_v47 = vsel %vm4754_vm14, %v1855_v30, 2147483648 }
 0x1f8   : > { %v1895_v63 = vsel %vm5775_vm4, %v1887_v61, 2147483648  ;;  %vm5776_vm2 = vmmov %vm5775_vm4 }
 0x1f9   : > { %v1896_v32 = vsel %vm5776_vm2, %v1888_v39, 2147483648  ;;  %vm5777_vm13 = vmmov %vm5776_vm2  ;;  %v1893_v51 = vsel %vm1885_vm0, %v1862_v55, 2147483648 }
 0x1fa   : > { %v1898_v26 = vsel %vm5777_vm13, %v1890_v22, 2147483648  ;;  %vm5778_vm10 = vmmov %vm5776_vm2 }
 0x1fb   : > { %v1897_v43 = vsel %vm5778_vm10, %v1889_v21, 2147483648  ;;  %vm5779_vm3 = vmmov %vm5776_vm2 }
 0x1fc   : > { %v1899_v19 = vsel %vm5779_vm3, %v1891_v11, 2147483648  ;;  %vm5780_vm7 = vmmov %vm5776_vm2 }
 0x1fd   : > { %v1902_v50 = vsel %vm5780_vm7, %v1892_v62, 2147483648  ;;  %vm5781_vm12 = vmmov %vm5776_vm2  ;;  %vm1900_vm15 = vcmp.gt.s32.totalorder %v1895_v63, %v1899_v19 }
 0x1fe   : > { %v1908_v35 = vsel %vm5781_vm12, %v1894_v47, 2147483648  ;;  %vm1903_vm6 = vcmp.gt.s32.totalorder %v1896_v32, %v1902_v50  ;;  %v1901_v9 = vsel %vm1900_vm15, %v1895_v63, %v1899_v19  ;;  %vm5782_vm5 = vmmov %vm5776_vm2 }
 0x1ff   : > { %vm1909_vm11 = vcmp.gt.s32.totalorder %v1898_v26, %v1908_v35  ;;  %v1904_v8 = vsel %vm1903_vm6, %v1896_v32, %v1902_v50  ;;  %v1905_v27 = vsel %vm5782_vm5, %v1893_v51, 2147483648  ;;  %vm5783_vm15 = vmmov %vm5782_vm5 }
 0x200   : > { %v1910_v6 = vsel %vm1909_vm11, %v1898_v26, %v1908_v35  ;;  %vm1906_vm9 = vcmp.gt.s32.totalorder %v1897_v43, %v1905_v27  ;;  %vm1911_vm14 = vcmp.gt.s32.totalorder %v1901_v9, %v1904_v8  ;;  %vm5784_vm6 = vmmov %vm5782_vm5 }
 0x201   : > { %v1907_v17 = vsel %vm1906_vm9, %v1897_v43, %v1905_v27  ;;  %v1912_v23 = vsel %vm1911_vm14, %v1901_v9, %v1904_v8  ;;  %vm5785_vm9 = vmmov %vm5782_vm5 }
 0x202   : > { %vm1913_vm8 = vcmp.gt.s32.totalorder %v1907_v17, %v1910_v6  ;;  %vm5786_vm14 = vmmov %vm5782_vm5 }
 0x203   : > { %v1914_v34 = vsel %vm1913_vm8, %v1907_v17, %v1910_v6  ;;  %vm5787_vm8 = vmmov %vm5782_vm5 }
 0x204   : > { %vm1915_vm4 = vcmp.gt.s32.totalorder %v1912_v23, %v1914_v34 }
 0x205   : > { %v4783_v12 = vsel %vm1915_vm4, %v1912_v23, %v1914_v34 }
 0x206   : > { %v1918_v13 = vand.u32 7, %v4783_v12  ;;  %v1920_v29 = vand.u32 4294967288, %v4783_v12  ;;  %vm1917_vm0 = vcmp.ge.s32.totalorder %v4783_v12, 0 }
 0x208   : > { %v1919_v5 = vsub.s32 7, %v1918_v13  ;;  %v1921_v57 = vshra.s32 %v1920_v29, 31 }
 0x20a   : > { %v1922_v18 = vand.u32 2147483647, %v1921_v57  ;;  %v4791_v0 = vsel %vm1917_vm0, %v1919_v5, %v4279_v49 }
 0x20b   : > { %vm1928_vm2 = vcmp.eq.s32.totalorder %v4791_v0, 0  ;;  %vm1929_vm13 = vcmp.eq.s32.totalorder %v4791_v0, 1  ;;  %vm1930_vm10 = vcmp.eq.s32.totalorder %v4791_v0, 2  ;;  %vm1931_vm3 = vcmp.eq.s32.totalorder %v4791_v0, 3 }
 0x20c   : > { %vm1932_vm7 = vcmp.eq.s32.totalorder %v4791_v0, 4  ;;  %vm1933_vm12 = vcmp.eq.s32.totalorder %v4791_v0, 5  ;;  %v1936_v36 = vsel %vm1928_vm2, 1, %v5618_v48  ;;  %v1937_v7 = vsel %vm1929_vm13, 1, %v5618_v48 }
 0x20d   : > { %v1938_v25 = vsel %vm1930_vm10, 1, %v5618_v48  ;;  %v1939_v49 = vsel %vm1931_vm3, 1, %v5618_v48  ;;  %v1940_v45 = vsel %vm1932_vm7, 1, %v5618_v48  ;;  %v1941_v20 = vsel %vm1933_vm12, 1, %v5618_v48 }
 0x20e   : > { %v1923_v44 = vxor.u32 %v1922_v18, %v1920_v29  ;;  %v1944_v33 = vsel %vm5783_vm15, %v1936_v36, 2147483648  ;;  %v1954_v4 = vsel %vm5784_vm6, %v1937_v7, 2147483648  ;;  %vm1934_vm11 = vcmp.eq.s32.totalorder %v4791_v0, 6 }
 0x20f   : > { %v1945_v10 = vrot.slane %v1944_v33, 4  ;;  %v1955_v60 = vrot.slane %v1954_v4, 4  ;;  %v1964_v15 = vsel %vm5782_vm5, %v1938_v25, 2147483648  ;;  %v1974_v16 = vsel %vm5785_vm9, %v1939_v49, 2147483648 }
 0x210   : > { %v1965_v28 = vrot.slane %v1964_v15, 4  ;;  %v1984_v59 = vsel %vm5786_vm14, %v1940_v45, 2147483648  ;;  %v1994_v40 = vsel %vm5787_vm8, %v1941_v20, 2147483648  ;;  %v1975_v31 = vrot.slane %v1974_v16, 4 }
 0x211   : > { %vm1946_vm4 = vcmp.gt.s32.totalorder %v1944_v33, %v1945_v10  ;;  %vm1956_vm2 = vcmp.gt.s32.totalorder %v1954_v4, %v1955_v60  ;;  %v1985_v42 = vrot.slane %v1984_v59, 4  ;;  %v1995_v54 = vrot.slane %v1994_v40, 4 }
 0x212   : > { %v1947_v2 = vsel %vm1946_vm4, %v1944_v33, %v1945_v10  ;;  %v1957_v52 = vsel %vm1956_vm2, %v1954_v4, %v1955_v60  ;;  %vm1966_vm13 = vcmp.gt.s32.totalorder %v1964_v15, %v1965_v28  ;;  %vm1976_vm10 = vcmp.gt.s32.totalorder %v1974_v16, %v1975_v31  ;;  %vm5788_vm2 = vmmov %vm5787_vm8  ;;  %v5795_v33 = vld [vmem:[#allocation4_spill] sm:$0xff]  ;;  %v5800_v10 = vld [vmem:[#allocation5_spill] sm:$0xff] }
 0x213   : > { %v1948_v58 = vrot.slane %v1947_v2, 2  ;;  %v1958_v41 = vrot.slane %v1957_v52, 2  ;;  %v1967_v61 = vsel %vm1966_vm13, %v1964_v15, %v1965_v28  ;;  %v1977_v46 = vsel %vm1976_vm10, %v1974_v16, %v1975_v31  ;;  %v5801_v15 = vld [vmem:[#allocation6_spill] sm:$0xff] }
 0x214   : > { %v1968_v39 = vrot.slane %v1967_v61, 2  ;;  %vm1986_vm3 = vcmp.gt.s32.totalorder %v1984_v59, %v1985_v42  ;;  %vm1996_vm7 = vcmp.gt.s32.totalorder %v1994_v40, %v1995_v54  ;;  %v1978_v30 = vrot.slane %v1977_v46, 2 }
 0x215   : > { %vm1949_vm12 = vcmp.gt.s32.totalorder %v1947_v2, %v1948_v58  ;;  %vm1959_vm15 = vcmp.gt.s32.totalorder %v1957_v52, %v1958_v41  ;;  %v1987_v21 = vsel %vm1986_vm3, %v1984_v59, %v1985_v42  ;;  %vm1935_vm6 = vcmp.eq.s32.totalorder %v4791_v0, 7 }
 0x216   : > { %v1950_v22 = vsel %vm1949_vm12, %v1947_v2, %v1948_v58  ;;  %v1988_v11 = vrot.slane %v1987_v21, 2  ;;  %v1960_v62 = vsel %vm1959_vm15, %v1957_v52, %v1958_v41  ;;  %v1942_v63 = vsel %vm1934_vm11, 1, %v5618_v48 }
 0x217   : > { %v1951_v32 = vrot.slane %v1950_v22, 1  ;;  %vm1969_vm5 = vcmp.gt.s32.totalorder %v1967_v61, %v1968_v39  ;;  %v1997_v55 = vsel %vm1996_vm7, %v1994_v40, %v1995_v54  ;;  %v1926_v47 = vadd.f32 %v1923_v44, %v4311_v38 }
 0x218   : > { %v1943_v26 = vsel %vm1935_vm6, 1, %v5618_v48  ;;  %vm1979_vm9 = vcmp.gt.s32.totalorder %v1977_v46, %v1978_v30  ;;  %v1961_v43 = vrot.slane %v1960_v62, 1  ;;  %vm1989_vm14 = vcmp.gt.s32.totalorder %v1987_v21, %v1988_v11 }
 0x219   : > { %v1970_v19 = vsel %vm1969_vm5, %v1967_v61, %v1968_v39  ;;  %v1998_v50 = vrot.slane %v1997_v55, 2  ;;  %v2004_v35 = vsel %vm5787_vm8, %v1942_v63, 2147483648  ;;  %vm1952_vm4 = vcmp.gt.s32.totalorder %v1950_v22, %v1951_v32  ;;  %vm5805_vm8 = vmmov %vm5788_vm2 }
 0x21a   : > { %v1980_v51 = vsel %vm1979_vm9, %v1977_v46, %v1978_v30  ;;  %v2005_v9 = vrot.slane %v2004_v35, 4  ;;  %v2014_v8 = vsel %vm5788_vm2, %v1943_v26, 2147483648  ;;  %v4823_v27 = vsel %vm1917_vm0, %v1926_v47, %v4311_v38  ;;  %vm5803_vm9 = vmmov %vm5788_vm2 }
 0x21b   : > { %v1990_v6 = vsel %vm1989_vm14, %v1987_v21, %v1988_v11  ;;  %vm1999_vm11 = vcmp.gt.s32.totalorder %v1997_v55, %v1998_v50  ;;  %v2015_v17 = vrot.slane %v2014_v8, 4  ;;  %vm4825_vm13 = vcmp.gt.s32.totalorder %v1960_v62, %v1961_v43  ;;  %vm5804_vm14 = vmmov %vm5788_vm2 }
 0x21c   : > { %v1971_v34 = vrot.slane %v1970_v19, 1  ;;  %v2000_v13 = vsel %vm1999_vm11, %v1997_v55, %v1998_v50  ;;  %vm2006_vm10 = vcmp.gt.s32.totalorder %v2004_v35, %v2005_v9  ;;  %v4829_v29 = vsel %vm1952_vm4, %v1950_v22, %v1951_v32  ;;  %vm5806_vm4 = vmmov %vm5788_vm2 }
 0x21d   : > { %v1981_v5 = vrot.slane %v1980_v51, 1  ;;  %v2007_v57 = vsel %vm2006_vm10, %v2004_v35, %v2005_v9  ;;  %vm2016_vm3 = vcmp.gt.s32.totalorder %v2014_v8, %v2015_v17  ;;  %v1991_v18 = vrot.slane %v1990_v6, 1 }
 0x21e   : > { %v2001_v36 = vrot.slane %v2000_v13, 1  ;;  %v2008_v12 = vrot.slane %v2007_v57, 2  ;;  %v2017_v38 = vsel %vm2016_vm3, %v2014_v8, %v2015_v17  ;;  %v4833_v25 = vsub.f32 %v4322_v56, %v4823_v27 }
 0x21f   : > { %v2018_v7 = vrot.slane %v2017_v38, 2  ;;  %v4837_v49 = vsub.f32 %v4331_v37, %v4823_v27  ;;  %v4841_v45 = vsub.f32 %v4340_v53, %v4823_v27  ;;  %v4845_v20 = vsel %vm4825_vm13, %v1960_v62, %v1961_v43  ;;  %vm5807_vm13 = vmmov %vm5788_vm2 }
 0x220   : > { %vm2009_vm0 = vcmp.gt.s32.totalorder %v2007_v57, %v2008_v12  ;;  %v4849_v44 = vsub.f32 %v4357_v24, %v4823_v27  ;;  %v4853_v56 = vsub.f32 %v4366_v3, %v4823_v27  ;;  %vm4855_vm7 = vcmp.gt.s32.totalorder %v1970_v19, %v1971_v34 }
 0x221   : > { %vm4859_vm12 = vcmp.gt.s32.totalorder %v1980_v51, %v1981_v5  ;;  %vm2019_vm15 = vcmp.gt.s32.totalorder %v2017_v38, %v2018_v7  ;;  %v4865_v4 = vsub.f32 %v5795_v33, %v4823_v27  ;;  %vm4867_vm6 = vcmp.gt.s32.totalorder %v1990_v6, %v1991_v18 }
 0x222   : > { %vm4871_vm5 = vcmp.gt.s32.totalorder %v2000_v13, %v2001_v36  ;;  %v4877_v60 = vsub.f32 %v5800_v10, %v4823_v27  ;;  %v4881_v28 = vsub.f32 %v5801_v15, %v4823_v27  ;;  %v4883_v16 = vsel %vm2009_vm0, %v2007_v57, %v2008_v12  ;;  %v5802_v12 = vld [vmem:[#allocation3_spill] sm:$0xff] }
 0x223   : > { %v2056_v59 = vshra.s32 %v4833_v25, 31  ;;  %v2057_v40 = vshra.s32 %v4837_v49, 31  ;;  %v2058_v31 = vshra.s32 %v4841_v45, 31  ;;  %v4888_v42 = vsel %vm2019_vm15, %v2017_v38, %v2018_v7 }
 0x224   : > { %v2059_v2 = vshra.s32 %v4849_v44, 31  ;;  %v2060_v52 = vshra.s32 %v4853_v56, 31  ;;  %v2061_v54 = vshra.s32 %v4865_v4, 31  ;;  %v4895_v58 = vsel %vm4855_vm7, %v1970_v19, %v1971_v34 }
 0x225   : > { %v4899_v41 = vsel %vm4859_vm12, %v1980_v51, %v1981_v5  ;;  %v2062_v61 = vshra.s32 %v4877_v60, 31  ;;  %v2063_v39 = vshra.s32 %v4881_v28, 31  ;;  %v4905_v46 = vsel %vm4867_vm6, %v1990_v6, %v1991_v18 }
 0x226   : > { %v4909_v30 = vsel %vm4871_vm5, %v2000_v13, %v2001_v36  ;;  %v2064_v21 = vand.u32 2147483647, %v2056_v59  ;;  %v2065_v22 = vand.u32 2147483647, %v2057_v40  ;;  %v2011_v11 = vrot.slane %v4883_v16, 1 }
 0x227   : > { %v2021_v62 = vrot.slane %v4888_v42, 1  ;;  %v2066_v63 = vand.u32 2147483647, %v2058_v31  ;;  %v2067_v32 = vand.u32 2147483647, %v2059_v2 }
 0x228   : > { %v2068_v55 = vand.u32 2147483647, %v2060_v52  ;;  %v2069_v47 = vand.u32 2147483647, %v2061_v54  ;;  %v2070_v26 = vand.u32 2147483647, %v2062_v61  ;;  %v2072_v43 = vxor.u32 %v2064_v21, %v4833_v25 }
 0x229   : > { %v2071_v19 = vand.u32 2147483647, %v2063_v39  ;;  %v2073_v50 = vxor.u32 %v2065_v22, %v4837_v49  ;;  %v2074_v35 = vxor.u32 %v2066_v63, %v4841_v45  ;;  %v2075_v51 = vxor.u32 %v2067_v32, %v4849_v44 }
 0x22a   : > { %v2076_v9 = vxor.u32 %v2068_v55, %v4853_v56  ;;  %v2077_v8 = vxor.u32 %v2069_v47, %v4865_v4  ;;  %v2078_v6 = vxor.u32 %v2070_v26, %v4877_v60  ;;  %v2080_v17 = vand.u32 4294967288, %v2072_v43 }
 0x22b   : > { %v2079_v23 = vxor.u32 %v2071_v19, %v4881_v28  ;;  %v2081_v34 = vand.u32 4294967288, %v2073_v50  ;;  %v2082_v13 = vand.u32 4294967288, %v2074_v35  ;;  %v2083_v5 = vand.u32 4294967288, %v2075_v51 }
 0x22c   : > { %v2084_v57 = vand.u32 4294967288, %v2076_v9  ;;  %v2085_v18 = vand.u32 4294967288, %v2077_v8  ;;  %v4921_v36 = vand.u32 4294967288, %v2078_v6  ;;  %v2088_v38 = vor.u32 %v2080_v17, %v5802_v12 }
 0x22d   : > { %v4924_v7 = vand.u32 4294967288, %v2079_v23  ;;  %v2089_v37 = vor.u32 %v2081_v34, %v5802_v12  ;;  %v2090_v53 = vor.u32 %v2082_v13, %v5802_v12  ;;  %v2091_v33 = vor.u32 %v2083_v5, %v5802_v12 }
 0x22e   : > { %v2092_v24 = vor.u32 %v2084_v57, %v5802_v12  ;;  %v2093_v3 = vor.u32 %v2085_v18, %v5802_v12  ;;  %v2094_v10 = vor.u32 %v4921_v36, %v5802_v12  ;;  %v2096_v15 = vsel %vm5803_vm9, %v2088_v38, 2147483648 }
 0x22f   : > { %v2095_v59 = vor.u32 %v4924_v7, %v5802_v12  ;;  %v2097_v40 = vrot.slane %v2096_v15, 4  ;;  %v2106_v31 = vsel %vm5804_vm14, %v2089_v37, 2147483648  ;;  %v2116_v2 = vsel %vm5805_vm8, %v2090_v53, 2147483648 }
 0x230   : > { %v2107_v52 = vrot.slane %v2106_v31, 4  ;;  %v2117_v54 = vrot.slane %v2116_v2, 4  ;;  %v2126_v61 = vsel %vm5806_vm4, %v2091_v33, 2147483648  ;;  %v2136_v39 = vsel %vm5788_vm2, %v2092_v24, 2147483648 }
 0x231   : > { %vm2098_vm11 = vcmp.gt.s32.totalorder %v2096_v15, %v2097_v40  ;;  %v2127_v21 = vrot.slane %v2126_v61, 4  ;;  %v2137_v22 = vrot.slane %v2136_v39, 4  ;;  %v2146_v63 = vsel %vm5807_vm13, %v2093_v3, 2147483648 }
 0x232   : > { %v2099_v32 = vsel %vm2098_vm11, %v2096_v15, %v2097_v40  ;;  %vm2108_vm10 = vcmp.gt.s32.totalorder %v2106_v31, %v2107_v52  ;;  %vm2118_vm3 = vcmp.gt.s32.totalorder %v2116_v2, %v2117_v54  ;;  %v2147_v55 = vrot.slane %v2146_v63, 4 }
 0x233   : > { %v2100_v47 = vrot.slane %v2099_v32, 2  ;;  %v2109_v26 = vsel %vm2108_vm10, %v2106_v31, %v2107_v52  ;;  %v2119_v43 = vsel %vm2118_vm3, %v2116_v2, %v2117_v54  ;;  %vm2128_vm0 = vcmp.gt.s32.totalorder %v2126_v61, %v2127_v21 }
 0x234   : > { %v2110_v19 = vrot.slane %v2109_v26, 2  ;;  %v2120_v50 = vrot.slane %v2119_v43, 2  ;;  %v2129_v35 = vsel %vm2128_vm0, %v2126_v61, %v2127_v21  ;;  %vm2138_vm7 = vcmp.gt.s32.totalorder %v2136_v39, %v2137_v22 }
 0x235   : > { %vm2101_vm12 = vcmp.gt.s32.totalorder %v2099_v32, %v2100_v47  ;;  %v2130_v51 = vrot.slane %v2129_v35, 2  ;;  %v2139_v9 = vsel %vm2138_vm7, %v2136_v39, %v2137_v22  ;;  %vm4941_vm15 = vcmp.gt.s32.totalorder %v2146_v63, %v2147_v55 }
 0x236   : > { %v2102_v6 = vsel %vm2101_vm12, %v2099_v32, %v2100_v47  ;;  %vm2111_vm6 = vcmp.gt.s32.totalorder %v2109_v26, %v2110_v19  ;;  %vm2121_vm5 = vcmp.gt.s32.totalorder %v2119_v43, %v2120_v50  ;;  %v2140_v17 = vrot.slane %v2139_v9, 2 }
 0x237   : > { %v2103_v23 = vrot.slane %v2102_v6, 1  ;;  %v2112_v34 = vsel %vm2111_vm6, %v2109_v26, %v2110_v19  ;;  %v2122_v13 = vsel %vm2121_vm5, %v2119_v43, %v2120_v50  ;;  %vm2131_vm9 = vcmp.gt.s32.totalorder %v2129_v35, %v2130_v51 }
 0x238   : > { %v2113_v5 = vrot.slane %v2112_v34, 1  ;;  %v2123_v57 = vrot.slane %v2122_v13, 1  ;;  %v2132_v18 = vsel %vm2131_vm9, %v2129_v35, %v2130_v51  ;;  %vm2141_vm14 = vcmp.gt.s32.totalorder %v2139_v9, %v2140_v17 }
 0x239   : > { %vm2104_vm8 = vcmp.gt.s32.totalorder %v2102_v6, %v2103_v23  ;;  %v2133_v36 = vrot.slane %v2132_v18, 1  ;;  %v2142_v12 = vsel %vm2141_vm14, %v2139_v9, %v2140_v17  ;;  %v2149_v38 = vsel %vm4941_vm15, %v2146_v63, %v2147_v55 }
 0x23a   : > { %v4947_v7 = vsel %vm2104_vm8, %v2102_v6, %v2103_v23  ;;  %vm2114_vm4 = vcmp.gt.s32.totalorder %v2112_v34, %v2113_v5  ;;  %vm2124_vm2 = vcmp.gt.s32.totalorder %v2122_v13, %v2123_v57  ;;  %v2143_v37 = vrot.slane %v2142_v12, 1 }
 0x23b   : > { %v4949_v53 = vsel %vm2114_vm4, %v2112_v34, %v2113_v5  ;;  %v4951_v33 = vsel %vm2124_vm2, %v2122_v13, %v2123_v57  ;;  %vm2134_vm11 = vcmp.gt.s32.totalorder %v2132_v18, %v2133_v36  ;;  %v2150_v24 = vrot.slane %v2149_v38, 2 }
 0x23c   : > { %v4953_v3 = vsel %vm2134_vm11, %v2132_v18, %v2133_v36  ;;  %vm2144_vm13 = vcmp.gt.s32.totalorder %v2142_v12, %v2143_v37  ;;  %vm5810_vm10 = vcmask 15360   ;;  %v2176_v61 = vand.u32 7, %v4947_v7 }
 0x23d   : > { %v2156_v15 = vsel %vm5810_vm10, %v2094_v10, 2147483648  ;;  %vm5811_vm3 = vmmov %vm5810_vm10  ;;  %v4957_v31 = vsel %vm2144_vm13, %v2142_v12, %v2143_v37  ;;  %vm2151_vm0 = vcmp.gt.s32.totalorder %v2149_v38, %v2150_v24  ;;  %v2177_v39 = vand.u32 7, %v4949_v53 }
 0x23e   : > { %v2166_v40 = vsel %vm5811_vm3, %v2095_v59, 2147483648  ;;  %v2157_v2 = vrot.slane %v2156_v15, 4  ;;  %v2152_v54 = vsel %vm2151_vm0, %v2149_v38, %v2150_v24  ;;  %v2178_v21 = vand.u32 7, %v4951_v33 }
 0x23f   : > { %v2167_v52 = vrot.slane %v2166_v40, 4  ;;  %vm4965_vm7 = vcmp.gt.s32.totalorder %v4883_v16, %v2011_v11  ;;  %v2153_v10 = vrot.slane %v2152_v54, 1  ;;  %v2179_v59 = vand.u32 7, %v4953_v3 }
 0x240   : > { %vm2158_vm12 = vcmp.gt.s32.totalorder %v2156_v15, %v2157_v2  ;;  %v2180_v55 = vand.u32 7, %v4957_v31  ;;  %v4971_v47 = vsub.s32 7, %v2176_v61  ;;  %vm4976_vm6 = vcmp.gt.s32.totalorder %v4888_v42, %v2021_v62 }
 0x241   : > { %vm2168_vm15 = vcmp.gt.s32.totalorder %v2166_v40, %v2167_v52  ;;  %v2159_v63 = vsel %vm2158_vm12, %v2156_v15, %v2157_v2  ;;  %vm2154_vm5 = vcmp.gt.s32.totalorder %v2152_v54, %v2153_v10  ;;  %v4980_v50 = vsub.s32 7, %v2177_v39 }
 0x242   : > { %v2169_v32 = vsel %vm2168_vm15, %v2166_v40, %v2167_v52  ;;  %v2160_v43 = vrot.slane %v2159_v63, 2  ;;  %v2155_v35 = vsel %vm2154_vm5, %v2152_v54, %v2153_v10  ;;  %v4982_v51 = vsub.s32 7, %v2178_v21 }
 0x243   : > { %v2170_v19 = vrot.slane %v2169_v32, 2  ;;  %v4984_v9 = vsub.s32 7, %v2179_v59  ;;  %v4986_v8 = vsub.s32 7, %v2180_v55  ;;  %v2181_v6 = vand.u32 7, %v2155_v35 }
 0x244   : > { %vm2161_vm9 = vcmp.gt.s32.totalorder %v2159_v63, %v2160_v43  ;;  %v2192_v17 = vand.u32 4294967288, %v4947_v7  ;;  %v2193_v13 = vand.u32 4294967288, %v4949_v53  ;;  %v2194_v5 = vand.u32 4294967288, %v4951_v33 }
 0x245   : > { %vm2171_vm14 = vcmp.gt.s32.totalorder %v2169_v32, %v2170_v19  ;;  %v2162_v23 = vsel %vm2161_vm9, %v2159_v63, %v2160_v43  ;;  %v4991_v36 = vsub.s32 7, %v2181_v6  ;;  %v2195_v12 = vand.u32 4294967288, %v4953_v3 }
 0x246   : > { %v2172_v34 = vsel %vm2171_vm14, %v2169_v32, %v2170_v19  ;;  %v2163_v57 = vrot.slane %v2162_v23, 1  ;;  %v2196_v38 = vand.u32 4294967288, %v4957_v31  ;;  %v2197_v37 = vand.u32 4294967288, %v2155_v35 }
 0x247   : > { %v2173_v18 = vrot.slane %v2172_v34, 1  ;;  %v2200_v24 = vshra.s32 %v2192_v17, 31  ;;  %v2201_v15 = vshra.s32 %v2193_v13, 31  ;;  %v2202_v7 = vshra.s32 %v2194_v5, 31 }
 0x248   : > { %vm2164_vm8 = vcmp.gt.s32.totalorder %v2162_v23, %v2163_v57  ;;  %v2203_v40 = vshra.s32 %v2195_v12, 31  ;;  %v2204_v53 = vshra.s32 %v2196_v38, 31  ;;  %v2205_v54 = vshra.s32 %v2197_v37, 31 }
 0x249   : > { %vm2174_vm4 = vcmp.gt.s32.totalorder %v2172_v34, %v2173_v18  ;;  %v2165_v2 = vsel %vm2164_vm8, %v2162_v23, %v2163_v57  ;;  %v5000_v3 = vsel %vm4965_vm7, %v4883_v16, %v2011_v11  ;;  %v2208_v31 = vand.u32 2147483647, %v2200_v24 }
 0x24a   : > { %v2175_v52 = vsel %vm2174_vm4, %v2172_v34, %v2173_v18  ;;  %v2182_v33 = vand.u32 7, %v2165_v2  ;;  %v2198_v39 = vand.u32 4294967288, %v2165_v2  ;;  %v2209_v10 = vand.u32 2147483647, %v2201_v15 }
 0x24b   : > { %v2183_v61 = vand.u32 7, %v2175_v52  ;;  %v2199_v21 = vand.u32 4294967288, %v2175_v52  ;;  %v2210_v59 = vand.u32 2147483647, %v2202_v7  ;;  %v5011_v19 = vsel %vm4976_vm6, %v4888_v42, %v2021_v62 }
 0x24c   : > { %v5002_v63 = vsub.s32 7, %v2182_v33  ;;  %v2206_v55 = vshra.s32 %v2198_v39, 31  ;;  %v2211_v35 = vand.u32 2147483647, %v2203_v40  ;;  %v2212_v22 = vand.u32 2147483647, %v2204_v53 }
 0x24d   : > { %v5004_v32 = vsub.s32 7, %v2183_v61  ;;  %v2207_v43 = vshra.s32 %v2199_v21, 31  ;;  %v2213_v16 = vand.u32 2147483647, %v2205_v54  ;;  %v5013_v23 = vxor.u32 %v2208_v31, %v2192_v17 }
 0x24e   : > { %v2214_v11 = vand.u32 2147483647, %v2206_v55  ;;  %vm2232_vm2 = vcmp.eq.s32.totalorder %v3266_v1, %v4971_v47  ;;  %v5017_v34 = vxor.u32 %v2209_v10, %v2193_v13  ;;  %v5019_v57 = vxor.u32 %v2210_v59, %v2194_v5 }
 0x24f   : > { %v2215_v6 = vand.u32 2147483647, %v2207_v43  ;;  %v5021_v18 = vxor.u32 %v2211_v35, %v2195_v12  ;;  %vm2233_vm11 = vcmp.eq.s32.totalorder %v3266_v1, %v4980_v50  ;;  %v5025_v42 = vxor.u32 %v2212_v22, %v2196_v38 }
 0x250   : > { %v5027_v62 = vxor.u32 %v2213_v16, %v2197_v37  ;;  %vm2234_vm13 = vcmp.eq.s32.totalorder %v3266_v1, %v4982_v51  ;;  %vm2235_vm10 = vcmp.eq.s32.totalorder %v3266_v1, %v4984_v9  ;;  %vm2236_vm3 = vcmp.eq.s32.totalorder %v3266_v1, %v4986_v8 }
 0x251   : > { %vm5471_vm0 = vcmp.eq.s32.totalorder %v3266_v1, %v4991_v36  ;;  %vm5469_vm7 = vcmp.eq.s32.totalorder %v3266_v1, %v5002_v63  ;;  %vm5470_vm12 = vcmp.eq.s32.totalorder %v3266_v1, %v5004_v32  ;;  %v5041_v26 = vxor.u32 %v2214_v11, %v2198_v39 }
 0x252   : > { %v2240_v17 = vsel %vm2232_vm2, -1e+30, %v4833_v25  ;;  %v2241_v13 = vsel %vm2233_vm11, -1e+30, %v4837_v49  ;;  %v2242_v5 = vsel %vm2234_vm13, -1e+30, %v4841_v45  ;;  %v5055_v12 = vxor.u32 %v2215_v6, %v2199_v21 }
 0x253   : > { %v2243_v38 = vsel %vm2235_vm10, -1e+30, %v4849_v44  ;;  %v2244_v25 = vsel %vm2236_vm3, -1e+30, %v4853_v56  ;;  %v2245_v49 = vsel %vm5471_vm0, -1e+30, %v4865_v4 }
 0x254   : > { %v2246_v45 = vsel %vm5469_vm7, -1e+30, %v4877_v60  ;;  %v2247_v44 = vsel %vm5470_vm12, -1e+30, %v4881_v28  ;;  %vm5816_vm15 = vcmask 15360   ;;  %vm2024_vm4 = vcmp.gt.s32.totalorder %v4829_v29, 0 }
 0x255   : > { %v2248_v37 = vsel %vm5816_vm15, %v2240_v17, -inf  ;;  %vm5817_vm6 = vmmov %vm5816_vm15  ;;  %vm2031_vm7 = vcmp.gt.s32.totalorder %v5011_v19, 0 }
 0x256   : > { %v2255_v24 = vsel %vm5817_vm6, %v2241_v13, -inf  ;;  %v2249_v56 = vrot.slane %v2248_v37, 4  ;;  %vm5818_vm5 = vmmov %vm5817_vm6 }
 0x257   : > { %v2256_v15 = vrot.slane %v2255_v24, 4  ;;  %v2262_v7 = vsel %vm5818_vm5, %v2242_v5, -inf  ;;  %vm5819_vm9 = vmmov %vm5818_vm5 }
 0x258   : > { %v2269_v4 = vsel %vm5819_vm9, %v2243_v38, -inf  ;;  %v2263_v40 = vrot.slane %v2262_v7, 4  ;;  %vm5820_vm14 = vmmov %vm5818_vm5  ;;  %v2250_v53 = vmax.f32 %v2248_v37, %v2249_v56  ;;  %vm2026_vm9 = vcmp.gt.s32.totalorder %v4895_v58, 0 }
 0x259   : > { %v2270_v2 = vrot.slane %v2269_v4, 4  ;;  %v2276_v52 = vsel %vm5820_vm14, %v2244_v25, -inf  ;;  %vm5821_vm8 = vmmov %vm5818_vm5  ;;  %v2257_v54 = vmax.f32 %v2255_v24, %v2256_v15  ;;  %vm2027_vm14 = vcmp.gt.s32.totalorder %v4899_v41, 0 }
 0x25a   : > { %v2283_v60 = vsel %vm5821_vm8, %v2245_v49, -inf  ;;  %v2277_v33 = vrot.slane %v2276_v52, 4  ;;  %v2264_v61 = vmax.f32 %v2262_v7, %v2263_v40  ;;  %vm5822_vm15 = vmmov %vm5818_vm5  ;;  %v2251_v10 = vrot.slane %v2250_v53, 2 }
 0x25b   : > { %v2284_v28 = vrot.slane %v2283_v60, 4  ;;  %v2271_v39 = vmax.f32 %v2269_v4, %v2270_v2  ;;  %v2290_v21 = vsel %vm5822_vm15, %v2246_v45, -inf  ;;  %vm5823_vm6 = vmmov %vm5818_vm5  ;;  %vm2025_vm5 = vcmp.gt.s32.totalorder %v4845_v20, 0 }
 0x25c   : > { %v2297_v31 = vsel %vm5823_vm6, %v2247_v44, -inf  ;;  %v2258_v59 = vrot.slane %v2257_v54, 2  ;;  %v2278_v55 = vmax.f32 %v2276_v52, %v2277_v33  ;;  %v2265_v35 = vrot.slane %v2264_v61, 2  ;;  %vm5100_vm12 = vmxor %vm2024_vm4, %vm2996_vm1 }
 0x25d   : > { %v2285_v43 = vmax.f32 %v2283_v60, %v2284_v28  ;;  %v2272_v22 = vrot.slane %v2271_v39, 2  ;;  %v2291_v16 = vrot.slane %v2290_v21, 4  ;;  %v2298_v11 = vrot.slane %v2297_v31, 4  ;;  %vm5109_vm0 = vmxor %vm2025_vm5, %vm2996_vm1 }
 0x25e   : > { %v2252_v6 = vmax.f32 %v2250_v53, %v2251_v10  ;;  %v2259_v17 = vmax.f32 %v2257_v54, %v2258_v59  ;;  %v2279_v13 = vrot.slane %v2278_v55, 2  ;;  %vm2028_vm8 = vcmp.gt.s32.totalorder %v4905_v46, 0  ;;  %vm5116_vm4 = vmxor %vm2026_vm9, %vm2996_vm1 }
 0x25f   : > { %v2286_v5 = vrot.slane %v2285_v43, 2  ;;  %v2266_v38 = vmax.f32 %v2264_v61, %v2265_v35  ;;  %v2273_v25 = vmax.f32 %v2271_v39, %v2272_v22  ;;  %v2292_v49 = vmax.f32 %v2290_v21, %v2291_v16  ;;  %vm5125_vm5 = vmxor %vm2027_vm14, %vm2996_vm1 }
 0x260   : > { %v2299_v45 = vmax.f32 %v2297_v31, %v2298_v11  ;;  %vm2029_vm15 = vcmp.gt.s32.totalorder %v4909_v30, 0  ;;  %v2253_v44 = vrot.slane %v2252_v6, 1  ;;  %v2260_v37 = vrot.slane %v2259_v17, 1  ;;  %vm5136_vm9 = vmxor %vm2028_vm8, %vm2996_vm1 }
 0x261   : > { %v2280_v24 = vmax.f32 %v2278_v55, %v2279_v13  ;;  %v2287_v56 = vmax.f32 %v2285_v43, %v2286_v5  ;;  %vm2030_vm6 = vcmp.gt.s32.totalorder %v5000_v3, 0  ;;  %v2267_v15 = vrot.slane %v2266_v38, 1  ;;  %vm5145_vm14 = vmxor %vm2029_vm15, %vm2996_vm1 }
 0x262   : > { %v2274_v7 = vrot.slane %v2273_v25, 1  ;;  %v2293_v4 = vrot.slane %v2292_v49, 2  ;;  %v2300_v40 = vrot.slane %v2299_v45, 2  ;;  %v2254_v2 = vmax.f32 %v2252_v6, %v2253_v44  ;;  %vm5152_vm8 = vmxor %vm2030_vm6, %vm2996_vm1 }
 0x263   : > { %v2261_v52 = vmax.f32 %v2259_v17, %v2260_v37  ;;  %v2281_v60 = vrot.slane %v2280_v24, 1  ;;  %v2288_v53 = vrot.slane %v2287_v56, 1  ;;  %v2268_v54 = vmax.f32 %v2266_v38, %v2267_v15  ;;  %vm5159_vm15 = vmxor %vm2031_vm7, %vm2996_vm1 }
 0x264   : > { %v2275_v33 = vmax.f32 %v2273_v25, %v2274_v7  ;;  %v2294_v28 = vmax.f32 %v2292_v49, %v2293_v4  ;;  %v2301_v61 = vmax.f32 %v2299_v45, %v2300_v40  ;;  %v2304_v31 = vsub.f32 %v5013_v23, %v2254_v2  ;;  %vm5170_vm6 = vmand %vm2232_vm2, %vm5100_vm12 }
 0x265   : > { %v2282_v39 = vmax.f32 %v2280_v24, %v2281_v60  ;;  %v2289_v21 = vmax.f32 %v2287_v56, %v2288_v53  ;;  %v2305_v10 = vsub.f32 %v5017_v34, %v2261_v52  ;;  %v2306_v43 = vsub.f32 %v5019_v57, %v2268_v54  ;;  %vm5179_vm7 = vmand %vm2233_vm11, %vm5109_vm0 }
 0x266   : > { %v2295_v59 = vrot.slane %v2294_v28, 1  ;;  %v2302_v55 = vrot.slane %v2301_v61, 1  ;;  %v2307_v35 = vsub.f32 %v5021_v18, %v2275_v33  ;;  %v2312_v23 = vmax.f32 %v2304_v31, 0.0  ;;  %vm5188_vm2 = vmand %vm2234_vm13, %vm5116_vm4 }
 0x267   : > { %v2308_v16 = vsub.f32 %v5025_v42, %v2282_v39  ;;  %v2309_v11 = vsub.f32 %v5027_v62, %v2289_v21  ;;  %v2313_v6 = vmax.f32 %v2305_v10, 0.0  ;;  %v2314_v29 = vmax.f32 %v2306_v43, 0.0  ;;  %vm5197_vm11 = vmand %vm2235_vm10, %vm5125_vm5 }
 0x268   : > { %v2296_v57 = vmax.f32 %v2294_v28, %v2295_v59  ;;  %v2303_v18 = vmax.f32 %v2301_v61, %v2302_v55  ;;  %v2315_v17 = vmax.f32 %v2307_v35, 0.0  ;;  %v2320_v5 = vadd.f32 %v2312_v23, %v3625_v14  ;;  %vm5206_vm13 = vmand %vm2236_vm3, %vm5136_vm9 }
 0x269   : > { %v2316_v62 = vmax.f32 %v2308_v16, 0.0  ;;  %v2317_v13 = vmax.f32 %v2309_v11, 0.0  ;;  %v2321_v20 = vadd.f32 %v2313_v6, %v3625_v14  ;;  %v2322_v49 = vadd.f32 %v2314_v29, %v3625_v14 }
 0x26a   : > { %v2310_v25 = vsub.f32 %v5041_v26, %v2296_v57  ;;  %v2311_v58 = vsub.f32 %v5055_v12, %v2303_v18  ;;  %v2323_v45 = vadd.f32 %v2315_v17, %v3625_v14  ;;  %v2336_v24 = vshra.s32 %v2320_v5, 31 }
 0x26b   : > { %v2324_v41 = vadd.f32 %v2316_v62, %v3625_v14  ;;  %v2325_v37 = vadd.f32 %v2317_v13, %v3625_v14  ;;  %v2337_v56 = vshra.s32 %v2321_v20, 31  ;;  %v2338_v46 = vshra.s32 %v2322_v49, 31 }
 0x26c   : > { %v2318_v12 = vmax.f32 %v2310_v25, 0.0  ;;  %v2319_v15 = vmax.f32 %v2311_v58, 0.0  ;;  %v2339_v7 = vshra.s32 %v2323_v45, 31  ;;  %v2344_v52 = vand.u32 2147483647, %v2336_v24 }
 0x26d   : > { %v2340_v40 = vshra.s32 %v2324_v41, 31  ;;  %v2341_v2 = vshra.s32 %v2325_v37, 31  ;;  %v2345_v60 = vand.u32 2147483647, %v2337_v56  ;;  %v2346_v3 = vand.u32 2147483647, %v2338_v46 }
 0x26e   : > { %v2326_v53 = vadd.f32 %v2318_v12, %v3625_v14  ;;  %v2327_v54 = vadd.f32 %v2319_v15, %v3625_v14  ;;  %v2347_v33 = vand.u32 2147483647, %v2339_v7  ;;  %v2352_v39 = vxor.u32 %v2344_v52, %v2320_v5 }
 0x26f   : > { %v2348_v28 = vand.u32 2147483647, %v2340_v40  ;;  %v2349_v61 = vand.u32 2147483647, %v2341_v2  ;;  %v2353_v21 = vxor.u32 %v2345_v60, %v2321_v20  ;;  %v2354_v59 = vxor.u32 %v2346_v3, %v2322_v49 }
 0x270   : > { %v2342_v31 = vshra.s32 %v2326_v53, 31  ;;  %v2343_v10 = vshra.s32 %v2327_v54, 31  ;;  %v2355_v55 = vxor.u32 %v2347_v33, %v2323_v45  ;;  %v2360_v47 = vand.u32 4294967288, %v2352_v39 }
 0x271   : > { %v2356_v43 = vxor.u32 %v2348_v28, %v2324_v41  ;;  %v2357_v35 = vxor.u32 %v2349_v61, %v2325_v37  ;;  %v2361_v22 = vand.u32 4294967288, %v2353_v21  ;;  %v2362_v50 = vand.u32 4294967288, %v2354_v59  ;;  %v5863_v28 = vld [vmem:[#allocation2_spill] sm:$0xff] }
 0x272   : > { %v2350_v11 = vand.u32 2147483647, %v2342_v31  ;;  %v2351_v23 = vand.u32 2147483647, %v2343_v10  ;;  %v2363_v6 = vand.u32 4294967288, %v2355_v55  ;;  %v2368_v51 = vor.u32 7, %v2360_v47 }
 0x273   : > { %v2364_v57 = vand.u32 4294967288, %v2356_v43  ;;  %v2365_v18 = vand.u32 4294967288, %v2357_v35  ;;  %v2369_v29 = vor.u32 6, %v2361_v22  ;;  %v2370_v9 = vor.u32 5, %v2362_v50 }
 0x274   : > { %v2358_v42 = vxor.u32 %v2350_v11, %v2326_v53  ;;  %v2359_v62 = vxor.u32 %v2351_v23, %v2327_v54  ;;  %v2371_v13 = vor.u32 4, %v2363_v6  ;;  %vm5850_vm10 = vcmp.eq.s32.totalorder %v3266_v1, %v4991_v36 }
 0x275   : > { %vm2396_vm0 = vmand %vm5850_vm10, %vm5145_vm14  ;;  %v2372_v5 = vor.u32 3, %v2364_v57  ;;  %v2373_v20 = vor.u32 2, %v2365_v18  ;;  %vm5851_vm3 = vcmp.eq.s32.totalorder %v3266_v1, %v5004_v32  ;;  %v2399_v38 = vsel %vm5170_vm6, %v2368_v51, 2147483648 }
 0x276   : > { %vm5220_vm12 = vmand %vm5851_vm3, %vm5159_vm15  ;;  %v2400_v25 = vsel %vm5179_vm7, %v2369_v29, 2147483648  ;;  %v2366_v58 = vand.u32 4294967288, %v2358_v42  ;;  %v2367_v36 = vand.u32 4294967288, %v2359_v62  ;;  %v2401_v49 = vsel %vm5188_vm2, %v2370_v9, 2147483648 }
 0x277   : > { %v2402_v45 = vsel %vm5197_vm11, %v2371_v13, 2147483648  ;;  %vm5854_vm4 = vcmp.eq.s32.totalorder %v3266_v1, %v5002_v63  ;;  %v2403_v32 = vsel %vm5206_vm13, %v2372_v5, 2147483648  ;;  %v2404_v44 = vsel %vm2396_vm0, %v2373_v20, 2147483648 }
 0x278   : > { %vm2397_vm5 = vmand %vm5854_vm4, %vm5152_vm8  ;;  %vm5855_vm9 = vcmask 15360   ;;  %v2374_v24 = vor.u32 1, %v2366_v58  ;;  %v2406_v56 = vsel %vm5220_vm12, %v2367_v36, 2147483648 }
 0x279   : > { %v2407_v41 = vsel %vm5855_vm9, %v2399_v38, 2147483648  ;;  %vm5856_vm14 = vmmov %vm5855_vm9 }
 0x27a   : > { %v2408_v37 = vsel %vm5856_vm14, %v2400_v25, 2147483648  ;;  %vm5857_vm15 = vmmov %vm5855_vm9  ;;  %v2405_v7 = vsel %vm2397_vm5, %v2374_v24, 2147483648  ;;  %vm5864_vm5 = vcmp.lt.s32.totalorder %v5863_v28, 2 }
 0x27b   : > { %v2410_v26 = vsel %vm5857_vm15, %v2402_v45, 2147483648  ;;  %vm5858_vm6 = vmmov %vm5855_vm9 }
 0x27c   : > { %v2409_v12 = vsel %vm5858_vm6, %v2401_v49, 2147483648  ;;  %vm5859_vm7 = vmmov %vm5858_vm6 }
 0x27d   : > { %v2411_v15 = vsel %vm5859_vm7, %v2403_v32, 2147483648  ;;  %vm5860_vm2 = vmmov %vm5858_vm6 }
 0x27e   : > { %v2414_v63 = vsel %vm5860_vm2, %v2404_v44, 2147483648  ;;  %vm5861_vm8 = vmmov %vm5860_vm2  ;;  %vm2412_vm11 = vcmp.gt.s32.totalorder %v2407_v41, %v2411_v15 }
 0x27f   : > { %v2420_v46 = vsel %vm5861_vm8, %v2406_v56, 2147483648  ;;  %vm2415_vm13 = vcmp.gt.s32.totalorder %v2408_v37, %v2414_v63  ;;  %v2413_v4 = vsel %vm2412_vm11, %v2407_v41, %v2411_v15  ;;  %vm5862_vm0 = vmmov %vm5860_vm2 }
 0x280   : > { %vm2421_vm10 = vcmp.gt.s32.totalorder %v2410_v26, %v2420_v46  ;;  %v2416_v40 = vsel %vm2415_vm13, %v2408_v37, %v2414_v63  ;;  %v2417_v2 = vsel %vm5862_vm0, %v2405_v7, 2147483648  ;;  %vm2441_vm15 = vmxor %vm5864_vm5, %vm2996_vm1 }
 0x281   : > { %v2422_v52 = vsel %vm2421_vm10, %v2410_v26, %v2420_v46  ;;  %vm2418_vm3 = vcmp.gt.s32.totalorder %v2409_v12, %v2417_v2  ;;  %vm2423_vm12 = vcmp.gt.s32.totalorder %v2413_v4, %v2416_v40  ;;  %vm5865_vm2 = vmmov %vm5862_vm0 }
 0x282   : > { %v2419_v60 = vsel %vm2418_vm3, %v2409_v12, %v2417_v2  ;;  %v2424_v30 = vsel %vm2423_vm12, %v2413_v4, %v2416_v40 }
 0x283   : > { %vm2425_vm4 = vcmp.gt.s32.totalorder %v2419_v60, %v2422_v52 }
 0x284   : > { %v2426_v53 = vsel %vm2425_vm4, %v2419_v60, %v2422_v52 }
 0x285   : > { %vm2427_vm9 = vcmp.gt.s32.totalorder %v2424_v30, %v2426_v53 }
 0x286   : > { %v2428_v54 = vsel %vm2427_vm9, %v2424_v30, %v2426_v53 }
 0x287   : > { %v2430_v3 = vand.u32 7, %v2428_v54  ;;  %vm2429_vm14 = vcmp.ge.s32.totalorder %v2428_v54, 0  ;;  %v2432_v43 = vand.u32 4294967288, %v2428_v54 }
 0x289   : > { %v2431_v33 = vsub.s32 7, %v2430_v3  ;;  %v2433_v35 = vshra.s32 %v2432_v43, 31 }
 0x28b   : > { %v2437_v61 = vsel %vm2429_vm14, %v2431_v33, %v4791_v0  ;;  %v2434_v47 = vand.u32 2147483647, %v2433_v35 }
 0x28c   : > { %vm2440_vm6 = vcmp.ge.s32.totalorder %v2437_v61, 0 }
 0x28d   : > { %vm2444_vm7 = vmor %vm2440_vm6, %vm2441_vm15  ;;  %v2435_v22 = vxor.u32 %v2434_v47, %v2432_v43 }
 0x28e   : > { %v2445_v39 = vsel %vm2444_vm7, 1, %v5618_v48 }
 0x28f   : > { %v2446_v21 = vsel %vm5865_vm2, %v2445_v39, 2147483647  ;;  %v2438_v0 = vadd.f32 %v2435_v22, %v4823_v27 }
 0x290   : > { %v2448_v19 = vshra.s32 %v2446_v21, 16  ;;  %v2447_v10 = vand.u32 65535, %v2446_v21 }
 0x291   : > { %v2439_v22 = vsel %vm2429_vm14, %v2438_v0, %v4823_v27  }
 0x292   : > { %v2450_v31 = vcvt.s32.f32 %v2448_v19  ;;  %v2449_v59 = vcvt.s32.f32 %v2447_v10 }
 0x294   : > { %2451 = vmin.xlane.f32.xlu0 %v2450_v31 }
 0x307   : > { %v2452_v55 = vpop.xlane.xlu0 %2451 }
 0x308   : > { %vm2453_vm8 = vcmp.eq.f32.partialorder %v2450_v31, %v2452_v55  ;;  %v2458_v48 = vcvt.f32.s32 %v2452_v55 }
 0x309   : > { %v2454_v14 = vsel %vm2453_vm8, %v2449_v59, inf }
 0x30a   : > { %2455 = vmin.xlane.f32.xlu0 %v2454_v14  ;;  %v2459_v23 = vshll.u32 %v2458_v48, 16 }
 0x37d   : > { %v2456_v16 = vpop.xlane.xlu0 %2455 }
 0x37e   : > { %v2457_v11 = vcvt.f32.s32 %v2456_v16 }
 0x380   : > { %v2460_v50 = vadd.s32 %v2459_v23, %v2457_v11 }
 0x382   : > { %v2461_v6 = vrot.slane %v2460_v50, 4 }
 0x384   : > { %vm2462_vm1 = vcmp.lt.s32.totalorder %v2460_v50, %v2461_v6 }
 0x385   : > { %v2463_v34 = vsel %vm2462_vm1, %v2460_v50, %v2461_v6 }
 0x386   : > { %v2464_v57 = vrot.slane %v2463_v34, 2 }
 0x388   : > { %vm2465_vm11 = vcmp.lt.s32.totalorder %v2463_v34, %v2464_v57 }
 0x389   : > { %v2466_v18 = vsel %vm2465_vm11, %v2463_v34, %v2464_v57 }
 0x38a   : > { %v2467_v51 = vrot.slane %v2466_v18, 1 }
 0x38c   : > { %vm2468_vm13 = vcmp.lt.s32.totalorder %v2466_v18, %v2467_v51 }
 0x38d   : > { %v2469_v27 = vsel %vm2468_vm13, %v2466_v18, %v2467_v51 }
 0x38e   : > { %2739 = vpush %v2469_v27 }
 0x3bf   : > { %s2740_s20 = spop %2739 }
 0x3c0   : > { %p2471_p2 = scmp.eq.s32.totalorder %s2740_s20, 1 }
 0x3c2   : > { %p2476_p3 = por %p2475_p1, %p2471_p2 }
 0x3c4   : > { %s5901_s21 = smov (!%p2476_p3, %s2477_s21), %s2953_s11  ;;  %s5903_s22 = smov (!%p2476_p3, %s2479_s22), %s2949_s10 }
 0x3c5   : > { %s5905_s19 = smov (%p2476_p3, %s2474_s19), 0  ;;  %p2483_p5 = pnand %p2482_p4, %p2476_p3 }
 0x3c6   : > { %p2738_p6 = scmp.ge.s32.totalorder %s5901_s21, 6  ;;  %s5868_s9 = smov %s5905_s19 }
 0x3c7   : > { %s2737_s23 = scalar_select %p2483_p5, 0, 1  ;;  %v2997_v42 = vmov (%p2738_p6), 0   ;;  %vm5871_vm6 = vcmask (%p2738_p6), 15360  }
 0x3c8   : > { %s5869_s10 = smov %s5903_s22  ;;  %s5870_s11 = smov %s5901_s21  ;;  %vm5872_vm7 = vmmov (%p2738_p6), %vm5871_vm6 }
 0x3c9   : > { %v2486_v29 = vstv %s2737_s23  ;;  %382 = sbr.rel (!%p2738_p6) target bundleno = 132 (0x84), region = 38  ;;  %vm5873_vm2 = vmmov (%p2738_p6), %vm5871_vm6  ;;  %s5314_s0 = smov (%p2738_p6), 0  }
 0x3ca   : > { %vm2487_vm10 = vcmp.eq.s32.totalorder %v2486_v29, 1  ;;  %vm5874_vm8 = vmmov (%p2738_p6), %vm5873_vm2 }
 0x3cb   : > { %v5266_v21 = vsel %vm2487_vm10, 4294967295, %v2437_v61   ;;  %vm5875_vm1 = vmmov (%p2738_p6), %vm5873_vm2 }
 0x3cc   : > { %v5866_v17 = vmov %v5266_v21  ;;  %vm5876_vm11 = vmmov (%p2738_p6), %vm5875_vm1 }
 0x3cd   : > { %v5867_v21 = vmov %v5866_v17  ;;  %vm2489_vm0 = vcmp.eq.s32.totalorder (%p2738_p6), %v5866_v17, 0  ;;  %vm2490_vm3 = vcmp.eq.s32.totalorder (%p2738_p6), %v5866_v17, 1  ;;  %vm2491_vm12 = vcmp.eq.s32.totalorder (%p2738_p6), %v5866_v17, 2  ;;  %vm5877_vm13 = vmmov (%p2738_p6), %vm5875_vm1 }
 0x3ce   :  { %vm2492_vm4 = vcmp.eq.s32.totalorder %v5866_v17, 3  ;;  %vm2493_vm9 = vcmp.eq.s32.totalorder %v5866_v17, 4  ;;  %vm2494_vm14 = vcmp.eq.s32.totalorder %v5866_v17, 5  ;;  %vm2495_vm5 = vcmp.eq.s32.totalorder %v5866_v17, 6  ;;  %vm5878_vm10 = vmmov %vm5875_vm1 }
 0x3cf   :  { %vm2496_vm15 = vcmp.eq.s32.totalorder %v5866_v17, 7  ;;  %v2497_v62 = vsel %vm2489_vm0, 1, %v2997_v42  ;;  %v2498_v9 = vsel %vm2490_vm3, 1, %v2997_v42  ;;  %v2499_v13 = vsel %vm2491_vm12, 1, %v2997_v42 }
 0x3d0   :  { %v2500_v5 = vsel %vm2492_vm4, 1, %v2997_v42  ;;  %v2501_v20 = vsel %vm2493_vm9, 1, %v2997_v42  ;;  %v2502_v8 = vsel %vm2494_vm14, 1, %v2997_v42  ;;  %v2503_v38 = vsel %vm2495_vm5, 1, %v2997_v42 }
 0x3d1   :  { %v2504_v25 = vsel %vm2496_vm15, 1, %v2997_v42  ;;  %v2505_v58 = vsel %vm5871_vm6, %v2497_v62, 2147483648  ;;  %v2515_v36 = vsel %vm5872_vm7, %v2498_v9, 2147483648  ;;  %v2525_v49 = vsel %vm5873_vm2, %v2499_v13, 2147483648 }
 0x3d2   :  { %v2535_v45 = vsel %vm5874_vm8, %v2500_v5, 2147483648  ;;  %v2506_v32 = vrot.slane %v2505_v58, 4  ;;  %v2516_v44 = vrot.slane %v2515_v36, 4  ;;  %v2526_v41 = vrot.slane %v2525_v49, 4 }
 0x3d3   :  { %v2536_v37 = vrot.slane %v2535_v45, 4  ;;  %v2545_v24 = vsel %vm5875_vm1, %v2501_v20, 2147483648  ;;  %v2555_v56 = vsel %vm5876_vm11, %v2502_v8, 2147483648  ;;  %v2565_v26 = vsel %vm5877_vm13, %v2503_v38, 2147483648 }
 0x3d4   :  { %v2575_v12 = vsel %vm5878_vm10, %v2504_v25, 2147483648  ;;  %vm2507_vm0 = vcmp.gt.s32.totalorder %v2505_v58, %v2506_v32  ;;  %vm2517_vm3 = vcmp.gt.s32.totalorder %v2515_v36, %v2516_v44  ;;  %vm2527_vm12 = vcmp.gt.s32.totalorder %v2525_v49, %v2526_v41 }
 0x3d5   :  { %vm2537_vm4 = vcmp.gt.s32.totalorder %v2535_v45, %v2536_v37  ;;  %v2508_v15 = vsel %vm2507_vm0, %v2505_v58, %v2506_v32  ;;  %v2518_v63 = vsel %vm2517_vm3, %v2515_v36, %v2516_v44  ;;  %v2528_v46 = vsel %vm2527_vm12, %v2525_v49, %v2526_v41 }
 0x3d6   :  { %v2538_v7 = vsel %vm2537_vm4, %v2535_v45, %v2536_v37  ;;  %v2509_v4 = vrot.slane %v2508_v15, 2  ;;  %v2519_v40 = vrot.slane %v2518_v63, 2  ;;  %v2529_v2 = vrot.slane %v2528_v46, 2 }
 0x3d7   :  { %v2539_v52 = vrot.slane %v2538_v7, 2  ;;  %v2546_v60 = vrot.slane %v2545_v24, 4  ;;  %v2556_v30 = vrot.slane %v2555_v56, 4  ;;  %v2566_v53 = vrot.slane %v2565_v26, 4 }
 0x3d8   :  { %v2576_v54 = vrot.slane %v2575_v12, 4  ;;  %vm2510_vm9 = vcmp.gt.s32.totalorder %v2508_v15, %v2509_v4  ;;  %vm2520_vm14 = vcmp.gt.s32.totalorder %v2518_v63, %v2519_v40  ;;  %vm2530_vm5 = vcmp.gt.s32.totalorder %v2528_v46, %v2529_v2 }
 0x3d9   :  { %vm2540_vm15 = vcmp.gt.s32.totalorder %v2538_v7, %v2539_v52  ;;  %v2511_v3 = vsel %vm2510_vm9, %v2508_v15, %v2509_v4  ;;  %v2521_v33 = vsel %vm2520_vm14, %v2518_v63, %v2519_v40  ;;  %v2531_v28 = vsel %vm2530_vm5, %v2528_v46, %v2529_v2 }
 0x3da   :  { %v2541_v61 = vsel %vm2540_vm15, %v2538_v7, %v2539_v52  ;;  %v2512_v39 = vrot.slane %v2511_v3, 1  ;;  %v2522_v21 = vrot.slane %v2521_v33, 1  ;;  %v2532_v19 = vrot.slane %v2531_v28, 1 }
 0x3db   :  { %v2542_v31 = vrot.slane %v2541_v61, 1  ;;  %vm2547_vm6 = vcmp.gt.s32.totalorder %v2545_v24, %v2546_v60  ;;  %vm2557_vm7 = vcmp.gt.s32.totalorder %v2555_v56, %v2556_v30  ;;  %vm2567_vm2 = vcmp.gt.s32.totalorder %v2565_v26, %v2566_v53 }
 0x3dc   :  { %vm2577_vm8 = vcmp.gt.s32.totalorder %v2575_v12, %v2576_v54  ;;  %vm2513_vm1 = vcmp.gt.s32.totalorder %v2511_v3, %v2512_v39  ;;  %vm2523_vm11 = vcmp.gt.s32.totalorder %v2521_v33, %v2522_v21  ;;  %vm2533_vm13 = vcmp.gt.s32.totalorder %v2531_v28, %v2532_v19 }
 0x3dd   :  { %vm2543_vm10 = vcmp.gt.s32.totalorder %v2541_v61, %v2542_v31  ;;  %v2514_v10 = vsel %vm2513_vm1, %v2511_v3, %v2512_v39   ;;  %v2524_v59 = vsel %vm2523_vm11, %v2521_v33, %v2522_v21   ;;  %v2534_v55 = vsel %vm2533_vm13, %v2531_v28, %v2532_v19  }
 0x3de   :  { %v2544_v14 = vsel %vm2543_vm10, %v2541_v61, %v2542_v31   ;;  %v2548_v43 = vsel %vm2547_vm6, %v2545_v24, %v2546_v60  ;;  %v2558_v35 = vsel %vm2557_vm7, %v2555_v56, %v2556_v30  ;;  %v2568_v47 = vsel %vm2567_vm2, %v2565_v26, %v2566_v53 }
 0x3df   :  { %v2578_v22 = vsel %vm2577_vm8, %v2575_v12, %v2576_v54  ;;  %v2549_v0 = vrot.slane %v2548_v43, 2  ;;  %v2559_v48 = vrot.slane %v2558_v35, 2  ;;  %v2569_v16 = vrot.slane %v2568_v47, 2 }
 0x3e0   :  { %v2579_v11 = vrot.slane %v2578_v22, 2 }
 0x3e1   :  { %vm2550_vm0 = vcmp.gt.s32.totalorder %v2548_v43, %v2549_v0  ;;  %vm2560_vm3 = vcmp.gt.s32.totalorder %v2558_v35, %v2559_v48  ;;  %vm2570_vm12 = vcmp.gt.s32.totalorder %v2568_v47, %v2569_v16 }
 0x3e2   :  { %vm2580_vm4 = vcmp.gt.s32.totalorder %v2578_v22, %v2579_v11  ;;  %v2551_v23 = vsel %vm2550_vm0, %v2548_v43, %v2549_v0  ;;  %v2561_v50 = vsel %vm2560_vm3, %v2558_v35, %v2559_v48  ;;  %v2571_v6 = vsel %vm2570_vm12, %v2568_v47, %v2569_v16 }
 0x3e3   :  { %v2581_v34 = vsel %vm2580_vm4, %v2578_v22, %v2579_v11  ;;  %v2552_v57 = vrot.slane %v2551_v23, 1  ;;  %v2562_v18 = vrot.slane %v2561_v50, 1  ;;  %v2572_v51 = vrot.slane %v2571_v6, 1 }
 0x3e4   :  { %v2582_v27 = vrot.slane %v2581_v34, 1 }
 0x3e5   :  { %vm2553_vm9 = vcmp.gt.s32.totalorder %v2551_v23, %v2552_v57  ;;  %vm2563_vm14 = vcmp.gt.s32.totalorder %v2561_v50, %v2562_v18  ;;  %vm2573_vm5 = vcmp.gt.s32.totalorder %v2571_v6, %v2572_v51 }
 0x3e6   :  { %vm2583_vm15 = vcmp.gt.s32.totalorder %v2581_v34, %v2582_v27  ;;  %v2554_v29 = vsel %vm2553_vm9, %v2551_v23, %v2552_v57   ;;  %v2564_v42 = vsel %vm2563_vm14, %v2561_v50, %v2562_v18   ;;  %v2574_v62 = vsel %vm2573_vm5, %v2571_v6, %v2572_v51  }
 0x3e7   :  { %v2584_v9 = vsel %vm2583_vm15, %v2581_v34, %v2582_v27  }
 0x3e8 LB: > { %vm2600_vm6 = vcmp.eq.s32.totalorder %v2985_v10, 0  ;;  %vm2601_vm7 = vcmp.eq.s32.totalorder %v2981_v59, 0  ;;  %vm2602_vm2 = vcmp.eq.s32.totalorder %v2977_v55, 0  ;;  %vm2603_vm8 = vcmp.eq.s32.totalorder %v2973_v14, 0  ;;  %s2590_s0 = sadd.s32 1, %s2993_s0   ;;  %s2993_s0 = sphi %s5314_s0, %s2590_s0   ;;  %v2989_v17 = vphi %v5866_v17, %v5898_v17   ;;  %v2985_v10 = vphi %v2514_v10, %v2674_v10   ;;  %v2981_v59 = vphi %v2524_v59, %v2675_v59   ;;  %v2977_v55 = vphi %v2534_v55, %v2676_v55   ;;  %v2973_v14 = vphi %v2544_v14, %v2677_v14   ;;  %v2969_v29 = vphi %v2554_v29, %v2678_v29   ;;  %v2965_v42 = vphi %v2564_v42, %v2679_v42   ;;  %v2961_v62 = vphi %v2574_v62, %v2680_v62   ;;  %v2957_v9 = vphi %v2584_v9, %v2681_v9  }
 0x3e9   : > { %vm2604_vm1 = vcmp.eq.s32.totalorder %v2969_v29, 0  ;;  %vm2605_vm11 = vcmp.eq.s32.totalorder %v2965_v42, 0  ;;  %vm2606_vm13 = vcmp.eq.s32.totalorder %v2961_v62, 0  ;;  %vm2607_vm10 = vcmp.eq.s32.totalorder %v2957_v9, 0  ;;  %p2587_p7 = scmp.ge.s32.totalorder %s2590_s0, 8  }
 0x3ea   : > { %vm2608_vm0 = vcmp.lt.s32.totalorder %v2989_v17, 0  ;;  %v2998_v13 = vmov 8   ;;  %vm5879_vm3 = vcmask 15360  }
 0x3eb   : > { %v2609_v5 = vsel %vm2600_vm6, 0, %v2998_v13  ;;  %v2610_v20 = vsel %vm2601_vm7, 1, %v2998_v13  ;;  %v2611_v8 = vsel %vm2602_vm2, 2, %v2998_v13  ;;  %v2612_v38 = vsel %vm2603_vm8, 3, %v2998_v13  ;;  %vm5880_vm12 = vmmov %vm5879_vm3 }
 0x3ec   : > { %v2613_v25 = vsel %vm2604_vm1, 4, %v2998_v13  ;;  %v2614_v58 = vsel %vm2605_vm11, 5, %v2998_v13  ;;  %v2615_v36 = vsel %vm2606_vm13, 6, %v2998_v13  ;;  %v2616_v49 = vsel %vm2607_vm10, 7, %v2998_v13  ;;  %vm5881_vm4 = vmmov %vm5879_vm3 }
 0x3ed   : > { %v2617_v45 = vsel %vm5879_vm3, %v2609_v5, 2147483647  ;;  %v2618_v32 = vsel %vm5880_vm12, %v2610_v20, 2147483647  ;;  %v2619_v44 = vsel %vm5881_vm4, %v2611_v8, 2147483647  ;;  %vm5882_vm9 = vmmov %vm5879_vm3 }
 0x3ee   : > { %v2620_v41 = vsel %vm5882_vm9, %v2612_v38, 2147483647  ;;  %vm5883_vm14 = vmmov %vm5879_vm3  ;;  %v2639_v7 = vsel %vm2608_vm0, %v3266_v1, 8 }
 0x3ef   : > { %v2621_v37 = vsel %vm5883_vm14, %v2613_v25, 2147483647  ;;  %vm5884_vm5 = vmmov %vm5879_vm3 }
 0x3f0   : > { %v2624_v24 = vsel %vm5884_vm5, %v2614_v58, 2147483647  ;;  %vm2622_vm15 = vcmp.lt.s32.totalorder %v2617_v45, %v2621_v37  ;;  %vm5885_vm7 = vmmov %vm5879_vm3 }
 0x3f1   : > { %vm2625_vm6 = vcmp.lt.s32.totalorder %v2618_v32, %v2624_v24  ;;  %v2627_v56 = vsel %vm5885_vm7, %v2615_v36, 2147483647  ;;  %vm5886_vm2 = vmmov %vm5879_vm3  ;;  %v2623_v12 = vsel %vm2622_vm15, %v2617_v45, %v2621_v37 }
 0x3f2   : > { %v2630_v26 = vsel %vm5886_vm2, %v2616_v49, 2147483647  ;;  %v2626_v15 = vsel %vm2625_vm6, %v2618_v32, %v2624_v24  ;;  %vm2628_vm8 = vcmp.lt.s32.totalorder %v2619_v44, %v2627_v56  ;;  %vm5887_vm10 = vmmov %vm5886_vm2 }
 0x3f3   : > { %vm2631_vm1 = vcmp.lt.s32.totalorder %v2620_v41, %v2630_v26  ;;  %v2629_v63 = vsel %vm2628_vm8, %v2619_v44, %v2627_v56  ;;  %vm2633_vm11 = vcmp.lt.s32.totalorder %v2623_v12, %v2626_v15  ;;  %v2640_v4 = vsel %vm5887_vm10, %v2639_v7, 2147483647 }
 0x3f4   : > { %v2632_v46 = vsel %vm2631_vm1, %v2620_v41, %v2630_v26  ;;  %v2641_v40 = vrot.slane %v2640_v4, 4  ;;  %v2634_v2 = vsel %vm2633_vm11, %v2623_v12, %v2626_v15 }
 0x3f5   : > { %vm2635_vm13 = vcmp.lt.s32.totalorder %v2629_v63, %v2632_v46 }
 0x3f6   : > { %v2636_v52 = vsel %vm2635_vm13, %v2629_v63, %v2632_v46  ;;  %vm2642_vm3 = vcmp.lt.s32.totalorder %v2640_v4, %v2641_v40 }
 0x3f7   : > { %v2643_v60 = vsel %vm2642_vm3, %v2640_v4, %v2641_v40  ;;  %vm2637_vm12 = vcmp.lt.s32.totalorder %v2634_v2, %v2636_v52 }
 0x3f8   : > { %v2644_v30 = vrot.slane %v2643_v60, 2  ;;  %v2638_v53 = vsel %vm2637_vm12, %v2634_v2, %v2636_v52 }
 0x3f9   : > { %vm2650_vm14 = vcmp.lt.s32.totalorder %v2638_v53, 8  ;;  %vm2658_vm15 = vcmp.eq.s32.totalorder %v2638_v53, 0  ;;  %vm2659_vm7 = vcmp.eq.s32.totalorder %v2638_v53, 1  ;;  %vm2660_vm8 = vcmp.eq.s32.totalorder %v2638_v53, 2 }
 0x3fa   : > { %vm2645_vm4 = vcmp.lt.s32.totalorder %v2643_v60, %v2644_v30  ;;  %vm2661_vm1 = vcmp.eq.s32.totalorder %v2638_v53, 3  ;;  %vm2662_vm13 = vcmp.eq.s32.totalorder %v2638_v53, 4  ;;  %vm2663_vm3 = vcmp.eq.s32.totalorder %v2638_v53, 5 }
 0x3fb   : > { %v2646_v54 = vsel %vm2645_vm4, %v2643_v60, %v2644_v30  ;;  %vm2664_vm4 = vcmp.eq.s32.totalorder %v2638_v53, 6 }
 0x3fc   : > { %v2647_v3 = vrot.slane %v2646_v54, 1 }
 0x3fe   : > { %vm2648_vm9 = vcmp.lt.s32.totalorder %v2646_v54, %v2647_v3 }
 0x3ff   : > { %v2649_v33 = vsel %vm2648_vm9, %v2646_v54, %v2647_v3 }
 0x400   : > { %vm2651_vm5 = vcmp.lt.s32.totalorder %v2649_v33, 8  ;;  %vm2653_vm0 = vcmp.eq.s32.totalorder %v3266_v1, %v2649_v33 }
 0x401   : > { %vm5364_vm6 = vmand %vm2650_vm14, %vm2651_vm5  ;;  %vm2665_vm14 = vcmp.eq.s32.totalorder %v2638_v53, 7 }
 0x402   : > { %vm2656_vm2 = vmand %vm5364_vm6, %vm2653_vm0 }
 0x403   : > { %v2657_v61 = vsel %vm2656_vm2, %v2638_v53, %v2989_v17   ;;  %vm5372_vm11 = vmand %vm5364_vm6, %vm2658_vm15 }
 0x404   : > { %vm5378_vm10 = vmand %vm5364_vm6, %vm2659_vm7  ;;  %v2674_v10 = vsel %vm5372_vm11, 1, %v2985_v10   ;;  %v5898_v17 = vmov %v2657_v61 }
 0x405   : > { %vm5387_vm12 = vmand %vm5364_vm6, %vm2660_vm8  ;;  %v2675_v59 = vsel %vm5378_vm10, 1, %v2981_v59  }
 0x406   : > { %vm5396_vm9 = vmand %vm5364_vm6, %vm2661_vm1  ;;  %v2676_v55 = vsel %vm5387_vm12, 1, %v2977_v55  }
 0x407   : > { %vm2670_vm5 = vmand %vm5364_vm6, %vm2662_vm13  ;;  %v2677_v14 = vsel %vm5396_vm9, 1, %v2973_v14   ;;  %2589 = sbr.rel (!%p2587_p7) target bundleno = 1000 (0x3e8), region = 49 }
 0x408   : > { %vm2671_vm0 = vmand %vm5364_vm6, %vm2663_vm3  ;;  %v2678_v29 = vsel %vm2670_vm5, 1, %v2969_v29  }
 0x409   : > { %vm2672_vm15 = vmand %vm5364_vm6, %vm2664_vm4  ;;  %v2679_v42 = vsel %vm2671_vm0, 1, %v2965_v42  }
 0x40a   : > { %vm2673_vm7 = vmand %vm5364_vm6, %vm2665_vm14  ;;  %v2680_v62 = vsel %vm2672_vm15, 1, %v2961_v62   ;;  %vm5899_vm6 = vcmask (%p2587_p7), 15360  }
 0x40b   : > { %v2681_v9 = vsel %vm2673_vm7, 1, %v2957_v9   ;;  %2682 = vst.msk [vmem:[%s5444_s1] sm:$0xff] (%p2587_p7), %vm5899_vm6, %v2657_v61 }

</bundles_post_ra>
